<compile_context>
chip_gen: v7x
topology: tpu7x:2x2x1
jax: 0.10.0
libtpu: 0.0.40
codegen_flags: <defaults>
</compile_context>

<pallas_src>
import jax
import jax.numpy as jnp
from jax import lax
from jax.experimental import pallas as pl
from jax.experimental.pallas import tpu as pltpu

SOS_TOKEN = 1


def seq2seq_kernel(src_col_ref,
                   eemb_ref, ewi_ref, ewh_ref, ebi_ref, ebh_ref,
                   demb_ref, dwi_ref, dwh_ref, dbi_ref, dbh_ref,
                   ow_ref, ob_ref,
                   dec_out_ref, attn_out_ref,
                   enc_outs):
    Tm1, B, Vt = dec_out_ref.shape          # decode steps, padded batch, tgt vocab
    S = attn_out_ref.shape[2]               # source length
    Vs, H = eemb_ref.shape                  # src vocab, hidden
    H3 = 3 * H

    # ---- hoist all weight/bias reads out of the recurrences ----------------
    eemb = eemb_ref[...]                    # [Vs, H]
    ewi = ewi_ref[...]                      # [H, 3H]   (r, z, n packed on lanes)
    ewh = ewh_ref[...]                      # [H, 3H]
    ebi = ebi_ref[...]                      # [1, 3H]
    ebh = ebh_ref[...]                      # [1, 3H]
    demb = demb_ref[...]                    # [Vt, H]
    dwi = dwi_ref[...]                      # [H, 3H]
    dwh = dwh_ref[...]                      # [H, 3H]
    dbi = dbi_ref[...]                      # [1, 3H]
    dbh = dbh_ref[...]                      # [1, 3H]
    ow = ow_ref[...]                        # [2H, Vt]  (fused hidden|context proj)
    ob = ob_ref[...]                        # [1, Vt]

    # Fold embedding lookup into the GRU input projection (done once).
    eemb_wi = jnp.dot(eemb, ewi, preferred_element_type=jnp.float32)   # [Vs, 3H]
    demb_wi = jnp.dot(demb, dwi, preferred_element_type=jnp.float32)   # [Vt, 3H]

    def gru_gates(gi, h, wh, bh):
        # PyTorch nn.GRU cell with packed gates: gi/gh are [B, 3H] = (r|z|n).
        gh = jnp.dot(h, wh, preferred_element_type=jnp.float32) + bh
        r = jax.nn.sigmoid(gi[:, 0:H] + gh[:, 0:H])
        z = jax.nn.sigmoid(gi[:, H:2 * H] + gh[:, H:2 * H])
        n = jnp.tanh(gi[:, 2 * H:H3] + r * gh[:, 2 * H:H3])
        return (1.0 - z) * n + z * h

    # ---------------- Encoder ------------------------------------------------
    # All source one-hots + embedding + input projection hoisted out of the
    # recurrence as one [S*B, Vs] @ [Vs, 3H] matmul (rows are time-major).
    src_col = src_col_ref[...]                                        # [S*B, 1] int32
    oh_src = (lax.broadcasted_iota(jnp.int32, (S * B, Vs), 1)
              == src_col).astype(jnp.float32)                         # [S*B, Vs]
    gix_all = jnp.dot(oh_src, eemb_wi,
                      preferred_element_type=jnp.float32) + ebi       # [S*B, 3H]

    h = jnp.zeros((B, H), jnp.float32)
    for s in range(S):                      # static trip count -> fully unrolled
        gi_s = gix_all[s * B:(s + 1) * B, :]                          # [B, 3H]
        h = gru_gates(gi_s, h, ewh, ebh)
        enc_outs[:, pl.ds(s, 1), :] = h[:, None, :]
    eo = enc_outs[...]                                                # [B, S, H]

    # ---------------- Decoder (greedy, unrolled) -----------------------------
    # TODO(synk): src_mask is None and teacher_forcing == 0.0 in this config,
    # so there is no softmax masking and no teacher-forcing branch.
    lane_v = lax.broadcasted_iota(jnp.int32, (B, Vt), 1)
    tok = jnp.full((B, 1), SOS_TOKEN, jnp.int32)
    logits_steps = []
    attn_steps = []
    for _ in range(Tm1):                    # static trip count -> fully unrolled
        oh = (lane_v == tok).astype(jnp.float32)                      # [B, Vt]
        gi = jnp.dot(oh, demb_wi, preferred_element_type=jnp.float32) + dbi
        h = gru_gates(gi, h, dwh, dbh)

        # Luong dot attention over encoder outputs — MXU contractions.
        scores = jnp.einsum('bqh,bsh->bqs', h[:, None, :], eo,
                            preferred_element_type=jnp.float32)[:, 0, :]   # [B, S]
        scores = scores - jnp.max(scores, axis=-1, keepdims=True)
        ex = jnp.exp(scores)
        attn = ex / jnp.sum(ex, axis=-1, keepdims=True)               # [B, S]
        ctx = jnp.einsum('bqs,bsh->bqh', attn[:, None, :], eo,
                         preferred_element_type=jnp.float32)[:, 0, :]      # [B, H]

        # Fused output projection over concat([hidden, context]).
        hc = jnp.concatenate([h, ctx], axis=-1)                       # [B, 2H]
        logits = jnp.dot(hc, ow, preferred_element_type=jnp.float32) + ob  # [B, Vt]

        logits_steps.append(logits)
        attn_steps.append(attn)

        # greedy next token = first argmax index (matches torch.argmax ties)
        maxv = jnp.max(logits, axis=-1, keepdims=True)
        tok = jnp.min(jnp.where(logits == maxv, lane_v, Vt),
                      axis=-1, keepdims=True).astype(jnp.int32)       # [B, 1]

    # Single dense write-back (time-major; transposed/trimmed in the wrapper).
    dec_out_ref[...] = jnp.stack(logits_steps, axis=0)                # [Tm1, B, Vt]
    attn_out_ref[...] = jnp.stack(attn_steps, axis=0)                 # [Tm1, B, S]


def seq2seq_forward(source, params, max_length=8):
    """Returns (decoder_outputs [B, max_length-1, Vt], attention_weights [B, max_length-1, S])."""
    B, S = source.shape
    Vs, H = params["enc_emb"].shape
    Vt = params["dec_emb"].shape[0]
    Tm1 = max_length - 1

    # Pad batch to a full 8-sublane group so every vreg / MXU tile is dense.
    Bp = ((B + 7) // 8) * 8
    src_p = jnp.pad(source, ((0, Bp - B), (0, 0))) if Bp != B else source
    # Time-major flattened token column: row (s*Bp + b) holds source[b, s].
    src_col = jnp.transpose(src_p).reshape(S * Bp, 1).astype(jnp.int32)

    inputs = (src_col,
              params["enc_emb"], params["enc_wi"], params["enc_wh"],
              params["enc_bi"], params["enc_bh"],
              params["dec_emb"], params["dec_wi"], params["dec_wh"],
              params["dec_bi"], params["dec_bh"],
              params["out_w"], params["out_b"])

    def full_spec(shape):
        nd = len(shape)
        return pl.BlockSpec(shape, lambda i, _nd=nd: (0,) * _nd)

    in_specs = [full_spec(x.shape) for x in inputs]
    out_shape = (jax.ShapeDtypeStruct((Tm1, Bp, Vt), jnp.float32),
                 jax.ShapeDtypeStruct((Tm1, Bp, S), jnp.float32))
    out_specs = (full_spec((Tm1, Bp, Vt)), full_spec((Tm1, Bp, S)))

    fn = pl.pallas_call(
        seq2seq_kernel,
        out_shape=out_shape,
        grid=(1,),
        in_specs=in_specs,
        out_specs=out_specs,
        scratch_shapes=[pltpu.VMEM((Bp, S, H), jnp.float32)],   # encoder_outputs
        compiler_params=pltpu.CompilerParams(dimension_semantics=("arbitrary",)),
    )
    dec_tm, attn_tm = fn(*inputs)

    # time-major -> batch-major, drop batch padding
    dec_out = jnp.transpose(dec_tm, (1, 0, 2))[:B]
    attn = jnp.transpose(attn_tm, (1, 0, 2))[:B]
    return dec_out, attn


if __name__ == "__main__":
    B, S, H = 2, 8, 32          # batch, source length, hidden size
    Vs, Vt = 16, 16             # source / target vocab sizes
    max_length = 8              # => 7 decode steps

    key = jax.random.PRNGKey(0)
    keys = jax.random.split(key, 14)
    s = 1.0 / float(H) ** 0.5

    def u(k, shape):
        return jax.random.uniform(k, shape, jnp.float32, -s, s)

    params = dict(
        enc_emb=jax.random.normal(keys[0], (Vs, H), jnp.float32) * 0.1,
        enc_wi=u(keys[1], (H, 3 * H)),      # lane-packed (r|z|n) input weights
        enc_wh=u(keys[2], (H, 3 * H)),      # lane-packed (r|z|n) hidden weights
        enc_bi=u(keys[3], (1, 3 * H)),
        enc_bh=u(keys[4], (1, 3 * H)),
        dec_emb=jax.random.normal(keys[5], (Vt, H), jnp.float32) * 0.1,
        dec_wi=u(keys[6], (H, 3 * H)),
        dec_wh=u(keys[7], (H, 3 * H)),
        dec_bi=u(keys[8], (1, 3 * H)),
        dec_bh=u(keys[9], (1, 3 * H)),
        out_w=u(keys[10], (2 * H, Vt)),     # fused Linear(2H, Vt) = [hidden|context]
        out_b=u(keys[11], (1, Vt)),
    )
    source = jax.random.randint(keys[12], (B, S), 0, Vs, dtype=jnp.int32)

    dec_out, attn = seq2seq_forward(source, params, max_length=max_length)
    jax.block_until_ready((dec_out, attn))

    assert dec_out.shape == (B, max_length - 1, Vt)
    assert attn.shape == (B, max_length - 1, S)
    assert bool(jnp.all(jnp.isfinite(dec_out))) and bool(jnp.all(jnp.isfinite(attn)))
    print("KERNEL_OK")
</pallas_src>

<mosaic_0001>
module attributes {stable_mosaic.version = 11 : i64} {
  func.func @seq2seq_kernel(%arg0: i32, %arg1: memref<64x1xi32, #tpu.memory_space<vmem>>, %arg2: memref<16x32xf32, #tpu.memory_space<vmem>>, %arg3: memref<32x96xf32, #tpu.memory_space<vmem>>, %arg4: memref<32x96xf32, #tpu.memory_space<vmem>>, %arg5: memref<1x96xf32, #tpu.memory_space<vmem>>, %arg6: memref<1x96xf32, #tpu.memory_space<vmem>>, %arg7: memref<16x32xf32, #tpu.memory_space<vmem>>, %arg8: memref<32x96xf32, #tpu.memory_space<vmem>>, %arg9: memref<32x96xf32, #tpu.memory_space<vmem>>, %arg10: memref<1x96xf32, #tpu.memory_space<vmem>>, %arg11: memref<1x96xf32, #tpu.memory_space<vmem>>, %arg12: memref<64x16xf32, #tpu.memory_space<vmem>>, %arg13: memref<1x16xf32, #tpu.memory_space<vmem>>, %arg14: memref<7x8x16xf32, #tpu.memory_space<vmem>>, %arg15: memref<7x8x8xf32, #tpu.memory_space<vmem>>, %arg16: memref<8x8x32xf32, #tpu.memory_space<vmem>>) attributes {dimension_semantics = [#tpu.dimension_semantics<arbitrary>], iteration_bounds = array<i64: 1>, scalar_prefetch = 0 : i64, scratch_operands = 1 : i64, tpu.core_type = #tpu.core_type<tc>, window_params = [{pipeline_mode = #tpu.pipeline_mode<synchronous>, transform_indices = @transform_0, window_bounds = array<i64: 64, 1>}, {pipeline_mode = #tpu.pipeline_mode<synchronous>, transform_indices = @transform_1, window_bounds = array<i64: 16, 32>}, {pipeline_mode = #tpu.pipeline_mode<synchronous>, transform_indices = @transform_2, window_bounds = array<i64: 32, 96>}, {pipeline_mode = #tpu.pipeline_mode<synchronous>, transform_indices = @transform_3, window_bounds = array<i64: 32, 96>}, {pipeline_mode = #tpu.pipeline_mode<synchronous>, transform_indices = @transform_4, window_bounds = array<i64: 1, 96>}, {pipeline_mode = #tpu.pipeline_mode<synchronous>, transform_indices = @transform_5, window_bounds = array<i64: 1, 96>}, {pipeline_mode = #tpu.pipeline_mode<synchronous>, transform_indices = @transform_6, window_bounds = array<i64: 16, 32>}, {pipeline_mode = #tpu.pipeline_mode<synchronous>, transform_indices = @transform_7, window_bounds = array<i64: 32, 96>}, {pipeline_mode = #tpu.pipeline_mode<synchronous>, transform_indices = @transform_8, window_bounds = array<i64: 32, 96>}, {pipeline_mode = #tpu.pipeline_mode<synchronous>, transform_indices = @transform_9, window_bounds = array<i64: 1, 96>}, {pipeline_mode = #tpu.pipeline_mode<synchronous>, transform_indices = @transform_10, window_bounds = array<i64: 1, 96>}, {pipeline_mode = #tpu.pipeline_mode<synchronous>, transform_indices = @transform_11, window_bounds = array<i64: 64, 16>}, {pipeline_mode = #tpu.pipeline_mode<synchronous>, transform_indices = @transform_12, window_bounds = array<i64: 1, 16>}, {pipeline_mode = #tpu.pipeline_mode<synchronous>, transform_indices = @transform_13, window_bounds = array<i64: 7, 8, 16>}, {pipeline_mode = #tpu.pipeline_mode<synchronous>, transform_indices = @transform_14, window_bounds = array<i64: 7, 8, 8>}]} {
    %c0 = arith.constant 0 : index
    %c0_0 = arith.constant 0 : index
    %0 = vector.load %arg2[%c0, %c0_0] : memref<16x32xf32, #tpu.memory_space<vmem>>, vector<16x32xf32>
    %c0_1 = arith.constant 0 : index
    %c0_2 = arith.constant 0 : index
    %1 = vector.load %arg3[%c0_1, %c0_2] : memref<32x96xf32, #tpu.memory_space<vmem>>, vector<32x96xf32>
    %c0_3 = arith.constant 0 : index
    %c0_4 = arith.constant 0 : index
    %2 = vector.load %arg4[%c0_3, %c0_4] : memref<32x96xf32, #tpu.memory_space<vmem>>, vector<32x96xf32>
    %c0_5 = arith.constant 0 : index
    %c0_6 = arith.constant 0 : index
    %3 = vector.load %arg5[%c0_5, %c0_6] : memref<1x96xf32, #tpu.memory_space<vmem>>, vector<1x96xf32>
    %c0_7 = arith.constant 0 : index
    %c0_8 = arith.constant 0 : index
    %4 = vector.load %arg6[%c0_7, %c0_8] : memref<1x96xf32, #tpu.memory_space<vmem>>, vector<1x96xf32>
    %c0_9 = arith.constant 0 : index
    %c0_10 = arith.constant 0 : index
    %5 = vector.load %arg7[%c0_9, %c0_10] : memref<16x32xf32, #tpu.memory_space<vmem>>, vector<16x32xf32>
    %c0_11 = arith.constant 0 : index
    %c0_12 = arith.constant 0 : index
    %6 = vector.load %arg8[%c0_11, %c0_12] : memref<32x96xf32, #tpu.memory_space<vmem>>, vector<32x96xf32>
    %c0_13 = arith.constant 0 : index
    %c0_14 = arith.constant 0 : index
    %7 = vector.load %arg9[%c0_13, %c0_14] : memref<32x96xf32, #tpu.memory_space<vmem>>, vector<32x96xf32>
    %c0_15 = arith.constant 0 : index
    %c0_16 = arith.constant 0 : index
    %8 = vector.load %arg10[%c0_15, %c0_16] : memref<1x96xf32, #tpu.memory_space<vmem>>, vector<1x96xf32>
    %c0_17 = arith.constant 0 : index
    %c0_18 = arith.constant 0 : index
    %9 = vector.load %arg11[%c0_17, %c0_18] : memref<1x96xf32, #tpu.memory_space<vmem>>, vector<1x96xf32>
    %c0_19 = arith.constant 0 : index
    %c0_20 = arith.constant 0 : index
    %10 = vector.load %arg12[%c0_19, %c0_20] : memref<64x16xf32, #tpu.memory_space<vmem>>, vector<64x16xf32>
    %c0_21 = arith.constant 0 : index
    %c0_22 = arith.constant 0 : index
    %11 = vector.load %arg13[%c0_21, %c0_22] : memref<1x16xf32, #tpu.memory_space<vmem>>, vector<1x16xf32>
    %cst = arith.constant dense<0.000000e+00> : vector<16x96xf32>
    %12 = tpu.matmul %0, %1, %cst {dimension_numbers = #tpu.dot_dimension_numbers<[1], [0], [0], [1], [0, 0, 1, 1], [], []>} : vector<16x32xf32>, vector<32x96xf32>, vector<16x96xf32> -> vector<16x96xf32>
    %cst_23 = arith.constant dense<0.000000e+00> : vector<16x96xf32>
    %13 = tpu.matmul %5, %6, %cst_23 {dimension_numbers = #tpu.dot_dimension_numbers<[1], [0], [0], [1], [0, 0, 1, 1], [], []>} : vector<16x32xf32>, vector<32x96xf32>, vector<16x96xf32> -> vector<16x96xf32>
    %c0_24 = arith.constant 0 : index
    %c0_25 = arith.constant 0 : index
    %14 = vector.load %arg1[%c0_24, %c0_25] : memref<64x1xi32, #tpu.memory_space<vmem>>, vector<64x1xi32>
    %15 = tpu.iota {dimensions = array<i32: 1>} : vector<64x16xi32>
    %16 = vector.broadcast %14 : vector<64x1xi32> to vector<64x16xi32>
    %17 = arith.cmpi eq, %15, %16 : vector<64x16xi32>
    %18 = arith.extui %17 : vector<64x16xi1> to vector<64x16xi32>
    %19 = arith.sitofp %18 : vector<64x16xi32> to vector<64x16xf32>
    %cst_26 = arith.constant dense<0.000000e+00> : vector<64x96xf32>
    %20 = tpu.matmul %19, %12, %cst_26 {dimension_numbers = #tpu.dot_dimension_numbers<[1], [0], [0], [1], [0, 0, 1, 1], [], []>} : vector<64x16xf32>, vector<16x96xf32>, vector<64x96xf32> -> vector<64x96xf32>
    %21 = vector.broadcast %3 : vector<1x96xf32> to vector<64x96xf32>
    %22 = arith.addf %20, %21 : vector<64x96xf32>
    %cst_27 = arith.constant 0.000000e+00 : f32
    %23 = vector.broadcast %cst_27 : f32 to vector<8x32xf32>
    %24 = vector.extract_strided_slice %22 {offsets = [0, 0], sizes = [8, 96], strides = [1, 1]} : vector<64x96xf32> to vector<8x96xf32>
    %cst_28 = arith.constant dense<0.000000e+00> : vector<8x96xf32>
    %25 = tpu.matmul %23, %2, %cst_28 {dimension_numbers = #tpu.dot_dimension_numbers<[1], [0], [0], [1], [0, 0, 1, 1], [], []>} : vector<8x32xf32>, vector<32x96xf32>, vector<8x96xf32> -> vector<8x96xf32>
    %26 = vector.broadcast %4 : vector<1x96xf32> to vector<8x96xf32>
    %27 = arith.addf %25, %26 : vector<8x96xf32>
    %28 = vector.extract_strided_slice %24 {offsets = [0, 0], sizes = [8, 32], strides = [1, 1]} : vector<8x96xf32> to vector<8x32xf32>
    %29 = vector.extract_strided_slice %27 {offsets = [0, 0], sizes = [8, 32], strides = [1, 1]} : vector<8x96xf32> to vector<8x32xf32>
    %30 = arith.addf %28, %29 : vector<8x32xf32>
    %31 = arith.negf %30 : vector<8x32xf32>
    %32 = math.exp %31 : vector<8x32xf32>
    %cst_29 = arith.constant 1.000000e+00 : f32
    %33 = vector.broadcast %cst_29 : f32 to vector<8x32xf32>
    %34 = arith.addf %33, %32 : vector<8x32xf32>
    %35 = arith.divf %33, %34 : vector<8x32xf32>
    %36 = vector.extract_strided_slice %24 {offsets = [0, 32], sizes = [8, 32], strides = [1, 1]} : vector<8x96xf32> to vector<8x32xf32>
    %37 = vector.extract_strided_slice %27 {offsets = [0, 32], sizes = [8, 32], strides = [1, 1]} : vector<8x96xf32> to vector<8x32xf32>
    %38 = arith.addf %36, %37 : vector<8x32xf32>
    %39 = arith.negf %38 : vector<8x32xf32>
    %40 = math.exp %39 : vector<8x32xf32>
    %cst_30 = arith.constant 1.000000e+00 : f32
    %41 = vector.broadcast %cst_30 : f32 to vector<8x32xf32>
    %42 = arith.addf %41, %40 : vector<8x32xf32>
    %43 = arith.divf %41, %42 : vector<8x32xf32>
    %44 = vector.extract_strided_slice %24 {offsets = [0, 64], sizes = [8, 32], strides = [1, 1]} : vector<8x96xf32> to vector<8x32xf32>
    %45 = vector.extract_strided_slice %27 {offsets = [0, 64], sizes = [8, 32], strides = [1, 1]} : vector<8x96xf32> to vector<8x32xf32>
    %46 = arith.mulf %35, %45 : vector<8x32xf32>
    %47 = arith.addf %44, %46 : vector<8x32xf32>
    %48 = math.tanh %47 : vector<8x32xf32>
    %cst_31 = arith.constant 1.000000e+00 : f32
    %49 = vector.broadcast %cst_31 : f32 to vector<8x32xf32>
    %50 = arith.subf %49, %43 : vector<8x32xf32>
    %51 = arith.mulf %50, %48 : vector<8x32xf32>
    %52 = arith.mulf %43, %23 : vector<8x32xf32>
    %53 = arith.addf %51, %52 : vector<8x32xf32>
    %54 = vector.shape_cast %53 : vector<8x32xf32> to vector<8x1x32xf32>
    %c0_32 = arith.constant 0 : index
    %c0_33 = arith.constant 0 : index
    %c0_34 = arith.constant 0 : index
    %55 = vector.load %arg16[%c0_32, %c0_33, %c0_34] : memref<8x8x32xf32, #tpu.memory_space<vmem>>, vector<8x1x32xf32>
    tpu.vector_store %arg16[%c0_32, %c0_33, %c0_34], %54 {strides = array<i32>} : memref<8x8x32xf32, #tpu.memory_space<vmem>>, vector<8x1x32xf32>,
    %56 = vector.extract_strided_slice %22 {offsets = [8, 0], sizes = [8, 96], strides = [1, 1]} : vector<64x96xf32> to vector<8x96xf32>
    %cst_35 = arith.constant dense<0.000000e+00> : vector<8x96xf32>
    %57 = tpu.matmul %53, %2, %cst_35 {dimension_numbers = #tpu.dot_dimension_numbers<[1], [0], [0], [1], [0, 0, 1, 1], [], []>} : vector<8x32xf32>, vector<32x96xf32>, vector<8x96xf32> -> vector<8x96xf32>
    %58 = vector.broadcast %4 : vector<1x96xf32> to vector<8x96xf32>
    %59 = arith.addf %57, %58 : vector<8x96xf32>
    %60 = vector.extract_strided_slice %56 {offsets = [0, 0], sizes = [8, 32], strides = [1, 1]} : vector<8x96xf32> to vector<8x32xf32>
    %61 = vector.extract_strided_slice %59 {offsets = [0, 0], sizes = [8, 32], strides = [1, 1]} : vector<8x96xf32> to vector<8x32xf32>
    %62 = arith.addf %60, %61 : vector<8x32xf32>
    %63 = arith.negf %62 : vector<8x32xf32>
    %64 = math.exp %63 : vector<8x32xf32>
    %cst_36 = arith.constant 1.000000e+00 : f32
    %65 = vector.broadcast %cst_36 : f32 to vector<8x32xf32>
    %66 = arith.addf %65, %64 : vector<8x32xf32>
    %67 = arith.divf %65, %66 : vector<8x32xf32>
    %68 = vector.extract_strided_slice %56 {offsets = [0, 32], sizes = [8, 32], strides = [1, 1]} : vector<8x96xf32> to vector<8x32xf32>
    %69 = vector.extract_strided_slice %59 {offsets = [0, 32], sizes = [8, 32], strides = [1, 1]} : vector<8x96xf32> to vector<8x32xf32>
    %70 = arith.addf %68, %69 : vector<8x32xf32>
    %71 = arith.negf %70 : vector<8x32xf32>
    %72 = math.exp %71 : vector<8x32xf32>
    %cst_37 = arith.constant 1.000000e+00 : f32
    %73 = vector.broadcast %cst_37 : f32 to vector<8x32xf32>
    %74 = arith.addf %73, %72 : vector<8x32xf32>
    %75 = arith.divf %73, %74 : vector<8x32xf32>
    %76 = vector.extract_strided_slice %56 {offsets = [0, 64], sizes = [8, 32], strides = [1, 1]} : vector<8x96xf32> to vector<8x32xf32>
    %77 = vector.extract_strided_slice %59 {offsets = [0, 64], sizes = [8, 32], strides = [1, 1]} : vector<8x96xf32> to vector<8x32xf32>
    %78 = arith.mulf %67, %77 : vector<8x32xf32>
    %79 = arith.addf %76, %78 : vector<8x32xf32>
    %80 = math.tanh %79 : vector<8x32xf32>
    %cst_38 = arith.constant 1.000000e+00 : f32
    %81 = vector.broadcast %cst_38 : f32 to vector<8x32xf32>
    %82 = arith.subf %81, %75 : vector<8x32xf32>
    %83 = arith.mulf %82, %80 : vector<8x32xf32>
    %84 = arith.mulf %75, %53 : vector<8x32xf32>
    %85 = arith.addf %83, %84 : vector<8x32xf32>
    %86 = vector.shape_cast %85 : vector<8x32xf32> to vector<8x1x32xf32>
    %c0_39 = arith.constant 0 : index
    %c1 = arith.constant 1 : index
    %c0_40 = arith.constant 0 : index
    %87 = vector.load %arg16[%c0_39, %c1, %c0_40] : memref<8x8x32xf32, #tpu.memory_space<vmem>>, vector<8x1x32xf32>
    tpu.vector_store %arg16[%c0_39, %c1, %c0_40], %86 {strides = array<i32>} : memref<8x8x32xf32, #tpu.memory_space<vmem>>, vector<8x1x32xf32>,
    %88 = vector.extract_strided_slice %22 {offsets = [16, 0], sizes = [8, 96], strides = [1, 1]} : vector<64x96xf32> to vector<8x96xf32>
    %cst_41 = arith.constant dense<0.000000e+00> : vector<8x96xf32>
    %89 = tpu.matmul %85, %2, %cst_41 {dimension_numbers = #tpu.dot_dimension_numbers<[1], [0], [0], [1], [0, 0, 1, 1], [], []>} : vector<8x32xf32>, vector<32x96xf32>, vector<8x96xf32> -> vector<8x96xf32>
    %90 = vector.broadcast %4 : vector<1x96xf32> to vector<8x96xf32>
    %91 = arith.addf %89, %90 : vector<8x96xf32>
    %92 = vector.extract_strided_slice %88 {offsets = [0, 0], sizes = [8, 32], strides = [1, 1]} : vector<8x96xf32> to vector<8x32xf32>
    %93 = vector.extract_strided_slice %91 {offsets = [0, 0], sizes = [8, 32], strides = [1, 1]} : vector<8x96xf32> to vector<8x32xf32>
    %94 = arith.addf %92, %93 : vector<8x32xf32>
    %95 = arith.negf %94 : vector<8x32xf32>
    %96 = math.exp %95 : vector<8x32xf32>
    %cst_42 = arith.constant 1.000000e+00 : f32
    %97 = vector.broadcast %cst_42 : f32 to vector<8x32xf32>
    %98 = arith.addf %97, %96 : vector<8x32xf32>
    %99 = arith.divf %97, %98 : vector<8x32xf32>
    %100 = vector.extract_strided_slice %88 {offsets = [0, 32], sizes = [8, 32], strides = [1, 1]} : vector<8x96xf32> to vector<8x32xf32>
    %101 = vector.extract_strided_slice %91 {offsets = [0, 32], sizes = [8, 32], strides = [1, 1]} : vector<8x96xf32> to vector<8x32xf32>
    %102 = arith.addf %100, %101 : vector<8x32xf32>
    %103 = arith.negf %102 : vector<8x32xf32>
    %104 = math.exp %103 : vector<8x32xf32>
    %cst_43 = arith.constant 1.000000e+00 : f32
    %105 = vector.broadcast %cst_43 : f32 to vector<8x32xf32>
    %106 = arith.addf %105, %104 : vector<8x32xf32>
    %107 = arith.divf %105, %106 : vector<8x32xf32>
    %108 = vector.extract_strided_slice %88 {offsets = [0, 64], sizes = [8, 32], strides = [1, 1]} : vector<8x96xf32> to vector<8x32xf32>
    %109 = vector.extract_strided_slice %91 {offsets = [0, 64], sizes = [8, 32], strides = [1, 1]} : vector<8x96xf32> to vector<8x32xf32>
    %110 = arith.mulf %99, %109 : vector<8x32xf32>
    %111 = arith.addf %108, %110 : vector<8x32xf32>
    %112 = math.tanh %111 : vector<8x32xf32>
    %cst_44 = arith.constant 1.000000e+00 : f32
    %113 = vector.broadcast %cst_44 : f32 to vector<8x32xf32>
    %114 = arith.subf %113, %107 : vector<8x32xf32>
    %115 = arith.mulf %114, %112 : vector<8x32xf32>
    %116 = arith.mulf %107, %85 : vector<8x32xf32>
    %117 = arith.addf %115, %116 : vector<8x32xf32>
    %118 = vector.shape_cast %117 : vector<8x32xf32> to vector<8x1x32xf32>
    %c0_45 = arith.constant 0 : index
    %c2 = arith.constant 2 : index
    %c0_46 = arith.constant 0 : index
    %119 = vector.load %arg16[%c0_45, %c2, %c0_46] : memref<8x8x32xf32, #tpu.memory_space<vmem>>, vector<8x1x32xf32>
    tpu.vector_store %arg16[%c0_45, %c2, %c0_46], %118 {strides = array<i32>} : memref<8x8x32xf32, #tpu.memory_space<vmem>>, vector<8x1x32xf32>,
    %120 = vector.extract_strided_slice %22 {offsets = [24, 0], sizes = [8, 96], strides = [1, 1]} : vector<64x96xf32> to vector<8x96xf32>
    %cst_47 = arith.constant dense<0.000000e+00> : vector<8x96xf32>
    %121 = tpu.matmul %117, %2, %cst_47 {dimension_numbers = #tpu.dot_dimension_numbers<[1], [0], [0], [1], [0, 0, 1, 1], [], []>} : vector<8x32xf32>, vector<32x96xf32>, vector<8x96xf32> -> vector<8x96xf32>
    %122 = vector.broadcast %4 : vector<1x96xf32> to vector<8x96xf32>
    %123 = arith.addf %121, %122 : vector<8x96xf32>
    %124 = vector.extract_strided_slice %120 {offsets = [0, 0], sizes = [8, 32], strides = [1, 1]} : vector<8x96xf32> to vector<8x32xf32>
    %125 = vector.extract_strided_slice %123 {offsets = [0, 0], sizes = [8, 32], strides = [1, 1]} : vector<8x96xf32> to vector<8x32xf32>
    %126 = arith.addf %124, %125 : vector<8x32xf32>
    %127 = arith.negf %126 : vector<8x32xf32>
    %128 = math.exp %127 : vector<8x32xf32>
    %cst_48 = arith.constant 1.000000e+00 : f32
    %129 = vector.broadcast %cst_48 : f32 to vector<8x32xf32>
    %130 = arith.addf %129, %128 : vector<8x32xf32>
    %131 = arith.divf %129, %130 : vector<8x32xf32>
    %132 = vector.extract_strided_slice %120 {offsets = [0, 32], sizes = [8, 32], strides = [1, 1]} : vector<8x96xf32> to vector<8x32xf32>
    %133 = vector.extract_strided_slice %123 {offsets = [0, 32], sizes = [8, 32], strides = [1, 1]} : vector<8x96xf32> to vector<8x32xf32>
    %134 = arith.addf %132, %133 : vector<8x32xf32>
    %135 = arith.negf %134 : vector<8x32xf32>
    %136 = math.exp %135 : vector<8x32xf32>
    %cst_49 = arith.constant 1.000000e+00 : f32
    %137 = vector.broadcast %cst_49 : f32 to vector<8x32xf32>
    %138 = arith.addf %137, %136 : vector<8x32xf32>
    %139 = arith.divf %137, %138 : vector<8x32xf32>
    %140 = vector.extract_strided_slice %120 {offsets = [0, 64], sizes = [8, 32], strides = [1, 1]} : vector<8x96xf32> to vector<8x32xf32>
    %141 = vector.extract_strided_slice %123 {offsets = [0, 64], sizes = [8, 32], strides = [1, 1]} : vector<8x96xf32> to vector<8x32xf32>
    %142 = arith.mulf %131, %141 : vector<8x32xf32>
    %143 = arith.addf %140, %142 : vector<8x32xf32>
    %144 = math.tanh %143 : vector<8x32xf32>
    %cst_50 = arith.constant 1.000000e+00 : f32
    %145 = vector.broadcast %cst_50 : f32 to vector<8x32xf32>
    %146 = arith.subf %145, %139 : vector<8x32xf32>
    %147 = arith.mulf %146, %144 : vector<8x32xf32>
    %148 = arith.mulf %139, %117 : vector<8x32xf32>
    %149 = arith.addf %147, %148 : vector<8x32xf32>
    %150 = vector.shape_cast %149 : vector<8x32xf32> to vector<8x1x32xf32>
    %c0_51 = arith.constant 0 : index
    %c3 = arith.constant 3 : index
    %c0_52 = arith.constant 0 : index
    %151 = vector.load %arg16[%c0_51, %c3, %c0_52] : memref<8x8x32xf32, #tpu.memory_space<vmem>>, vector<8x1x32xf32>
    tpu.vector_store %arg16[%c0_51, %c3, %c0_52], %150 {strides = array<i32>} : memref<8x8x32xf32, #tpu.memory_space<vmem>>, vector<8x1x32xf32>,
    %152 = vector.extract_strided_slice %22 {offsets = [32, 0], sizes = [8, 96], strides = [1, 1]} : vector<64x96xf32> to vector<8x96xf32>
    %cst_53 = arith.constant dense<0.000000e+00> : vector<8x96xf32>
    %153 = tpu.matmul %149, %2, %cst_53 {dimension_numbers = #tpu.dot_dimension_numbers<[1], [0], [0], [1], [0, 0, 1, 1], [], []>} : vector<8x32xf32>, vector<32x96xf32>, vector<8x96xf32> -> vector<8x96xf32>
    %154 = vector.broadcast %4 : vector<1x96xf32> to vector<8x96xf32>
    %155 = arith.addf %153, %154 : vector<8x96xf32>
    %156 = vector.extract_strided_slice %152 {offsets = [0, 0], sizes = [8, 32], strides = [1, 1]} : vector<8x96xf32> to vector<8x32xf32>
    %157 = vector.extract_strided_slice %155 {offsets = [0, 0], sizes = [8, 32], strides = [1, 1]} : vector<8x96xf32> to vector<8x32xf32>
    %158 = arith.addf %156, %157 : vector<8x32xf32>
    %159 = arith.negf %158 : vector<8x32xf32>
    %160 = math.exp %159 : vector<8x32xf32>
    %cst_54 = arith.constant 1.000000e+00 : f32
    %161 = vector.broadcast %cst_54 : f32 to vector<8x32xf32>
    %162 = arith.addf %161, %160 : vector<8x32xf32>
    %163 = arith.divf %161, %162 : vector<8x32xf32>
    %164 = vector.extract_strided_slice %152 {offsets = [0, 32], sizes = [8, 32], strides = [1, 1]} : vector<8x96xf32> to vector<8x32xf32>
    %165 = vector.extract_strided_slice %155 {offsets = [0, 32], sizes = [8, 32], strides = [1, 1]} : vector<8x96xf32> to vector<8x32xf32>
    %166 = arith.addf %164, %165 : vector<8x32xf32>
    %167 = arith.negf %166 : vector<8x32xf32>
    %168 = math.exp %167 : vector<8x32xf32>
    %cst_55 = arith.constant 1.000000e+00 : f32
    %169 = vector.broadcast %cst_55 : f32 to vector<8x32xf32>
    %170 = arith.addf %169, %168 : vector<8x32xf32>
    %171 = arith.divf %169, %170 : vector<8x32xf32>
    %172 = vector.extract_strided_slice %152 {offsets = [0, 64], sizes = [8, 32], strides = [1, 1]} : vector<8x96xf32> to vector<8x32xf32>
    %173 = vector.extract_strided_slice %155 {offsets = [0, 64], sizes = [8, 32], strides = [1, 1]} : vector<8x96xf32> to vector<8x32xf32>
    %174 = arith.mulf %163, %173 : vector<8x32xf32>
    %175 = arith.addf %172, %174 : vector<8x32xf32>
    %176 = math.tanh %175 : vector<8x32xf32>
    %cst_56 = arith.constant 1.000000e+00 : f32
    %177 = vector.broadcast %cst_56 : f32 to vector<8x32xf32>
    %178 = arith.subf %177, %171 : vector<8x32xf32>
    %179 = arith.mulf %178, %176 : vector<8x32xf32>
    %180 = arith.mulf %171, %149 : vector<8x32xf32>
    %181 = arith.addf %179, %180 : vector<8x32xf32>
    %182 = vector.shape_cast %181 : vector<8x32xf32> to vector<8x1x32xf32>
    %c0_57 = arith.constant 0 : index
    %c4 = arith.constant 4 : index
    %c0_58 = arith.constant 0 : index
    %183 = vector.load %arg16[%c0_57, %c4, %c0_58] : memref<8x8x32xf32, #tpu.memory_space<vmem>>, vector<8x1x32xf32>
    tpu.vector_store %arg16[%c0_57, %c4, %c0_58], %182 {strides = array<i32>} : memref<8x8x32xf32, #tpu.memory_space<vmem>>, vector<8x1x32xf32>,
    %184 = vector.extract_strided_slice %22 {offsets = [40, 0], sizes = [8, 96], strides = [1, 1]} : vector<64x96xf32> to vector<8x96xf32>
    %cst_59 = arith.constant dense<0.000000e+00> : vector<8x96xf32>
    %185 = tpu.matmul %181, %2, %cst_59 {dimension_numbers = #tpu.dot_dimension_numbers<[1], [0], [0], [1], [0, 0, 1, 1], [], []>} : vector<8x32xf32>, vector<32x96xf32>, vector<8x96xf32> -> vector<8x96xf32>
    %186 = vector.broadcast %4 : vector<1x96xf32> to vector<8x96xf32>
    %187 = arith.addf %185, %186 : vector<8x96xf32>
    %188 = vector.extract_strided_slice %184 {offsets = [0, 0], sizes = [8, 32], strides = [1, 1]} : vector<8x96xf32> to vector<8x32xf32>
    %189 = vector.extract_strided_slice %187 {offsets = [0, 0], sizes = [8, 32], strides = [1, 1]} : vector<8x96xf32> to vector<8x32xf32>
    %190 = arith.addf %188, %189 : vector<8x32xf32>
    %191 = arith.negf %190 : vector<8x32xf32>
    %192 = math.exp %191 : vector<8x32xf32>
    %cst_60 = arith.constant 1.000000e+00 : f32
    %193 = vector.broadcast %cst_60 : f32 to vector<8x32xf32>
    %194 = arith.addf %193, %192 : vector<8x32xf32>
    %195 = arith.divf %193, %194 : vector<8x32xf32>
    %196 = vector.extract_strided_slice %184 {offsets = [0, 32], sizes = [8, 32], strides = [1, 1]} : vector<8x96xf32> to vector<8x32xf32>
    %197 = vector.extract_strided_slice %187 {offsets = [0, 32], sizes = [8, 32], strides = [1, 1]} : vector<8x96xf32> to vector<8x32xf32>
    %198 = arith.addf %196, %197 : vector<8x32xf32>
    %199 = arith.negf %198 : vector<8x32xf32>
    %200 = math.exp %199 : vector<8x32xf32>
    %cst_61 = arith.constant 1.000000e+00 : f32
    %201 = vector.broadcast %cst_61 : f32 to vector<8x32xf32>
    %202 = arith.addf %201, %200 : vector<8x32xf32>
    %203 = arith.divf %201, %202 : vector<8x32xf32>
    %204 = vector.extract_strided_slice %184 {offsets = [0, 64], sizes = [8, 32], strides = [1, 1]} : vector<8x96xf32> to vector<8x32xf32>
    %205 = vector.extract_strided_slice %187 {offsets = [0, 64], sizes = [8, 32], strides = [1, 1]} : vector<8x96xf32> to vector<8x32xf32>
    %206 = arith.mulf %195, %205 : vector<8x32xf32>
    %207 = arith.addf %204, %206 : vector<8x32xf32>
    %208 = math.tanh %207 : vector<8x32xf32>
    %cst_62 = arith.constant 1.000000e+00 : f32
    %209 = vector.broadcast %cst_62 : f32 to vector<8x32xf32>
    %210 = arith.subf %209, %203 : vector<8x32xf32>
    %211 = arith.mulf %210, %208 : vector<8x32xf32>
    %212 = arith.mulf %203, %181 : vector<8x32xf32>
    %213 = arith.addf %211, %212 : vector<8x32xf32>
    %214 = vector.shape_cast %213 : vector<8x32xf32> to vector<8x1x32xf32>
    %c0_63 = arith.constant 0 : index
    %c5 = arith.constant 5 : index
    %c0_64 = arith.constant 0 : index
    %215 = vector.load %arg16[%c0_63, %c5, %c0_64] : memref<8x8x32xf32, #tpu.memory_space<vmem>>, vector<8x1x32xf32>
    tpu.vector_store %arg16[%c0_63, %c5, %c0_64], %214 {strides = array<i32>} : memref<8x8x32xf32, #tpu.memory_space<vmem>>, vector<8x1x32xf32>,
    %216 = vector.extract_strided_slice %22 {offsets = [48, 0], sizes = [8, 96], strides = [1, 1]} : vector<64x96xf32> to vector<8x96xf32>
    %cst_65 = arith.constant dense<0.000000e+00> : vector<8x96xf32>
    %217 = tpu.matmul %213, %2, %cst_65 {dimension_numbers = #tpu.dot_dimension_numbers<[1], [0], [0], [1], [0, 0, 1, 1], [], []>} : vector<8x32xf32>, vector<32x96xf32>, vector<8x96xf32> -> vector<8x96xf32>
    %218 = vector.broadcast %4 : vector<1x96xf32> to vector<8x96xf32>
    %219 = arith.addf %217, %218 : vector<8x96xf32>
    %220 = vector.extract_strided_slice %216 {offsets = [0, 0], sizes = [8, 32], strides = [1, 1]} : vector<8x96xf32> to vector<8x32xf32>
    %221 = vector.extract_strided_slice %219 {offsets = [0, 0], sizes = [8, 32], strides = [1, 1]} : vector<8x96xf32> to vector<8x32xf32>
    %222 = arith.addf %220, %221 : vector<8x32xf32>
    %223 = arith.negf %222 : vector<8x32xf32>
    %224 = math.exp %223 : vector<8x32xf32>
    %cst_66 = arith.constant 1.000000e+00 : f32
    %225 = vector.broadcast %cst_66 : f32 to vector<8x32xf32>
    %226 = arith.addf %225, %224 : vector<8x32xf32>
    %227 = arith.divf %225, %226 : vector<8x32xf32>
    %228 = vector.extract_strided_slice %216 {offsets = [0, 32], sizes = [8, 32], strides = [1, 1]} : vector<8x96xf32> to vector<8x32xf32>
    %229 = vector.extract_strided_slice %219 {offsets = [0, 32], sizes = [8, 32], strides = [1, 1]} : vector<8x96xf32> to vector<8x32xf32>
    %230 = arith.addf %228, %229 : vector<8x32xf32>
    %231 = arith.negf %230 : vector<8x32xf32>
    %232 = math.exp %231 : vector<8x32xf32>
    %cst_67 = arith.constant 1.000000e+00 : f32
    %233 = vector.broadcast %cst_67 : f32 to vector<8x32xf32>
    %234 = arith.addf %233, %232 : vector<8x32xf32>
    %235 = arith.divf %233, %234 : vector<8x32xf32>
    %236 = vector.extract_strided_slice %216 {offsets = [0, 64], sizes = [8, 32], strides = [1, 1]} : vector<8x96xf32> to vector<8x32xf32>
    %237 = vector.extract_strided_slice %219 {offsets = [0, 64], sizes = [8, 32], strides = [1, 1]} : vector<8x96xf32> to vector<8x32xf32>
    %238 = arith.mulf %227, %237 : vector<8x32xf32>
    %239 = arith.addf %236, %238 : vector<8x32xf32>
    %240 = math.tanh %239 : vector<8x32xf32>
    %cst_68 = arith.constant 1.000000e+00 : f32
    %241 = vector.broadcast %cst_68 : f32 to vector<8x32xf32>
    %242 = arith.subf %241, %235 : vector<8x32xf32>
    %243 = arith.mulf %242, %240 : vector<8x32xf32>
    %244 = arith.mulf %235, %213 : vector<8x32xf32>
    %245 = arith.addf %243, %244 : vector<8x32xf32>
    %246 = vector.shape_cast %245 : vector<8x32xf32> to vector<8x1x32xf32>
    %c0_69 = arith.constant 0 : index
    %c6 = arith.constant 6 : index
    %c0_70 = arith.constant 0 : index
    %247 = vector.load %arg16[%c0_69, %c6, %c0_70] : memref<8x8x32xf32, #tpu.memory_space<vmem>>, vector<8x1x32xf32>
    tpu.vector_store %arg16[%c0_69, %c6, %c0_70], %246 {strides = array<i32>} : memref<8x8x32xf32, #tpu.memory_space<vmem>>, vector<8x1x32xf32>,
    %248 = vector.extract_strided_slice %22 {offsets = [56, 0], sizes = [8, 96], strides = [1, 1]} : vector<64x96xf32> to vector<8x96xf32>
    %cst_71 = arith.constant dense<0.000000e+00> : vector<8x96xf32>
    %249 = tpu.matmul %245, %2, %cst_71 {dimension_numbers = #tpu.dot_dimension_numbers<[1], [0], [0], [1], [0, 0, 1, 1], [], []>} : vector<8x32xf32>, vector<32x96xf32>, vector<8x96xf32> -> vector<8x96xf32>
    %250 = vector.broadcast %4 : vector<1x96xf32> to vector<8x96xf32>
    %251 = arith.addf %249, %250 : vector<8x96xf32>
    %252 = vector.extract_strided_slice %248 {offsets = [0, 0], sizes = [8, 32], strides = [1, 1]} : vector<8x96xf32> to vector<8x32xf32>
    %253 = vector.extract_strided_slice %251 {offsets = [0, 0], sizes = [8, 32], strides = [1, 1]} : vector<8x96xf32> to vector<8x32xf32>
    %254 = arith.addf %252, %253 : vector<8x32xf32>
    %255 = arith.negf %254 : vector<8x32xf32>
    %256 = math.exp %255 : vector<8x32xf32>
    %cst_72 = arith.constant 1.000000e+00 : f32
    %257 = vector.broadcast %cst_72 : f32 to vector<8x32xf32>
    %258 = arith.addf %257, %256 : vector<8x32xf32>
    %259 = arith.divf %257, %258 : vector<8x32xf32>
    %260 = vector.extract_strided_slice %248 {offsets = [0, 32], sizes = [8, 32], strides = [1, 1]} : vector<8x96xf32> to vector<8x32xf32>
    %261 = vector.extract_strided_slice %251 {offsets = [0, 32], sizes = [8, 32], strides = [1, 1]} : vector<8x96xf32> to vector<8x32xf32>
    %262 = arith.addf %260, %261 : vector<8x32xf32>
    %263 = arith.negf %262 : vector<8x32xf32>
    %264 = math.exp %263 : vector<8x32xf32>
    %cst_73 = arith.constant 1.000000e+00 : f32
    %265 = vector.broadcast %cst_73 : f32 to vector<8x32xf32>
    %266 = arith.addf %265, %264 : vector<8x32xf32>
    %267 = arith.divf %265, %266 : vector<8x32xf32>
    %268 = vector.extract_strided_slice %248 {offsets = [0, 64], sizes = [8, 32], strides = [1, 1]} : vector<8x96xf32> to vector<8x32xf32>
    %269 = vector.extract_strided_slice %251 {offsets = [0, 64], sizes = [8, 32], strides = [1, 1]} : vector<8x96xf32> to vector<8x32xf32>
    %270 = arith.mulf %259, %269 : vector<8x32xf32>
    %271 = arith.addf %268, %270 : vector<8x32xf32>
    %272 = math.tanh %271 : vector<8x32xf32>
    %cst_74 = arith.constant 1.000000e+00 : f32
    %273 = vector.broadcast %cst_74 : f32 to vector<8x32xf32>
    %274 = arith.subf %273, %267 : vector<8x32xf32>
    %275 = arith.mulf %274, %272 : vector<8x32xf32>
    %276 = arith.mulf %267, %245 : vector<8x32xf32>
    %277 = arith.addf %275, %276 : vector<8x32xf32>
    %278 = vector.shape_cast %277 : vector<8x32xf32> to vector<8x1x32xf32>
    %c0_75 = arith.constant 0 : index
    %c7 = arith.constant 7 : index
    %c0_76 = arith.constant 0 : index
    %279 = vector.load %arg16[%c0_75, %c7, %c0_76] : memref<8x8x32xf32, #tpu.memory_space<vmem>>, vector<8x1x32xf32>
    tpu.vector_store %arg16[%c0_75, %c7, %c0_76], %278 {strides = array<i32>} : memref<8x8x32xf32, #tpu.memory_space<vmem>>, vector<8x1x32xf32>,
    %c0_77 = arith.constant 0 : index
    %c0_78 = arith.constant 0 : index
    %c0_79 = arith.constant 0 : index
    %280 = vector.load %arg16[%c0_77, %c0_78, %c0_79] : memref<8x8x32xf32, #tpu.memory_space<vmem>>, vector<8x8x32xf32>
    %281 = tpu.iota {dimensions = array<i32: 1>} : vector<8x16xi32>
    %c1_i32 = arith.constant 1 : i32
    %282 = vector.broadcast %c1_i32 : i32 to vector<8x1xi32>
    %283 = vector.broadcast %282 : vector<8x1xi32> to vector<8x16xi32>
    %284 = arith.cmpi eq, %281, %283 : vector<8x16xi32>
    %285 = arith.extui %284 : vector<8x16xi1> to vector<8x16xi32>
    %286 = arith.sitofp %285 : vector<8x16xi32> to vector<8x16xf32>
    %cst_80 = arith.constant dense<0.000000e+00> : vector<8x96xf32>
    %287 = tpu.matmul %286, %13, %cst_80 {dimension_numbers = #tpu.dot_dimension_numbers<[1], [0], [0], [1], [0, 0, 1, 1], [], []>} : vector<8x16xf32>, vector<16x96xf32>, vector<8x96xf32> -> vector<8x96xf32>
    %288 = vector.broadcast %8 : vector<1x96xf32> to vector<8x96xf32>
    %289 = arith.addf %287, %288 : vector<8x96xf32>
    %cst_81 = arith.constant dense<0.000000e+00> : vector<8x96xf32>
    %290 = tpu.matmul %277, %7, %cst_81 {dimension_numbers = #tpu.dot_dimension_numbers<[1], [0], [0], [1], [0, 0, 1, 1], [], []>} : vector<8x32xf32>, vector<32x96xf32>, vector<8x96xf32> -> vector<8x96xf32>
    %291 = vector.broadcast %9 : vector<1x96xf32> to vector<8x96xf32>
    %292 = arith.addf %290, %291 : vector<8x96xf32>
    %293 = vector.extract_strided_slice %289 {offsets = [0, 0], sizes = [8, 32], strides = [1, 1]} : vector<8x96xf32> to vector<8x32xf32>
    %294 = vector.extract_strided_slice %292 {offsets = [0, 0], sizes = [8, 32], strides = [1, 1]} : vector<8x96xf32> to vector<8x32xf32>
    %295 = arith.addf %293, %294 : vector<8x32xf32>
    %296 = arith.negf %295 : vector<8x32xf32>
    %297 = math.exp %296 : vector<8x32xf32>
    %cst_82 = arith.constant 1.000000e+00 : f32
    %298 = vector.broadcast %cst_82 : f32 to vector<8x32xf32>
    %299 = arith.addf %298, %297 : vector<8x32xf32>
    %300 = arith.divf %298, %299 : vector<8x32xf32>
    %301 = vector.extract_strided_slice %289 {offsets = [0, 32], sizes = [8, 32], strides = [1, 1]} : vector<8x96xf32> to vector<8x32xf32>
    %302 = vector.extract_strided_slice %292 {offsets = [0, 32], sizes = [8, 32], strides = [1, 1]} : vector<8x96xf32> to vector<8x32xf32>
    %303 = arith.addf %301, %302 : vector<8x32xf32>
    %304 = arith.negf %303 : vector<8x32xf32>
    %305 = math.exp %304 : vector<8x32xf32>
    %cst_83 = arith.constant 1.000000e+00 : f32
    %306 = vector.broadcast %cst_83 : f32 to vector<8x32xf32>
    %307 = arith.addf %306, %305 : vector<8x32xf32>
    %308 = arith.divf %306, %307 : vector<8x32xf32>
    %309 = vector.extract_strided_slice %289 {offsets = [0, 64], sizes = [8, 32], strides = [1, 1]} : vector<8x96xf32> to vector<8x32xf32>
    %310 = vector.extract_strided_slice %292 {offsets = [0, 64], sizes = [8, 32], strides = [1, 1]} : vector<8x96xf32> to vector<8x32xf32>
    %311 = arith.mulf %300, %310 : vector<8x32xf32>
    %312 = arith.addf %309, %311 : vector<8x32xf32>
    %313 = math.tanh %312 : vector<8x32xf32>
    %cst_84 = arith.constant 1.000000e+00 : f32
    %314 = vector.broadcast %cst_84 : f32 to vector<8x32xf32>
    %315 = arith.subf %314, %308 : vector<8x32xf32>
    %316 = arith.mulf %315, %313 : vector<8x32xf32>
    %317 = arith.mulf %308, %277 : vector<8x32xf32>
    %318 = arith.addf %316, %317 : vector<8x32xf32>
    %319 = vector.shape_cast %318 : vector<8x32xf32> to vector<8x1x32xf32>
    "tpu.trace_start"() <{level = 10 : i32, message = "bqh,bsh->bqs"}> : () -> ()
    %cst_85 = arith.constant dense<0.000000e+00> : vector<8x1x8xf32>
    %320 = tpu.matmul %319, %280, %cst_85 {dimension_numbers = #tpu.dot_dimension_numbers<[2], [2], [1], [1], [0, 0, 0, 1, 1, 1], [0], [0]>} : vector<8x1x32xf32>, vector<8x8x32xf32>, vector<8x1x8xf32> -> vector<8x1x8xf32>
    "tpu.trace_stop"() : () -> ()
    %321 = vector.shape_cast %320 : vector<8x1x8xf32> to vector<8x8xf32>
    %cst_86 = arith.constant dense<0xFF800000> : vector<8xf32>
    %322 = vector.multi_reduction <maximumf>, %321, %cst_86 [1] : vector<8x8xf32> to vector<8xf32>
    %323 = vector.shape_cast %322 : vector<8xf32> to vector<8x1xf32>
    %324 = vector.broadcast %323 : vector<8x1xf32> to vector<8x8xf32>
    %325 = arith.subf %321, %324 : vector<8x8xf32>
    %326 = math.exp %325 : vector<8x8xf32>
    %cst_87 = arith.constant dense<0.000000e+00> : vector<8xf32>
    %327 = vector.multi_reduction <add>, %326, %cst_87 [1] : vector<8x8xf32> to vector<8xf32>
    %328 = vector.shape_cast %327 : vector<8xf32> to vector<8x1xf32>
    %329 = vector.broadcast %328 : vector<8x1xf32> to vector<8x8xf32>
    %330 = arith.divf %326, %329 : vector<8x8xf32>
    %331 = vector.shape_cast %330 : vector<8x8xf32> to vector<8x1x8xf32>
    "tpu.trace_start"() <{level = 10 : i32, message = "bqs,bsh->bqh"}> : () -> ()
    %cst_88 = arith.constant dense<0.000000e+00> : vector<8x1x32xf32>
    %332 = tpu.matmul %331, %280, %cst_88 {dimension_numbers = #tpu.dot_dimension_numbers<[2], [1], [1], [2], [0, 0, 0, 1, 1, 2], [0], [0]>} : vector<8x1x8xf32>, vector<8x8x32xf32>, vector<8x1x32xf32> -> vector<8x1x32xf32>
    "tpu.trace_stop"() : () -> ()
    %333 = vector.shape_cast %332 : vector<8x1x32xf32> to vector<8x32xf32>
    %334 = tpu.concatenate %318, %333 in 1 : vector<8x32xf32>, vector<8x32xf32> -> vector<8x64xf32>
    %cst_89 = arith.constant dense<0.000000e+00> : vector<8x16xf32>
    %335 = tpu.matmul %334, %10, %cst_89 {dimension_numbers = #tpu.dot_dimension_numbers<[1], [0], [0], [1], [0, 0, 1, 1], [], []>} : vector<8x64xf32>, vector<64x16xf32>, vector<8x16xf32> -> vector<8x16xf32>
    %336 = vector.broadcast %11 : vector<1x16xf32> to vector<8x16xf32>
    %337 = arith.addf %335, %336 : vector<8x16xf32>
    %cst_90 = arith.constant dense<0xFF800000> : vector<8xf32>
    %338 = vector.multi_reduction <maximumf>, %337, %cst_90 [1] : vector<8x16xf32> to vector<8xf32>
    %339 = vector.shape_cast %338 : vector<8xf32> to vector<8x1xf32>
    %340 = vector.broadcast %339 : vector<8x1xf32> to vector<8x16xf32>
    %341 = arith.cmpf oeq, %337, %340 : vector<8x16xf32>
    %c16_i32 = arith.constant 16 : i32
    %342 = vector.broadcast %c16_i32 : i32 to vector<8x16xi32>
    %343 = arith.select %341, %281, %342 : vector<8x16xi1>, vector<8x16xi32>
    %cst_91 = arith.constant dense<2147483647> : vector<8xi32>
    %344 = vector.multi_reduction <minsi>, %343, %cst_91 [1] : vector<8x16xi32> to vector<8xi32>
    %345 = vector.shape_cast %344 : vector<8xi32> to vector<8x1xi32>
    %346 = vector.broadcast %345 : vector<8x1xi32> to vector<8x16xi32>
    %347 = arith.cmpi eq, %281, %346 : vector<8x16xi32>
    %348 = arith.extui %347 : vector<8x16xi1> to vector<8x16xi32>
    %349 = arith.sitofp %348 : vector<8x16xi32> to vector<8x16xf32>
    %cst_92 = arith.constant dense<0.000000e+00> : vector<8x96xf32>
    %350 = tpu.matmul %349, %13, %cst_92 {dimension_numbers = #tpu.dot_dimension_numbers<[1], [0], [0], [1], [0, 0, 1, 1], [], []>} : vector<8x16xf32>, vector<16x96xf32>, vector<8x96xf32> -> vector<8x96xf32>
    %351 = vector.broadcast %8 : vector<1x96xf32> to vector<8x96xf32>
    %352 = arith.addf %350, %351 : vector<8x96xf32>
    %cst_93 = arith.constant dense<0.000000e+00> : vector<8x96xf32>
    %353 = tpu.matmul %318, %7, %cst_93 {dimension_numbers = #tpu.dot_dimension_numbers<[1], [0], [0], [1], [0, 0, 1, 1], [], []>} : vector<8x32xf32>, vector<32x96xf32>, vector<8x96xf32> -> vector<8x96xf32>
    %354 = vector.broadcast %9 : vector<1x96xf32> to vector<8x96xf32>
    %355 = arith.addf %353, %354 : vector<8x96xf32>
    %356 = vector.extract_strided_slice %352 {offsets = [0, 0], sizes = [8, 32], strides = [1, 1]} : vector<8x96xf32> to vector<8x32xf32>
    %357 = vector.extract_strided_slice %355 {offsets = [0, 0], sizes = [8, 32], strides = [1, 1]} : vector<8x96xf32> to vector<8x32xf32>
    %358 = arith.addf %356, %357 : vector<8x32xf32>
    %359 = arith.negf %358 : vector<8x32xf32>
    %360 = math.exp %359 : vector<8x32xf32>
    %cst_94 = arith.constant 1.000000e+00 : f32
    %361 = vector.broadcast %cst_94 : f32 to vector<8x32xf32>
    %362 = arith.addf %361, %360 : vector<8x32xf32>
    %363 = arith.divf %361, %362 : vector<8x32xf32>
    %364 = vector.extract_strided_slice %352 {offsets = [0, 32], sizes = [8, 32], strides = [1, 1]} : vector<8x96xf32> to vector<8x32xf32>
    %365 = vector.extract_strided_slice %355 {offsets = [0, 32], sizes = [8, 32], strides = [1, 1]} : vector<8x96xf32> to vector<8x32xf32>
    %366 = arith.addf %364, %365 : vector<8x32xf32>
    %367 = arith.negf %366 : vector<8x32xf32>
    %368 = math.exp %367 : vector<8x32xf32>
    %cst_95 = arith.constant 1.000000e+00 : f32
    %369 = vector.broadcast %cst_95 : f32 to vector<8x32xf32>
    %370 = arith.addf %369, %368 : vector<8x32xf32>
    %371 = arith.divf %369, %370 : vector<8x32xf32>
    %372 = vector.extract_strided_slice %352 {offsets = [0, 64], sizes = [8, 32], strides = [1, 1]} : vector<8x96xf32> to vector<8x32xf32>
    %373 = vector.extract_strided_slice %355 {offsets = [0, 64], sizes = [8, 32], strides = [1, 1]} : vector<8x96xf32> to vector<8x32xf32>
    %374 = arith.mulf %363, %373 : vector<8x32xf32>
    %375 = arith.addf %372, %374 : vector<8x32xf32>
    %376 = math.tanh %375 : vector<8x32xf32>
    %cst_96 = arith.constant 1.000000e+00 : f32
    %377 = vector.broadcast %cst_96 : f32 to vector<8x32xf32>
    %378 = arith.subf %377, %371 : vector<8x32xf32>
    %379 = arith.mulf %378, %376 : vector<8x32xf32>
    %380 = arith.mulf %371, %318 : vector<8x32xf32>
    %381 = arith.addf %379, %380 : vector<8x32xf32>
    %382 = vector.shape_cast %381 : vector<8x32xf32> to vector<8x1x32xf32>
    "tpu.trace_start"() <{level = 10 : i32, message = "bqh,bsh->bqs"}> : () -> ()
    %cst_97 = arith.constant dense<0.000000e+00> : vector<8x1x8xf32>
    %383 = tpu.matmul %382, %280, %cst_97 {dimension_numbers = #tpu.dot_dimension_numbers<[2], [2], [1], [1], [0, 0, 0, 1, 1, 1], [0], [0]>} : vector<8x1x32xf32>, vector<8x8x32xf32>, vector<8x1x8xf32> -> vector<8x1x8xf32>
    "tpu.trace_stop"() : () -> ()
    %384 = vector.shape_cast %383 : vector<8x1x8xf32> to vector<8x8xf32>
    %cst_98 = arith.constant dense<0xFF800000> : vector<8xf32>
    %385 = vector.multi_reduction <maximumf>, %384, %cst_98 [1] : vector<8x8xf32> to vector<8xf32>
    %386 = vector.shape_cast %385 : vector<8xf32> to vector<8x1xf32>
    %387 = vector.broadcast %386 : vector<8x1xf32> to vector<8x8xf32>
    %388 = arith.subf %384, %387 : vector<8x8xf32>
    %389 = math.exp %388 : vector<8x8xf32>
    %cst_99 = arith.constant dense<0.000000e+00> : vector<8xf32>
    %390 = vector.multi_reduction <add>, %389, %cst_99 [1] : vector<8x8xf32> to vector<8xf32>
    %391 = vector.shape_cast %390 : vector<8xf32> to vector<8x1xf32>
    %392 = vector.broadcast %391 : vector<8x1xf32> to vector<8x8xf32>
    %393 = arith.divf %389, %392 : vector<8x8xf32>
    %394 = vector.shape_cast %393 : vector<8x8xf32> to vector<8x1x8xf32>
    "tpu.trace_start"() <{level = 10 : i32, message = "bqs,bsh->bqh"}> : () -> ()
    %cst_100 = arith.constant dense<0.000000e+00> : vector<8x1x32xf32>
    %395 = tpu.matmul %394, %280, %cst_100 {dimension_numbers = #tpu.dot_dimension_numbers<[2], [1], [1], [2], [0, 0, 0, 1, 1, 2], [0], [0]>} : vector<8x1x8xf32>, vector<8x8x32xf32>, vector<8x1x32xf32> -> vector<8x1x32xf32>
    "tpu.trace_stop"() : () -> ()
    %396 = vector.shape_cast %395 : vector<8x1x32xf32> to vector<8x32xf32>
    %397 = tpu.concatenate %381, %396 in 1 : vector<8x32xf32>, vector<8x32xf32> -> vector<8x64xf32>
    %cst_101 = arith.constant dense<0.000000e+00> : vector<8x16xf32>
    %398 = tpu.matmul %397, %10, %cst_101 {dimension_numbers = #tpu.dot_dimension_numbers<[1], [0], [0], [1], [0, 0, 1, 1], [], []>} : vector<8x64xf32>, vector<64x16xf32>, vector<8x16xf32> -> vector<8x16xf32>
    %399 = vector.broadcast %11 : vector<1x16xf32> to vector<8x16xf32>
    %400 = arith.addf %398, %399 : vector<8x16xf32>
    %cst_102 = arith.constant dense<0xFF800000> : vector<8xf32>
    %401 = vector.multi_reduction <maximumf>, %400, %cst_102 [1] : vector<8x16xf32> to vector<8xf32>
    %402 = vector.shape_cast %401 : vector<8xf32> to vector<8x1xf32>
    %403 = vector.broadcast %402 : vector<8x1xf32> to vector<8x16xf32>
    %404 = arith.cmpf oeq, %400, %403 : vector<8x16xf32>
    %c16_i32_103 = arith.constant 16 : i32
    %405 = vector.broadcast %c16_i32_103 : i32 to vector<8x16xi32>
    %406 = arith.select %404, %281, %405 : vector<8x16xi1>, vector<8x16xi32>
    %cst_104 = arith.constant dense<2147483647> : vector<8xi32>
    %407 = vector.multi_reduction <minsi>, %406, %cst_104 [1] : vector<8x16xi32> to vector<8xi32>
    %408 = vector.shape_cast %407 : vector<8xi32> to vector<8x1xi32>
    %409 = vector.broadcast %408 : vector<8x1xi32> to vector<8x16xi32>
    %410 = arith.cmpi eq, %281, %409 : vector<8x16xi32>
    %411 = arith.extui %410 : vector<8x16xi1> to vector<8x16xi32>
    %412 = arith.sitofp %411 : vector<8x16xi32> to vector<8x16xf32>
    %cst_105 = arith.constant dense<0.000000e+00> : vector<8x96xf32>
    %413 = tpu.matmul %412, %13, %cst_105 {dimension_numbers = #tpu.dot_dimension_numbers<[1], [0], [0], [1], [0, 0, 1, 1], [], []>} : vector<8x16xf32>, vector<16x96xf32>, vector<8x96xf32> -> vector<8x96xf32>
    %414 = vector.broadcast %8 : vector<1x96xf32> to vector<8x96xf32>
    %415 = arith.addf %413, %414 : vector<8x96xf32>
    %cst_106 = arith.constant dense<0.000000e+00> : vector<8x96xf32>
    %416 = tpu.matmul %381, %7, %cst_106 {dimension_numbers = #tpu.dot_dimension_numbers<[1], [0], [0], [1], [0, 0, 1, 1], [], []>} : vector<8x32xf32>, vector<32x96xf32>, vector<8x96xf32> -> vector<8x96xf32>
    %417 = vector.broadcast %9 : vector<1x96xf32> to vector<8x96xf32>
    %418 = arith.addf %416, %417 : vector<8x96xf32>
    %419 = vector.extract_strided_slice %415 {offsets = [0, 0], sizes = [8, 32], strides = [1, 1]} : vector<8x96xf32> to vector<8x32xf32>
    %420 = vector.extract_strided_slice %418 {offsets = [0, 0], sizes = [8, 32], strides = [1, 1]} : vector<8x96xf32> to vector<8x32xf32>
    %421 = arith.addf %419, %420 : vector<8x32xf32>
    %422 = arith.negf %421 : vector<8x32xf32>
    %423 = math.exp %422 : vector<8x32xf32>
    %cst_107 = arith.constant 1.000000e+00 : f32
    %424 = vector.broadcast %cst_107 : f32 to vector<8x32xf32>
    %425 = arith.addf %424, %423 : vector<8x32xf32>
    %426 = arith.divf %424, %425 : vector<8x32xf32>
    %427 = vector.extract_strided_slice %415 {offsets = [0, 32], sizes = [8, 32], strides = [1, 1]} : vector<8x96xf32> to vector<8x32xf32>
    %428 = vector.extract_strided_slice %418 {offsets = [0, 32], sizes = [8, 32], strides = [1, 1]} : vector<8x96xf32> to vector<8x32xf32>
    %429 = arith.addf %427, %428 : vector<8x32xf32>
    %430 = arith.negf %429 : vector<8x32xf32>
    %431 = math.exp %430 : vector<8x32xf32>
    %cst_108 = arith.constant 1.000000e+00 : f32
    %432 = vector.broadcast %cst_108 : f32 to vector<8x32xf32>
    %433 = arith.addf %432, %431 : vector<8x32xf32>
    %434 = arith.divf %432, %433 : vector<8x32xf32>
    %435 = vector.extract_strided_slice %415 {offsets = [0, 64], sizes = [8, 32], strides = [1, 1]} : vector<8x96xf32> to vector<8x32xf32>
    %436 = vector.extract_strided_slice %418 {offsets = [0, 64], sizes = [8, 32], strides = [1, 1]} : vector<8x96xf32> to vector<8x32xf32>
    %437 = arith.mulf %426, %436 : vector<8x32xf32>
    %438 = arith.addf %435, %437 : vector<8x32xf32>
    %439 = math.tanh %438 : vector<8x32xf32>
    %cst_109 = arith.constant 1.000000e+00 : f32
    %440 = vector.broadcast %cst_109 : f32 to vector<8x32xf32>
    %441 = arith.subf %440, %434 : vector<8x32xf32>
    %442 = arith.mulf %441, %439 : vector<8x32xf32>
    %443 = arith.mulf %434, %381 : vector<8x32xf32>
    %444 = arith.addf %442, %443 : vector<8x32xf32>
    %445 = vector.shape_cast %444 : vector<8x32xf32> to vector<8x1x32xf32>
    "tpu.trace_start"() <{level = 10 : i32, message = "bqh,bsh->bqs"}> : () -> ()
    %cst_110 = arith.constant dense<0.000000e+00> : vector<8x1x8xf32>
    %446 = tpu.matmul %445, %280, %cst_110 {dimension_numbers = #tpu.dot_dimension_numbers<[2], [2], [1], [1], [0, 0, 0, 1, 1, 1], [0], [0]>} : vector<8x1x32xf32>, vector<8x8x32xf32>, vector<8x1x8xf32> -> vector<8x1x8xf32>
    "tpu.trace_stop"() : () -> ()
    %447 = vector.shape_cast %446 : vector<8x1x8xf32> to vector<8x8xf32>
    %cst_111 = arith.constant dense<0xFF800000> : vector<8xf32>
    %448 = vector.multi_reduction <maximumf>, %447, %cst_111 [1] : vector<8x8xf32> to vector<8xf32>
    %449 = vector.shape_cast %448 : vector<8xf32> to vector<8x1xf32>
    %450 = vector.broadcast %449 : vector<8x1xf32> to vector<8x8xf32>
    %451 = arith.subf %447, %450 : vector<8x8xf32>
    %452 = math.exp %451 : vector<8x8xf32>
    %cst_112 = arith.constant dense<0.000000e+00> : vector<8xf32>
    %453 = vector.multi_reduction <add>, %452, %cst_112 [1] : vector<8x8xf32> to vector<8xf32>
    %454 = vector.shape_cast %453 : vector<8xf32> to vector<8x1xf32>
    %455 = vector.broadcast %454 : vector<8x1xf32> to vector<8x8xf32>
    %456 = arith.divf %452, %455 : vector<8x8xf32>
    %457 = vector.shape_cast %456 : vector<8x8xf32> to vector<8x1x8xf32>
    "tpu.trace_start"() <{level = 10 : i32, message = "bqs,bsh->bqh"}> : () -> ()
    %cst_113 = arith.constant dense<0.000000e+00> : vector<8x1x32xf32>
    %458 = tpu.matmul %457, %280, %cst_113 {dimension_numbers = #tpu.dot_dimension_numbers<[2], [1], [1], [2], [0, 0, 0, 1, 1, 2], [0], [0]>} : vector<8x1x8xf32>, vector<8x8x32xf32>, vector<8x1x32xf32> -> vector<8x1x32xf32>
    "tpu.trace_stop"() : () -> ()
    %459 = vector.shape_cast %458 : vector<8x1x32xf32> to vector<8x32xf32>
    %460 = tpu.concatenate %444, %459 in 1 : vector<8x32xf32>, vector<8x32xf32> -> vector<8x64xf32>
    %cst_114 = arith.constant dense<0.000000e+00> : vector<8x16xf32>
    %461 = tpu.matmul %460, %10, %cst_114 {dimension_numbers = #tpu.dot_dimension_numbers<[1], [0], [0], [1], [0, 0, 1, 1], [], []>} : vector<8x64xf32>, vector<64x16xf32>, vector<8x16xf32> -> vector<8x16xf32>
    %462 = vector.broadcast %11 : vector<1x16xf32> to vector<8x16xf32>
    %463 = arith.addf %461, %462 : vector<8x16xf32>
    %cst_115 = arith.constant dense<0xFF800000> : vector<8xf32>
    %464 = vector.multi_reduction <maximumf>, %463, %cst_115 [1] : vector<8x16xf32> to vector<8xf32>
    %465 = vector.shape_cast %464 : vector<8xf32> to vector<8x1xf32>
    %466 = vector.broadcast %465 : vector<8x1xf32> to vector<8x16xf32>
    %467 = arith.cmpf oeq, %463, %466 : vector<8x16xf32>
    %c16_i32_116 = arith.constant 16 : i32
    %468 = vector.broadcast %c16_i32_116 : i32 to vector<8x16xi32>
    %469 = arith.select %467, %281, %468 : vector<8x16xi1>, vector<8x16xi32>
    %cst_117 = arith.constant dense<2147483647> : vector<8xi32>
    %470 = vector.multi_reduction <minsi>, %469, %cst_117 [1] : vector<8x16xi32> to vector<8xi32>
    %471 = vector.shape_cast %470 : vector<8xi32> to vector<8x1xi32>
    %472 = vector.broadcast %471 : vector<8x1xi32> to vector<8x16xi32>
    %473 = arith.cmpi eq, %281, %472 : vector<8x16xi32>
    %474 = arith.extui %473 : vector<8x16xi1> to vector<8x16xi32>
    %475 = arith.sitofp %474 : vector<8x16xi32> to vector<8x16xf32>
    %cst_118 = arith.constant dense<0.000000e+00> : vector<8x96xf32>
    %476 = tpu.matmul %475, %13, %cst_118 {dimension_numbers = #tpu.dot_dimension_numbers<[1], [0], [0], [1], [0, 0, 1, 1], [], []>} : vector<8x16xf32>, vector<16x96xf32>, vector<8x96xf32> -> vector<8x96xf32>
    %477 = vector.broadcast %8 : vector<1x96xf32> to vector<8x96xf32>
    %478 = arith.addf %476, %477 : vector<8x96xf32>
    %cst_119 = arith.constant dense<0.000000e+00> : vector<8x96xf32>
    %479 = tpu.matmul %444, %7, %cst_119 {dimension_numbers = #tpu.dot_dimension_numbers<[1], [0], [0], [1], [0, 0, 1, 1], [], []>} : vector<8x32xf32>, vector<32x96xf32>, vector<8x96xf32> -> vector<8x96xf32>
    %480 = vector.broadcast %9 : vector<1x96xf32> to vector<8x96xf32>
    %481 = arith.addf %479, %480 : vector<8x96xf32>
    %482 = vector.extract_strided_slice %478 {offsets = [0, 0], sizes = [8, 32], strides = [1, 1]} : vector<8x96xf32> to vector<8x32xf32>
    %483 = vector.extract_strided_slice %481 {offsets = [0, 0], sizes = [8, 32], strides = [1, 1]} : vector<8x96xf32> to vector<8x32xf32>
    %484 = arith.addf %482, %483 : vector<8x32xf32>
    %485 = arith.negf %484 : vector<8x32xf32>
    %486 = math.exp %485 : vector<8x32xf32>
    %cst_120 = arith.constant 1.000000e+00 : f32
    %487 = vector.broadcast %cst_120 : f32 to vector<8x32xf32>
    %488 = arith.addf %487, %486 : vector<8x32xf32>
    %489 = arith.divf %487, %488 : vector<8x32xf32>
    %490 = vector.extract_strided_slice %478 {offsets = [0, 32], sizes = [8, 32], strides = [1, 1]} : vector<8x96xf32> to vector<8x32xf32>
    %491 = vector.extract_strided_slice %481 {offsets = [0, 32], sizes = [8, 32], strides = [1, 1]} : vector<8x96xf32> to vector<8x32xf32>
    %492 = arith.addf %490, %491 : vector<8x32xf32>
    %493 = arith.negf %492 : vector<8x32xf32>
    %494 = math.exp %493 : vector<8x32xf32>
    %cst_121 = arith.constant 1.000000e+00 : f32
    %495 = vector.broadcast %cst_121 : f32 to vector<8x32xf32>
    %496 = arith.addf %495, %494 : vector<8x32xf32>
    %497 = arith.divf %495, %496 : vector<8x32xf32>
    %498 = vector.extract_strided_slice %478 {offsets = [0, 64], sizes = [8, 32], strides = [1, 1]} : vector<8x96xf32> to vector<8x32xf32>
    %499 = vector.extract_strided_slice %481 {offsets = [0, 64], sizes = [8, 32], strides = [1, 1]} : vector<8x96xf32> to vector<8x32xf32>
    %500 = arith.mulf %489, %499 : vector<8x32xf32>
    %501 = arith.addf %498, %500 : vector<8x32xf32>
    %502 = math.tanh %501 : vector<8x32xf32>
    %cst_122 = arith.constant 1.000000e+00 : f32
    %503 = vector.broadcast %cst_122 : f32 to vector<8x32xf32>
    %504 = arith.subf %503, %497 : vector<8x32xf32>
    %505 = arith.mulf %504, %502 : vector<8x32xf32>
    %506 = arith.mulf %497, %444 : vector<8x32xf32>
    %507 = arith.addf %505, %506 : vector<8x32xf32>
    %508 = vector.shape_cast %507 : vector<8x32xf32> to vector<8x1x32xf32>
    "tpu.trace_start"() <{level = 10 : i32, message = "bqh,bsh->bqs"}> : () -> ()
    %cst_123 = arith.constant dense<0.000000e+00> : vector<8x1x8xf32>
    %509 = tpu.matmul %508, %280, %cst_123 {dimension_numbers = #tpu.dot_dimension_numbers<[2], [2], [1], [1], [0, 0, 0, 1, 1, 1], [0], [0]>} : vector<8x1x32xf32>, vector<8x8x32xf32>, vector<8x1x8xf32> -> vector<8x1x8xf32>
    "tpu.trace_stop"() : () -> ()
    %510 = vector.shape_cast %509 : vector<8x1x8xf32> to vector<8x8xf32>
    %cst_124 = arith.constant dense<0xFF800000> : vector<8xf32>
    %511 = vector.multi_reduction <maximumf>, %510, %cst_124 [1] : vector<8x8xf32> to vector<8xf32>
    %512 = vector.shape_cast %511 : vector<8xf32> to vector<8x1xf32>
    %513 = vector.broadcast %512 : vector<8x1xf32> to vector<8x8xf32>
    %514 = arith.subf %510, %513 : vector<8x8xf32>
    %515 = math.exp %514 : vector<8x8xf32>
    %cst_125 = arith.constant dense<0.000000e+00> : vector<8xf32>
    %516 = vector.multi_reduction <add>, %515, %cst_125 [1] : vector<8x8xf32> to vector<8xf32>
    %517 = vector.shape_cast %516 : vector<8xf32> to vector<8x1xf32>
    %518 = vector.broadcast %517 : vector<8x1xf32> to vector<8x8xf32>
    %519 = arith.divf %515, %518 : vector<8x8xf32>
    %520 = vector.shape_cast %519 : vector<8x8xf32> to vector<8x1x8xf32>
    "tpu.trace_start"() <{level = 10 : i32, message = "bqs,bsh->bqh"}> : () -> ()
    %cst_126 = arith.constant dense<0.000000e+00> : vector<8x1x32xf32>
    %521 = tpu.matmul %520, %280, %cst_126 {dimension_numbers = #tpu.dot_dimension_numbers<[2], [1], [1], [2], [0, 0, 0, 1, 1, 2], [0], [0]>} : vector<8x1x8xf32>, vector<8x8x32xf32>, vector<8x1x32xf32> -> vector<8x1x32xf32>
    "tpu.trace_stop"() : () -> ()
    %522 = vector.shape_cast %521 : vector<8x1x32xf32> to vector<8x32xf32>
    %523 = tpu.concatenate %507, %522 in 1 : vector<8x32xf32>, vector<8x32xf32> -> vector<8x64xf32>
    %cst_127 = arith.constant dense<0.000000e+00> : vector<8x16xf32>
    %524 = tpu.matmul %523, %10, %cst_127 {dimension_numbers = #tpu.dot_dimension_numbers<[1], [0], [0], [1], [0, 0, 1, 1], [], []>} : vector<8x64xf32>, vector<64x16xf32>, vector<8x16xf32> -> vector<8x16xf32>
    %525 = vector.broadcast %11 : vector<1x16xf32> to vector<8x16xf32>
    %526 = arith.addf %524, %525 : vector<8x16xf32>
    %cst_128 = arith.constant dense<0xFF800000> : vector<8xf32>
    %527 = vector.multi_reduction <maximumf>, %526, %cst_128 [1] : vector<8x16xf32> to vector<8xf32>
    %528 = vector.shape_cast %527 : vector<8xf32> to vector<8x1xf32>
    %529 = vector.broadcast %528 : vector<8x1xf32> to vector<8x16xf32>
    %530 = arith.cmpf oeq, %526, %529 : vector<8x16xf32>
    %c16_i32_129 = arith.constant 16 : i32
    %531 = vector.broadcast %c16_i32_129 : i32 to vector<8x16xi32>
    %532 = arith.select %530, %281, %531 : vector<8x16xi1>, vector<8x16xi32>
    %cst_130 = arith.constant dense<2147483647> : vector<8xi32>
    %533 = vector.multi_reduction <minsi>, %532, %cst_130 [1] : vector<8x16xi32> to vector<8xi32>
    %534 = vector.shape_cast %533 : vector<8xi32> to vector<8x1xi32>
    %535 = vector.broadcast %534 : vector<8x1xi32> to vector<8x16xi32>
    %536 = arith.cmpi eq, %281, %535 : vector<8x16xi32>
    %537 = arith.extui %536 : vector<8x16xi1> to vector<8x16xi32>
    %538 = arith.sitofp %537 : vector<8x16xi32> to vector<8x16xf32>
    %cst_131 = arith.constant dense<0.000000e+00> : vector<8x96xf32>
    %539 = tpu.matmul %538, %13, %cst_131 {dimension_numbers = #tpu.dot_dimension_numbers<[1], [0], [0], [1], [0, 0, 1, 1], [], []>} : vector<8x16xf32>, vector<16x96xf32>, vector<8x96xf32> -> vector<8x96xf32>
    %540 = vector.broadcast %8 : vector<1x96xf32> to vector<8x96xf32>
    %541 = arith.addf %539, %540 : vector<8x96xf32>
    %cst_132 = arith.constant dense<0.000000e+00> : vector<8x96xf32>
    %542 = tpu.matmul %507, %7, %cst_132 {dimension_numbers = #tpu.dot_dimension_numbers<[1], [0], [0], [1], [0, 0, 1, 1], [], []>} : vector<8x32xf32>, vector<32x96xf32>, vector<8x96xf32> -> vector<8x96xf32>
    %543 = vector.broadcast %9 : vector<1x96xf32> to vector<8x96xf32>
    %544 = arith.addf %542, %543 : vector<8x96xf32>
    %545 = vector.extract_strided_slice %541 {offsets = [0, 0], sizes = [8, 32], strides = [1, 1]} : vector<8x96xf32> to vector<8x32xf32>
    %546 = vector.extract_strided_slice %544 {offsets = [0, 0], sizes = [8, 32], strides = [1, 1]} : vector<8x96xf32> to vector<8x32xf32>
    %547 = arith.addf %545, %546 : vector<8x32xf32>
    %548 = arith.negf %547 : vector<8x32xf32>
    %549 = math.exp %548 : vector<8x32xf32>
    %cst_133 = arith.constant 1.000000e+00 : f32
    %550 = vector.broadcast %cst_133 : f32 to vector<8x32xf32>
    %551 = arith.addf %550, %549 : vector<8x32xf32>
    %552 = arith.divf %550, %551 : vector<8x32xf32>
    %553 = vector.extract_strided_slice %541 {offsets = [0, 32], sizes = [8, 32], strides = [1, 1]} : vector<8x96xf32> to vector<8x32xf32>
    %554 = vector.extract_strided_slice %544 {offsets = [0, 32], sizes = [8, 32], strides = [1, 1]} : vector<8x96xf32> to vector<8x32xf32>
    %555 = arith.addf %553, %554 : vector<8x32xf32>
    %556 = arith.negf %555 : vector<8x32xf32>
    %557 = math.exp %556 : vector<8x32xf32>
    %cst_134 = arith.constant 1.000000e+00 : f32
    %558 = vector.broadcast %cst_134 : f32 to vector<8x32xf32>
    %559 = arith.addf %558, %557 : vector<8x32xf32>
    %560 = arith.divf %558, %559 : vector<8x32xf32>
    %561 = vector.extract_strided_slice %541 {offsets = [0, 64], sizes = [8, 32], strides = [1, 1]} : vector<8x96xf32> to vector<8x32xf32>
    %562 = vector.extract_strided_slice %544 {offsets = [0, 64], sizes = [8, 32], strides = [1, 1]} : vector<8x96xf32> to vector<8x32xf32>
    %563 = arith.mulf %552, %562 : vector<8x32xf32>
    %564 = arith.addf %561, %563 : vector<8x32xf32>
    %565 = math.tanh %564 : vector<8x32xf32>
    %cst_135 = arith.constant 1.000000e+00 : f32
    %566 = vector.broadcast %cst_135 : f32 to vector<8x32xf32>
    %567 = arith.subf %566, %560 : vector<8x32xf32>
    %568 = arith.mulf %567, %565 : vector<8x32xf32>
    %569 = arith.mulf %560, %507 : vector<8x32xf32>
    %570 = arith.addf %568, %569 : vector<8x32xf32>
    %571 = vector.shape_cast %570 : vector<8x32xf32> to vector<8x1x32xf32>
    "tpu.trace_start"() <{level = 10 : i32, message = "bqh,bsh->bqs"}> : () -> ()
    %cst_136 = arith.constant dense<0.000000e+00> : vector<8x1x8xf32>
    %572 = tpu.matmul %571, %280, %cst_136 {dimension_numbers = #tpu.dot_dimension_numbers<[2], [2], [1], [1], [0, 0, 0, 1, 1, 1], [0], [0]>} : vector<8x1x32xf32>, vector<8x8x32xf32>, vector<8x1x8xf32> -> vector<8x1x8xf32>
    "tpu.trace_stop"() : () -> ()
    %573 = vector.shape_cast %572 : vector<8x1x8xf32> to vector<8x8xf32>
    %cst_137 = arith.constant dense<0xFF800000> : vector<8xf32>
    %574 = vector.multi_reduction <maximumf>, %573, %cst_137 [1] : vector<8x8xf32> to vector<8xf32>
    %575 = vector.shape_cast %574 : vector<8xf32> to vector<8x1xf32>
    %576 = vector.broadcast %575 : vector<8x1xf32> to vector<8x8xf32>
    %577 = arith.subf %573, %576 : vector<8x8xf32>
    %578 = math.exp %577 : vector<8x8xf32>
    %cst_138 = arith.constant dense<0.000000e+00> : vector<8xf32>
    %579 = vector.multi_reduction <add>, %578, %cst_138 [1] : vector<8x8xf32> to vector<8xf32>
    %580 = vector.shape_cast %579 : vector<8xf32> to vector<8x1xf32>
    %581 = vector.broadcast %580 : vector<8x1xf32> to vector<8x8xf32>
    %582 = arith.divf %578, %581 : vector<8x8xf32>
    %583 = vector.shape_cast %582 : vector<8x8xf32> to vector<8x1x8xf32>
    "tpu.trace_start"() <{level = 10 : i32, message = "bqs,bsh->bqh"}> : () -> ()
    %cst_139 = arith.constant dense<0.000000e+00> : vector<8x1x32xf32>
    %584 = tpu.matmul %583, %280, %cst_139 {dimension_numbers = #tpu.dot_dimension_numbers<[2], [1], [1], [2], [0, 0, 0, 1, 1, 2], [0], [0]>} : vector<8x1x8xf32>, vector<8x8x32xf32>, vector<8x1x32xf32> -> vector<8x1x32xf32>
    "tpu.trace_stop"() : () -> ()
    %585 = vector.shape_cast %584 : vector<8x1x32xf32> to vector<8x32xf32>
    %586 = tpu.concatenate %570, %585 in 1 : vector<8x32xf32>, vector<8x32xf32> -> vector<8x64xf32>
    %cst_140 = arith.constant dense<0.000000e+00> : vector<8x16xf32>
    %587 = tpu.matmul %586, %10, %cst_140 {dimension_numbers = #tpu.dot_dimension_numbers<[1], [0], [0], [1], [0, 0, 1, 1], [], []>} : vector<8x64xf32>, vector<64x16xf32>, vector<8x16xf32> -> vector<8x16xf32>
    %588 = vector.broadcast %11 : vector<1x16xf32> to vector<8x16xf32>
    %589 = arith.addf %587, %588 : vector<8x16xf32>
    %cst_141 = arith.constant dense<0xFF800000> : vector<8xf32>
    %590 = vector.multi_reduction <maximumf>, %589, %cst_141 [1] : vector<8x16xf32> to vector<8xf32>
    %591 = vector.shape_cast %590 : vector<8xf32> to vector<8x1xf32>
    %592 = vector.broadcast %591 : vector<8x1xf32> to vector<8x16xf32>
    %593 = arith.cmpf oeq, %589, %592 : vector<8x16xf32>
    %c16_i32_142 = arith.constant 16 : i32
    %594 = vector.broadcast %c16_i32_142 : i32 to vector<8x16xi32>
    %595 = arith.select %593, %281, %594 : vector<8x16xi1>, vector<8x16xi32>
    %cst_143 = arith.constant dense<2147483647> : vector<8xi32>
    %596 = vector.multi_reduction <minsi>, %595, %cst_143 [1] : vector<8x16xi32> to vector<8xi32>
    %597 = vector.shape_cast %596 : vector<8xi32> to vector<8x1xi32>
    %598 = vector.broadcast %597 : vector<8x1xi32> to vector<8x16xi32>
    %599 = arith.cmpi eq, %281, %598 : vector<8x16xi32>
    %600 = arith.extui %599 : vector<8x16xi1> to vector<8x16xi32>
    %601 = arith.sitofp %600 : vector<8x16xi32> to vector<8x16xf32>
    %cst_144 = arith.constant dense<0.000000e+00> : vector<8x96xf32>
    %602 = tpu.matmul %601, %13, %cst_144 {dimension_numbers = #tpu.dot_dimension_numbers<[1], [0], [0], [1], [0, 0, 1, 1], [], []>} : vector<8x16xf32>, vector<16x96xf32>, vector<8x96xf32> -> vector<8x96xf32>
    %603 = vector.broadcast %8 : vector<1x96xf32> to vector<8x96xf32>
    %604 = arith.addf %602, %603 : vector<8x96xf32>
    %cst_145 = arith.constant dense<0.000000e+00> : vector<8x96xf32>
    %605 = tpu.matmul %570, %7, %cst_145 {dimension_numbers = #tpu.dot_dimension_numbers<[1], [0], [0], [1], [0, 0, 1, 1], [], []>} : vector<8x32xf32>, vector<32x96xf32>, vector<8x96xf32> -> vector<8x96xf32>
    %606 = vector.broadcast %9 : vector<1x96xf32> to vector<8x96xf32>
    %607 = arith.addf %605, %606 : vector<8x96xf32>
    %608 = vector.extract_strided_slice %604 {offsets = [0, 0], sizes = [8, 32], strides = [1, 1]} : vector<8x96xf32> to vector<8x32xf32>
    %609 = vector.extract_strided_slice %607 {offsets = [0, 0], sizes = [8, 32], strides = [1, 1]} : vector<8x96xf32> to vector<8x32xf32>
    %610 = arith.addf %608, %609 : vector<8x32xf32>
    %611 = arith.negf %610 : vector<8x32xf32>
    %612 = math.exp %611 : vector<8x32xf32>
    %cst_146 = arith.constant 1.000000e+00 : f32
    %613 = vector.broadcast %cst_146 : f32 to vector<8x32xf32>
    %614 = arith.addf %613, %612 : vector<8x32xf32>
    %615 = arith.divf %613, %614 : vector<8x32xf32>
    %616 = vector.extract_strided_slice %604 {offsets = [0, 32], sizes = [8, 32], strides = [1, 1]} : vector<8x96xf32> to vector<8x32xf32>
    %617 = vector.extract_strided_slice %607 {offsets = [0, 32], sizes = [8, 32], strides = [1, 1]} : vector<8x96xf32> to vector<8x32xf32>
    %618 = arith.addf %616, %617 : vector<8x32xf32>
    %619 = arith.negf %618 : vector<8x32xf32>
    %620 = math.exp %619 : vector<8x32xf32>
    %cst_147 = arith.constant 1.000000e+00 : f32
    %621 = vector.broadcast %cst_147 : f32 to vector<8x32xf32>
    %622 = arith.addf %621, %620 : vector<8x32xf32>
    %623 = arith.divf %621, %622 : vector<8x32xf32>
    %624 = vector.extract_strided_slice %604 {offsets = [0, 64], sizes = [8, 32], strides = [1, 1]} : vector<8x96xf32> to vector<8x32xf32>
    %625 = vector.extract_strided_slice %607 {offsets = [0, 64], sizes = [8, 32], strides = [1, 1]} : vector<8x96xf32> to vector<8x32xf32>
    %626 = arith.mulf %615, %625 : vector<8x32xf32>
    %627 = arith.addf %624, %626 : vector<8x32xf32>
    %628 = math.tanh %627 : vector<8x32xf32>
    %cst_148 = arith.constant 1.000000e+00 : f32
    %629 = vector.broadcast %cst_148 : f32 to vector<8x32xf32>
    %630 = arith.subf %629, %623 : vector<8x32xf32>
    %631 = arith.mulf %630, %628 : vector<8x32xf32>
    %632 = arith.mulf %623, %570 : vector<8x32xf32>
    %633 = arith.addf %631, %632 : vector<8x32xf32>
    %634 = vector.shape_cast %633 : vector<8x32xf32> to vector<8x1x32xf32>
    "tpu.trace_start"() <{level = 10 : i32, message = "bqh,bsh->bqs"}> : () -> ()
    %cst_149 = arith.constant dense<0.000000e+00> : vector<8x1x8xf32>
    %635 = tpu.matmul %634, %280, %cst_149 {dimension_numbers = #tpu.dot_dimension_numbers<[2], [2], [1], [1], [0, 0, 0, 1, 1, 1], [0], [0]>} : vector<8x1x32xf32>, vector<8x8x32xf32>, vector<8x1x8xf32> -> vector<8x1x8xf32>
    "tpu.trace_stop"() : () -> ()
    %636 = vector.shape_cast %635 : vector<8x1x8xf32> to vector<8x8xf32>
    %cst_150 = arith.constant dense<0xFF800000> : vector<8xf32>
    %637 = vector.multi_reduction <maximumf>, %636, %cst_150 [1] : vector<8x8xf32> to vector<8xf32>
    %638 = vector.shape_cast %637 : vector<8xf32> to vector<8x1xf32>
    %639 = vector.broadcast %638 : vector<8x1xf32> to vector<8x8xf32>
    %640 = arith.subf %636, %639 : vector<8x8xf32>
    %641 = math.exp %640 : vector<8x8xf32>
    %cst_151 = arith.constant dense<0.000000e+00> : vector<8xf32>
    %642 = vector.multi_reduction <add>, %641, %cst_151 [1] : vector<8x8xf32> to vector<8xf32>
    %643 = vector.shape_cast %642 : vector<8xf32> to vector<8x1xf32>
    %644 = vector.broadcast %643 : vector<8x1xf32> to vector<8x8xf32>
    %645 = arith.divf %641, %644 : vector<8x8xf32>
    %646 = vector.shape_cast %645 : vector<8x8xf32> to vector<8x1x8xf32>
    "tpu.trace_start"() <{level = 10 : i32, message = "bqs,bsh->bqh"}> : () -> ()
    %cst_152 = arith.constant dense<0.000000e+00> : vector<8x1x32xf32>
    %647 = tpu.matmul %646, %280, %cst_152 {dimension_numbers = #tpu.dot_dimension_numbers<[2], [1], [1], [2], [0, 0, 0, 1, 1, 2], [0], [0]>} : vector<8x1x8xf32>, vector<8x8x32xf32>, vector<8x1x32xf32> -> vector<8x1x32xf32>
    "tpu.trace_stop"() : () -> ()
    %648 = vector.shape_cast %647 : vector<8x1x32xf32> to vector<8x32xf32>
    %649 = tpu.concatenate %633, %648 in 1 : vector<8x32xf32>, vector<8x32xf32> -> vector<8x64xf32>
    %cst_153 = arith.constant dense<0.000000e+00> : vector<8x16xf32>
    %650 = tpu.matmul %649, %10, %cst_153 {dimension_numbers = #tpu.dot_dimension_numbers<[1], [0], [0], [1], [0, 0, 1, 1], [], []>} : vector<8x64xf32>, vector<64x16xf32>, vector<8x16xf32> -> vector<8x16xf32>
    %651 = vector.broadcast %11 : vector<1x16xf32> to vector<8x16xf32>
    %652 = arith.addf %650, %651 : vector<8x16xf32>
    %cst_154 = arith.constant dense<0xFF800000> : vector<8xf32>
    %653 = vector.multi_reduction <maximumf>, %652, %cst_154 [1] : vector<8x16xf32> to vector<8xf32>
    %654 = vector.shape_cast %653 : vector<8xf32> to vector<8x1xf32>
    %655 = vector.broadcast %654 : vector<8x1xf32> to vector<8x16xf32>
    %656 = arith.cmpf oeq, %652, %655 : vector<8x16xf32>
    %c16_i32_155 = arith.constant 16 : i32
    %657 = vector.broadcast %c16_i32_155 : i32 to vector<8x16xi32>
    %658 = arith.select %656, %281, %657 : vector<8x16xi1>, vector<8x16xi32>
    %cst_156 = arith.constant dense<2147483647> : vector<8xi32>
    %659 = vector.multi_reduction <minsi>, %658, %cst_156 [1] : vector<8x16xi32> to vector<8xi32>
    %660 = vector.shape_cast %659 : vector<8xi32> to vector<8x1xi32>
    %661 = vector.broadcast %660 : vector<8x1xi32> to vector<8x16xi32>
    %662 = arith.cmpi eq, %281, %661 : vector<8x16xi32>
    %663 = arith.extui %662 : vector<8x16xi1> to vector<8x16xi32>
    %664 = arith.sitofp %663 : vector<8x16xi32> to vector<8x16xf32>
    %cst_157 = arith.constant dense<0.000000e+00> : vector<8x96xf32>
    %665 = tpu.matmul %664, %13, %cst_157 {dimension_numbers = #tpu.dot_dimension_numbers<[1], [0], [0], [1], [0, 0, 1, 1], [], []>} : vector<8x16xf32>, vector<16x96xf32>, vector<8x96xf32> -> vector<8x96xf32>
    %666 = vector.broadcast %8 : vector<1x96xf32> to vector<8x96xf32>
    %667 = arith.addf %665, %666 : vector<8x96xf32>
    %cst_158 = arith.constant dense<0.000000e+00> : vector<8x96xf32>
    %668 = tpu.matmul %633, %7, %cst_158 {dimension_numbers = #tpu.dot_dimension_numbers<[1], [0], [0], [1], [0, 0, 1, 1], [], []>} : vector<8x32xf32>, vector<32x96xf32>, vector<8x96xf32> -> vector<8x96xf32>
    %669 = vector.broadcast %9 : vector<1x96xf32> to vector<8x96xf32>
    %670 = arith.addf %668, %669 : vector<8x96xf32>
    %671 = vector.extract_strided_slice %667 {offsets = [0, 0], sizes = [8, 32], strides = [1, 1]} : vector<8x96xf32> to vector<8x32xf32>
    %672 = vector.extract_strided_slice %670 {offsets = [0, 0], sizes = [8, 32], strides = [1, 1]} : vector<8x96xf32> to vector<8x32xf32>
    %673 = arith.addf %671, %672 : vector<8x32xf32>
    %674 = arith.negf %673 : vector<8x32xf32>
    %675 = math.exp %674 : vector<8x32xf32>
    %cst_159 = arith.constant 1.000000e+00 : f32
    %676 = vector.broadcast %cst_159 : f32 to vector<8x32xf32>
    %677 = arith.addf %676, %675 : vector<8x32xf32>
    %678 = arith.divf %676, %677 : vector<8x32xf32>
    %679 = vector.extract_strided_slice %667 {offsets = [0, 32], sizes = [8, 32], strides = [1, 1]} : vector<8x96xf32> to vector<8x32xf32>
    %680 = vector.extract_strided_slice %670 {offsets = [0, 32], sizes = [8, 32], strides = [1, 1]} : vector<8x96xf32> to vector<8x32xf32>
    %681 = arith.addf %679, %680 : vector<8x32xf32>
    %682 = arith.negf %681 : vector<8x32xf32>
    %683 = math.exp %682 : vector<8x32xf32>
    %cst_160 = arith.constant 1.000000e+00 : f32
    %684 = vector.broadcast %cst_160 : f32 to vector<8x32xf32>
    %685 = arith.addf %684, %683 : vector<8x32xf32>
    %686 = arith.divf %684, %685 : vector<8x32xf32>
    %687 = vector.extract_strided_slice %667 {offsets = [0, 64], sizes = [8, 32], strides = [1, 1]} : vector<8x96xf32> to vector<8x32xf32>
    %688 = vector.extract_strided_slice %670 {offsets = [0, 64], sizes = [8, 32], strides = [1, 1]} : vector<8x96xf32> to vector<8x32xf32>
    %689 = arith.mulf %678, %688 : vector<8x32xf32>
    %690 = arith.addf %687, %689 : vector<8x32xf32>
    %691 = math.tanh %690 : vector<8x32xf32>
    %cst_161 = arith.constant 1.000000e+00 : f32
    %692 = vector.broadcast %cst_161 : f32 to vector<8x32xf32>
    %693 = arith.subf %692, %686 : vector<8x32xf32>
    %694 = arith.mulf %693, %691 : vector<8x32xf32>
    %695 = arith.mulf %686, %633 : vector<8x32xf32>
    %696 = arith.addf %694, %695 : vector<8x32xf32>
    %697 = vector.shape_cast %696 : vector<8x32xf32> to vector<8x1x32xf32>
    "tpu.trace_start"() <{level = 10 : i32, message = "bqh,bsh->bqs"}> : () -> ()
    %cst_162 = arith.constant dense<0.000000e+00> : vector<8x1x8xf32>
    %698 = tpu.matmul %697, %280, %cst_162 {dimension_numbers = #tpu.dot_dimension_numbers<[2], [2], [1], [1], [0, 0, 0, 1, 1, 1], [0], [0]>} : vector<8x1x32xf32>, vector<8x8x32xf32>, vector<8x1x8xf32> -> vector<8x1x8xf32>
    "tpu.trace_stop"() : () -> ()
    %699 = vector.shape_cast %698 : vector<8x1x8xf32> to vector<8x8xf32>
    %cst_163 = arith.constant dense<0xFF800000> : vector<8xf32>
    %700 = vector.multi_reduction <maximumf>, %699, %cst_163 [1] : vector<8x8xf32> to vector<8xf32>
    %701 = vector.shape_cast %700 : vector<8xf32> to vector<8x1xf32>
    %702 = vector.broadcast %701 : vector<8x1xf32> to vector<8x8xf32>
    %703 = arith.subf %699, %702 : vector<8x8xf32>
    %704 = math.exp %703 : vector<8x8xf32>
    %cst_164 = arith.constant dense<0.000000e+00> : vector<8xf32>
    %705 = vector.multi_reduction <add>, %704, %cst_164 [1] : vector<8x8xf32> to vector<8xf32>
    %706 = vector.shape_cast %705 : vector<8xf32> to vector<8x1xf32>
    %707 = vector.broadcast %706 : vector<8x1xf32> to vector<8x8xf32>
    %708 = arith.divf %704, %707 : vector<8x8xf32>
    %709 = vector.shape_cast %708 : vector<8x8xf32> to vector<8x1x8xf32>
    "tpu.trace_start"() <{level = 10 : i32, message = "bqs,bsh->bqh"}> : () -> ()
    %cst_165 = arith.constant dense<0.000000e+00> : vector<8x1x32xf32>
    %710 = tpu.matmul %709, %280, %cst_165 {dimension_numbers = #tpu.dot_dimension_numbers<[2], [1], [1], [2], [0, 0, 0, 1, 1, 2], [0], [0]>} : vector<8x1x8xf32>, vector<8x8x32xf32>, vector<8x1x32xf32> -> vector<8x1x32xf32>
    "tpu.trace_stop"() : () -> ()
    %711 = vector.shape_cast %710 : vector<8x1x32xf32> to vector<8x32xf32>
    %712 = tpu.concatenate %696, %711 in 1 : vector<8x32xf32>, vector<8x32xf32> -> vector<8x64xf32>
    %cst_166 = arith.constant dense<0.000000e+00> : vector<8x16xf32>
    %713 = tpu.matmul %712, %10, %cst_166 {dimension_numbers = #tpu.dot_dimension_numbers<[1], [0], [0], [1], [0, 0, 1, 1], [], []>} : vector<8x64xf32>, vector<64x16xf32>, vector<8x16xf32> -> vector<8x16xf32>
    %714 = vector.broadcast %11 : vector<1x16xf32> to vector<8x16xf32>
    %715 = arith.addf %713, %714 : vector<8x16xf32>
    %716 = vector.shape_cast %337 : vector<8x16xf32> to vector<1x8x16xf32>
    %717 = vector.shape_cast %400 : vector<8x16xf32> to vector<1x8x16xf32>
    %718 = vector.shape_cast %463 : vector<8x16xf32> to vector<1x8x16xf32>
    %719 = vector.shape_cast %526 : vector<8x16xf32> to vector<1x8x16xf32>
    %720 = vector.shape_cast %589 : vector<8x16xf32> to vector<1x8x16xf32>
    %721 = vector.shape_cast %652 : vector<8x16xf32> to vector<1x8x16xf32>
    %722 = vector.shape_cast %715 : vector<8x16xf32> to vector<1x8x16xf32>
    %723 = tpu.concatenate %716, %717, %718, %719, %720, %721, %722 in 0 : vector<1x8x16xf32>, vector<1x8x16xf32>, vector<1x8x16xf32>, vector<1x8x16xf32>, vector<1x8x16xf32>, vector<1x8x16xf32>, vector<1x8x16xf32> -> vector<7x8x16xf32>
    %c0_167 = arith.constant 0 : index
    %c0_168 = arith.constant 0 : index
    %c0_169 = arith.constant 0 : index
    %724 = vector.load %arg14[%c0_167, %c0_168, %c0_169] : memref<7x8x16xf32, #tpu.memory_space<vmem>>, vector<7x8x16xf32>
    tpu.vector_store %arg14[%c0_167, %c0_168, %c0_169], %723 {strides = array<i32>} : memref<7x8x16xf32, #tpu.memory_space<vmem>>, vector<7x8x16xf32>,
    %725 = vector.shape_cast %330 : vector<8x8xf32> to vector<1x8x8xf32>
    %726 = vector.shape_cast %393 : vector<8x8xf32> to vector<1x8x8xf32>
    %727 = vector.shape_cast %456 : vector<8x8xf32> to vector<1x8x8xf32>
    %728 = vector.shape_cast %519 : vector<8x8xf32> to vector<1x8x8xf32>
    %729 = vector.shape_cast %582 : vector<8x8xf32> to vector<1x8x8xf32>
    %730 = vector.shape_cast %645 : vector<8x8xf32> to vector<1x8x8xf32>
    %731 = vector.shape_cast %708 : vector<8x8xf32> to vector<1x8x8xf32>
    %732 = tpu.concatenate %725, %726, %727, %728, %729, %730, %731 in 0 : vector<1x8x8xf32>, vector<1x8x8xf32>, vector<1x8x8xf32>, vector<1x8x8xf32>, vector<1x8x8xf32>, vector<1x8x8xf32>, vector<1x8x8xf32> -> vector<7x8x8xf32>
    %c0_170 = arith.constant 0 : index
    %c0_171 = arith.constant 0 : index
    %c0_172 = arith.constant 0 : index
    %733 = vector.load %arg15[%c0_170, %c0_171, %c0_172] : memref<7x8x8xf32, #tpu.memory_space<vmem>>, vector<7x8x8xf32>
    tpu.vector_store %arg15[%c0_170, %c0_171, %c0_172], %732 {strides = array<i32>} : memref<7x8x8xf32, #tpu.memory_space<vmem>>, vector<7x8x8xf32>,
    return
  }
  func.func @transform_0(%arg0: i32) -> (i32, i32) {
    %c0_i32 = arith.constant 0 : i32
    %c0_i32_0 = arith.constant 0 : i32
    %c0_i32_1 = arith.constant 0 : i32
    return %c0_i32, %c0_i32_0 : i32, i32
  }
  func.func @transform_1(%arg0: i32) -> (i32, i32) {
    %c0_i32 = arith.constant 0 : i32
    %c0_i32_0 = arith.constant 0 : i32
    %c0_i32_1 = arith.constant 0 : i32
    return %c0_i32, %c0_i32_0 : i32, i32
  }
  func.func @transform_2(%arg0: i32) -> (i32, i32) {
    %c0_i32 = arith.constant 0 : i32
    %c0_i32_0 = arith.constant 0 : i32
    %c0_i32_1 = arith.constant 0 : i32
    return %c0_i32, %c0_i32_0 : i32, i32
  }
  func.func @transform_3(%arg0: i32) -> (i32, i32) {
    %c0_i32 = arith.constant 0 : i32
    %c0_i32_0 = arith.constant 0 : i32
    %c0_i32_1 = arith.constant 0 : i32
    return %c0_i32, %c0_i32_0 : i32, i32
  }
  func.func @transform_4(%arg0: i32) -> (i32, i32) {
    %c0_i32 = arith.constant 0 : i32
    %c0_i32_0 = arith.constant 0 : i32
    %c0_i32_1 = arith.constant 0 : i32
    return %c0_i32, %c0_i32_0 : i32, i32
  }
  func.func @transform_5(%arg0: i32) -> (i32, i32) {
    %c0_i32 = arith.constant 0 : i32
    %c0_i32_0 = arith.constant 0 : i32
    %c0_i32_1 = arith.constant 0 : i32
    return %c0_i32, %c0_i32_0 : i32, i32
  }
  func.func @transform_6(%arg0: i32) -> (i32, i32) {
    %c0_i32 = arith.constant 0 : i32
    %c0_i32_0 = arith.constant 0 : i32
    %c0_i32_1 = arith.constant 0 : i32
    return %c0_i32, %c0_i32_0 : i32, i32
  }
  func.func @transform_7(%arg0: i32) -> (i32, i32) {
    %c0_i32 = arith.constant 0 : i32
    %c0_i32_0 = arith.constant 0 : i32
    %c0_i32_1 = arith.constant 0 : i32
    return %c0_i32, %c0_i32_0 : i32, i32
  }
  func.func @transform_8(%arg0: i32) -> (i32, i32) {
    %c0_i32 = arith.constant 0 : i32
    %c0_i32_0 = arith.constant 0 : i32
    %c0_i32_1 = arith.constant 0 : i32
    return %c0_i32, %c0_i32_0 : i32, i32
  }
  func.func @transform_9(%arg0: i32) -> (i32, i32) {
    %c0_i32 = arith.constant 0 : i32
    %c0_i32_0 = arith.constant 0 : i32
    %c0_i32_1 = arith.constant 0 : i32
    return %c0_i32, %c0_i32_0 : i32, i32
  }
  func.func @transform_10(%arg0: i32) -> (i32, i32) {
    %c0_i32 = arith.constant 0 : i32
    %c0_i32_0 = arith.constant 0 : i32
    %c0_i32_1 = arith.constant 0 : i32
    return %c0_i32, %c0_i32_0 : i32, i32
  }
  func.func @transform_11(%arg0: i32) -> (i32, i32) {
    %c0_i32 = arith.constant 0 : i32
    %c0_i32_0 = arith.constant 0 : i32
    %c0_i32_1 = arith.constant 0 : i32
    return %c0_i32, %c0_i32_0 : i32, i32
  }
  func.func @transform_12(%arg0: i32) -> (i32, i32) {
    %c0_i32 = arith.constant 0 : i32
    %c0_i32_0 = arith.constant 0 : i32
    %c0_i32_1 = arith.constant 0 : i32
    return %c0_i32, %c0_i32_0 : i32, i32
  }
  func.func @transform_13(%arg0: i32) -> (i32, i32, i32) {
    %c0_i32 = arith.constant 0 : i32
    %c0_i32_0 = arith.constant 0 : i32
    %c0_i32_1 = arith.constant 0 : i32
    %c0_i32_2 = arith.constant 0 : i32
    return %c0_i32, %c0_i32_0, %c0_i32_1 : i32, i32, i32
  }
  func.func @transform_14(%arg0: i32) -> (i32, i32, i32) {
    %c0_i32 = arith.constant 0 : i32
    %c0_i32_0 = arith.constant 0 : i32
    %c0_i32_1 = arith.constant 0 : i32
    %c0_i32_2 = arith.constant 0 : i32
    return %c0_i32, %c0_i32_0, %c0_i32_1 : i32, i32, i32
  }
}

</mosaic_0001>

<bundles_post_ra>
// kernel: tpu_custom_call.1
= control target key start
LH: loop header
LB: loop body
LE: loop exit
PB: predicated region body
PF: predicated region fallthrough
CT: control target
= control target key end

     0   :  { %20 = vsyncpa [#allocation4], 0  ;;  %s18597_s0 = inlined_call_operand.vmem [shape: s32[64,1], index: 0, kind: input, shape index: {}]   ;;  %s18598_s1 = inlined_call_operand.hbm [shape: f32[16,32], index: 1, kind: input, shape index: {}]   ;;  %s18599_s2 = inlined_call_operand.vmem [shape: f32[32,96], index: 2, kind: input, shape index: {}]   ;;  %s18600_s3 = inlined_call_operand.vmem [shape: f32[32,96], index: 3, kind: input, shape index: {}]   ;;  %s18601_s4 = inlined_call_operand.hbm [shape: f32[1,96], index: 4, kind: input, shape index: {}]   ;;  %s18602_s5 = inlined_call_operand.vmem [shape: f32[1,96], index: 5, kind: input, shape index: {}]   ;;  %s18603_s6 = inlined_call_operand.vmem [shape: f32[16,32], index: 6, kind: input, shape index: {}]   ;;  %s18604_s7 = inlined_call_operand.vmem [shape: f32[32,96], index: 7, kind: input, shape index: {}]   ;;  %s18605_s8 = inlined_call_operand.vmem [shape: f32[32,96], index: 8, kind: input, shape index: {}]   ;;  %s18606_s9 = inlined_call_operand.vmem [shape: f32[1,96], index: 9, kind: input, shape index: {}]   ;;  %s18607_s10 = inlined_call_operand.vmem [shape: f32[1,96], index: 10, kind: input, shape index: {}]   ;;  %s18608_s11 = inlined_call_operand.vmem [shape: f32[64,16], index: 11, kind: input, shape index: {}]   ;;  %s18609_s12 = inlined_call_operand.vmem [shape: f32[1,16], index: 12, kind: input, shape index: {}]   ;;  %s18610_s13 = inlined_call_operand.hbm [shape: f32[7,8,16], index: 13, kind: output, shape index: {0}]   ;;  %s18611_s14 = inlined_call_operand.hbm [shape: f32[7,8,8], index: 14, kind: output, shape index: {1}]  }
   0x1   :  { %21 = vsyncpa [#allocation7], 0 }
   0x2   :  { %22 = vsyncpa [#allocation5], 0 }
   0x3   :  { %23 = vsyncpa [#allocation10], 0  ;;  %s16390_s29 = smov [#allocation3]   ;;  %s16294_s17 = scalar_lea.hbm %s18598_s1, 256 }
   0x4   :  { %s31_s30 = sshll.u32 %s16390_s29, 4  ;;  %p16295_p0 = scmp.ne.s32.totalorder %s18598_s1, %s16294_s17  ;;  %s32_s30 = int_to_ptr.vmem [resolvable:$true] %s31_s30 }
   0x5   :  { %p16298_p1 = scmp.lt.u32.totalorder %s16294_s17, %s18598_s1 }
   0x7   :  { %p16300_p2 = pnand %p16298_p1, %p16295_p0 }
   0x9   :  { %16303 = shalt.err (!%p16300_p2)
}
   0xa   :  { %s16304_s22 = scalar_lea.vmem %s32_s30, 256  ;;  %p16309_p4 = scmp.lt.s32.totalorder %s32_s30, %s32_s30 }
   0xb   :  { %p16305_p3 = scmp.ne.s32.totalorder %s32_s30, %s16304_s22  ;;  %p16310_p5 = scmp.lt.s32.totalorder %s16304_s22, %s16304_s22 }
   0xd   :  { %p16311_p6 = por %p16310_p5, %p16309_p4 }
   0xf   :  { %p16312_p7 = pnand %p16311_p6, %p16305_p3 }
  0x11   :  { %16315 = shalt.err (!%p16312_p7)
}
  0x12   :  { %s16391_s23 = smov 128   ;;  %s16392_s24 = smov 8  }
  0x13   :  { %37 = dma.hbm_to_vmem [thread:$0]  %s18598_s1, 256, %s32_s30, [#allocation4], %s16391_s23, %s16391_s23, %s16392_s24  }
  0x14   :  { %s16393_s27 = smov [#allocation6]   ;;  %s16316_s16 = scalar_lea.hbm %s18601_s4, 16 }
  0x15   :  { %s48_s28 = sshll.u32 %s16393_s27, 4  ;;  %p16317_p8 = scmp.ne.s32.totalorder %s18601_s4, %s16316_s16  ;;  %s49_s28 = int_to_ptr.vmem [resolvable:$true] %s48_s28 }
  0x16   :  { %p16320_p9 = scmp.lt.u32.totalorder %s16316_s16, %s18601_s4 }
  0x18   :  { %p16322_p10 = pnand %p16320_p9, %p16317_p8 }
  0x1a   :  { %16325 = shalt.err (!%p16322_p10)
}
  0x1b   :  { %s16326_s21 = scalar_lea.vmem %s49_s28, 16  ;;  %s16330_s1 = scalar_lea.vmem %s49_s28, 32 }
  0x1c   :  { %p16327_p11 = scmp.ne.s32.totalorder %s49_s28, %s16326_s21  ;;  %p16331_p12 = scmp.lt.s32.totalorder %s49_s28, %s49_s28 }
  0x1d   :  { %p16332_p13 = scmp.lt.s32.totalorder %s16330_s1, %s16326_s21 }
  0x1f   :  { %p16333_p0 = por %p16332_p13, %p16331_p12 }
  0x21   :  { %p16334_p1 = pnand %p16333_p0, %p16327_p11 }
  0x23   :  { %16337 = shalt.err (!%p16334_p1)
}
  0x24   :  { %51 = dma.hbm_to_vmem [thread:$0]  %s18601_s4, 16, %s49_s28, [#allocation7]  }
  0x25   :  { %16382 = dma.done.wait [#allocation4], 256  }
  0x26   :  { %16383 = vsyncadd [#allocation4], 4294967040 }
  0x27   :  { %16384 = dma.done.wait [#allocation7], 16  }
  0x28   :  { %16385 = vsyncadd [#allocation7], 4294967280  ;;  %v16394_v0 = vmov 0   ;;  %vm107_vm0 = vcmask 261120   ;;  %v76_v1 = vld [vmem:[%s18599_s2] sm:$0xff]  ;;  %v77_v2 = vld [vmem:[%s18599_s2 + $0x8] sm:$0xff]  ;;  %v278_v27 = vlaneseq }
  0x29   :  { %15944 = vset.pattern.permute.xlu0 %v16394_v0  ;;  %15945 = vset.pattern.permute.xlu1 %v16394_v0  ;;  %v78_v3 = vld [vmem:[%s18599_s2 + $0x10] sm:$0xff]  ;;  %v15715_v4 = vpack.c.bf16 %v77_v2, %v76_v1  ;;  %v79_v5 = vld [vmem:[%s18599_s2 + $0x18] sm:$0xff]  ;;  %v74_v6 = vld [vmem:[#allocation3] sm:$0xff]  ;;  %v16395_v22 = vmov 0.0|0.0   ;;  %vm16396_vm1 = vmmov 0   ;;  %v16397_v26 = vmov 0.0  }
  0x2a   :  { %v15719_v7 = vpack.c.bf16 %v79_v5, %v78_v3  ;;  %14778 = vmatprep.mubr.msk.f32.mxu1 %vm107_vm0, %v74_v6  ;;  %v270_v8 = vld [vmem:[%s18597_s0] sm:$0xff]  ;;  %v89_v10 = vld [vmem:[%s18604_s7 + $0x8] sm:$0xff]  ;;  %v90_v13 = vld [vmem:[%s18604_s7 + $0x10] sm:$0xff]  ;;  %v16577_v28 = vand.u32 127, %v278_v27  ;;  %vm334_vm2 = vcmask 130048   ;;  %s16398_s2 = smov 64  }
  0x2b   :  { %v88_v9 = vld [vmem:[%s18604_s7] sm:$0xff]  ;;  %15716 = vmatprep.subr.bf16.mxu1 %v15715_v4  ;;  %281 = vperm.xlu0 %15944, %v270_v8   ;;  %v271_v11 = vld [vmem:[%s18597_s0 + $0x8] sm:$0xff]  ;;  %v91_v14 = vld [vmem:[%s18604_s7 + $0x18] sm:$0xff]  ;;  %vm675_vm12 = vcmask 253952   ;;  %vm3085_vm13 = vcmask 1041409   ;;  %vm3088_vm14 = vcmask 1042434  }
  0x2c   :  { %15718 = vmatpush3.bf16.msra.mxu1 %v15715_v4  ;;  %v15723_v12 = vpack.c.bf16 %v89_v10, %v88_v9  ;;  %v75_v15 = vld [vmem:[#allocation3 + $0x8] sm:$0xff]  ;;  %v15727_v16 = vpack.c.bf16 %v91_v14, %v90_v13  ;;  %v86_v17 = vld [vmem:[%s18603_s6] sm:$0xff]  ;;  %v82_v23 = vld [vmem:[%s18600_s3 + $0x10] sm:$0xff]  ;;  %vm2190_vm11 = vcmp.eq.s32.totalorder %v16577_v28, 1  ;;  %vm3091_vm15 = vcmask 1043459  }
  0x2d   :  { %15720 = vmatprep.subr.bf16.mxu1 %v15719_v7  ;;  %v80_v18 = vld [vmem:[%s18600_s3] sm:$0xff]  ;;  %v81_v19 = vld [vmem:[%s18600_s3 + $0x8] sm:$0xff]  ;;  %v83_v24 = vld [vmem:[%s18600_s3 + $0x18] sm:$0xff] }
  0x2e   :  { %v87_v20 = vld [vmem:[%s18603_s6 + $0x8] sm:$0xff]  ;;  %v16551_v21 = vpack.c.bf16 %v81_v19, %v80_v18  ;;  %v16562_v25 = vpack.c.bf16 %v83_v24, %v82_v23  ;;  %v16594_v39 = vld [vmem:[%s18602_s5] ss:$0 sm:$0xff]  ;;  %v16599_v43 = vld [vmem:[#allocation6] ss:$0 sm:$0xff]  ;;  %s16399_s5 = smov 96  }
  0x2f   :  { %284 = vperm.xlu0 %15944, %v271_v11   ;;  %v272_v10 = vld [vmem:[%s18597_s0 + $0x10] sm:$0xff]  ;;  %v274_v11 = vld [vmem:[%s18597_s0 + $0x20] sm:$0xff]  ;;  %v275_v18 = vld [vmem:[%s18597_s0 + $0x28] sm:$0xff] }
  0x30   :  { %15722 = vmatpush3.bf16.msra.mxu1 %v15719_v7 }
  0x31   :  { %15724 = vmatprep.subr.bf16.mxu1 %v15723_v12 }
  0x33   :  { %14779 = vmatmul.mubr.msk.f32.vlgmr.msra.gmra.mrb[0].mxu1 %vm107_vm0, %v75_v15 }
  0x34   :  { %15726 = vmatpush3.bf16.msra.mxu1 %v15723_v12  ;;  %14789 = vmatprep.mubr.msk.f32.mxu1 %vm107_vm0, %v86_v17  ;;  %v276_v12 = vld [vmem:[%s18597_s0 + $0x30] sm:$0xff] }
  0x35   :  { %15728 = vmatprep.subr.bf16.mxu1 %v15727_v16 }
  0x38   :  { %15730 = vmatpush3.bf16.msra.mxu1 %v15727_v16  ;;  %v273_v16 = vld [vmem:[%s18597_s0 + $0x18] sm:$0xff] }
  0x39   :  { %15735 = vmatprep.subr.bf16.mxu1 %v16395_v22 }
  0x3b   :  { %14790 = vmatmul.mubr.msk.f32.vlgmr.msra.gmra.mrb[2].mxu1 %vm107_vm0, %v87_v20  ;;  %v277_v20 = vld [vmem:[%s18597_s0 + $0x38] sm:$0xff] }
  0x3c   :  { %15737 = vmatpush3.bf16.msra.mxu1 %v16551_v21  ;;  %14816 = vmatprep.mubr.msk.f32.mxu1 %vm16396_vm1, %v16397_v26 }
  0x3d   :  { %15738 = vmatprep.subr.bf16.mxu1 %v16395_v22 }
  0x40   :  { %15740 = vmatpush3.bf16.msra.mxu1 %v16562_v25 }
  0x41   :  { %15741 = vmatprep.subr.bf16.mxu1 %v16395_v22 }
  0x43   :  { %14817 = vmatmul.mubr.f32.vlgmr.msra.gmra.mrb[4].mxu1 %v16397_v26 }
  0x44   :  { %15743 = vmatpush3.bf16.msra.mxu1 %v16551_v21  ;;  %14827 = vmatprep.mubr.msk.f32.mxu1 %vm16396_vm1, %v16397_v26 }
  0x45   :  { %15744 = vmatprep.subr.bf16.mxu1 %v16395_v22 }
  0x48   :  { %15746 = vmatpush3.bf16.msra.mxu1 %v16562_v25 }
  0x49   :  { %15753 = vmatprep.subr.bf16.mxu1 %v16395_v22 }
  0xaa   :  { %v282_v29 = vpop.permute.xlu0 %281 }
  0xab   :  { %vm304_vm3 = vcmp.eq.s32.totalorder %v16577_v28, %v282_v29 }
  0xac   :  { %v14126_v30 = vsel %vm304_vm3, 1.0, %v16397_v26  ;;  %vm3094_vm3 = vcmask 1044484  }
  0xad   :  { %14796 = vmatprep.mubr.msk.f32.mxu0 %vm334_vm2, %v14126_v30 }
  0xae   :  { %v285_v32 = vpop.permute.xlu0 %284 }
  0xaf   :  { %vm305_vm4 = vcmp.eq.s32.totalorder %v16577_v28, %v285_v32 }
  0xb0   :  { %v14127_v35 = vsel %vm305_vm4, 1.0, %v16397_v26  ;;  %vm3097_vm4 = vcmask 1045509  }
 0x106   :  { %v14780_v31 = vpop.f32.mrb[0].mxu1 }
 0x107   :  { %v180_v33 = vpop.f32.mrb[1].mxu1 }
 0x108   :  { %v15731_v34 = vpack.c.bf16 %v14780_v31, %v180_v33 }
 0x10a   :  { %15732 = vmatprep.subr.bf16.mxu0 %v15731_v34 }
 0x10b   :  { %15734 = vmatpush3.bf16.msra.mxu0 %v15731_v34 }
 0x10c   :  { %15747 = vmatprep.subr.bf16.mxu0 %v16395_v22 }
 0x10e   :  { %14797 = vmatmul.mubr.msk.f32.vlgmr.msra.gmra.mrb[0].mxu0 %vm334_vm2, %v14127_v35  ;;  %v14791_v36 = vpop.f32.mrb[2].mxu1 }
 0x10f   :  { %v261_v37 = vpop.f32.mrb[3].mxu1  ;;  %15749 = vmatpush3.bf16.msra.mxu0 %v16551_v21 }
 0x110   :  { %v16587_v38 = vpack.c.bf16 %v14791_v36, %v261_v37  ;;  %15750 = vmatprep.subr.bf16.mxu0 %v16395_v22 }
 0x113   :  { %15752 = vmatpush3.bf16.msra.mxu0 %v16562_v25 }
 0x114   :  { %15759 = vmatprep.subr.bf16.mxu0 %v16395_v22 }
 0x116   :  { %v539_v40 = vpop.f32.mrb[4].mxu1 }
 0x117   :  { %v540_v41 = vadd.f32 %v16594_v39, %v539_v40  ;;  %v14818_v42 = vpop.f32.mrb[5].mxu1 }
 0x119   :  { %551 = vrot.lane.b32.xlu1 %v540_v41, %s16398_s2 }
 0x18b   :  { %v552_v51 = vpop.permute.xlu1 %551 }
 0x1e1   :  { %v14798_v44 = vpop.f32.mrb[0].mxu0 }
 0x1e2   :  { %v425_v45 = vpop.f32.mrb[1].mxu0  ;;  %v431_v2 = vadd.f32 %v14798_v44, %v16599_v43 }
 0x1e3   :  { %v426_v46 = vadd.f32 %v16599_v43, %v425_v45 }
 0x1e5   :  { %v543_v47 = vadd.f32 %v540_v41, %v426_v46 }
 0x1e7   :  { %v14144_v48 = vmul.f32 -1.442695, %v543_v47 }
 0x1e9   :  { %15946 = vpow2.f32 %v14144_v48 }
 0x1f3   :  { %v15947_v49 = vpop.eup %15946 }
 0x1f4   :  { %v547_v50 = vadd.f32 1.0, %v15947_v49 }
 0x1f6   :  { %15948 = vrcp.f32 %v547_v50 }
 0x200   :  { %v15949_v52 = vpop.eup %15948 }
 0x201   :  { %v554_v53 = vmul.f32 %v15949_v52, %v552_v51  ;;  %v561_v57 = vsub.f32 1.0, %v15949_v52  ;;  %v567_v59 = vmul.f32 0.0, %v15949_v52 }
 0x203   :  { %556 = vrot.lane.b32.xlu1 %v554_v53, %s16398_s2 }
 0x275   :  { %v557_v54 = vpop.permute.xlu1 %556 }
 0x276   :  { %v559_v55 = vadd.f32 %v557_v54, %v426_v46 }
 0x278   :  { %15950 = vtanh.f32 %v559_v55 }
 0x282   :  { %v15951_v56 = vpop.eup %15950 }
 0x283   :  { %563 = vrot.lane.b32.xlu0 %v15951_v56, %s16399_s5 }
 0x2f5   :  { %v564_v58 = vpop.permute.xlu0 %563 }
 0x2f6   :  { %v566_v60 = vmul.f32 %v564_v58, %v561_v57 }
 0x2f8   :  { %v16604_v61 = vadd.f32 %v567_v59, %v566_v60 }
 0x2fa   :  { %684 = vrot.lane.b32.xlu1 %v16604_v61, %s16399_s5 }
 0x36c   :  { %v685_v62 = vpop.permute.xlu1 %684 }
 0x36d   :  { %14828 = vmatmul.mubr.msk.f32.vlgmr.msra.gmra.mrb[6].mxu1 %vm107_vm0, %v685_v62 }
 0x36e   :  { %15755 = vmatpush3.bf16.msra.mxu1 %v16551_v21  ;;  %14849 = vmatprep.mubr.msk.f32.mxu1 %vm16396_vm1, %v16397_v26 }
 0x36f   :  { %15756 = vmatprep.subr.bf16.mxu1 %v16395_v22 }
 0x372   :  { %15758 = vmatpush3.bf16.msra.mxu1 %v16562_v25 }
 0x373   :  { %15765 = vmatprep.subr.bf16.mxu1 %v16395_v22 }
 0x440   :  { %v754_v63 = vpop.f32.mrb[6].mxu1 }
 0x441   :  { %v755_v0 = vadd.f32 %v16594_v39, %v754_v63  ;;  %v14829_v1 = vpop.f32.mrb[7].mxu1 }
 0x443   :  { %766 = vrot.lane.b32.xlu0 %v755_v0, %s16398_s2  ;;  %v758_v3 = vadd.f32 %v755_v0, %v431_v2 }
 0x445   :  { %v14146_v4 = vmul.f32 -1.442695, %v758_v3 }
 0x447   :  { %15952 = vpow2.f32 %v14146_v4 }
 0x451   :  { %v15953_v5 = vpop.eup %15952 }
 0x452   :  { %v762_v6 = vadd.f32 1.0, %v15953_v5 }
 0x454   :  { %15954 = vrcp.f32 %v762_v6 }
 0x45e   :  { %v15955_v7 = vpop.eup %15954 }
 0x45f   :  { %v776_v23 = vsub.f32 1.0, %v15955_v7  ;;  %v782_v29 = vmul.f32 %v15955_v7, %v16604_v61 }
 0x4b5   :  { %v767_v8 = vpop.permute.xlu0 %766 }
 0x4b6   :  { %v769_v9 = vmul.f32 %v15955_v7, %v767_v8 }
 0x4b8   :  { %771 = vrot.lane.b32.xlu1 %v769_v9, %s16398_s2 }
 0x4bc   :  { %287 = vperm.xlu1 %15945, %v272_v10  }
 0x4c0   :  { %293 = vperm.xlu1 %15945, %v274_v11  }
 0x4c4   :  { %299 = vperm.xlu1 %15945, %v276_v12  }
 0x52a   :  { %v772_v13 = vpop.permute.xlu1 %771 }
 0x52b   :  { %v774_v14 = vadd.f32 %v772_v13, %v431_v2 }
 0x52d   :  { %15956 = vtanh.f32 %v774_v14 }
 0x537   :  { %v15957_v15 = vpop.eup %15956 }
 0x538   :  { %778 = vrot.lane.b32.xlu0 %v15957_v15, %s16399_s5 }
 0x53b   :  { %v288_v17 = vpop.permute.xlu1 %287 }
 0x53c   :  { %290 = vperm.xlu0 %15944, %v273_v16   ;;  %vm306_vm5 = vcmp.eq.s32.totalorder %v16577_v28, %v288_v17 }
 0x53d   :  { %v14128_v19 = vsel %vm306_vm5, 1.0, %v16397_v26  ;;  %vm3100_vm5 = vcmask 1046534  }
 0x53e   :  { %14799 = vmatprep.mubr.msk.f32.mxu0 %vm334_vm2, %v14128_v19 }
 0x53f   :  { %v294_v32 = vpop.permute.xlu1 %293 }
 0x540   :  { %296 = vperm.xlu0 %15944, %v275_v18   ;;  %vm308_vm6 = vcmp.eq.s32.totalorder %v16577_v28, %v294_v32 }
 0x541   :  { %v14130_v35 = vsel %vm308_vm6, 1.0, %v16397_v26  ;;  %vm3103_vm6 = vcmask 1047559  }
 0x543   :  { %v300_v33 = vpop.permute.xlu1 %299 }
 0x544   :  { %302 = vperm.xlu0 %15944, %v277_v20   ;;  %vm310_vm8 = vcmp.eq.s32.totalorder %v16577_v28, %v300_v33 }
 0x545   :  { %v14132_v40 = vsel %vm310_vm8, 1.0, %v16397_v26  ;;  %vm3827_vm8 = vcmask 523264  }
 0x5aa   :  { %v779_v24 = vpop.permute.xlu0 %778 }
 0x5ab   :  { %v781_v30 = vmul.f32 %v779_v24, %v776_v23 }
 0x5ad   :  { %v16642_v31 = vadd.f32 %v782_v29, %v781_v30 }
 0x5af   :  { %898 = vrot.lane.b32.xlu1 %v16642_v31, %s16399_s5 }
 0x5bb   :  { %v291_v34 = vpop.permute.xlu0 %290 }
 0x5bc   :  { %vm307_vm7 = vcmp.eq.s32.totalorder %v16577_v28, %v291_v34 }
 0x5bd   :  { %v14129_v36 = vsel %vm307_vm7, 1.0, %v16397_v26  ;;  %vm3106_vm7 = vcmask 64512  }
 0x5be   :  { %14800 = vmatmul.mubr.msk.f32.gmra.mrb[2].mxu0 %vm334_vm2, %v14129_v36 }
 0x5bf   :  { %v297_v37 = vpop.permute.xlu0 %296  ;;  %14802 = vmatprep.mubr.msk.f32.mxu0 %vm334_vm2, %v14130_v35 }
 0x5c0   :  { %vm309_vm9 = vcmp.eq.s32.totalorder %v16577_v28, %v297_v37 }
 0x5c1   :  { %v14131_v41 = vsel %vm309_vm9, 1.0, %v16397_v26 }
 0x5c2   :  { %14803 = vmatmul.mubr.msk.f32.gmra.mrb[4].mxu0 %vm334_vm2, %v14131_v41 }
 0x5c3   :  { %v303_v42 = vpop.permute.xlu0 %302  ;;  %14805 = vmatprep.mubr.msk.f32.mxu0 %vm334_vm2, %v14132_v40 }
 0x5c4   :  { %vm311_vm10 = vcmp.eq.s32.totalorder %v16577_v28, %v303_v42 }
 0x5c5   :  { %v14133_v44 = vsel %vm311_vm10, 1.0, %v16397_v26 }
 0x5c6   :  { %14806 = vmatmul.mubr.msk.f32.gmra.mrb[6].mxu0 %vm334_vm2, %v14133_v44 }
 0x5c7   :  { %14838 = vmatprep.mubr.msk.f32.mxu0 %vm16396_vm1, %v16397_v26 }
 0x621   :  { %v899_v45 = vpop.permute.xlu1 %898 }
 0x622   :  { %14839 = vmatmul.mubr.msk.f32.vlgmr.msra.gmra.mrb[8].mxu0 %vm107_vm0, %v899_v45 }
 0x623   :  { %15761 = vmatpush3.bf16.msra.mxu0 %v16551_v21  ;;  %14860 = vmatprep.mubr.msk.f32.mxu0 %vm16396_vm1, %v16397_v26 }
 0x624   :  { %15762 = vmatprep.subr.bf16.mxu0 %v16395_v22 }
 0x627   :  { %15764 = vmatpush3.bf16.msra.mxu0 %v16562_v25 }
 0x628   :  { %15771 = vmatprep.subr.bf16.mxu0 %v16395_v22 }
 0x691   :  { %v14801_v46 = vpop.f32.mrb[2].mxu0 }
 0x692   :  { %v435_v47 = vpop.f32.mrb[3].mxu0  ;;  %v441_v12 = vadd.f32 %v14801_v46, %v16599_v43 }
 0x693   :  { %v436_v55 = vadd.f32 %v16599_v43, %v435_v47 }
 0x695   :  { %v16670_v48 = vpop.f32.mrb[4].mxu0 }
 0x696   :  { %v16672_v49 = vpop.f32.mrb[5].mxu0 }
 0x697   :  { %v446_v41 = vadd.f32 %v16599_v43, %v16672_v49 }
 0x699   :  { %v16674_v50 = vpop.f32.mrb[6].mxu0 }
 0x69a   :  { %v16676_v51 = vpop.f32.mrb[7].mxu0 }
 0x6f5   :  { %v968_v52 = vpop.f32.mrb[8].mxu0 }
 0x6f6   :  { %v969_v53 = vadd.f32 %v16594_v39, %v968_v52  ;;  %v14840_v54 = vpop.f32.mrb[9].mxu0 }
 0x6f8   :  { %980 = vrot.lane.b32.xlu0 %v969_v53, %s16398_s2  ;;  %v972_v56 = vadd.f32 %v969_v53, %v436_v55 }
 0x6fa   :  { %v14148_v57 = vmul.f32 -1.442695, %v972_v56 }
 0x6fc   :  { %15958 = vpow2.f32 %v14148_v57 }
 0x706   :  { %v15959_v58 = vpop.eup %15958 }
 0x707   :  { %v976_v59 = vadd.f32 1.0, %v15959_v58 }
 0x709   :  { %15960 = vrcp.f32 %v976_v59 }
 0x713   :  { %v15961_v60 = vpop.eup %15960 }
 0x714   :  { %v990_v3 = vsub.f32 1.0, %v15961_v60  ;;  %v996_v5 = vmul.f32 %v15961_v60, %v16642_v31 }
 0x76a   :  { %v981_v62 = vpop.permute.xlu0 %980 }
 0x76b   :  { %v983_v63 = vmul.f32 %v15961_v60, %v981_v62 }
 0x76d   :  { %985 = vrot.lane.b32.xlu1 %v983_v63, %s16398_s2 }
 0x7df   :  { %v986_v0 = vpop.permute.xlu1 %985 }
 0x7e0   :  { %v988_v1 = vadd.f32 %v986_v0, %v436_v55 }
 0x7e2   :  { %15962 = vtanh.f32 %v988_v1 }
 0x7ec   :  { %v15963_v2 = vpop.eup %15962 }
 0x7ed   :  { %992 = vrot.lane.b32.xlu0 %v15963_v2, %s16399_s5  ;;  %v451_v2 = vadd.f32 %v16670_v48, %v16599_v43 }
 0x85f   :  { %v993_v4 = vpop.permute.xlu0 %992 }
 0x860   :  { %v995_v6 = vmul.f32 %v993_v4, %v990_v3 }
 0x862   :  { %v16684_v7 = vadd.f32 %v996_v5, %v995_v6 }
 0x864   :  { %1112 = vrot.lane.b32.xlu1 %v16684_v7, %s16399_s5 }
 0x8d6   :  { %v1113_v8 = vpop.permute.xlu1 %1112 }
 0x8d7   :  { %14850 = vmatmul.mubr.msk.f32.vlgmr.msra.gmra.mrb[8].mxu1 %vm107_vm0, %v1113_v8 }
 0x8d8   :  { %15767 = vmatpush3.bf16.msra.mxu1 %v16551_v21  ;;  %14871 = vmatprep.mubr.msk.f32.mxu1 %vm16396_vm1, %v16397_v26 }
 0x8d9   :  { %15768 = vmatprep.subr.bf16.mxu1 %v16395_v22 }
 0x8dc   :  { %15770 = vmatpush3.bf16.msra.mxu1 %v16562_v25 }
 0x8dd   :  { %15777 = vmatprep.subr.bf16.mxu1 %v16395_v22 }
 0x9aa   :  { %v1182_v9 = vpop.f32.mrb[8].mxu1 }
 0x9ab   :  { %v1183_v10 = vadd.f32 %v16594_v39, %v1182_v9  ;;  %v14851_v11 = vpop.f32.mrb[9].mxu1 }
 0x9ad   :  { %1194 = vrot.lane.b32.xlu0 %v1183_v10, %s16398_s2  ;;  %v1186_v13 = vadd.f32 %v1183_v10, %v441_v12 }
 0x9af   :  { %v14150_v14 = vmul.f32 -1.442695, %v1186_v13 }
 0x9b1   :  { %15964 = vpow2.f32 %v14150_v14 }
 0x9bb   :  { %v15965_v15 = vpop.eup %15964 }
 0x9bc   :  { %v1190_v16 = vadd.f32 1.0, %v15965_v15 }
 0x9be   :  { %15966 = vrcp.f32 %v1190_v16 }
 0x9c8   :  { %v15967_v17 = vpop.eup %15966 }
 0x9c9   :  { %v1204_v29 = vsub.f32 1.0, %v15967_v17  ;;  %v1210_v32 = vmul.f32 %v15967_v17, %v16684_v7 }
 0xa1f   :  { %v1195_v18 = vpop.permute.xlu0 %1194 }
 0xa20   :  { %v1197_v19 = vmul.f32 %v15967_v17, %v1195_v18 }
 0xa22   :  { %1199 = vrot.lane.b32.xlu1 %v1197_v19, %s16398_s2 }
 0xa94   :  { %v1200_v20 = vpop.permute.xlu1 %1199 }
 0xa95   :  { %v1202_v23 = vadd.f32 %v1200_v20, %v441_v12  ;;  %v456_v20 = vadd.f32 %v16599_v43, %v16676_v51 }
 0xa97   :  { %15968 = vtanh.f32 %v1202_v23 }
 0xaa1   :  { %v15969_v24 = vpop.eup %15968 }
 0xaa2   :  { %1206 = vrot.lane.b32.xlu0 %v15969_v24, %s16399_s5 }
 0xb14   :  { %v1207_v30 = vpop.permute.xlu0 %1206 }
 0xb15   :  { %v1209_v33 = vmul.f32 %v1207_v30, %v1204_v29 }
 0xb17   :  { %v16701_v34 = vadd.f32 %v1210_v32, %v1209_v33 }
 0xb19   :  { %1326 = vrot.lane.b32.xlu1 %v16701_v34, %s16399_s5 }
 0xb8b   :  { %v1327_v35 = vpop.permute.xlu1 %1326 }
 0xb8c   :  { %14861 = vmatmul.mubr.msk.f32.vlgmr.msra.gmra.mrb[10].mxu0 %vm107_vm0, %v1327_v35 }
 0xb8d   :  { %15773 = vmatpush3.bf16.msra.mxu0 %v16551_v21  ;;  %14882 = vmatprep.mubr.msk.f32.mxu0 %vm16396_vm1, %v16397_v26 }
 0xb8e   :  { %15774 = vmatprep.subr.bf16.mxu0 %v16395_v22 }
 0xb91   :  { %15776 = vmatpush3.bf16.msra.mxu0 %v16562_v25 }
 0xb92   :  { %15783 = vmatprep.subr.bf16.mxu0 %v16395_v22 }
 0xc5f   :  { %v1396_v36 = vpop.f32.mrb[10].mxu0 }
 0xc60   :  { %v1397_v37 = vadd.f32 %v16594_v39, %v1396_v36  ;;  %v14862_v40 = vpop.f32.mrb[11].mxu0 }
 0xc62   :  { %1408 = vrot.lane.b32.xlu0 %v1397_v37, %s16398_s2  ;;  %v1400_v42 = vadd.f32 %v1397_v37, %v446_v41 }
 0xc64   :  { %v14152_v44 = vmul.f32 -1.442695, %v1400_v42 }
 0xc66   :  { %15970 = vpow2.f32 %v14152_v44 }
 0xc70   :  { %v15971_v45 = vpop.eup %15970 }
 0xc71   :  { %v1404_v46 = vadd.f32 1.0, %v15971_v45 }
 0xc73   :  { %15972 = vrcp.f32 %v1404_v46 }
 0xc7d   :  { %v15973_v47 = vpop.eup %15972 }
 0xc7e   :  { %v1418_v57 = vsub.f32 1.0, %v15973_v47  ;;  %v1424_v49 = vmul.f32 %v15973_v47, %v16701_v34 }
 0xcd4   :  { %v1409_v52 = vpop.permute.xlu0 %1408 }
 0xcd5   :  { %v1411_v53 = vmul.f32 %v15973_v47, %v1409_v52 }
 0xcd7   :  { %1413 = vrot.lane.b32.xlu1 %v1411_v53, %s16398_s2 }
 0xd49   :  { %v1414_v54 = vpop.permute.xlu1 %1413 }
 0xd4a   :  { %v1416_v55 = vadd.f32 %v1414_v54, %v446_v41  ;;  %v461_v54 = vadd.f32 %v16674_v50, %v16599_v43  ;;  %v93_v43 = vld [vmem:[%s18605_s8 + $0x8] sm:$0xff]  ;;  %v94_v50 = vld [vmem:[%s18605_s8 + $0x10] sm:$0xff] }
 0xd4c   :  { %15974 = vtanh.f32 %v1416_v55 }
 0xd56   :  { %v15975_v56 = vpop.eup %15974 }
 0xd57   :  { %1420 = vrot.lane.b32.xlu0 %v15975_v56, %s16399_s5 }
 0xdc9   :  { %v1421_v58 = vpop.permute.xlu0 %1420 }
 0xdca   :  { %v1423_v59 = vmul.f32 %v1421_v58, %v1418_v57 }
 0xdcc   :  { %v16719_v60 = vadd.f32 %v1424_v49, %v1423_v59 }
 0xdce   :  { %1540 = vrot.lane.b32.xlu1 %v16719_v60, %s16399_s5 }
 0xe40   :  { %v1541_v62 = vpop.permute.xlu1 %1540 }
 0xe41   :  { %14872 = vmatmul.mubr.msk.f32.vlgmr.msra.gmra.mrb[10].mxu1 %vm107_vm0, %v1541_v62 }
 0xe42   :  { %15779 = vmatpush3.bf16.msra.mxu1 %v16551_v21  ;;  %14893 = vmatprep.mubr.msk.f32.mxu1 %vm16396_vm1, %v16397_v26 }
 0xe43   :  { %15780 = vmatprep.subr.bf16.mxu1 %v16395_v22 }
 0xe46   :  { %15782 = vmatpush3.bf16.msra.mxu1 %v16562_v25 }
 0xe47   :  { %14914 = vmatprep.subr.mxu1 %v16397_v26 }
 0xf14   :  { %v1610_v63 = vpop.f32.mrb[10].mxu1 }
 0xf15   :  { %v1611_v0 = vadd.f32 %v16594_v39, %v1610_v63  ;;  %v14873_v1 = vpop.f32.mrb[11].mxu1 }
 0xf16   :  { %v14159_v1 = vsel %vm2190_vm11, 1.0, %v16397_v26 }
 0xf17   :  { %1622 = vrot.lane.b32.xlu0 %v1611_v0, %s16398_s2  ;;  %v1614_v3 = vadd.f32 %v1611_v0, %v451_v2 }
 0xf19   :  { %v14154_v21 = vmul.f32 -1.442695, %v1614_v3  ;;  %v95_v3 = vld [vmem:[%s18605_s8 + $0x18] sm:$0xff] }
 0xf1b   :  { %15976 = vpow2.f32 %v14154_v21  ;;  %v16783_v21 = vpack.c.bf16 %v95_v3, %v94_v50 }
 0xf25   :  { %v15977_v4 = vpop.eup %15976 }
 0xf26   :  { %v1618_v5 = vadd.f32 1.0, %v15977_v4 }
 0xf28   :  { %15978 = vrcp.f32 %v1618_v5 }
 0xf32   :  { %v15979_v6 = vpop.eup %15978 }
 0xf33   :  { %v1632_v12 = vsub.f32 1.0, %v15979_v6  ;;  %v1638_v48 = vmul.f32 %v15979_v6, %v16719_v60 }
 0xf89   :  { %v1623_v8 = vpop.permute.xlu0 %1622 }
 0xf8a   :  { %v1625_v25 = vmul.f32 %v15979_v6, %v1623_v8 }
 0xf8c   :  { %1627 = vrot.lane.b32.xlu1 %v1625_v25, %s16398_s2 }
 0xffe   :  { %v1628_v9 = vpop.permute.xlu1 %1627 }
 0xfff   :  { %v1630_v10 = vadd.f32 %v1628_v9, %v451_v2 }
0x1001   :  { %15980 = vtanh.f32 %v1630_v10 }
0x100b   :  { %v15981_v11 = vpop.eup %15980 }
0x100c   :  { %1634 = vrot.lane.b32.xlu0 %v15981_v11, %s16399_s5 }
0x107e   :  { %v1635_v13 = vpop.permute.xlu0 %1634 }
0x107f   :  { %v1637_v14 = vmul.f32 %v1635_v13, %v1632_v12  ;;  %v16400_v13 = vmov 1966171168  }
0x1081   :  { %v16737_v15 = vadd.f32 %v1638_v48, %v1637_v14  ;;  %v572_v48 = vunpack.c.l.s4 %v16400_v13 }
0x1083   :  { %1754 = vrot.lane.b32.xlu1 %v16737_v15, %s16399_s5  ;;  %v573_v14 = vunpack.c.0.s8 %v572_v48 }
0x10f5   :  { %v1755_v16 = vpop.permute.xlu1 %1754 }
0x10f6   :  { %14883 = vmatmul.mubr.msk.f32.vlgmr.msra.gmra.mrb[12].mxu0 %vm107_vm0, %v1755_v16  ;;  %v575_v16 = vshrl.u32 %v278_v27, 7 }
0x10f7   :  { %15785 = vmatpush3.bf16.msra.mxu0 %v16587_v38  ;;  %14900 = vmatprep.mubr.msk.f32.mxu0 %vm16396_vm1, %v16397_v26 }
0x10f8   :  { %15786 = vmatprep.subr.bf16.mxu0 %v16395_v22 }
0x10fa   :  { %14901 = vmatmul.mubr.msk.f32.vlgmr.msra.gmra.mrb[14].mxu0 %vm334_vm2, %v14159_v1 }
0x10fb   :  { %14911 = vmatprep.mubr.msk.f32.mxu0 %vm16396_vm1, %v16397_v26 }
0x11c9   :  { %v1824_v17 = vpop.f32.mrb[12].mxu0 }
0x11ca   :  { %v1825_v18 = vadd.f32 %v16594_v39, %v1824_v17  ;;  %v14884_v19 = vpop.f32.mrb[13].mxu0  ;;  %v16802_v17 = vsub.s32 %v573_v14, %v575_v16 }
0x11cb   :  { %v14162_v19 = vld [vmem:[%s18607_s10] ss:$0 sm:$0xff] }
0x11cc   :  { %1836 = vrot.lane.b32.xlu0 %v1825_v18, %s16398_s2  ;;  %v1828_v23 = vadd.f32 %v1825_v18, %v456_v20  ;;  %v792_v18 = vrot.slane %v16642_v31, %v16802_v17 }
0x11cd   :  { %v16796_v10 = vpop.f32.mrb[14].mxu0 }
0x11ce   :  { %v14156_v24 = vmul.f32 -1.442695, %v1828_v23  ;;  %v14902_v11 = vpop.f32.mrb[15].mxu0 }
0x11d0   :  { %15982 = vpow2.f32 %v14156_v24 }
0x11da   :  { %v15983_v29 = vpop.eup %15982 }
0x11db   :  { %v1832_v30 = vadd.f32 1.0, %v15983_v29  ;;  %v808_v29 = vrot.slane %v792_v18, %v16802_v17 }
0x11dd   :  { %15984 = vrcp.f32 %v1832_v30  ;;  %v1220_v30 = vrot.slane %v16701_v34, %v16802_v17 }
0x11e7   :  { %v15985_v32 = vpop.eup %15984 }
0x11e8   :  { %v1846_v41 = vsub.f32 1.0, %v15985_v32  ;;  %v1852_v51 = vmul.f32 %v15985_v32, %v16737_v15 }
0x123e   :  { %v1837_v33 = vpop.permute.xlu0 %1836 }
0x123f   :  { %v1839_v35 = vmul.f32 %v15985_v32, %v1837_v33  ;;  %v16812_v32 = vsub.s32 0, %v575_v16  ;;  %v1236_v33 = vrot.slane %v1220_v30, %v16802_v17 }
0x1241   :  { %1841 = vrot.lane.b32.xlu1 %v1839_v35, %s16398_s2  ;;  %v837_v27 = vrot.slane %v808_v29, %v16812_v32  ;;  %v1648_v35 = vrot.slane %v16737_v15, %v16802_v17 }
0x12b3   :  { %v1842_v36 = vpop.permute.xlu1 %1841 }
0x12b4   :  { %v1844_v37 = vadd.f32 %v1842_v36, %v456_v20  ;;  %v1265_v36 = vrot.slane %v1236_v33, %v16812_v32 }
0x12b6   :  { %15986 = vtanh.f32 %v1844_v37  ;;  %v1664_v37 = vrot.slane %v1648_v35, %v16802_v17 }
0x12c0   :  { %v15987_v40 = vpop.eup %15986 }
0x12c1   :  { %1848 = vrot.lane.b32.xlu0 %v15987_v40, %s16399_s5 }
0x1333   :  { %v1849_v42 = vpop.permute.xlu0 %1848 }
0x1334   :  { %v1851_v44 = vmul.f32 %v1849_v42, %v1846_v41  ;;  %v1693_v41 = vrot.slane %v1664_v37, %v16812_v32 }
0x1336   :  { %v16753_v45 = vadd.f32 %v1852_v51, %v1851_v44  ;;  %v800_v51 = vcombine.high %v792_v18, %v792_v18 }
0x1338   :  { %1968 = vrot.lane.b32.xlu1 %v16753_v45, %s16399_s5 }
0x13aa   :  { %v1969_v46 = vpop.permute.xlu1 %1968 }
0x13ab   :  { %14894 = vmatmul.mubr.msk.f32.vlgmr.msra.gmra.mrb[12].mxu1 %vm107_vm0, %v1969_v46  ;;  %v822_v46 = vrot.slane %v800_v51, %v16802_v17 }
0x13ac   :  { %14916 = vmatprep.mubr.msk.f32.mxu1 %vm16396_vm1, %v16397_v26 }
0x147e   :  { %v2038_v47 = vpop.f32.mrb[12].mxu1 }
0x147f   :  { %v2039_v52 = vadd.f32 %v16594_v39, %v2038_v47  ;;  %v14895_v53 = vpop.f32.mrb[13].mxu1  ;;  %v92_v39 = vld [vmem:[%s18605_s8] sm:$0xff]  ;;  %v1228_v47 = vcombine.high %v1220_v30, %v1220_v30 }
0x1480   :  { %v16776_v2 = vpack.c.bf16 %v93_v43, %v92_v39  ;;  %v1686_v43 = vcombine.high %v1664_v37, %v1664_v37 }
0x1481   :  { %2050 = vrot.lane.b32.xlu0 %v2039_v52, %s16398_s2  ;;  %v2042_v55 = vadd.f32 %v2039_v52, %v461_v54  ;;  %v841_v52 = vrot.slane %v822_v46, %v16812_v32  ;;  %v1250_v53 = vrot.slane %v1228_v47, %v16802_v17 }
0x1482   :  { %15788 = vmatpush3.bf16.msra.mxu0 %v16776_v2  ;;  %v1701_v50 = vrot.slane %v1686_v43, %v16812_v32 }
0x1483   :  { %v14158_v56 = vmul.f32 -1.442695, %v2042_v55  ;;  %15789 = vmatprep.subr.bf16.mxu0 %v16395_v22  ;;  %v1269_v55 = vrot.slane %v1250_v53, %v16812_v32 }
0x1485   :  { %15988 = vpow2.f32 %v14158_v56 }
0x1486   :  { %15791 = vmatpush3.bf16.msra.mxu0 %v16783_v21 }
0x1487   :  { %14924 = vmatprep.subr.mxu0 %v16397_v26 }
0x148f   :  { %v15989_v57 = vpop.eup %15988 }
0x1490   :  { %v2046_v58 = vadd.f32 1.0, %v15989_v57 }
0x1492   :  { %15990 = vrcp.f32 %v2046_v58 }
0x149c   :  { %v15991_v49 = vpop.eup %15990 }
0x149d   :  { %v2060_v5 = vsub.f32 1.0, %v15991_v49  ;;  %v2066_v8 = vmul.f32 %v15991_v49, %v16753_v45 }
0x14f3   :  { %v2051_v59 = vpop.permute.xlu0 %2050 }
0x14f4   :  { %v2053_v62 = vmul.f32 %v15991_v49, %v2051_v59 }
0x14f6   :  { %2055 = vrot.lane.b32.xlu1 %v2053_v62, %s16398_s2  ;;  %v830_v62 = vcombine.high %v808_v29, %v808_v29 }
0x1568   :  { %v2056_v63 = vpop.permute.xlu1 %2055 }
0x1569   :  { %v2058_v0 = vadd.f32 %v2056_v63, %v461_v54  ;;  %v1656_v54 = vcombine.high %v1648_v35, %v1648_v35  ;;  %v845_v63 = vrot.slane %v830_v62, %v16812_v32  ;;  %v1434_v35 = vrot.slane %v16719_v60, %v16802_v17 }
0x156b   :  { %15992 = vtanh.f32 %v2058_v0  ;;  %v1678_v56 = vrot.slane %v1656_v54, %v16802_v17  ;;  %v1258_v0 = vcombine.high %v1236_v33, %v1236_v33 }
0x156d   :  { %v1697_v58 = vrot.slane %v1678_v56, %v16812_v32  ;;  %v1273_v39 = vrot.slane %v1258_v0, %v16812_v32 }
0x1575   :  { %v15993_v4 = vpop.eup %15992 }
0x1576   :  { %2062 = vrot.lane.b32.xlu0 %v15993_v4, %s16399_s5  ;;  %v832_v4 = vcombine.high %v822_v46, %v822_v46 }
0x15e8   :  { %v2063_v6 = vpop.permute.xlu0 %2062 }
0x15e9   :  { %v2065_v25 = vmul.f32 %v2063_v6, %v2060_v5  ;;  %v849_v5 = vrot.slane %v832_v4, %v16812_v32  ;;  %v1260_v6 = vcombine.high %v1250_v53, %v1250_v53 }
0x15eb   :  { %v16792_v9 = vadd.f32 %v2066_v8, %v2065_v25  ;;  %v1277_v8 = vrot.slane %v1260_v6, %v16812_v32  ;;  %v1688_v25 = vcombine.high %v1678_v56, %v1678_v56 }
0x15ed   :  { %2278 = vrot.lane.b32.xlu1 %v16792_v9, %s16399_s5  ;;  %v2076_v40 = vrot.slane %v16792_v9, %v16802_v17  ;;  %v1705_v11 = vrot.slane %v1688_v25, %v16812_v32 }
0x15ef   :  { %v2092_v42 = vrot.slane %v2076_v40, %v16802_v17  ;;  %v2084_v57 = vcombine.high %v2076_v40, %v2076_v40  ;;  %v1450_v40 = vrot.slane %v1434_v35, %v16802_v17 }
0x15f1   :  { %v2121_v44 = vrot.slane %v2092_v42, %v16812_v32  ;;  %v16839_v49 = vrot.slane %v2084_v57, %v16802_v17  ;;  %v2114_v1 = vcombine.high %v2092_v42, %v2092_v42  ;;  %v1479_v51 = vrot.slane %v1450_v40, %v16812_v32 }
0x15f3   :  { %v2125_v59 = vrot.slane %v16839_v49, %v16812_v32  ;;  %v2129_v3 = vrot.slane %v2114_v1, %v16812_v32 }
0x165f   :  { %v2279_v12 = vpop.permute.xlu1 %2278 }
0x1660   :  { %14912 = vmatmul.mubr.msk.f32.vlgmr.msra.gmra.mrb[16].mxu0 %vm107_vm0, %v2279_v12  ;;  %v14160_v12 = vld [vmem:[%s18606_s9] ss:$0 sm:$0xff] }
0x1661   :  { %14926 = vmatprep.mubr.msk.f32.mxu0 %vm16396_vm1, %v16397_v26  ;;  %v16863_v13 = vadd.f32 %v14160_v12, %v16796_v10  ;;  %v1006_v10 = vrot.slane %v16684_v7, %v16802_v17  ;;  %v1472_v12 = vcombine.high %v1450_v40, %v1450_v40 }
0x1663   :  { %v1022_v33 = vrot.slane %v1006_v10, %v16802_v17  ;;  %v1014_v54 = vcombine.high %v1006_v10, %v1006_v10 }
0x1665   :  { %v1051_v37 = vrot.slane %v1022_v33, %v16812_v32  ;;  %v1036_v57 = vrot.slane %v1014_v54, %v16802_v17  ;;  %v1855_v54 = vcombine.high %v16753_v45, %v16753_v45 }
0x1667   :  { %v1055_v62 = vrot.slane %v1036_v57, %v16812_v32  ;;  %v1046_v10 = vcombine.high %v1036_v57, %v1036_v57  ;;  %v16964_v57 = vrot.slane %v1855_v54, %v16802_v17 }
0x1733   :  { %v2348_v20 = vpop.f32.mrb[16].mxu0 }
0x1734   :  { %v2349_v23 = vadd.f32 %v14162_v19, %v2348_v20  ;;  %v14913_v24 = vpop.f32.mrb[17].mxu0  ;;  %v577_v19 = vrot.slane %v16604_v61, %v16802_v17 }
0x1736   :  { %2360 = vrot.lane.b32.xlu0 %v2349_v23, %s16398_s2  ;;  %v2352_v48 = vadd.f32 %v2349_v23, %v16863_v13  ;;  %v593_v30 = vrot.slane %v577_v19, %v16802_v17  ;;  %v585_v46 = vcombine.high %v577_v19, %v577_v19 }
0x1738   :  { %v14164_v14 = vmul.f32 -1.442695, %v2352_v48  ;;  %v607_v53 = vrot.slane %v585_v46, %v16802_v17  ;;  %v615_v4 = vcombine.high %v593_v30, %v593_v30  ;;  %v1427_v46 = vcombine.high %v16719_v60, %v16719_v60 }
0x173a   :  { %866 = vrot.lane.b32.xlu0 %v837_v27, %s16399_s5  ;;  %15994 = vpow2.f32 %v14164_v14  ;;  %v622_v27 = vrot.slane %v593_v30, %v16812_v32  ;;  %v626_v56 = vrot.slane %v607_v53, %v16812_v32  ;;  %v630_v6 = vrot.slane %v615_v4, %v16812_v32 }
0x173b   :  { %v1487_v14 = vrot.slane %v1472_v12, %v16812_v32 }
0x173e   :  { %1294 = vrot.lane.b32.xlu0 %v1265_v36, %s16399_s5 }
0x1742   :  { %1722 = vrot.lane.b32.xlu0 %v1693_v41, %s16399_s5  ;;  %v1862_v41 = vrot.slane %v16753_v45, %v16802_v17  ;;  %v1641_v45 = vcombine.high %v16737_v15, %v16737_v15 }
0x1744   :  { %v15995_v16 = vpop.eup %15994  ;;  %v1870_v0 = vcombine.high %v1862_v41, %v1862_v41 }
0x1745   :  { %v2356_v18 = vadd.f32 1.0, %v15995_v16 }
0x1746   :  { %2150 = vrot.lane.b32.xlu0 %v2121_v44, %s16399_s5  ;;  %v1878_v44 = vrot.slane %v1862_v41, %v16802_v17 }
0x1747   :  { %15996 = vrcp.f32 %v2356_v18 }
0x1748   :  { %v1900_v16 = vcombine.high %v1878_v44, %v1878_v44 }
0x174a   :  { %868 = vrot.lane.b32.xlu0 %v841_v52, %s16399_s5  ;;  %v1907_v52 = vrot.slane %v1878_v44, %v16812_v32  ;;  %v1915_v19 = vrot.slane %v1900_v16, %v16812_v32 }
0x174e   :  { %1296 = vrot.lane.b32.xlu0 %v1269_v55, %s16399_s5 }
0x1751   :  { %v16868_v20 = vpop.eup %15996 }
0x1752   :  { %1724 = vrot.lane.b32.xlu0 %v1697_v58, %s16399_s5  ;;  %v1442_v58 = vcombine.high %v1434_v35, %v1434_v35  ;;  %v570_v35 = vcombine.high %v16604_v61, %v16604_v61 }
0x1754   :  { %v584_v41 = vrot.slane %v570_v35, %v16802_v17 }
0x1756   :  { %2152 = vrot.lane.b32.xlu0 %v2125_v59, %s16399_s5  ;;  %v16938_v44 = vrot.slane %v584_v41, %v16802_v17 }
0x175a   :  { %870 = vrot.lane.b32.xlu0 %v845_v63, %s16399_s5  ;;  %v1464_v63 = vrot.slane %v1442_v58, %v16802_v17 }
0x175c   :  { %v1483_v43 = vrot.slane %v1464_v63, %v16812_v32 }
0x175e   :  { %1298 = vrot.lane.b32.xlu0 %v1273_v39, %s16399_s5 }
0x1762   :  { %1726 = vrot.lane.b32.xlu0 %v1701_v50, %s16399_s5  ;;  %v1892_v50 = vrot.slane %v1870_v0, %v16802_v17  ;;  %v2069_v0 = vcombine.high %v16792_v9, %v16792_v9 }
0x1764   :  { %v1902_v40 = vcombine.high %v1892_v50, %v1892_v50  ;;  %v2083_v4 = vrot.slane %v2069_v0, %v16802_v17 }
0x1766   :  { %2154 = vrot.lane.b32.xlu0 %v2129_v3, %s16399_s5  ;;  %v1911_v3 = vrot.slane %v1892_v50, %v16812_v32 }
0x176a   :  { %872 = vrot.lane.b32.xlu0 %v849_v5, %s16399_s5 }
0x176e   :  { %1300 = vrot.lane.b32.xlu0 %v1277_v8, %s16399_s5  ;;  %v1044_v8 = vcombine.high %v1022_v33, %v1022_v33  ;;  %v1474_v33 = vcombine.high %v1464_v63, %v1464_v63 }
0x1772   :  { %1728 = vrot.lane.b32.xlu0 %v1705_v11, %s16399_s5  ;;  %v1059_v11 = vrot.slane %v1044_v8, %v16812_v32  ;;  %v2085_v8 = vcombine.high %v2083_v4, %v2083_v4 }
0x17a8   :  { %v2361_v24 = vpop.permute.xlu0 %2360 }
0x17a9   :  { %v2363_v29 = vmul.f32 %v16868_v20, %v2361_v24  ;;  %v617_v24 = vcombine.high %v607_v53, %v607_v53  ;;  %v1441_v53 = vrot.slane %v1427_v46, %v16802_v17 }
0x17ab   :  { %2365 = vrot.lane.b32.xlu1 %v2363_v29, %s16398_s2  ;;  %v634_v30 = vrot.slane %v617_v24, %v16812_v32 }
0x17ac   :  { %v867_v23 = vpop.permute.xlu0 %866 }
0x17ad   :  { %890 = vst.msk [vmem:[#allocation2 + $0x1] sm:$0x1] %vm675_vm12, %v867_v23 }
0x17af   :  { %651 = vrot.lane.b32.xlu1 %v622_v27, %s16399_s5  ;;  %v1063_v27 = vrot.slane %v1046_v10, %v16812_v32 }
0x17b0   :  { %v1295_v36 = vpop.permute.xlu0 %1294 }
0x17b1   :  { %1318 = vst.msk [vmem:[#allocation2 + $0x3] sm:$0x1] %vm675_vm12, %v1295_v36 }
0x17b3   :  { %1080 = vrot.lane.b32.xlu1 %v1051_v37, %s16399_s5  ;;  %v1491_v37 = vrot.slane %v1474_v33, %v16812_v32 }
0x17b4   :  { %v1723_v42 = vpop.permute.xlu0 %1722 }
0x17b5   :  { %1746 = vst.msk [vmem:[#allocation2 + $0x5] sm:$0x1] %vm675_vm12, %v1723_v42  ;;  %v999_v42 = vcombine.high %v16684_v7, %v16684_v7  ;;  %v638_v7 = vrot.slane %v16938_v44, %v16812_v32 }
0x17b7   :  { %1508 = vrot.lane.b32.xlu1 %v1479_v51, %s16399_s5  ;;  %v1919_v51 = vrot.slane %v1902_v40, %v16812_v32  ;;  %v1013_v61 = vrot.slane %v999_v42, %v16802_v17 }
0x17b8   :  { %v2151_v47 = vpop.permute.xlu0 %2150 }
0x17b9   :  { %2174 = vst.msk [vmem:[#allocation2 + $0x7] sm:$0x1] %vm675_vm12, %v2151_v47  ;;  %v785_v47 = vcombine.high %v16642_v31, %v16642_v31 }
0x17bb   :  { %1936 = vrot.lane.b32.xlu1 %v1907_v52, %s16399_s5  ;;  %v16949_v52 = vrot.slane %v1013_v61, %v16802_v17  ;;  %v799_v60 = vrot.slane %v785_v47, %v16802_v17 }
0x17bc   :  { %v869_v55 = vpop.permute.xlu0 %868 }
0x17bd   :  { %891 = vst.msk [vmem:[#allocation2 + $0x9] sm:$0x1] %vm675_vm12, %v869_v55  ;;  %v1213_v55 = vcombine.high %v16701_v34, %v16701_v34  ;;  %v1067_v31 = vrot.slane %v16949_v52, %v16812_v32  ;;  %v801_v58 = vcombine.high %v799_v60, %v799_v60  ;;  %v16973_v34 = vrot.slane %v16964_v57, %v16802_v17 }
0x17be   :  { %v815_v12 = vrot.slane %v799_v60, %v16802_v17 }
0x17bf   :  { %653 = vrot.lane.b32.xlu1 %v626_v56, %s16399_s5  ;;  %v16961_v56 = vrot.slane %v1441_v53, %v16802_v17  ;;  %v16978_v63 = vrot.slane %v801_v58, %v16802_v17  ;;  %v1923_v15 = vrot.slane %v16973_v34, %v16812_v32 }
0x17c0   :  { %v1297_v59 = vpop.permute.xlu0 %1296 }
0x17c1   :  { %1319 = vst.msk [vmem:[#allocation2 + $0xb] sm:$0x1] %vm675_vm12, %v1297_v59  ;;  %v1495_v59 = vrot.slane %v16961_v56, %v16812_v32  ;;  %v857_v50 = vrot.slane %v16978_v63, %v16812_v32 }
0x17c3   :  { %1082 = vrot.lane.b32.xlu1 %v1055_v62, %s16399_s5  ;;  %v1227_v62 = vrot.slane %v1213_v55, %v16802_v17 }
0x17c4   :  { %v1725_v39 = vpop.permute.xlu0 %1724 }
0x17c5   :  { %1747 = vst.msk [vmem:[#allocation2 + $0xd] sm:$0x1] %vm675_vm12, %v1725_v39  ;;  %v1229_v39 = vcombine.high %v1227_v62, %v1227_v62  ;;  %v1243_v16 = vrot.slane %v1227_v62, %v16802_v17 }
0x17c7   :  { %1510 = vrot.lane.b32.xlu1 %v1483_v43, %s16399_s5  ;;  %v1655_v43 = vrot.slane %v1641_v45, %v16802_v17 }
0x17c8   :  { %v2153_v1 = vpop.permute.xlu0 %2152 }
0x17c9   :  { %2175 = vst.msk [vmem:[#allocation2 + $0xf] sm:$0x1] %vm675_vm12, %v2153_v1  ;;  %v16989_v1 = vrot.slane %v1229_v39, %v16802_v17  ;;  %v1671_v24 = vrot.slane %v1655_v43, %v16802_v17 }
0x17cb   :  { %1938 = vrot.lane.b32.xlu1 %v1911_v3, %s16399_s5  ;;  %v1657_v3 = vcombine.high %v1655_v43, %v1655_v43  ;;  %v1687_v10 = vcombine.high %v1671_v24, %v1671_v24  ;;  %v1281_v43 = vrot.slane %v1243_v16, %v16812_v32 }
0x17cc   :  { %v871_v5 = vpop.permute.xlu0 %870 }
0x17cd   :  { %892 = vst.msk [vmem:[#allocation2 + $0x11] sm:$0x1] %vm675_vm12, %v871_v5  ;;  %v1285_v5 = vrot.slane %v16989_v1, %v16812_v32  ;;  %v1717_v33 = vrot.slane %v1687_v10, %v16812_v32 }
0x17cf   :  { %655 = vrot.lane.b32.xlu1 %v630_v6, %s16399_s5  ;;  %v16996_v6 = vrot.slane %v1657_v3, %v16802_v17  ;;  %v1709_v3 = vrot.slane %v1671_v24, %v16812_v32 }
0x17d0   :  { %v1299_v25 = vpop.permute.xlu0 %1298 }
0x17d1   :  { %1320 = vst.msk [vmem:[#allocation2 + $0x13] sm:$0x1] %vm675_vm12, %v1299_v25  ;;  %v1713_v25 = vrot.slane %v16996_v6, %v16812_v32 }
0x17d3   :  { %1084 = vrot.lane.b32.xlu1 %v1059_v11, %s16399_s5  ;;  %v17002_v11 = vrot.slane %v2085_v8, %v16802_v17 }
0x17d4   :  { %v1727_v48 = vpop.permute.xlu0 %1726 }
0x17d5   :  { %1748 = vst.msk [vmem:[#allocation2 + $0x15] sm:$0x1] %vm675_vm12, %v1727_v48  ;;  %v2141_v48 = vrot.slane %v17002_v11, %v16812_v32 }
0x17d7   :  { %1512 = vrot.lane.b32.xlu1 %v1487_v14, %s16399_s5  ;;  %v831_v14 = vcombine.high %v815_v12, %v815_v12 }
0x17d8   :  { %v2155_v18 = vpop.permute.xlu0 %2154 }
0x17d9   :  { %2176 = vst.msk [vmem:[#allocation2 + $0x17] sm:$0x1] %vm675_vm12, %v2155_v18  ;;  %v861_v18 = vrot.slane %v831_v14, %v16812_v32  ;;  %v1871_v14 = vcombine.high %v16964_v57, %v16964_v57  ;;  %v616_v57 = vcombine.high %v16938_v44, %v16938_v44  ;;  %v1473_v44 = vcombine.high %v16961_v56, %v16961_v56 }
0x17da   :  { %v833_v56 = vcombine.high %v16978_v63, %v16978_v63  ;;  %v1689_v63 = vcombine.high %v16996_v6, %v16996_v6 }
0x17db   :  { %1940 = vrot.lane.b32.xlu1 %v1915_v19, %s16399_s5  ;;  %v1259_v19 = vcombine.high %v1243_v16, %v1243_v16  ;;  %v646_v10 = vrot.slane %v616_v57, %v16812_v32 }
0x17dc   :  { %v873_v29 = vpop.permute.xlu0 %872 }
0x17dd   :  { %893 = vst.msk [vmem:[#allocation2 + $0x19] sm:$0x1] %vm675_vm12, %v873_v29  ;;  %v586_v29 = vcombine.high %v584_v41, %v584_v41 }
0x17df   :  { %657 = vrot.lane.b32.xlu1 %v634_v30, %s16399_s5  ;;  %v1289_v30 = vrot.slane %v1259_v19, %v16812_v32  ;;  %v17066_v19 = vrot.slane %v1871_v14, %v16802_v17 }
0x17e0   :  { %v1301_v23 = vpop.permute.xlu0 %1300 }
0x17e1   :  { %1321 = vst.msk [vmem:[#allocation2 + $0x1b] sm:$0x1] %vm675_vm12, %v1301_v23  ;;  %v2099_v23 = vrot.slane %v2083_v4, %v16802_v17 }
0x17e3   :  { %1086 = vrot.lane.b32.xlu1 %v1063_v27, %s16399_s5  ;;  %v1015_v27 = vcombine.high %v1013_v61, %v1013_v61  ;;  %v2115_v35 = vcombine.high %v2099_v23, %v2099_v23 }
0x17e4   :  { %v1729_v36 = vpop.permute.xlu0 %1728 }
0x17e5   :  { %1749 = vst.msk [vmem:[#allocation2 + $0x1d] sm:$0x1] %vm675_vm12, %v1729_v36  ;;  %v614_v36 = vrot.slane %v586_v29, %v16802_v17  ;;  %v2145_v40 = vrot.slane %v2115_v35, %v16812_v32  ;;  %v1043_v41 = vrot.slane %v1015_v27, %v16802_v17  ;;  %v1927_v29 = vrot.slane %v17066_v19, %v16812_v32 }
0x17e7   :  { %1514 = vrot.lane.b32.xlu1 %v1491_v37, %s16399_s5  ;;  %v1443_v37 = vcombine.high %v1441_v53, %v1441_v53  ;;  %v618_v42 = vcombine.high %v614_v36, %v614_v36  ;;  %v1047_v47 = vcombine.high %v1043_v41, %v1043_v41 }
0x17e9   :  { %v650_v46 = vrot.slane %v618_v42, %v16812_v32  ;;  %v1471_v61 = vrot.slane %v1443_v37, %v16802_v17  ;;  %v1079_v53 = vrot.slane %v1047_v47, %v16812_v32  ;;  %v1503_v37 = vrot.slane %v1473_v44, %v16812_v32 }
0x17eb   :  { %1942 = vrot.lane.b32.xlu1 %v1919_v51, %s16399_s5  ;;  %v1475_v60 = vcombine.high %v1471_v61, %v1471_v61 }
0x17ef   :  { %659 = vrot.lane.b32.xlu1 %v638_v7, %s16399_s5 }
0x17f3   :  { %1088 = vrot.lane.b32.xlu1 %v1067_v31, %s16399_s5  ;;  %v1507_v31 = vrot.slane %v1475_v60, %v16812_v32 }
0x17f7   :  { %1516 = vrot.lane.b32.xlu1 %v1495_v59, %s16399_s5 }
0x17fb   :  { %1944 = vrot.lane.b32.xlu1 %v1923_v15, %s16399_s5  ;;  %v853_v15 = vrot.slane %v815_v12, %v16812_v32 }
0x17ff   :  { %876 = vrot.lane.b32.xlu1 %v857_v50, %s16399_s5 }
0x1803   :  { %1304 = vrot.lane.b32.xlu1 %v1285_v5, %s16399_s5  ;;  %v2137_v5 = vrot.slane %v2099_v23, %v16812_v32  ;;  %v1045_v23 = vcombine.high %v16949_v52, %v16949_v52  ;;  %v1901_v52 = vcombine.high %v16973_v34, %v16973_v34  ;;  %v1261_v34 = vcombine.high %v16989_v1, %v16989_v1 }
0x1804   :  { %v2117_v1 = vcombine.high %v17002_v11, %v17002_v11 }
0x1805   :  { %v1075_v35 = vrot.slane %v1045_v23, %v16812_v32  ;;  %v1931_v42 = vrot.slane %v1901_v52, %v16812_v32  ;;  %v1293_v47 = vrot.slane %v1261_v34, %v16812_v32 }
0x1806   :  { %v2149_v6 = vrot.slane %v2117_v1, %v16812_v32 }
0x1807   :  { %1732 = vrot.lane.b32.xlu1 %v1713_v25, %s16399_s5  ;;  %v642_v25 = vrot.slane %v614_v36, %v16812_v32 }
0x180b   :  { %2160 = vrot.lane.b32.xlu1 %v2141_v48, %s16399_s5  ;;  %v1071_v48 = vrot.slane %v1043_v41, %v16812_v32 }
0x180f   :  { %878 = vrot.lane.b32.xlu1 %v861_v18, %s16399_s5  ;;  %v1499_v18 = vrot.slane %v1471_v61, %v16812_v32 }
0x1813   :  { %1306 = vrot.lane.b32.xlu1 %v1289_v30, %s16399_s5 }
0x1817   :  { %1734 = vrot.lane.b32.xlu1 %v1717_v33, %s16399_s5 }
0x181b   :  { %2162 = vrot.lane.b32.xlu1 %v2145_v40, %s16399_s5 }
0x181d   :  { %v2366_v51 = vpop.permute.xlu1 %2365 }
0x181e   :  { %v2368_v7 = vadd.f32 %v2366_v51, %v16863_v13  ;;  %v2116_v13 = vcombine.high %v16839_v49, %v16839_v49  ;;  %v865_v51 = vrot.slane %v833_v56, %v16812_v32 }
0x181f   :  { %665 = vrot.lane.b32.xlu1 %v650_v46, %s16399_s5 }
0x1820   :  { %15998 = vtanh.f32 %v2368_v7  ;;  %v2133_v62 = vrot.slane %v2116_v13, %v16812_v32  ;;  %v1721_v7 = vrot.slane %v1689_v63, %v16812_v32 }
0x1821   :  { %v652_v54 = vpop.permute.xlu1 %651 }
0x1822   :  { %676 = vst.msk [vmem:[#allocation2] sm:$0x1] %vm675_vm12, %v652_v54 }
0x1823   :  { %1094 = vrot.lane.b32.xlu1 %v1079_v53, %s16399_s5 }
0x1825   :  { %v1081_v55 = vpop.permute.xlu1 %1080 }
0x1826   :  { %1104 = vst.msk [vmem:[#allocation2 + $0x2] sm:$0x1] %vm675_vm12, %v1081_v55 }
0x1827   :  { %1522 = vrot.lane.b32.xlu1 %v1507_v31, %s16399_s5 }
0x1829   :  { %v1509_v58 = vpop.permute.xlu1 %1508 }
0x182a   :  { %v15999_v45 = vpop.eup %15998  ;;  %1532 = vst.msk [vmem:[#allocation2 + $0x4] sm:$0x1] %vm675_vm12, %v1509_v58 }
0x182b   :  { %2372 = vrot.lane.b32.xlu0 %v15999_v45, %s16399_s5 }
0x182d   :  { %v1937_v59 = vpop.permute.xlu1 %1936 }
0x182e   :  { %1960 = vst.msk [vmem:[#allocation2 + $0x6] sm:$0x1] %vm675_vm12, %v1937_v59 }
0x182f   :  { %2156 = vrot.lane.b32.xlu0 %v2133_v62, %s16399_s5 }
0x1831   :  { %v654_v0 = vpop.permute.xlu1 %653 }
0x1832   :  { %677 = vst.msk [vmem:[#allocation2 + $0x8] sm:$0x1] %vm675_vm12, %v654_v0 }
0x1833   :  { %874 = vrot.lane.b32.xlu0 %v853_v15, %s16399_s5  ;;  %v2370_v15 = vsub.f32 1.0, %v16868_v20 }
0x1835   :  { %v17042_v49 = vld [vmem:[#allocation2] sm:$0xff]  ;;  %v1083_v39 = vpop.permute.xlu1 %1082 }
0x1836   :  { %1105 = vst.msk [vmem:[#allocation2 + $0xa] sm:$0x1] %vm675_vm12, %v1083_v39  ;;  %14915 = vmatpush3.xpose.msk.msra.mxu1 %vm107_vm0, %v17042_v49 }
0x1837   :  { %1302 = vrot.lane.b32.xlu0 %v1281_v43, %s16399_s5  ;;  %14919 = vmatprep.subr.mxu1 %v16397_v26  ;;  %v2376_v43 = vmul.f32 %v16868_v20, %v16792_v9  ;;  %v1903_v9 = vcombine.high %v17066_v19, %v17066_v19 }
0x1839   :  { %v1511_v50 = vpop.permute.xlu1 %1510 }
0x183a   :  { %1533 = vst.msk [vmem:[#allocation2 + $0xc] sm:$0x1] %vm675_vm12, %v1511_v50 }
0x183b   :  { %1730 = vrot.lane.b32.xlu0 %v1709_v3, %s16399_s5 }
0x183d   :  { %v1939_v4 = vpop.permute.xlu1 %1938 }
0x183e   :  { %1961 = vst.msk [vmem:[#allocation2 + $0xe] sm:$0x1] %vm675_vm12, %v1939_v4 }
0x183f   :  { %2158 = vrot.lane.b32.xlu0 %v2137_v5, %s16399_s5 }
0x1841   :  { %v656_v8 = vpop.permute.xlu1 %655 }
0x1842   :  { %678 = vst.msk [vmem:[#allocation2 + $0x10] sm:$0x1] %vm675_vm12, %v656_v8 }
0x1843   :  { %661 = vrot.lane.b32.xlu0 %v642_v25, %s16399_s5 }
0x1845   :  { %v1085_v12 = vpop.permute.xlu1 %1084 }
0x1846   :  { %1106 = vst.msk [vmem:[#allocation2 + $0x12] sm:$0x1] %vm675_vm12, %v1085_v12 }
0x1847   :  { %1090 = vrot.lane.b32.xlu0 %v1071_v48, %s16399_s5 }
0x1849   :  { %v1513_v16 = vpop.permute.xlu1 %1512 }
0x184a   :  { %1534 = vst.msk [vmem:[#allocation2 + $0x14] sm:$0x1] %vm675_vm12, %v1513_v16 }
0x184b   :  { %1518 = vrot.lane.b32.xlu0 %v1499_v18, %s16399_s5 }
0x184d   :  { %v1941_v24 = vpop.permute.xlu1 %1940 }
0x184e   :  { %1962 = vst.msk [vmem:[#allocation2 + $0x16] sm:$0x1] %vm675_vm12, %v1941_v24 }
0x184f   :  { %1946 = vrot.lane.b32.xlu0 %v1927_v29, %s16399_s5 }
0x1851   :  { %v658_v30 = vpop.permute.xlu1 %657 }
0x1852   :  { %679 = vst.msk [vmem:[#allocation2 + $0x18] sm:$0x1] %vm675_vm12, %v658_v30  ;;  %v1935_v30 = vrot.slane %v1903_v9, %v16812_v32 }
0x1853   :  { %663 = vrot.lane.b32.xlu0 %v646_v10, %s16399_s5 }
0x1855   :  { %v17081_v27 = vld [vmem:[#allocation2 + $0x10] sm:$0xff]  ;;  %v1087_v33 = vpop.permute.xlu1 %1086 }
0x1856   :  { %1107 = vst.msk [vmem:[#allocation2 + $0x1a] sm:$0x1] %vm675_vm12, %v1087_v33  ;;  %14925 = vmatpush3.xpose.msk.msra.mxu0 %vm107_vm0, %v17081_v27 }
0x1857   :  { %1092 = vrot.lane.b32.xlu0 %v1075_v35, %s16399_s5  ;;  %14934 = vmatprep.subr.mxu0 %v16397_v26 }
0x1859   :  { %v1515_v36 = vpop.permute.xlu1 %1514 }
0x185a   :  { %1535 = vst.msk [vmem:[#allocation2 + $0x1c] sm:$0x1] %vm675_vm12, %v1515_v36 }
0x185b   :  { %1520 = vrot.lane.b32.xlu0 %v1503_v37, %s16399_s5 }
0x185d   :  { %v1943_v40 = vpop.permute.xlu1 %1942 }
0x185e   :  { %1963 = vst.msk [vmem:[#allocation2 + $0x1e] sm:$0x1] %vm675_vm12, %v1943_v40 }
0x185f   :  { %1948 = vrot.lane.b32.xlu0 %v1931_v42, %s16399_s5 }
0x1861   :  { %v660_v41 = vpop.permute.xlu1 %659 }
0x1862   :  { %680 = vst.msk [vmem:[#allocation2 + $0x20] sm:$0x1] %vm675_vm12, %v660_v41 }
0x1863   :  { %880 = vrot.lane.b32.xlu0 %v865_v51, %s16399_s5 }
0x1865   :  { %v1089_v46 = vpop.permute.xlu1 %1088 }
0x1866   :  { %1108 = vst.msk [vmem:[#allocation2 + $0x22] sm:$0x1] %vm675_vm12, %v1089_v46 }
0x1867   :  { %1308 = vrot.lane.b32.xlu0 %v1293_v47, %s16399_s5 }
0x1869   :  { %v1517_v61 = vpop.permute.xlu1 %1516 }
0x186a   :  { %1536 = vst.msk [vmem:[#allocation2 + $0x24] sm:$0x1] %vm675_vm12, %v1517_v61 }
0x186b   :  { %1736 = vrot.lane.b32.xlu0 %v1721_v7, %s16399_s5 }
0x186d   :  { %v1945_v54 = vpop.permute.xlu1 %1944 }
0x186e   :  { %1964 = vst.msk [vmem:[#allocation2 + $0x26] sm:$0x1] %vm675_vm12, %v1945_v54 }
0x186f   :  { %2164 = vrot.lane.b32.xlu0 %v2149_v6, %s16399_s5 }
0x1871   :  { %v877_v53 = vpop.permute.xlu1 %876 }
0x1872   :  { %895 = vst.msk [vmem:[#allocation2 + $0x29] sm:$0x1] %vm675_vm12, %v877_v53 }
0x1875   :  { %v1305_v60 = vpop.permute.xlu1 %1304 }
0x1876   :  { %1323 = vst.msk [vmem:[#allocation2 + $0x2b] sm:$0x1] %vm675_vm12, %v1305_v60 }
0x1879   :  { %v1733_v11 = vpop.permute.xlu1 %1732 }
0x187a   :  { %1751 = vst.msk [vmem:[#allocation2 + $0x2d] sm:$0x1] %vm675_vm12, %v1733_v11 }
0x187d   :  { %v2161_v55 = vpop.permute.xlu1 %2160 }
0x187e   :  { %2179 = vst.msk [vmem:[#allocation2 + $0x2f] sm:$0x1] %vm675_vm12, %v2161_v55  ;;  %v17181_v55 = vld [vmem:[#allocation2 + $0x8] sm:$0xff] }
0x1881   :  { %v879_v31 = vpop.permute.xlu1 %878 }
0x1882   :  { %896 = vst.msk [vmem:[#allocation2 + $0x31] sm:$0x1] %vm675_vm12, %v879_v31 }
0x1885   :  { %v1307_v58 = vpop.permute.xlu1 %1306 }
0x1886   :  { %1324 = vst.msk [vmem:[#allocation2 + $0x33] sm:$0x1] %vm675_vm12, %v1307_v58 }
0x1889   :  { %v1735_v13 = vpop.permute.xlu1 %1734 }
0x188a   :  { %1752 = vst.msk [vmem:[#allocation2 + $0x35] sm:$0x1] %vm675_vm12, %v1735_v13 }
0x188d   :  { %v2163_v45 = vpop.permute.xlu1 %2162 }
0x188e   :  { %2180 = vst.msk [vmem:[#allocation2 + $0x37] sm:$0x1] %vm675_vm12, %v2163_v45 }
0x1891   :  { %v666_v59 = vpop.permute.xlu1 %665 }
0x1892   :  { %683 = vst.msk [vmem:[#allocation2 + $0x38] sm:$0x1] %vm675_vm12, %v666_v59 }
0x1895   :  { %v1095_v62 = vpop.permute.xlu1 %1094 }
0x1896   :  { %1111 = vst.msk [vmem:[#allocation2 + $0x3a] sm:$0x1] %vm675_vm12, %v1095_v62 }
0x1899   :  { %v1523_v0 = vpop.permute.xlu1 %1522 }
0x189a   :  { %1539 = vst.msk [vmem:[#allocation2 + $0x3c] sm:$0x1] %vm675_vm12, %v1523_v0 }
0x189d   :  { %v2373_v39 = vpop.permute.xlu0 %2372 }
0x189e   :  { %v2375_v50 = vmul.f32 %v2373_v39, %v2370_v15 }
0x18a0   :  { %v17133_v3 = vadd.f32 %v2376_v43, %v2375_v50 }
0x18a1   :  { %v2157_v4 = vpop.permute.xlu0 %2156 }
0x18a2   :  { %v2379_v5 = vcombine.high %v17133_v3, %v17133_v3  ;;  %2177 = vst.msk [vmem:[#allocation2 + $0x1f] sm:$0x1] %vm675_vm12, %v2157_v4  ;;  %v2386_v8 = vrot.slane %v17133_v3, %v16802_v17 }
0x18a4   :  { %v2402_v25 = vrot.slane %v2386_v8, %v16802_v17  ;;  %v2394_v12 = vcombine.high %v2386_v8, %v2386_v8  ;;  %v2393_v48 = vrot.slane %v2379_v5, %v16802_v17 }
0x18a5   :  { %v875_v14 = vpop.permute.xlu0 %874 }
0x18a6   :  { %894 = vst.msk [vmem:[#allocation2 + $0x21] sm:$0x1] %vm675_vm12, %v875_v14  ;;  %v2431_v20 = vrot.slane %v2402_v25, %v16812_v32  ;;  %v2416_v16 = vrot.slane %v2394_v12, %v16802_v17  ;;  %v2395_v29 = vcombine.high %v2393_v48, %v2393_v48  ;;  %v2424_v19 = vcombine.high %v2402_v25, %v2402_v25 }
0x18a7   :  { %v2409_v44 = vrot.slane %v2393_v48, %v16802_v17 }
0x18a8   :  { %2432 = vrot.lane.b32.xlu1 %v2431_v20, %s16399_s5  ;;  %v2512_v18 = vrot.slane %v2416_v16, %v16812_v32  ;;  %v2426_v24 = vcombine.high %v2416_v16, %v2416_v16  ;;  %v2423_v23 = vrot.slane %v2395_v29, %v16802_v17  ;;  %v2593_v35 = vrot.slane %v2424_v19, %v16812_v32 }
0x18a9   :  { %v1303_v57 = vpop.permute.xlu0 %1302  ;;  %v2755_v56 = vrot.slane %v2409_v44, %v16812_v32  ;;  %v2425_v40 = vcombine.high %v2409_v44, %v2409_v44  ;;  %v17189_v13 = vld [vmem:[#allocation2 + $0x18] sm:$0xff] }
0x18aa   :  { %1322 = vst.msk [vmem:[#allocation2 + $0x23] sm:$0x1] %vm675_vm12, %v1303_v57  ;;  %2513 = vrot.lane.b32.xlu0 %v2512_v18, %s16399_s5  ;;  %v2674_v10 = vrot.slane %v2426_v24, %v16812_v32  ;;  %v2836_v52 = vrot.slane %v2423_v23, %v16812_v32  ;;  %v2427_v36 = vcombine.high %v2423_v23, %v2423_v23 }
0x18ab   :  { %v2917_v41 = vrot.slane %v2425_v40, %v16812_v32 }
0x18ac   :  { %1950 = vrot.lane.b32.xlu1 %v1935_v30, %s16399_s5  ;;  %v2998_v42 = vrot.slane %v2427_v36, %v16812_v32 }
0x18ad   :  { %v1731_v33 = vpop.permute.xlu0 %1730 }
0x18ae   :  { %1750 = vst.msk [vmem:[#allocation2 + $0x25] sm:$0x1] %vm675_vm12, %v1731_v33  ;;  %2675 = vrot.lane.b32.xlu0 %v2674_v10, %s16399_s5 }
0x18b0   :  { %2594 = vrot.lane.b32.xlu1 %v2593_v35, %s16399_s5 }
0x18b1   :  { %v2159_v37 = vpop.permute.xlu0 %2158 }
0x18b2   :  { %2178 = vst.msk [vmem:[#allocation2 + $0x27] sm:$0x1] %vm675_vm12, %v2159_v37  ;;  %2837 = vrot.lane.b32.xlu0 %v2836_v52, %s16399_s5 }
0x18b4   :  { %2756 = vrot.lane.b32.xlu1 %v2755_v56, %s16399_s5 }
0x18b5   :  { %v662_v34 = vpop.permute.xlu0 %661 }
0x18b6   :  { %681 = vst.msk [vmem:[#allocation2 + $0x28] sm:$0x1] %vm675_vm12, %v662_v34  ;;  %2999 = vrot.lane.b32.xlu0 %v2998_v42, %s16399_s5 }
0x18b8   :  { %2918 = vrot.lane.b32.xlu1 %v2917_v41, %s16399_s5 }
0x18b9   :  { %v1091_v51 = vpop.permute.xlu0 %1090  ;;  %v17198_v62 = vld [vmem:[#allocation2 + $0x20] sm:$0xff] }
0x18ba   :  { %1109 = vst.msk [vmem:[#allocation2 + $0x2a] sm:$0x1] %vm675_vm12, %v1091_v51 }
0x18bd   :  { %v1519_v63 = vpop.permute.xlu0 %1518 }
0x18be   :  { %1537 = vst.msk [vmem:[#allocation2 + $0x2c] sm:$0x1] %vm675_vm12, %v1519_v63 }
0x18c1   :  { %v1947_v46 = vpop.permute.xlu0 %1946 }
0x18c2   :  { %1965 = vst.msk [vmem:[#allocation2 + $0x2e] sm:$0x1] %vm675_vm12, %v1947_v46 }
0x18c5   :  { %v664_v47 = vpop.permute.xlu0 %663 }
0x18c6   :  { %682 = vst.msk [vmem:[#allocation2 + $0x30] sm:$0x1] %vm675_vm12, %v664_v47 }
0x18c9   :  { %v1093_v1 = vpop.permute.xlu0 %1092  ;;  %v17200_v0 = vld [vmem:[#allocation2 + $0x28] sm:$0xff] }
0x18ca   :  { %1110 = vst.msk [vmem:[#allocation2 + $0x32] sm:$0x1] %vm675_vm12, %v1093_v1 }
0x18cd   :  { %v1521_v61 = vpop.permute.xlu0 %1520 }
0x18ce   :  { %1538 = vst.msk [vmem:[#allocation2 + $0x34] sm:$0x1] %vm675_vm12, %v1521_v61 }
0x18d1   :  { %v1949_v7 = vpop.permute.xlu0 %1948 }
0x18d2   :  { %1966 = vst.msk [vmem:[#allocation2 + $0x36] sm:$0x1] %vm675_vm12, %v1949_v7 }
0x18d5   :  { %v881_v54 = vpop.permute.xlu0 %880 }
0x18d6   :  { %897 = vst.msk [vmem:[#allocation2 + $0x39] sm:$0x1] %vm675_vm12, %v881_v54 }
0x18d9   :  { %v1309_v6 = vpop.permute.xlu0 %1308  ;;  %v17216_v50 = vld [vmem:[#allocation2 + $0x30] sm:$0xff] }
0x18da   :  { %1325 = vst.msk [vmem:[#allocation2 + $0x3b] sm:$0x1] %vm675_vm12, %v1309_v6 }
0x18dd   :  { %v1737_v53 = vpop.permute.xlu0 %1736 }
0x18de   :  { %1753 = vst.msk [vmem:[#allocation2 + $0x3d] sm:$0x1] %vm675_vm12, %v1737_v53 }
0x18e1   :  { %v2165_v60 = vpop.permute.xlu0 %2164 }
0x18e2   :  { %2181 = vst.msk [vmem:[#allocation2 + $0x3f] sm:$0x1] %vm675_vm12, %v2165_v60 }
0x191a   :  { %v2433_v11 = vpop.permute.xlu1 %2432 }
0x191b   :  { %14917 = vmatmul.mubr.msk.f32.vlgmr.msra.gmra.mrb[14].mxu1 %vm107_vm0, %v2433_v11 }
0x191c   :  { %14920 = vmatpush3.xpose.msk.msra.mxu1 %vm107_vm0, %v17181_v55  ;;  %v2514_v31 = vpop.permute.xlu0 %2513  ;;  %14921 = vmatprep.mubr.msk.f32.mxu1 %vm16396_vm1, %v16397_v26 }
0x191d   :  { %14929 = vmatprep.subr.mxu1 %v16397_v26 }
0x191e   :  { %v1951_v58 = vpop.permute.xlu1 %1950 }
0x191f   :  { %1967 = vst.msk [vmem:[#allocation2 + $0x3e] sm:$0x1] %vm675_vm12, %v1951_v58  ;;  %14922 = vmatmul.mubr.msk.f32.vlgmr.msra.gmra.mrb[16].mxu1 %vm107_vm0, %v2514_v31 }
0x1920   :  { %14930 = vmatpush3.xpose.msk.msra.mxu1 %vm107_vm0, %v17189_v13  ;;  %v2676_v45 = vpop.permute.xlu0 %2675  ;;  %14931 = vmatprep.mubr.msk.f32.mxu1 %vm16396_vm1, %v16397_v26 }
0x1921   :  { %14939 = vmatprep.subr.mxu1 %v16397_v26 }
0x1922   :  { %v2595_v59 = vpop.permute.xlu1 %2594 }
0x1923   :  { %14927 = vmatmul.mubr.msk.f32.vlgmr.msra.gmra.mrb[18].mxu0 %vm107_vm0, %v2595_v59  ;;  %14932 = vmatmul.mubr.msk.f32.vlgmr.msra.gmra.mrb[18].mxu1 %vm107_vm0, %v2676_v45 }
0x1924   :  { %14935 = vmatpush3.xpose.msk.msra.mxu0 %vm107_vm0, %v17198_v62  ;;  %14940 = vmatpush3.xpose.msk.msra.mxu1 %vm107_vm0, %v17200_v0  ;;  %v2838_v15 = vpop.permute.xlu0 %2837 }
0x1925   :  { %14936 = vmatprep.mubr.msk.f32.mxu0 %vm16396_vm1, %v16397_v26  ;;  %14944 = vmatprep.subr.mxu0 %v16397_v26 }
0x1926   :  { %v17211_v39 = vld [vmem:[#allocation2 + $0x38] sm:$0xff]  ;;  %v2757_v43 = vpop.permute.xlu1 %2756  ;;  %14941 = vmatprep.mubr.msk.f32.mxu1 %vm16396_vm1, %v16397_v26  ;;  %14949 = vmatprep.subr.mxu1 %v16397_v26 }
0x1927   :  { %14937 = vmatmul.mubr.msk.f32.vlgmr.msra.gmra.mrb[20].mxu0 %vm107_vm0, %v2757_v43  ;;  %14942 = vmatmul.mubr.msk.f32.vlgmr.msra.gmra.mrb[20].mxu1 %vm107_vm0, %v2838_v15 }
0x1928   :  { %14945 = vmatpush3.xpose.msk.msra.mxu0 %vm107_vm0, %v17216_v50  ;;  %14950 = vmatpush3.xpose.msk.msra.mxu1 %vm107_vm0, %v17211_v39  ;;  %v3000_v4 = vpop.permute.xlu0 %2999 }
0x1929   :  { %14946 = vmatprep.mubr.msk.f32.mxu0 %vm16396_vm1, %v16397_v26  ;;  %14954 = vmatprep.subr.mxu0 %v16397_v26 }
0x192a   :  { %v2919_v5 = vpop.permute.xlu1 %2918  ;;  %14951 = vmatprep.mubr.msk.f32.mxu1 %vm16396_vm1, %v16397_v26  ;;  %14959 = vmatprep.subr.mxu1 %v16397_v26 }
0x192b   :  { %14947 = vmatmul.mubr.msk.f32.vlgmr.msra.gmra.mrb[22].mxu0 %vm107_vm0, %v2919_v5  ;;  %14952 = vmatmul.mubr.msk.f32.vlgmr.msra.gmra.mrb[22].mxu1 %vm107_vm0, %v3000_v4 }
0x192c   :  { %14955 = vmatpush3.msra.mxu0 %v17042_v49  ;;  %14960 = vmatpush3.msra.mxu1 %v17181_v55 }
0x192d   :  { %14956 = vmatprep.mubr.msk.f32.mxu0 %vm16396_vm1, %v16397_v26  ;;  %14964 = vmatprep.subr.mxu0 %v16397_v26 }
0x192e   :  { %14961 = vmatprep.mubr.msk.f32.mxu1 %vm16396_vm1, %v16397_v26  ;;  %14969 = vmatprep.subr.mxu1 %v16397_v26 }
0x19ee   :  { %v2505_v8 = vpop.f32.mrb[14].mxu1 }
0x19ef   :  { %v14918_v25 = vpop.f32.mrb[15].mxu1 }
0x19f2   :  { %v2586_v12 = vpop.f32.mrb[16].mxu1 }
0x19f3   :  { %v3084_v48 = vrot.slane %v2586_v12, 7  ;;  %v14923_v14 = vpop.f32.mrb[17].mxu1 }
0x19f5   :  { %v3086_v9 = vsel %vm3085_vm13, %v3084_v48, %v2505_v8 }
0x19f6   :  { %v2667_v20 = vpop.f32.mrb[18].mxu0  ;;  %v2748_v16 = vpop.f32.mrb[18].mxu1 }
0x19f7   :  { %v3087_v18 = vrot.slane %v2667_v20, 6  ;;  %v3090_v24 = vrot.slane %v2748_v16, 5  ;;  %v14928_v29 = vpop.f32.mrb[19].mxu0  ;;  %v14933_v57 = vpop.f32.mrb[19].mxu1 }
0x19f9   :  { %v3089_v30 = vsel %vm3088_vm14, %v3087_v18, %v3086_v9 }
0x19fa   :  { %v3092_v19 = vsel %vm3091_vm15, %v3090_v24, %v3089_v30  ;;  %v2829_v10 = vpop.f32.mrb[20].mxu0  ;;  %v2910_v23 = vpop.f32.mrb[20].mxu1 }
0x19fb   :  { %v3093_v33 = vrot.slane %v2829_v10, 4  ;;  %v3096_v35 = vrot.slane %v2910_v23, 3  ;;  %v14938_v44 = vpop.f32.mrb[21].mxu0  ;;  %v14943_v52 = vpop.f32.mrb[21].mxu1 }
0x19fd   :  { %v3095_v36 = vsel %vm3094_vm3, %v3093_v33, %v3092_v19 }
0x19fe   :  { %v3098_v37 = vsel %vm3097_vm4, %v3096_v35, %v3095_v36  ;;  %v2991_v56 = vpop.f32.mrb[22].mxu0  ;;  %v3072_v40 = vpop.f32.mrb[22].mxu1 }
0x19ff   :  { %v3099_v42 = vrot.slane %v2991_v56, 2  ;;  %v3102_v34 = vrot.slane %v3072_v40, 1  ;;  %v14948_v41 = vpop.f32.mrb[23].mxu0  ;;  %v14953_v51 = vpop.f32.mrb[23].mxu1 }
0x1a01   :  { %v3101_v63 = vsel %vm3100_vm5, %v3099_v42, %v3098_v37 }
0x1a02   :  { %v3104_v46 = vsel %vm3103_vm6, %v3102_v34, %v3101_v63 }
0x1a03   :  { %v3107_v47 = vsel %vm3106_vm7, %v3104_v46, -inf }
0x1a04   :  { %3108 = vmax.xlane.f32.xlu1 %v3107_v47 }
0x1a91   :  { %v3109_v1 = vpop.xlane.xlu1 %3108 }
0x1a92   :  { %v3111_v61 = vrot.slane %v3109_v1, 1  ;;  %v3112_v7 = vrot.slane %v3109_v1, 2  ;;  %v3113_v54 = vrot.slane %v3109_v1, 3  ;;  %v3114_v6 = vrot.slane %v3109_v1, 4 }
0x1a93   :  { %v3115_v53 = vrot.slane %v3109_v1, 5  ;;  %v3126_v60 = vsub.f32 %v2505_v8, %v3109_v1  ;;  %v3116_v11 = vrot.slane %v3109_v1, 6  ;;  %v3117_v31 = vrot.slane %v3109_v1, 7 }
0x1a94   :  { %v3127_v58 = vsub.f32 %v2586_v12, %v3111_v61  ;;  %v3128_v45 = vsub.f32 %v2667_v20, %v3112_v7  ;;  %v3129_v59 = vsub.f32 %v2748_v16, %v3113_v54  ;;  %v3130_v15 = vsub.f32 %v2829_v10, %v3114_v6 }
0x1a95   :  { %v3134_v43 = vmul.f32 1.442695, %v3126_v60  ;;  %v3131_v4 = vsub.f32 %v2910_v23, %v3115_v53  ;;  %v3132_v5 = vsub.f32 %v2991_v56, %v3116_v11  ;;  %v3133_v9 = vsub.f32 %v3072_v40, %v3117_v31 }
0x1a96   :  { %v3136_v25 = vmul.f32 1.442695, %v3127_v58  ;;  %v3138_v48 = vmul.f32 1.442695, %v3128_v45  ;;  %v3140_v14 = vmul.f32 1.442695, %v3129_v59 }
0x1a97   :  { %16000 = vpow2.f32 %v3134_v43  ;;  %v3142_v18 = vmul.f32 1.442695, %v3130_v15  ;;  %v3144_v24 = vmul.f32 1.442695, %v3131_v4  ;;  %v3146_v29 = vmul.f32 1.442695, %v3132_v5 }
0x1a98   :  { %16002 = vpow2.f32 %v3136_v25  ;;  %v3148_v8 = vmul.f32 1.442695, %v3133_v9 }
0x1a99   :  { %16004 = vpow2.f32 %v3138_v48 }
0x1a9a   :  { %16006 = vpow2.f32 %v3140_v14 }
0x1a9b   :  { %16008 = vpow2.f32 %v3142_v18 }
0x1a9c   :  { %16010 = vpow2.f32 %v3144_v24 }
0x1a9d   :  { %16012 = vpow2.f32 %v3146_v29 }
0x1a9e   :  { %16014 = vpow2.f32 %v3148_v8 }
0x1aa1   :  { %v16001_v12 = vpop.eup %16000 }
0x1aa2   :  { %v16003_v20 = vpop.eup %16002 }
0x1aa3   :  { %v16005_v16 = vpop.eup %16004  ;;  %v3158_v57 = vrot.slane %v16003_v20, 7 }
0x1aa4   :  { %v16007_v30 = vpop.eup %16006  ;;  %v3160_v19 = vrot.slane %v16005_v16, 6 }
0x1aa5   :  { %v16009_v10 = vpop.eup %16008  ;;  %v3159_v23 = vsel %vm3085_vm13, %v3158_v57, %v16001_v12  ;;  %v3162_v33 = vrot.slane %v16007_v30, 5 }
0x1aa6   :  { %v16011_v35 = vpop.eup %16010  ;;  %v3161_v44 = vsel %vm3088_vm14, %v3160_v19, %v3159_v23  ;;  %v3164_v52 = vrot.slane %v16009_v10, 4 }
0x1aa7   :  { %v16013_v36 = vpop.eup %16012  ;;  %v3163_v37 = vsel %vm3091_vm15, %v3162_v33, %v3161_v44  ;;  %v3166_v56 = vrot.slane %v16011_v35, 3 }
0x1aa8   :  { %v16015_v40 = vpop.eup %16014  ;;  %v3165_v42 = vsel %vm3094_vm3, %v3164_v52, %v3163_v37  ;;  %v3168_v34 = vrot.slane %v16013_v36, 2 }
0x1aa9   :  { %v3167_v41 = vsel %vm3097_vm4, %v3166_v56, %v3165_v42  ;;  %v3170_v51 = vrot.slane %v16015_v40, 1  ;;  %v98_v56 = vld [vmem:[%s18608_s11] sm:$0xff]  ;;  %v100_v42 = vld [vmem:[%s18608_s11 + $0x10] sm:$0xff] }
0x1aaa   :  { %v3169_v63 = vsel %vm3100_vm5, %v3168_v34, %v3167_v41  ;;  %v101_v41 = vld [vmem:[%s18608_s11 + $0x18] sm:$0xff] }
0x1aab   :  { %v3171_v46 = vsel %vm3103_vm6, %v3170_v51, %v3169_v63  ;;  %v17319_v51 = vpack.c.bf16 %v101_v41, %v100_v42  ;;  %v102_v63 = vld [vmem:[%s18608_s11 + $0x20] sm:$0xff] }
0x1aac   :  { %v3173_v47 = vsel %vm3106_vm7, %v3171_v46, 0.0  ;;  %v103_v46 = vld [vmem:[%s18608_s11 + $0x28] sm:$0xff] }
0x1aad   :  { %3174 = vadd.xlane.f32.xlu0 %v3173_v47  ;;  %v17329_v47 = vpack.c.bf16 %v103_v46, %v102_v63 }
0x1ac3   :  { %3792 = vrot.lane.b32.xlu0 %v17133_v3, %s16399_s5 }
0x1b3a   :  { %v3175_v1 = vpop.xlane.xlu0 %3174 }
0x1b3b   :  { %16016 = vrcp.f32 %v3175_v1  ;;  %v3177_v61 = vrot.slane %v3175_v1, 1  ;;  %v3178_v7 = vrot.slane %v3175_v1, 2  ;;  %v3179_v54 = vrot.slane %v3175_v1, 3 }
0x1b3c   :  { %v3180_v6 = vrot.slane %v3175_v1, 4  ;;  %v3181_v53 = vrot.slane %v3175_v1, 5  ;;  %v3182_v60 = vrot.slane %v3175_v1, 6  ;;  %v3183_v11 = vrot.slane %v3175_v1, 7  ;;  %v104_v1 = vld [vmem:[%s18608_s11 + $0x30] sm:$0xff] }
0x1b3d   :  { %16018 = vrcp.f32 %v3177_v61  ;;  %v105_v61 = vld [vmem:[%s18608_s11 + $0x38] sm:$0xff] }
0x1b3e   :  { %16020 = vrcp.f32 %v3178_v7  ;;  %v17339_v7 = vpack.c.bf16 %v105_v61, %v104_v1 }
0x1b3f   :  { %16022 = vrcp.f32 %v3179_v54 }
0x1b40   :  { %16024 = vrcp.f32 %v3180_v6 }
0x1b41   :  { %16026 = vrcp.f32 %v3181_v53 }
0x1b42   :  { %16028 = vrcp.f32 %v3182_v60 }
0x1b43   :  { %16030 = vrcp.f32 %v3183_v11 }
0x1b45   :  { %v16017_v31 = vpop.eup %16016 }
0x1b46   :  { %v3193_v58 = vmul.f32 %v16017_v31, %v16001_v12 }
0x1b47   :  { %v16019_v45 = vpop.eup %16018 }
0x1b48   :  { %v16021_v59 = vpop.eup %16020  ;;  %14957 = vmatmul.mubr.msk.f32.vlgmr.msra.gmra.mrb[24].mxu0 %vm3106_vm7, %v3193_v58  ;;  %v3195_v15 = vmul.f32 %v16019_v45, %v16003_v20 }
0x1b49   :  { %v16023_v43 = vpop.eup %16022  ;;  %14965 = vmatpush3.msra.mxu0 %v17081_v27  ;;  %14966 = vmatprep.mubr.msk.f32.mxu0 %vm16396_vm1, %v16397_v26  ;;  %v3197_v4 = vmul.f32 %v16021_v59, %v16005_v16 }
0x1b4a   :  { %v16025_v5 = vpop.eup %16024  ;;  %14962 = vmatmul.mubr.msk.f32.vlgmr.msra.gmra.mrb[24].mxu1 %vm3106_vm7, %v3195_v15  ;;  %v13976_v25 = vrot.slane %v3195_v15, 7  ;;  %14974 = vmatprep.subr.mxu0 %v16397_v26  ;;  %v3199_v48 = vmul.f32 %v16023_v43, %v16007_v30 }
0x1b4b   :  { %v16027_v14 = vpop.eup %16026  ;;  %14970 = vmatpush3.msra.mxu1 %v17189_v13  ;;  %v13978_v9 = vrot.slane %v3197_v4, 6  ;;  %14971 = vmatprep.mubr.msk.f32.mxu1 %vm16396_vm1, %v16397_v26  ;;  %v3201_v18 = vmul.f32 %v16025_v5, %v16009_v10 }
0x1b4c   :  { %v16029_v24 = vpop.eup %16028  ;;  %v13977_v29 = vsel %vm3085_vm13, %v13976_v25, %v3193_v58  ;;  %14967 = vmatmul.mubr.msk.f32.vlgmr.msra.gmra.mrb[26].mxu0 %vm3106_vm7, %v3197_v4  ;;  %14979 = vmatprep.subr.mxu1 %v16397_v26  ;;  %v13980_v8 = vrot.slane %v3199_v48, 5  ;;  %v3203_v12 = vmul.f32 %v16027_v14, %v16011_v35 }
0x1b4d   :  { %v16031_v20 = vpop.eup %16030  ;;  %v13979_v16 = vsel %vm3088_vm14, %v13978_v9, %v13977_v29  ;;  %14975 = vmatpush3.msra.mxu0 %v17198_v62  ;;  %14976 = vmatprep.mubr.msk.f32.mxu0 %vm16396_vm1, %v16397_v26  ;;  %v13982_v57 = vrot.slane %v3201_v18, 4  ;;  %v3205_v30 = vmul.f32 %v16029_v24, %v16013_v36 }
0x1b4e   :  { %14972 = vmatmul.mubr.msk.f32.vlgmr.msra.gmra.mrb[26].mxu1 %vm3106_vm7, %v3199_v48  ;;  %v13981_v19 = vsel %vm3091_vm15, %v13980_v8, %v13979_v16  ;;  %14984 = vmatprep.subr.mxu0 %v16397_v26  ;;  %v13984_v10 = vrot.slane %v3203_v12, 3  ;;  %v3207_v23 = vmul.f32 %v16031_v20, %v16015_v40  ;;  %v99_v40 = vld [vmem:[%s18608_s11 + $0x8] sm:$0xff]  ;;  %s16401_s11 = smov 32  }
0x1b4f   :  { %14980 = vmatpush3.msra.mxu1 %v17200_v0  ;;  %v13983_v33 = vsel %vm3094_vm3, %v13982_v57, %v13981_v19  ;;  %14981 = vmatprep.mubr.msk.f32.mxu1 %vm16396_vm1, %v16397_v26  ;;  %v13986_v35 = vrot.slane %v3205_v30, 2  ;;  %v17313_v34 = vpack.c.bf16 %v99_v40, %v98_v56 }
0x1b50   :  { %14977 = vmatmul.mubr.msk.f32.vlgmr.msra.gmra.mrb[28].mxu0 %vm3106_vm7, %v3201_v18  ;;  %14989 = vmatprep.subr.mxu1 %v16397_v26  ;;  %v13985_v44 = vsel %vm3097_vm4, %v13984_v10, %v13983_v33  ;;  %v13988_v52 = vrot.slane %v3207_v23, 1 }
0x1b51   :  { %14985 = vmatpush3.msra.mxu0 %v17216_v50  ;;  %14986 = vmatprep.mubr.msk.f32.mxu0 %vm16396_vm1, %v16397_v26  ;;  %v13987_v36 = vsel %vm3100_vm5, %v13986_v35, %v13985_v44  ;;  %v3793_v35 = vpop.permute.xlu0 %3792 }
0x1b52   :  { %14982 = vmatmul.mubr.msk.f32.vlgmr.msra.gmra.mrb[28].mxu1 %vm3106_vm7, %v3203_v12  ;;  %v13989_v37 = vsel %vm3103_vm6, %v13988_v52, %v13987_v36  ;;  %15792 = vmatprep.subr.bf16.mxu0 %v16395_v22  ;;  %v17362_v36 = vld [vmem:[%s18609_s12] ss:$0 sm:$0xff] }
0x1b53   :  { %14990 = vmatpush3.msra.mxu1 %v17211_v39  ;;  %14991 = vmatprep.mubr.msk.f32.mxu1 %vm16396_vm1, %v16397_v26  ;;  %14081 = vst.msk [vmem:[#allocation9] sm:$0xff] %vm3106_vm7, %v13989_v37 }
0x1b54   :  { %14987 = vmatmul.mubr.msk.f32.vlgmr.msra.gmra.mrb[30].mxu0 %vm3106_vm7, %v3205_v30  ;;  %15804 = vmatprep.subr.bf16.mxu1 %v16395_v22 }
0x1b55   :  { %15010 = vmatprep.mubr.msk.f32.mxu0 %vm16396_vm1, %v16397_v26  ;;  %15794 = vmatpush3.bf16.msra.mxu0 %v17313_v34 }
0x1b56   :  { %14992 = vmatmul.mubr.msk.f32.vlgmr.msra.gmra.mrb[30].mxu1 %vm3106_vm7, %v3207_v23  ;;  %15795 = vmatprep.subr.bf16.mxu0 %v16395_v22 }
0x1b57   :  { %15806 = vmatpush3.bf16.msra.mxu1 %v16587_v38  ;;  %15017 = vmatprep.mubr.msk.f32.mxu1 %vm16396_vm1, %v16397_v26 }
0x1b58   :  { %15807 = vmatprep.subr.bf16.mxu1 %v16395_v22 }
0x1b59   :  { %15797 = vmatpush3.bf16.msra.mxu0 %v17319_v51 }
0x1b5a   :  { %15798 = vmatprep.subr.bf16.mxu0 %v16395_v22 }
0x1b5d   :  { %15800 = vmatpush3.bf16.msra.mxu0 %v17329_v47 }
0x1b5e   :  { %15801 = vmatprep.subr.bf16.mxu0 %v16395_v22 }
0x1b61   :  { %15803 = vmatpush3.bf16.msra.mxu0 %v17339_v7 }
0x1b62   :  { %15036 = vmatprep.subr.mxu0 %v16397_v26 }
0x1c1b   :  { %v3277_v54 = vpop.f32.mrb[24].mxu0 }
0x1c1c   :  { %v14958_v6 = vpop.f32.mrb[25].mxu0 }
0x1c1d   :  { %v3350_v53 = vpop.f32.mrb[24].mxu1 }
0x1c1e   :  { %v3803_v60 = vrot.slane %v3350_v53, 7  ;;  %v14963_v11 = vpop.f32.mrb[25].mxu1 }
0x1c1f   :  { %v3423_v31 = vpop.f32.mrb[26].mxu0 }
0x1c20   :  { %v3804_v58 = vsel %vm3085_vm13, %v3803_v60, %v3277_v54  ;;  %v3805_v45 = vrot.slane %v3423_v31, 6  ;;  %v14968_v59 = vpop.f32.mrb[27].mxu0 }
0x1c21   :  { %v3496_v15 = vpop.f32.mrb[26].mxu1 }
0x1c22   :  { %v3806_v43 = vsel %vm3088_vm14, %v3805_v45, %v3804_v58  ;;  %v3807_v4 = vrot.slane %v3496_v15, 5  ;;  %v14973_v5 = vpop.f32.mrb[27].mxu1 }
0x1c23   :  { %v3569_v25 = vpop.f32.mrb[28].mxu0 }
0x1c24   :  { %v3808_v48 = vsel %vm3091_vm15, %v3807_v4, %v3806_v43  ;;  %v3809_v14 = vrot.slane %v3569_v25, 4  ;;  %v14978_v9 = vpop.f32.mrb[29].mxu0  ;;  %v17387_v25 = vld [vmem:[%s18607_s10] ss:$0 sm:$0xff] }
0x1c25   :  { %v3642_v18 = vpop.f32.mrb[28].mxu1  ;;  %v17394_v9 = vld [vmem:[%s18606_s9] ss:$0 sm:$0xff] }
0x1c26   :  { %v3810_v24 = vsel %vm3094_vm3, %v3809_v14, %v3808_v48  ;;  %v3811_v29 = vrot.slane %v3642_v18, 3  ;;  %v14983_v8 = vpop.f32.mrb[29].mxu1 }
0x1c27   :  { %v3715_v12 = vpop.f32.mrb[30].mxu0 }
0x1c28   :  { %v3812_v20 = vsel %vm3097_vm4, %v3811_v29, %v3810_v24  ;;  %v3813_v16 = vrot.slane %v3715_v12, 2  ;;  %v14988_v57 = vpop.f32.mrb[31].mxu0 }
0x1c29   :  { %v3788_v30 = vpop.f32.mrb[30].mxu1 }
0x1c2a   :  { %v3814_v19 = vsel %vm3100_vm5, %v3813_v16, %v3812_v20  ;;  %v3815_v10 = vrot.slane %v3788_v30, 1  ;;  %v14993_v23 = vpop.f32.mrb[31].mxu1 }
0x1c2c   :  { %v3816_v33 = vsel %vm3103_vm6, %v3815_v10, %v3814_v19 }
0x1c2d   :  { %3817 = vrot.lane.b32.xlu1 %v3816_v33, %s16401_s11 }
0x1c9f   :  { %v3818_v44 = vpop.permute.xlu1 %3817 }
0x1ca0   :  { %v3820_v52 = vsel %vm107_vm0, %v3793_v35, %v3818_v44 }
0x1ca1   :  { %15011 = vmatmul.mubr.msk.f32.vlgmr.msra.gmra.mrb[32].mxu0 %vm3827_vm8, %v3820_v52 }
0x1ca2   :  { %15037 = vmatpush3.xpose.msk.msra.mxu0 %vm107_vm0, %v17181_v55  ;;  %15038 = vmatprep.mubr.msk.f32.mxu0 %vm16396_vm1, %v16397_v26 }
0x1ca3   :  { %15046 = vmatprep.subr.mxu0 %v16397_v26 }
0x1d74   :  { %v3897_v37 = vpop.f32.mrb[32].mxu0 }
0x1d75   :  { %v3898_v56 = vadd.f32 %v17362_v36, %v3897_v37  ;;  %v15012_v40 = vpop.f32.mrb[33].mxu0 }
0x1d77   :  { %13969 = vst.msk [vmem:[#allocation8] sm:$0xff] %vm334_vm2, %v3898_v56  ;;  %v3901_v42 = vsel %vm334_vm2, %v3898_v56, -inf }
0x1d78   :  { %3902 = vmax.xlane.f32.xlu1 %v3901_v42 }
0x1e05   :  { %v3903_v41 = vpop.xlane.xlu1 %3902 }
0x1e06   :  { %vm3904_vm9 = vcmp.eq.f32.partialorder %v3898_v56, %v3903_v41 }
0x1e07   :  { %v3905_v63 = vsel %vm3904_vm9, %v16577_v28, 16 }
0x1e08   :  { %v3906_v46 = vsel %vm334_vm2, %v3905_v63, 2147483647 }
0x1e09   :  { %v3908_v1 = vshra.s32 %v3906_v46, 16  ;;  %v3907_v54 = vand.u32 65535, %v3906_v46 }
0x1e0b   :  { %v3910_v61 = vcvt.s32.f32 %v3908_v1  ;;  %v3909_v53 = vcvt.s32.f32 %v3907_v54 }
0x1e0d   :  { %3911 = vmin.xlane.f32.xlu0 %v3910_v61 }
0x1e9a   :  { %v3912_v6 = vpop.xlane.xlu0 %3911 }
0x1e9b   :  { %vm3913_vm10 = vcmp.eq.f32.partialorder %v3910_v61, %v3912_v6  ;;  %v3918_v11 = vcvt.f32.s32 %v3912_v6 }
0x1e9c   :  { %v3914_v60 = vsel %vm3913_vm10, %v3909_v53, inf }
0x1e9d   :  { %3915 = vmin.xlane.f32.xlu0 %v3914_v60  ;;  %v3919_v58 = vshll.u32 %v3918_v11, 16 }
0x1f2a   :  { %v3916_v31 = vpop.xlane.xlu0 %3915 }
0x1f2b   :  { %v3917_v45 = vcvt.f32.s32 %v3916_v31 }
0x1f2d   :  { %v3920_v59 = vadd.s32 %v3919_v58, %v3917_v45 }
0x1f2f   :  { %vm3921_vm11 = vcmp.eq.s32.totalorder %v16577_v28, %v3920_v59 }
0x1f30   :  { %v14191_v15 = vsel %vm3921_vm11, 1.0, %v16397_v26 }
0x1f31   :  { %15018 = vmatmul.mubr.msk.f32.vlgmr.msra.gmra.mrb[32].mxu1 %vm334_vm2, %v14191_v15 }
0x1f32   :  { %15809 = vmatpush3.bf16.msra.mxu1 %v16776_v2  ;;  %15028 = vmatprep.mubr.msk.f32.mxu1 %vm16396_vm1, %v16397_v26 }
0x1f33   :  { %15810 = vmatprep.subr.bf16.mxu1 %v16395_v22 }
0x1f36   :  { %15812 = vmatpush3.bf16.msra.mxu1 %v16783_v21 }
0x1f37   :  { %15031 = vmatprep.subr.mxu1 %v16397_v26 }
0x1f39   :  { %15029 = vmatmul.mubr.msk.f32.vlgmr.msra.gmra.mrb[34].mxu1 %vm107_vm0, %v3793_v35 }
0x1f3a   :  { %15033 = vmatprep.mubr.msk.f32.mxu1 %vm16396_vm1, %v16397_v26 }
0x1f3f   :  { %15032 = vmatpush3.xpose.msk.msra.mxu1 %vm107_vm0, %v17042_v49 }
0x1f40   :  { %15041 = vmatprep.subr.mxu1 %v16397_v26 }
0x2004   :  { %v3993_v43 = vpop.f32.mrb[32].mxu1 }
0x2005   :  { %v15019_v4 = vpop.f32.mrb[33].mxu1  ;;  %v3994_v49 = vadd.f32 %v17394_v9, %v3993_v43 }
0x200c   :  { %v4065_v5 = vpop.f32.mrb[34].mxu1 }
0x200d   :  { %v4066_v48 = vadd.f32 %v17387_v25, %v4065_v5  ;;  %v15030_v14 = vpop.f32.mrb[35].mxu1 }
0x200f   :  { %4077 = vrot.lane.b32.xlu1 %v4066_v48, %s16398_s2  ;;  %v4069_v18 = vadd.f32 %v4066_v48, %v3994_v49 }
0x2011   :  { %v14194_v24 = vmul.f32 -1.442695, %v4069_v18 }
0x2013   :  { %16032 = vpow2.f32 %v14194_v24 }
0x201d   :  { %v16033_v29 = vpop.eup %16032 }
0x201e   :  { %v4073_v8 = vadd.f32 1.0, %v16033_v29 }
0x2020   :  { %16034 = vrcp.f32 %v4073_v8 }
0x202a   :  { %v16035_v12 = vpop.eup %16034 }
0x202b   :  { %v4087_v10 = vsub.f32 1.0, %v16035_v12  ;;  %v4093_v33 = vmul.f32 %v16035_v12, %v17133_v3 }
0x2081   :  { %v4078_v20 = vpop.permute.xlu1 %4077 }
0x2082   :  { %v4080_v16 = vmul.f32 %v16035_v12, %v4078_v20 }
0x2084   :  { %4082 = vrot.lane.b32.xlu0 %v4080_v16, %s16398_s2 }
0x20f6   :  { %v4083_v57 = vpop.permute.xlu0 %4082 }
0x20f7   :  { %v4085_v30 = vadd.f32 %v4083_v57, %v3994_v49 }
0x20f9   :  { %16036 = vtanh.f32 %v4085_v30 }
0x2103   :  { %v16037_v19 = vpop.eup %16036 }
0x2104   :  { %4089 = vrot.lane.b32.xlu1 %v16037_v19, %s16399_s5 }
0x2176   :  { %v4090_v23 = vpop.permute.xlu1 %4089 }
0x2177   :  { %v4092_v35 = vmul.f32 %v4090_v23, %v4087_v10 }
0x2179   :  { %v17400_v44 = vadd.f32 %v4093_v33, %v4092_v35 }
0x217b   :  { %v4096_v52 = vcombine.high %v17400_v44, %v17400_v44  ;;  %v4103_v37 = vrot.slane %v17400_v44, %v16802_v17 }
0x217d   :  { %v4119_v56 = vrot.slane %v4103_v37, %v16802_v17  ;;  %v4111_v40 = vcombine.high %v4103_v37, %v4103_v37  ;;  %v4110_v42 = vrot.slane %v4096_v52, %v16802_v17 }
0x217f   :  { %v4148_v41 = vrot.slane %v4119_v56, %v16812_v32  ;;  %v4133_v63 = vrot.slane %v4111_v40, %v16802_v17  ;;  %v4141_v46 = vcombine.high %v4119_v56, %v4119_v56  ;;  %v4112_v61 = vcombine.high %v4110_v42, %v4110_v42 }
0x2180   :  { %v4126_v6 = vrot.slane %v4110_v42, %v16802_v17 }
0x2181   :  { %4149 = vrot.lane.b32.xlu1 %v4148_v41, %s16399_s5  ;;  %v4226_v3 = vrot.slane %v4133_v63, %v16812_v32  ;;  %v4143_v1 = vcombine.high %v4133_v63, %v4133_v63  ;;  %v4304_v54 = vrot.slane %v4141_v46, %v16812_v32  ;;  %v4140_v60 = vrot.slane %v4112_v61, %v16802_v17 }
0x2182   :  { %v4460_v11 = vrot.slane %v4126_v6, %v16812_v32  ;;  %v4142_v31 = vcombine.high %v4126_v6, %v4126_v6 }
0x2183   :  { %4227 = vrot.lane.b32.xlu0 %v4226_v3, %s16399_s5  ;;  %v4382_v53 = vrot.slane %v4143_v1, %v16812_v32  ;;  %v4538_v58 = vrot.slane %v4140_v60, %v16812_v32  ;;  %v4144_v45 = vcombine.high %v4140_v60, %v4140_v60 }
0x2184   :  { %v4616_v59 = vrot.slane %v4142_v31, %v16812_v32 }
0x2185   :  { %4305 = vrot.lane.b32.xlu1 %v4304_v54, %s16399_s5  ;;  %v4694_v15 = vrot.slane %v4144_v45, %v16812_v32 }
0x2187   :  { %4383 = vrot.lane.b32.xlu0 %v4382_v53, %s16399_s5 }
0x2189   :  { %4461 = vrot.lane.b32.xlu1 %v4460_v11, %s16399_s5 }
0x218b   :  { %4539 = vrot.lane.b32.xlu0 %v4538_v58, %s16399_s5 }
0x218d   :  { %4617 = vrot.lane.b32.xlu1 %v4616_v59, %s16399_s5 }
0x218f   :  { %4695 = vrot.lane.b32.xlu0 %v4694_v15, %s16399_s5 }
0x21f3   :  { %v4150_v43 = vpop.permute.xlu1 %4149 }
0x21f4   :  { %15034 = vmatmul.mubr.msk.f32.vlgmr.msra.gmra.mrb[36].mxu1 %vm107_vm0, %v4150_v43 }
0x21f5   :  { %15042 = vmatpush3.xpose.msk.msra.mxu1 %vm107_vm0, %v17081_v27  ;;  %v4228_v4 = vpop.permute.xlu0 %4227  ;;  %15043 = vmatprep.mubr.msk.f32.mxu1 %vm16396_vm1, %v16397_v26 }
0x21f6   :  { %15039 = vmatmul.mubr.msk.f32.vlgmr.msra.gmra.mrb[34].mxu0 %vm107_vm0, %v4228_v4  ;;  %15051 = vmatprep.subr.mxu1 %v16397_v26 }
0x21f7   :  { %15047 = vmatpush3.xpose.msk.msra.mxu0 %vm107_vm0, %v17189_v13  ;;  %v4306_v5 = vpop.permute.xlu1 %4305  ;;  %15048 = vmatprep.mubr.msk.f32.mxu0 %vm16396_vm1, %v16397_v26 }
0x21f8   :  { %15044 = vmatmul.mubr.msk.f32.vlgmr.msra.gmra.mrb[38].mxu1 %vm107_vm0, %v4306_v5  ;;  %15056 = vmatprep.subr.mxu0 %v16397_v26 }
0x21f9   :  { %15052 = vmatpush3.xpose.msk.msra.mxu1 %vm107_vm0, %v17198_v62  ;;  %v4384_v27 = vpop.permute.xlu0 %4383  ;;  %15053 = vmatprep.mubr.msk.f32.mxu1 %vm16396_vm1, %v16397_v26 }
0x21fa   :  { %15049 = vmatmul.mubr.msk.f32.vlgmr.msra.gmra.mrb[36].mxu0 %vm107_vm0, %v4384_v27  ;;  %15061 = vmatprep.subr.mxu1 %v16397_v26 }
0x21fb   :  { %15057 = vmatpush3.xpose.msk.msra.mxu0 %vm107_vm0, %v17200_v0  ;;  %v4462_v13 = vpop.permute.xlu1 %4461  ;;  %15058 = vmatprep.mubr.msk.f32.mxu0 %vm16396_vm1, %v16397_v26 }
0x21fc   :  { %15054 = vmatmul.mubr.msk.f32.vlgmr.msra.gmra.mrb[40].mxu1 %vm107_vm0, %v4462_v13  ;;  %15066 = vmatprep.subr.mxu0 %v16397_v26 }
0x21fd   :  { %15062 = vmatpush3.xpose.msk.msra.mxu1 %vm107_vm0, %v17216_v50  ;;  %v4540_v62 = vpop.permute.xlu0 %4539  ;;  %15063 = vmatprep.mubr.msk.f32.mxu1 %vm16396_vm1, %v16397_v26  ;;  %v17464_v50 = vld [vmem:[#allocation2] sm:$0xff] }
0x21fe   :  { %15059 = vmatmul.mubr.msk.f32.vlgmr.msra.gmra.mrb[38].mxu0 %vm107_vm0, %v4540_v62  ;;  %15071 = vmatprep.subr.mxu1 %v16397_v26 }
0x21ff   :  { %15067 = vmatpush3.xpose.msk.msra.mxu0 %vm107_vm0, %v17211_v39  ;;  %v4618_v0 = vpop.permute.xlu1 %4617  ;;  %15068 = vmatprep.mubr.msk.f32.mxu0 %vm16396_vm1, %v16397_v26 }
0x2200   :  { %15064 = vmatmul.mubr.msk.f32.vlgmr.msra.gmra.mrb[42].mxu1 %vm107_vm0, %v4618_v0  ;;  %15076 = vmatprep.subr.mxu0 %v16397_v26 }
0x2201   :  { %15072 = vmatpush3.msra.mxu1 %v17464_v50  ;;  %v4696_v48 = vpop.permute.xlu0 %4695  ;;  %15073 = vmatprep.mubr.msk.f32.mxu1 %vm16396_vm1, %v16397_v26 }
0x2202   :  { %15069 = vmatmul.mubr.msk.f32.vlgmr.msra.gmra.mrb[40].mxu0 %vm107_vm0, %v4696_v48  ;;  %15081 = vmatprep.subr.mxu1 %v16397_v26 }
0x2203   :  { %15077 = vmatpush3.msra.mxu0 %v17181_v55  ;;  %15078 = vmatprep.mubr.msk.f32.mxu0 %vm16396_vm1, %v16397_v26 }
0x2204   :  { %15086 = vmatprep.subr.mxu0 %v16397_v26 }
0x22c7   :  { %v4219_v39 = vpop.f32.mrb[36].mxu1 }
0x22c8   :  { %v15035_v14 = vpop.f32.mrb[37].mxu1 }
0x22c9   :  { %v4297_v49 = vpop.f32.mrb[34].mxu0 }
0x22ca   :  { %v4777_v18 = vrot.slane %v4297_v49, 7  ;;  %v15040_v24 = vpop.f32.mrb[35].mxu0 }
0x22cb   :  { %v4375_v29 = vpop.f32.mrb[38].mxu1 }
0x22cc   :  { %v4778_v8 = vsel %vm3085_vm13, %v4777_v18, %v4219_v39  ;;  %v4779_v12 = vrot.slane %v4375_v29, 6  ;;  %v15045_v20 = vpop.f32.mrb[39].mxu1 }
0x22cd   :  { %v4453_v16 = vpop.f32.mrb[36].mxu0 }
0x22ce   :  { %v4780_v57 = vsel %vm3088_vm14, %v4779_v12, %v4778_v8  ;;  %v4781_v30 = vrot.slane %v4453_v16, 5  ;;  %v15050_v55 = vpop.f32.mrb[37].mxu0 }
0x22cf   :  { %v4531_v19 = vpop.f32.mrb[40].mxu1 }
0x22d0   :  { %v4782_v10 = vsel %vm3091_vm15, %v4781_v30, %v4780_v57  ;;  %v4783_v23 = vrot.slane %v4531_v19, 4  ;;  %v15055_v33 = vpop.f32.mrb[41].mxu1 }
0x22d1   :  { %v4609_v35 = vpop.f32.mrb[38].mxu0 }
0x22d2   :  { %v4784_v52 = vsel %vm3094_vm3, %v4783_v23, %v4782_v10  ;;  %v4785_v37 = vrot.slane %v4609_v35, 3  ;;  %v15060_v56 = vpop.f32.mrb[39].mxu0 }
0x22d3   :  { %v4687_v40 = vpop.f32.mrb[42].mxu1 }
0x22d4   :  { %v4786_v42 = vsel %vm3097_vm4, %v4785_v37, %v4784_v52  ;;  %v4787_v41 = vrot.slane %v4687_v40, 2  ;;  %v15065_v63 = vpop.f32.mrb[43].mxu1 }
0x22d5   :  { %v4765_v46 = vpop.f32.mrb[40].mxu0 }
0x22d6   :  { %v4789_v3 = vrot.slane %v4765_v46, 1  ;;  %v15070_v1 = vpop.f32.mrb[41].mxu0  ;;  %v4788_v61 = vsel %vm3100_vm5, %v4787_v41, %v4786_v42 }
0x22d8   :  { %v4790_v54 = vsel %vm3103_vm6, %v4789_v3, %v4788_v61 }
0x22d9   :  { %v4792_v6 = vsel %vm3106_vm7, %v4790_v54, -inf }
0x22da   :  { %4793 = vmax.xlane.f32.xlu1 %v4792_v6 }
0x2367   :  { %v4794_v53 = vpop.xlane.xlu1 %4793 }
0x2368   :  { %v4796_v60 = vrot.slane %v4794_v53, 1  ;;  %v4797_v11 = vrot.slane %v4794_v53, 2  ;;  %v4798_v31 = vrot.slane %v4794_v53, 3  ;;  %v4799_v58 = vrot.slane %v4794_v53, 4 }
0x2369   :  { %v4800_v45 = vrot.slane %v4794_v53, 5  ;;  %v4801_v59 = vrot.slane %v4794_v53, 6  ;;  %v4802_v15 = vrot.slane %v4794_v53, 7  ;;  %v4811_v43 = vsub.f32 %v4219_v39, %v4794_v53 }
0x236a   :  { %v4812_v4 = vsub.f32 %v4297_v49, %v4796_v60  ;;  %v4813_v5 = vsub.f32 %v4375_v29, %v4797_v11  ;;  %v4814_v27 = vsub.f32 %v4453_v16, %v4798_v31  ;;  %v4815_v13 = vsub.f32 %v4531_v19, %v4799_v58 }
0x236b   :  { %v4816_v62 = vsub.f32 %v4609_v35, %v4800_v45  ;;  %v4819_v0 = vmul.f32 1.442695, %v4811_v43  ;;  %v4817_v48 = vsub.f32 %v4687_v40, %v4801_v59  ;;  %v4818_v8 = vsub.f32 %v4765_v46, %v4802_v15 }
0x236c   :  { %v4821_v14 = vmul.f32 1.442695, %v4812_v4  ;;  %v4823_v18 = vmul.f32 1.442695, %v4813_v5  ;;  %v4825_v24 = vmul.f32 1.442695, %v4814_v27 }
0x236d   :  { %16038 = vpow2.f32 %v4819_v0  ;;  %v4827_v12 = vmul.f32 1.442695, %v4815_v13  ;;  %v4829_v20 = vmul.f32 1.442695, %v4816_v62  ;;  %v4831_v57 = vmul.f32 1.442695, %v4817_v48 }
0x236e   :  { %16040 = vpow2.f32 %v4821_v14  ;;  %v4833_v30 = vmul.f32 1.442695, %v4818_v8  ;;  %v17497_v14 = vld [vmem:[#allocation2 + $0x10] sm:$0xff] }
0x236f   :  { %16042 = vpow2.f32 %v4823_v18 }
0x2370   :  { %16044 = vpow2.f32 %v4825_v24 }
0x2371   :  { %16046 = vpow2.f32 %v4827_v12  ;;  %v17501_v12 = vld [vmem:[#allocation2 + $0x18] sm:$0xff] }
0x2372   :  { %16048 = vpow2.f32 %v4829_v20 }
0x2373   :  { %16050 = vpow2.f32 %v4831_v57 }
0x2374   :  { %16052 = vpow2.f32 %v4833_v30 }
0x2377   :  { %v16039_v39 = vpop.eup %16038 }
0x2378   :  { %v16041_v49 = vpop.eup %16040 }
0x2379   :  { %v16043_v29 = vpop.eup %16042  ;;  %v4843_v16 = vrot.slane %v16041_v49, 7 }
0x237a   :  { %v16045_v55 = vpop.eup %16044  ;;  %v4845_v19 = vrot.slane %v16043_v29, 6 }
0x237b   :  { %v16047_v10 = vpop.eup %16046  ;;  %v4844_v23 = vsel %vm3085_vm13, %v4843_v16, %v16039_v39  ;;  %v4847_v33 = vrot.slane %v16045_v55, 5 }
0x237c   :  { %v16049_v35 = vpop.eup %16048  ;;  %v4846_v52 = vsel %vm3088_vm14, %v4845_v19, %v4844_v23  ;;  %v4849_v37 = vrot.slane %v16047_v10, 4 }
0x237d   :  { %v16051_v56 = vpop.eup %16050  ;;  %v4848_v40 = vsel %vm3091_vm15, %v4847_v33, %v4846_v52  ;;  %v4851_v42 = vrot.slane %v16049_v35, 3 }
0x237e   :  { %v17486_v41 = vpop.eup %16052  ;;  %v4850_v63 = vsel %vm3094_vm3, %v4849_v37, %v4848_v40  ;;  %v4853_v46 = vrot.slane %v16051_v56, 2  ;;  %v17519_v37 = vld [vmem:[#allocation2 + $0x28] sm:$0xff] }
0x237f   :  { %v4852_v3 = vsel %vm3097_vm4, %v4851_v42, %v4850_v63  ;;  %v4855_v1 = vrot.slane %v17486_v41, 1 }
0x2380   :  { %v4854_v61 = vsel %vm3100_vm5, %v4853_v46, %v4852_v3  ;;  %v17532_v46 = vld [vmem:[#allocation2 + $0x30] sm:$0xff] }
0x2381   :  { %v4856_v54 = vsel %vm3103_vm6, %v4855_v1, %v4854_v61  ;;  %v17537_v1 = vld [vmem:[#allocation2 + $0x38] sm:$0xff] }
0x2382   :  { %v4858_v6 = vsel %vm3106_vm7, %v4856_v54, 0.0 }
0x2383   :  { %4859 = vadd.xlane.f32.xlu0 %v4858_v6 }
0x2399   :  { %5477 = vrot.lane.b32.xlu0 %v17400_v44, %s16399_s5 }
0x2410   :  { %v4860_v53 = vpop.xlane.xlu0 %4859 }
0x2411   :  { %v4862_v60 = vrot.slane %v4860_v53, 1  ;;  %v4863_v11 = vrot.slane %v4860_v53, 2  ;;  %v4864_v31 = vrot.slane %v4860_v53, 3  ;;  %v4865_v58 = vrot.slane %v4860_v53, 4 }
0x2412   :  { %16054 = vrcp.f32 %v4860_v53  ;;  %v4866_v45 = vrot.slane %v4860_v53, 5  ;;  %v4867_v59 = vrot.slane %v4860_v53, 6  ;;  %v4868_v15 = vrot.slane %v4860_v53, 7 }
0x2413   :  { %16056 = vrcp.f32 %v4862_v60 }
0x2414   :  { %16058 = vrcp.f32 %v4863_v11 }
0x2415   :  { %16060 = vrcp.f32 %v4864_v31 }
0x2416   :  { %16062 = vrcp.f32 %v4865_v58 }
0x2417   :  { %16064 = vrcp.f32 %v4866_v45 }
0x2418   :  { %16066 = vrcp.f32 %v4867_v59 }
0x2419   :  { %16068 = vrcp.f32 %v4868_v15 }
0x241c   :  { %v16055_v43 = vpop.eup %16054 }
0x241d   :  { %v16057_v4 = vpop.eup %16056  ;;  %v4878_v5 = vmul.f32 %v16055_v43, %v16039_v39 }
0x241e   :  { %v16059_v27 = vpop.eup %16058  ;;  %v4880_v13 = vmul.f32 %v16057_v4, %v16041_v49 }
0x241f   :  { %v16061_v62 = vpop.eup %16060  ;;  %15074 = vmatmul.mubr.msk.f32.vlgmr.msra.gmra.mrb[44].mxu1 %vm3106_vm7, %v4878_v5  ;;  %v4882_v0 = vmul.f32 %v16059_v27, %v16043_v29 }
0x2420   :  { %v16063_v48 = vpop.eup %16062  ;;  %15082 = vmatpush3.msra.mxu1 %v17497_v14  ;;  %15079 = vmatmul.mubr.msk.f32.vlgmr.msra.gmra.mrb[42].mxu0 %vm3106_vm7, %v4880_v13  ;;  %v13990_v18 = vrot.slane %v4880_v13, 7  ;;  %v4884_v24 = vmul.f32 %v16061_v62, %v16045_v55 }
0x2421   :  { %v16065_v8 = vpop.eup %16064  ;;  %15087 = vmatpush3.msra.mxu0 %v17501_v12  ;;  %15083 = vmatprep.mubr.msk.f32.mxu1 %vm16396_vm1, %v16397_v26  ;;  %v13992_v20 = vrot.slane %v4882_v0, 6  ;;  %v4886_v57 = vmul.f32 %v16063_v48, %v16047_v10  ;;  %v17513_v10 = vld [vmem:[#allocation2 + $0x20] sm:$0xff] }
0x2422   :  { %v16067_v30 = vpop.eup %16066  ;;  %v13991_v39 = vsel %vm3085_vm13, %v13990_v18, %v4878_v5  ;;  %15091 = vmatprep.subr.mxu1 %v16397_v26  ;;  %15088 = vmatprep.mubr.msk.f32.mxu0 %vm16396_vm1, %v16397_v26  ;;  %v13994_v49 = vrot.slane %v4884_v24, 5  ;;  %v4888_v29 = vmul.f32 %v16065_v8, %v16049_v35 }
0x2423   :  { %v16069_v16 = vpop.eup %16068  ;;  %15084 = vmatmul.mubr.msk.f32.vlgmr.msra.gmra.mrb[46].mxu1 %vm3106_vm7, %v4882_v0  ;;  %v13993_v55 = vsel %vm3088_vm14, %v13992_v20, %v13991_v39  ;;  %15096 = vmatprep.subr.mxu0 %v16397_v26  ;;  %v13996_v19 = vrot.slane %v4886_v57, 4  ;;  %v4890_v23 = vmul.f32 %v16067_v30, %v16051_v56 }
0x2424   :  { %15092 = vmatpush3.msra.mxu1 %v17513_v10  ;;  %15089 = vmatmul.mubr.msk.f32.vlgmr.msra.gmra.mrb[44].mxu0 %vm3106_vm7, %v4884_v24  ;;  %v13995_v33 = vsel %vm3091_vm15, %v13994_v49, %v13993_v55  ;;  %v13998_v52 = vrot.slane %v4888_v29, 3  ;;  %v4892_v35 = vmul.f32 %v16069_v16, %v17486_v41 }
0x2425   :  { %15097 = vmatpush3.msra.mxu0 %v17519_v37  ;;  %15093 = vmatprep.mubr.msk.f32.mxu1 %vm16396_vm1, %v16397_v26  ;;  %v13997_v56 = vsel %vm3094_vm3, %v13996_v19, %v13995_v33  ;;  %v14000_v40 = vrot.slane %v4890_v23, 2  ;;  %v5478_v19 = vpop.permute.xlu0 %5477 }
0x2426   :  { %15101 = vmatprep.subr.mxu1 %v16397_v26  ;;  %15098 = vmatprep.mubr.msk.f32.mxu0 %vm16396_vm1, %v16397_v26  ;;  %v13999_v42 = vsel %vm3097_vm4, %v13998_v52, %v13997_v56  ;;  %v14002_v63 = vrot.slane %v4892_v35, 1  ;;  %v17573_v52 = vld [vmem:[#allocation2 + $0x8] sm:$0xff] }
0x2427   :  { %15094 = vmatmul.mubr.msk.f32.vlgmr.msra.gmra.mrb[48].mxu1 %vm3106_vm7, %v4886_v57  ;;  %15106 = vmatprep.subr.mxu0 %v16397_v26  ;;  %v14001_v41 = vsel %vm3100_vm5, %v14000_v40, %v13999_v42 }
0x2428   :  { %15102 = vmatpush3.msra.mxu1 %v17532_v46  ;;  %15099 = vmatmul.mubr.msk.f32.vlgmr.msra.gmra.mrb[46].mxu0 %vm3106_vm7, %v4888_v29  ;;  %v14003_v3 = vsel %vm3103_vm6, %v14002_v63, %v14001_v41 }
0x2429   :  { %15107 = vmatpush3.msra.mxu0 %v17537_v1  ;;  %15103 = vmatprep.mubr.msk.f32.mxu1 %vm16396_vm1, %v16397_v26  ;;  %14082 = vst.msk [vmem:[#allocation9 + $0x8] sm:$0xff] %vm3106_vm7, %v14003_v3 }
0x242a   :  { %15108 = vmatprep.mubr.msk.f32.mxu0 %vm16396_vm1, %v16397_v26  ;;  %15825 = vmatprep.subr.bf16.mxu0 %v16395_v22 }
0x242b   :  { %15104 = vmatmul.mubr.msk.f32.vlgmr.msra.gmra.mrb[50].mxu1 %vm3106_vm7, %v4890_v23  ;;  %15813 = vmatprep.subr.bf16.mxu1 %v16395_v22 }
0x242c   :  { %15109 = vmatmul.mubr.msk.f32.vlgmr.msra.gmra.mrb[48].mxu0 %vm3106_vm7, %v4892_v35  ;;  %15815 = vmatpush3.bf16.msra.mxu1 %v17313_v34 }
0x242d   :  { %15827 = vmatpush3.bf16.msra.mxu0 %v16587_v38  ;;  %15816 = vmatprep.subr.bf16.mxu1 %v16395_v22 }
0x242e   :  { %15127 = vmatprep.mubr.msk.f32.mxu1 %vm16396_vm1, %v16397_v26  ;;  %15134 = vmatprep.mubr.msk.f32.mxu0 %vm16396_vm1, %v16397_v26 }
0x242f   :  { %15828 = vmatprep.subr.bf16.mxu0 %v16395_v22 }
0x2430   :  { %15818 = vmatpush3.bf16.msra.mxu1 %v17319_v51 }
0x2431   :  { %15819 = vmatprep.subr.bf16.mxu1 %v16395_v22 }
0x2434   :  { %15821 = vmatpush3.bf16.msra.mxu1 %v17329_v47 }
0x2435   :  { %15822 = vmatprep.subr.bf16.mxu1 %v16395_v22 }
0x2438   :  { %15824 = vmatpush3.bf16.msra.mxu1 %v17339_v7 }
0x2439   :  { %15153 = vmatprep.subr.mxu1 %v16397_v26 }
0x24f2   :  { %v4962_v61 = vpop.f32.mrb[44].mxu1 }
0x24f3   :  { %v15075_v54 = vpop.f32.mrb[45].mxu1  ;;  %v5035_v6 = vpop.f32.mrb[42].mxu0 }
0x24f4   :  { %v5488_v53 = vrot.slane %v5035_v6, 7  ;;  %v15080_v60 = vpop.f32.mrb[43].mxu0 }
0x24f6   :  { %v5489_v11 = vsel %vm3085_vm13, %v5488_v53, %v4962_v61  ;;  %v5108_v31 = vpop.f32.mrb[46].mxu1 }
0x24f7   :  { %v5490_v58 = vrot.slane %v5108_v31, 6  ;;  %v15085_v45 = vpop.f32.mrb[47].mxu1  ;;  %v5181_v59 = vpop.f32.mrb[44].mxu0 }
0x24f8   :  { %v5492_v15 = vrot.slane %v5181_v59, 5  ;;  %v15090_v43 = vpop.f32.mrb[45].mxu0 }
0x24f9   :  { %v5491_v4 = vsel %vm3088_vm14, %v5490_v58, %v5489_v11 }
0x24fa   :  { %v5493_v5 = vsel %vm3091_vm15, %v5492_v15, %v5491_v4  ;;  %v5254_v27 = vpop.f32.mrb[48].mxu1 }
0x24fb   :  { %v5494_v13 = vrot.slane %v5254_v27, 4  ;;  %v15095_v62 = vpop.f32.mrb[49].mxu1  ;;  %v5327_v0 = vpop.f32.mrb[46].mxu0 }
0x24fc   :  { %v5496_v48 = vrot.slane %v5327_v0, 3  ;;  %v15100_v18 = vpop.f32.mrb[47].mxu0 }
0x24fd   :  { %v5495_v24 = vsel %vm3094_vm3, %v5494_v13, %v5493_v5 }
0x24fe   :  { %v5497_v8 = vsel %vm3097_vm4, %v5496_v48, %v5495_v24  ;;  %v5400_v20 = vpop.f32.mrb[50].mxu1 }
0x24ff   :  { %v5498_v57 = vrot.slane %v5400_v20, 2  ;;  %v15105_v30 = vpop.f32.mrb[51].mxu1  ;;  %v5473_v39 = vpop.f32.mrb[48].mxu0 }
0x2500   :  { %v5500_v49 = vrot.slane %v5473_v39, 1  ;;  %v15110_v29 = vpop.f32.mrb[49].mxu0 }
0x2501   :  { %v5499_v16 = vsel %vm3100_vm5, %v5498_v57, %v5497_v8 }
0x2502   :  { %v5501_v55 = vsel %vm3103_vm6, %v5500_v49, %v5499_v16 }
0x2503   :  { %5502 = vrot.lane.b32.xlu1 %v5501_v55, %s16401_s11 }
0x2575   :  { %v5503_v23 = vpop.permute.xlu1 %5502 }
0x2576   :  { %v5505_v33 = vsel %vm107_vm0, %v5478_v19, %v5503_v23 }
0x2577   :  { %15128 = vmatmul.mubr.msk.f32.vlgmr.msra.gmra.mrb[52].mxu1 %vm3827_vm8, %v5505_v33 }
0x2578   :  { %15154 = vmatpush3.xpose.msk.msra.mxu1 %vm107_vm0, %v17573_v52  ;;  %15155 = vmatprep.mubr.msk.f32.mxu1 %vm16396_vm1, %v16397_v26 }
0x2579   :  { %15163 = vmatprep.subr.mxu1 %v16397_v26 }
0x264a   :  { %v5575_v35 = vpop.f32.mrb[52].mxu1 }
0x264b   :  { %v5576_v56 = vadd.f32 %v17362_v36, %v5575_v35  ;;  %v15129_v40 = vpop.f32.mrb[53].mxu1 }
0x264d   :  { %13970 = vst.msk [vmem:[#allocation8 + $0x8] sm:$0xff] %vm334_vm2, %v5576_v56  ;;  %v5579_v42 = vsel %vm334_vm2, %v5576_v56, -inf }
0x264e   :  { %5580 = vmax.xlane.f32.xlu1 %v5579_v42 }
0x26db   :  { %v5581_v63 = vpop.xlane.xlu1 %5580 }
0x26dc   :  { %vm5582_vm12 = vcmp.eq.f32.partialorder %v5576_v56, %v5581_v63 }
0x26dd   :  { %v5583_v41 = vsel %vm5582_vm12, %v16577_v28, 16 }
0x26de   :  { %v5584_v3 = vsel %vm334_vm2, %v5583_v41, 2147483647 }
0x26df   :  { %v5586_v61 = vshra.s32 %v5584_v3, 16  ;;  %v5585_v6 = vand.u32 65535, %v5584_v3 }
0x26e1   :  { %v5588_v54 = vcvt.s32.f32 %v5586_v61  ;;  %v5587_v60 = vcvt.s32.f32 %v5585_v6 }
0x26e3   :  { %5589 = vmin.xlane.f32.xlu0 %v5588_v54 }
0x2770   :  { %v5590_v53 = vpop.xlane.xlu0 %5589 }
0x2771   :  { %vm5591_vm9 = vcmp.eq.f32.partialorder %v5588_v54, %v5590_v53  ;;  %v5596_v11 = vcvt.f32.s32 %v5590_v53 }
0x2772   :  { %v5592_v36 = vsel %vm5591_vm9, %v5587_v60, inf }
0x2773   :  { %5593 = vmin.xlane.f32.xlu0 %v5592_v36  ;;  %v5597_v58 = vshll.u32 %v5596_v11, 16 }
0x2800   :  { %v5594_v31 = vpop.xlane.xlu0 %5593 }
0x2801   :  { %v5595_v45 = vcvt.f32.s32 %v5594_v31 }
0x2803   :  { %v5598_v59 = vadd.s32 %v5597_v58, %v5595_v45 }
0x2805   :  { %vm5599_vm10 = vcmp.eq.s32.totalorder %v16577_v28, %v5598_v59 }
0x2806   :  { %v14220_v15 = vsel %vm5599_vm10, 1.0, %v16397_v26 }
0x2807   :  { %15135 = vmatmul.mubr.msk.f32.vlgmr.msra.gmra.mrb[50].mxu0 %vm334_vm2, %v14220_v15 }
0x2808   :  { %15830 = vmatpush3.bf16.msra.mxu0 %v16776_v2  ;;  %15145 = vmatprep.mubr.msk.f32.mxu0 %vm16396_vm1, %v16397_v26 }
0x2809   :  { %15831 = vmatprep.subr.bf16.mxu0 %v16395_v22 }
0x280c   :  { %15833 = vmatpush3.bf16.msra.mxu0 %v16783_v21 }
0x280d   :  { %15148 = vmatprep.subr.mxu0 %v16397_v26 }
0x280f   :  { %15146 = vmatmul.mubr.msk.f32.vlgmr.msra.gmra.mrb[52].mxu0 %vm107_vm0, %v5478_v19 }
0x2810   :  { %15150 = vmatprep.mubr.msk.f32.mxu0 %vm16396_vm1, %v16397_v26 }
0x2815   :  { %15149 = vmatpush3.xpose.msk.msra.mxu0 %vm107_vm0, %v17464_v50 }
0x2816   :  { %15158 = vmatprep.subr.mxu0 %v16397_v26 }
0x28da   :  { %v5671_v43 = vpop.f32.mrb[50].mxu0 }
0x28db   :  { %v15136_v4 = vpop.f32.mrb[51].mxu0  ;;  %v5672_v62 = vadd.f32 %v17394_v9, %v5671_v43 }
0x28e2   :  { %v5743_v5 = vpop.f32.mrb[52].mxu0 }
0x28e3   :  { %v5744_v27 = vadd.f32 %v17387_v25, %v5743_v5  ;;  %v15147_v13 = vpop.f32.mrb[53].mxu0 }
0x28e5   :  { %5755 = vrot.lane.b32.xlu1 %v5744_v27, %s16398_s2  ;;  %v5747_v0 = vadd.f32 %v5744_v27, %v5672_v62 }
0x28e7   :  { %v14223_v48 = vmul.f32 -1.442695, %v5747_v0 }
0x28e9   :  { %16070 = vpow2.f32 %v14223_v48 }
0x28f3   :  { %v16071_v18 = vpop.eup %16070 }
0x28f4   :  { %v5751_v24 = vadd.f32 1.0, %v16071_v18 }
0x28f6   :  { %16072 = vrcp.f32 %v5751_v24 }
0x2900   :  { %v16073_v8 = vpop.eup %16072 }
0x2901   :  { %v5765_v49 = vsub.f32 1.0, %v16073_v8  ;;  %v5771_v9 = vmul.f32 %v16073_v8, %v17400_v44 }
0x2957   :  { %v5756_v20 = vpop.permute.xlu1 %5755 }
0x2958   :  { %v5758_v57 = vmul.f32 %v16073_v8, %v5756_v20 }
0x295a   :  { %5760 = vrot.lane.b32.xlu0 %v5758_v57, %s16398_s2 }
0x29cc   :  { %v5761_v30 = vpop.permute.xlu0 %5760 }
0x29cd   :  { %v5763_v39 = vadd.f32 %v5761_v30, %v5672_v62 }
0x29cf   :  { %16074 = vtanh.f32 %v5763_v39 }
0x29d9   :  { %v16075_v25 = vpop.eup %16074 }
0x29da   :  { %5767 = vrot.lane.b32.xlu1 %v16075_v25, %s16399_s5 }
0x2a4c   :  { %v5768_v29 = vpop.permute.xlu1 %5767 }
0x2a4d   :  { %v5770_v16 = vmul.f32 %v5768_v29, %v5765_v49 }
0x2a4f   :  { %v17606_v55 = vadd.f32 %v5771_v9, %v5770_v16 }
0x2a51   :  { %v5774_v19 = vcombine.high %v17606_v55, %v17606_v55  ;;  %v5781_v23 = vrot.slane %v17606_v55, %v16802_v17 }
0x2a53   :  { %v5797_v33 = vrot.slane %v5781_v23, %v16802_v17  ;;  %v5789_v35 = vcombine.high %v5781_v23, %v5781_v23  ;;  %v5788_v56 = vrot.slane %v5774_v19, %v16802_v17 }
0x2a55   :  { %v5826_v40 = vrot.slane %v5797_v33, %v16812_v32  ;;  %v5811_v42 = vrot.slane %v5789_v35, %v16802_v17  ;;  %v5819_v63 = vcombine.high %v5797_v33, %v5797_v33  ;;  %v5790_v3 = vcombine.high %v5788_v56, %v5788_v56 }
0x2a56   :  { %v5804_v54 = vrot.slane %v5788_v56, %v16802_v17 }
0x2a57   :  { %5827 = vrot.lane.b32.xlu1 %v5826_v40, %s16399_s5  ;;  %v5904_v44 = vrot.slane %v5811_v42, %v16812_v32  ;;  %v5821_v41 = vcombine.high %v5811_v42, %v5811_v42  ;;  %v5982_v61 = vrot.slane %v5819_v63, %v16812_v32  ;;  %v5818_v53 = vrot.slane %v5790_v3, %v16802_v17 }
0x2a58   :  { %v6138_v60 = vrot.slane %v5804_v54, %v16812_v32  ;;  %v5820_v36 = vcombine.high %v5804_v54, %v5804_v54 }
0x2a59   :  { %5905 = vrot.lane.b32.xlu0 %v5904_v44, %s16399_s5  ;;  %v6060_v6 = vrot.slane %v5821_v41, %v16812_v32  ;;  %v6216_v11 = vrot.slane %v5818_v53, %v16812_v32  ;;  %v5822_v31 = vcombine.high %v5818_v53, %v5818_v53 }
0x2a5a   :  { %v6294_v58 = vrot.slane %v5820_v36, %v16812_v32 }
0x2a5b   :  { %5983 = vrot.lane.b32.xlu1 %v5982_v61, %s16399_s5  ;;  %v6372_v45 = vrot.slane %v5822_v31, %v16812_v32 }
0x2a5d   :  { %6061 = vrot.lane.b32.xlu0 %v6060_v6, %s16399_s5 }
0x2a5f   :  { %6139 = vrot.lane.b32.xlu1 %v6138_v60, %s16399_s5 }
0x2a61   :  { %6217 = vrot.lane.b32.xlu0 %v6216_v11, %s16399_s5 }
0x2a63   :  { %6295 = vrot.lane.b32.xlu1 %v6294_v58, %s16399_s5 }
0x2a65   :  { %6373 = vrot.lane.b32.xlu0 %v6372_v45, %s16399_s5 }
0x2ac9   :  { %v5828_v59 = vpop.permute.xlu1 %5827 }
0x2aca   :  { %15151 = vmatmul.mubr.msk.f32.vlgmr.msra.gmra.mrb[54].mxu0 %vm107_vm0, %v5828_v59 }
0x2acb   :  { %15159 = vmatpush3.xpose.msk.msra.mxu0 %vm107_vm0, %v17497_v14  ;;  %v5906_v15 = vpop.permute.xlu0 %5905  ;;  %15160 = vmatprep.mubr.msk.f32.mxu0 %vm16396_vm1, %v16397_v26 }
0x2acc   :  { %15156 = vmatmul.mubr.msk.f32.vlgmr.msra.gmra.mrb[54].mxu1 %vm107_vm0, %v5906_v15  ;;  %15168 = vmatprep.subr.mxu0 %v16397_v26 }
0x2acd   :  { %15164 = vmatpush3.xpose.msk.msra.mxu1 %vm107_vm0, %v17501_v12  ;;  %v5984_v43 = vpop.permute.xlu1 %5983  ;;  %15165 = vmatprep.mubr.msk.f32.mxu1 %vm16396_vm1, %v16397_v26 }
0x2ace   :  { %15161 = vmatmul.mubr.msk.f32.vlgmr.msra.gmra.mrb[56].mxu0 %vm107_vm0, %v5984_v43  ;;  %15173 = vmatprep.subr.mxu1 %v16397_v26 }
0x2acf   :  { %15169 = vmatpush3.xpose.msk.msra.mxu0 %vm107_vm0, %v17513_v10  ;;  %v6062_v4 = vpop.permute.xlu0 %6061  ;;  %15170 = vmatprep.mubr.msk.f32.mxu0 %vm16396_vm1, %v16397_v26 }
0x2ad0   :  { %15166 = vmatmul.mubr.msk.f32.vlgmr.msra.gmra.mrb[56].mxu1 %vm107_vm0, %v6062_v4  ;;  %15178 = vmatprep.subr.mxu0 %v16397_v26 }
0x2ad1   :  { %15174 = vmatpush3.xpose.msk.msra.mxu1 %vm107_vm0, %v17519_v37  ;;  %v6140_v5 = vpop.permute.xlu1 %6139  ;;  %15175 = vmatprep.mubr.msk.f32.mxu1 %vm16396_vm1, %v16397_v26 }
0x2ad2   :  { %15171 = vmatmul.mubr.msk.f32.vlgmr.msra.gmra.mrb[58].mxu0 %vm107_vm0, %v6140_v5  ;;  %15183 = vmatprep.subr.mxu1 %v16397_v26 }
0x2ad3   :  { %15179 = vmatpush3.xpose.msk.msra.mxu0 %vm107_vm0, %v17532_v46  ;;  %v6218_v27 = vpop.permute.xlu0 %6217  ;;  %15180 = vmatprep.mubr.msk.f32.mxu0 %vm16396_vm1, %v16397_v26 }
0x2ad4   :  { %15176 = vmatmul.mubr.msk.f32.vlgmr.msra.gmra.mrb[58].mxu1 %vm107_vm0, %v6218_v27  ;;  %15188 = vmatprep.subr.mxu0 %v16397_v26 }
0x2ad5   :  { %15184 = vmatpush3.xpose.msk.msra.mxu1 %vm107_vm0, %v17537_v1  ;;  %v6296_v13 = vpop.permute.xlu1 %6295  ;;  %15185 = vmatprep.mubr.msk.f32.mxu1 %vm16396_vm1, %v16397_v26 }
0x2ad6   :  { %15181 = vmatmul.mubr.msk.f32.vlgmr.msra.gmra.mrb[60].mxu0 %vm107_vm0, %v6296_v13  ;;  %15193 = vmatprep.subr.mxu1 %v16397_v26 }
0x2ad7   :  { %15189 = vmatpush3.msra.mxu0 %v17464_v50  ;;  %v6374_v62 = vpop.permute.xlu0 %6373  ;;  %15190 = vmatprep.mubr.msk.f32.mxu0 %vm16396_vm1, %v16397_v26 }
0x2ad8   :  { %15186 = vmatmul.mubr.msk.f32.vlgmr.msra.gmra.mrb[60].mxu1 %vm107_vm0, %v6374_v62  ;;  %15198 = vmatprep.subr.mxu0 %v16397_v26 }
0x2ad9   :  { %15194 = vmatpush3.msra.mxu1 %v17573_v52  ;;  %15195 = vmatprep.mubr.msk.f32.mxu1 %vm16396_vm1, %v16397_v26 }
0x2ada   :  { %15203 = vmatprep.subr.mxu1 %v16397_v26 }
0x2b9d   :  { %v5897_v0 = vpop.f32.mrb[54].mxu0 }
0x2b9e   :  { %v15152_v48 = vpop.f32.mrb[55].mxu0 }
0x2b9f   :  { %v5975_v18 = vpop.f32.mrb[54].mxu1 }
0x2ba0   :  { %v6455_v24 = vrot.slane %v5975_v18, 7  ;;  %v15157_v50 = vpop.f32.mrb[55].mxu1 }
0x2ba1   :  { %v6053_v8 = vpop.f32.mrb[56].mxu0 }
0x2ba2   :  { %v6456_v20 = vsel %vm3085_vm13, %v6455_v24, %v5897_v0  ;;  %v6457_v57 = vrot.slane %v6053_v8, 6  ;;  %v15162_v30 = vpop.f32.mrb[57].mxu0 }
0x2ba3   :  { %v6131_v39 = vpop.f32.mrb[56].mxu1 }
0x2ba4   :  { %v6458_v25 = vsel %vm3088_vm14, %v6457_v57, %v6456_v20  ;;  %v6459_v49 = vrot.slane %v6131_v39, 5  ;;  %v15167_v29 = vpop.f32.mrb[57].mxu1 }
0x2ba5   :  { %v6209_v9 = vpop.f32.mrb[58].mxu0 }
0x2ba6   :  { %v6460_v16 = vsel %vm3091_vm15, %v6459_v49, %v6458_v25  ;;  %v6461_v19 = vrot.slane %v6209_v9, 4  ;;  %v15172_v23 = vpop.f32.mrb[59].mxu0 }
0x2ba7   :  { %v6287_v33 = vpop.f32.mrb[58].mxu1 }
0x2ba8   :  { %v6462_v35 = vsel %vm3094_vm3, %v6461_v19, %v6460_v16  ;;  %v6463_v56 = vrot.slane %v6287_v33, 3  ;;  %v15177_v40 = vpop.f32.mrb[59].mxu1 }
0x2ba9   :  { %v6365_v42 = vpop.f32.mrb[60].mxu0 }
0x2baa   :  { %v6464_v63 = vsel %vm3097_vm4, %v6463_v56, %v6462_v35  ;;  %v6465_v44 = vrot.slane %v6365_v42, 2  ;;  %v15182_v41 = vpop.f32.mrb[61].mxu0 }
0x2bab   :  { %v6443_v3 = vpop.f32.mrb[60].mxu1 }
0x2bac   :  { %v6467_v61 = vrot.slane %v6443_v3, 1  ;;  %v15187_v54 = vpop.f32.mrb[61].mxu1  ;;  %v6466_v6 = vsel %vm3100_vm5, %v6465_v44, %v6464_v63 }
0x2bae   :  { %v6468_v53 = vsel %vm3103_vm6, %v6467_v61, %v6466_v6 }
0x2baf   :  { %v6470_v60 = vsel %vm3106_vm7, %v6468_v53, -inf }
0x2bb0   :  { %6471 = vmax.xlane.f32.xlu1 %v6470_v60 }
0x2c3d   :  { %v6472_v36 = vpop.xlane.xlu1 %6471 }
0x2c3e   :  { %v6474_v11 = vrot.slane %v6472_v36, 1  ;;  %v6475_v31 = vrot.slane %v6472_v36, 2  ;;  %v6476_v58 = vrot.slane %v6472_v36, 3  ;;  %v6477_v45 = vrot.slane %v6472_v36, 4 }
0x2c3f   :  { %v6478_v59 = vrot.slane %v6472_v36, 5  ;;  %v6479_v15 = vrot.slane %v6472_v36, 6  ;;  %v6480_v43 = vrot.slane %v6472_v36, 7  ;;  %v6489_v4 = vsub.f32 %v5897_v0, %v6472_v36 }
0x2c40   :  { %v6490_v5 = vsub.f32 %v5975_v18, %v6474_v11  ;;  %v6491_v27 = vsub.f32 %v6053_v8, %v6475_v31  ;;  %v6492_v13 = vsub.f32 %v6131_v39, %v6476_v58  ;;  %v6493_v62 = vsub.f32 %v6209_v9, %v6477_v45 }
0x2c41   :  { %v6494_v48 = vsub.f32 %v6287_v33, %v6478_v59  ;;  %v6497_v24 = vmul.f32 1.442695, %v6489_v4  ;;  %v6495_v50 = vsub.f32 %v6365_v42, %v6479_v15  ;;  %v6496_v25 = vsub.f32 %v6443_v3, %v6480_v43 }
0x2c42   :  { %v6499_v20 = vmul.f32 1.442695, %v6490_v5  ;;  %v6501_v57 = vmul.f32 1.442695, %v6491_v27  ;;  %v6503_v30 = vmul.f32 1.442695, %v6492_v13 }
0x2c43   :  { %16076 = vpow2.f32 %v6497_v24  ;;  %v6505_v49 = vmul.f32 1.442695, %v6493_v62  ;;  %v6507_v29 = vmul.f32 1.442695, %v6494_v48  ;;  %v6509_v16 = vmul.f32 1.442695, %v6495_v50 }
0x2c44   :  { %16078 = vpow2.f32 %v6499_v20  ;;  %v6511_v19 = vmul.f32 1.442695, %v6496_v25 }
0x2c45   :  { %16080 = vpow2.f32 %v6501_v57 }
0x2c46   :  { %16082 = vpow2.f32 %v6503_v30 }
0x2c47   :  { %16084 = vpow2.f32 %v6505_v49 }
0x2c48   :  { %16086 = vpow2.f32 %v6507_v29 }
0x2c49   :  { %16088 = vpow2.f32 %v6509_v16 }
0x2c4a   :  { %16090 = vpow2.f32 %v6511_v19 }
0x2c4d   :  { %v16077_v0 = vpop.eup %16076 }
0x2c4e   :  { %v16079_v18 = vpop.eup %16078 }
0x2c4f   :  { %v16081_v8 = vpop.eup %16080  ;;  %v6521_v39 = vrot.slane %v16079_v18, 7 }
0x2c50   :  { %v16083_v9 = vpop.eup %16082  ;;  %v6523_v23 = vrot.slane %v16081_v8, 6 }
0x2c51   :  { %v16085_v33 = vpop.eup %16084  ;;  %v6522_v35 = vsel %vm3085_vm13, %v6521_v39, %v16077_v0  ;;  %v6525_v56 = vrot.slane %v16083_v9, 5 }
0x2c52   :  { %v16087_v40 = vpop.eup %16086  ;;  %v6524_v42 = vsel %vm3088_vm14, %v6523_v23, %v6522_v35  ;;  %v6527_v63 = vrot.slane %v16085_v33, 4 }
0x2c53   :  { %v16089_v44 = vpop.eup %16088  ;;  %v6526_v41 = vsel %vm3091_vm15, %v6525_v56, %v6524_v42  ;;  %v6529_v3 = vrot.slane %v16087_v40, 3 }
0x2c54   :  { %v16091_v61 = vpop.eup %16090  ;;  %v6528_v54 = vsel %vm3094_vm3, %v6527_v63, %v6526_v41  ;;  %v6531_v6 = vrot.slane %v16089_v44, 2 }
0x2c55   :  { %v6530_v53 = vsel %vm3097_vm4, %v6529_v3, %v6528_v54  ;;  %v6533_v60 = vrot.slane %v16091_v61, 1 }
0x2c56   :  { %v6532_v36 = vsel %vm3100_vm5, %v6531_v6, %v6530_v53 }
0x2c57   :  { %v6534_v11 = vsel %vm3103_vm6, %v6533_v60, %v6532_v36 }
0x2c58   :  { %v6536_v31 = vsel %vm3106_vm7, %v6534_v11, 0.0 }
0x2c59   :  { %6537 = vadd.xlane.f32.xlu0 %v6536_v31 }
0x2c6f   :  { %7155 = vrot.lane.b32.xlu0 %v17606_v55, %s16399_s5 }
0x2ce6   :  { %v6538_v58 = vpop.xlane.xlu0 %6537 }
0x2ce7   :  { %v6540_v45 = vrot.slane %v6538_v58, 1  ;;  %v6541_v59 = vrot.slane %v6538_v58, 2  ;;  %v6542_v15 = vrot.slane %v6538_v58, 3  ;;  %v6543_v43 = vrot.slane %v6538_v58, 4 }
0x2ce8   :  { %16092 = vrcp.f32 %v6538_v58  ;;  %v6544_v4 = vrot.slane %v6538_v58, 5  ;;  %v6545_v5 = vrot.slane %v6538_v58, 6  ;;  %v6546_v27 = vrot.slane %v6538_v58, 7 }
0x2ce9   :  { %16094 = vrcp.f32 %v6540_v45 }
0x2cea   :  { %16096 = vrcp.f32 %v6541_v59 }
0x2ceb   :  { %16098 = vrcp.f32 %v6542_v15 }
0x2cec   :  { %16100 = vrcp.f32 %v6543_v43 }
0x2ced   :  { %16102 = vrcp.f32 %v6544_v4 }
0x2cee   :  { %16104 = vrcp.f32 %v6545_v5 }
0x2cef   :  { %16106 = vrcp.f32 %v6546_v27 }
0x2cf2   :  { %v16093_v13 = vpop.eup %16092 }
0x2cf3   :  { %v16095_v62 = vpop.eup %16094  ;;  %v6556_v48 = vmul.f32 %v16093_v13, %v16077_v0 }
0x2cf4   :  { %v16097_v24 = vpop.eup %16096  ;;  %v6558_v50 = vmul.f32 %v16095_v62, %v16079_v18 }
0x2cf5   :  { %v16099_v20 = vpop.eup %16098  ;;  %15191 = vmatmul.mubr.msk.f32.vlgmr.msra.gmra.mrb[62].mxu0 %vm3106_vm7, %v6556_v48  ;;  %v6560_v57 = vmul.f32 %v16097_v24, %v16081_v8 }
0x2cf6   :  { %v16101_v30 = vpop.eup %16100  ;;  %15199 = vmatpush3.msra.mxu0 %v17497_v14  ;;  %15196 = vmatmul.mubr.msk.f32.vlgmr.msra.gmra.mrb[62].mxu1 %vm3106_vm7, %v6558_v50  ;;  %v14004_v25 = vrot.slane %v6558_v50, 7  ;;  %v6562_v49 = vmul.f32 %v16099_v20, %v16083_v9 }
0x2cf7   :  { %v16103_v29 = vpop.eup %16102  ;;  %15204 = vmatpush3.msra.mxu1 %v17501_v12  ;;  %15200 = vmatprep.mubr.msk.f32.mxu0 %vm16396_vm1, %v16397_v26  ;;  %v14006_v16 = vrot.slane %v6560_v57, 6  ;;  %v6564_v19 = vmul.f32 %v16101_v30, %v16085_v33 }
0x2cf8   :  { %v16105_v0 = vpop.eup %16104  ;;  %v14005_v18 = vsel %vm3085_vm13, %v14004_v25, %v6556_v48  ;;  %15208 = vmatprep.subr.mxu0 %v16397_v26  ;;  %15205 = vmatprep.mubr.msk.f32.mxu1 %vm16396_vm1, %v16397_v26  ;;  %v14008_v14 = vrot.slane %v6562_v49, 5  ;;  %v6566_v8 = vmul.f32 %v16103_v29, %v16087_v40  ;;  %v7156_v29 = vpop.permute.xlu0 %7155 }
0x2cf9   :  { %v16107_v39 = vpop.eup %16106  ;;  %15201 = vmatmul.mubr.msk.f32.vlgmr.msra.gmra.mrb[64].mxu0 %vm3106_vm7, %v6560_v57  ;;  %v14007_v12 = vsel %vm3088_vm14, %v14006_v16, %v14005_v18  ;;  %15213 = vmatprep.subr.mxu1 %v16397_v26  ;;  %v14010_v9 = vrot.slane %v6564_v19, 4  ;;  %v6568_v23 = vmul.f32 %v16105_v0, %v16089_v44  ;;  %v17769_v18 = vld [vmem:[%s18609_s12] ss:$0 sm:$0xff] }
0x2cfa   :  { %15209 = vmatpush3.msra.mxu0 %v17513_v10  ;;  %15206 = vmatmul.mubr.msk.f32.vlgmr.msra.gmra.mrb[64].mxu1 %vm3106_vm7, %v6562_v49  ;;  %v14009_v33 = vsel %vm3091_vm15, %v14008_v14, %v14007_v12  ;;  %v14012_v35 = vrot.slane %v6566_v8, 3  ;;  %v6570_v56 = vmul.f32 %v16107_v39, %v16091_v61 }
0x2cfb   :  { %15214 = vmatpush3.msra.mxu1 %v17519_v37  ;;  %15210 = vmatprep.mubr.msk.f32.mxu0 %vm16396_vm1, %v16397_v26  ;;  %v14011_v40 = vsel %vm3094_vm3, %v14010_v9, %v14009_v33  ;;  %v14014_v42 = vrot.slane %v6568_v23, 2 }
0x2cfc   :  { %15218 = vmatprep.subr.mxu0 %v16397_v26  ;;  %15215 = vmatprep.mubr.msk.f32.mxu1 %vm16396_vm1, %v16397_v26  ;;  %v14013_v10 = vsel %vm3097_vm4, %v14012_v35, %v14011_v40  ;;  %v14016_v63 = vrot.slane %v6570_v56, 1 }
0x2cfd   :  { %15211 = vmatmul.mubr.msk.f32.vlgmr.msra.gmra.mrb[66].mxu0 %vm3106_vm7, %v6564_v19  ;;  %15223 = vmatprep.subr.mxu1 %v16397_v26  ;;  %v14015_v37 = vsel %vm3100_vm5, %v14014_v42, %v14013_v10 }
0x2cfe   :  { %15219 = vmatpush3.msra.mxu0 %v17532_v46  ;;  %15216 = vmatmul.mubr.msk.f32.vlgmr.msra.gmra.mrb[66].mxu1 %vm3106_vm7, %v6566_v8  ;;  %v14017_v44 = vsel %vm3103_vm6, %v14016_v63, %v14015_v37 }
0x2cff   :  { %15224 = vmatpush3.msra.mxu1 %v17537_v1  ;;  %15220 = vmatprep.mubr.msk.f32.mxu0 %vm16396_vm1, %v16397_v26  ;;  %14083 = vst.msk [vmem:[#allocation9 + $0x10] sm:$0xff] %vm3106_vm7, %v14017_v44 }
0x2d00   :  { %15225 = vmatprep.mubr.msk.f32.mxu1 %vm16396_vm1, %v16397_v26  ;;  %15846 = vmatprep.subr.bf16.mxu1 %v16395_v22 }
0x2d01   :  { %15221 = vmatmul.mubr.msk.f32.vlgmr.msra.gmra.mrb[68].mxu0 %vm3106_vm7, %v6568_v23  ;;  %15834 = vmatprep.subr.bf16.mxu0 %v16395_v22 }
0x2d02   :  { %15226 = vmatmul.mubr.msk.f32.vlgmr.msra.gmra.mrb[68].mxu1 %vm3106_vm7, %v6570_v56  ;;  %15836 = vmatpush3.bf16.msra.mxu0 %v17313_v34 }
0x2d03   :  { %15848 = vmatpush3.bf16.msra.mxu1 %v16587_v38  ;;  %15837 = vmatprep.subr.bf16.mxu0 %v16395_v22 }
0x2d04   :  { %15244 = vmatprep.mubr.msk.f32.mxu0 %vm16396_vm1, %v16397_v26  ;;  %15251 = vmatprep.mubr.msk.f32.mxu1 %vm16396_vm1, %v16397_v26 }
0x2d05   :  { %15849 = vmatprep.subr.bf16.mxu1 %v16395_v22 }
0x2d06   :  { %15839 = vmatpush3.bf16.msra.mxu0 %v17319_v51 }
0x2d07   :  { %15840 = vmatprep.subr.bf16.mxu0 %v16395_v22 }
0x2d0a   :  { %15842 = vmatpush3.bf16.msra.mxu0 %v17329_v47 }
0x2d0b   :  { %15843 = vmatprep.subr.bf16.mxu0 %v16395_v22 }
0x2d0e   :  { %15845 = vmatpush3.bf16.msra.mxu0 %v17339_v7 }
0x2d0f   :  { %15270 = vmatprep.subr.mxu0 %v16397_v26 }
0x2dc8   :  { %v6640_v46 = vpop.f32.mrb[62].mxu0 }
0x2dc9   :  { %v15192_v1 = vpop.f32.mrb[63].mxu0  ;;  %v6713_v41 = vpop.f32.mrb[62].mxu1 }
0x2dca   :  { %v7166_v3 = vrot.slane %v6713_v41, 7  ;;  %v15197_v61 = vpop.f32.mrb[63].mxu1 }
0x2dcc   :  { %v7167_v54 = vsel %vm3085_vm13, %v7166_v3, %v6640_v46  ;;  %v6786_v6 = vpop.f32.mrb[64].mxu0  ;;  %v17788_v3 = vld [vmem:[#allocation2] sm:$0xff] }
0x2dcd   :  { %v7168_v53 = vrot.slane %v6786_v6, 6  ;;  %v15202_v60 = vpop.f32.mrb[65].mxu0  ;;  %v6859_v36 = vpop.f32.mrb[64].mxu1 }
0x2dce   :  { %v7170_v11 = vrot.slane %v6859_v36, 5  ;;  %v15207_v31 = vpop.f32.mrb[65].mxu1 }
0x2dcf   :  { %v7169_v58 = vsel %vm3088_vm14, %v7168_v53, %v7167_v54  ;;  %v17796_v53 = vld [vmem:[%s18607_s10] ss:$0 sm:$0xff] }
0x2dd0   :  { %v7171_v45 = vsel %vm3091_vm15, %v7170_v11, %v7169_v58  ;;  %v6932_v59 = vpop.f32.mrb[66].mxu0  ;;  %v17803_v11 = vld [vmem:[%s18606_s9] ss:$0 sm:$0xff] }
0x2dd1   :  { %v7172_v15 = vrot.slane %v6932_v59, 4  ;;  %v15212_v43 = vpop.f32.mrb[67].mxu0  ;;  %v7005_v4 = vpop.f32.mrb[66].mxu1 }
0x2dd2   :  { %v7174_v5 = vrot.slane %v7005_v4, 3  ;;  %v15217_v27 = vpop.f32.mrb[67].mxu1 }
0x2dd3   :  { %v7173_v13 = vsel %vm3094_vm3, %v7172_v15, %v7171_v45 }
0x2dd4   :  { %v7175_v62 = vsel %vm3097_vm4, %v7174_v5, %v7173_v13  ;;  %v7078_v48 = vpop.f32.mrb[68].mxu0 }
0x2dd5   :  { %v7176_v24 = vrot.slane %v7078_v48, 2  ;;  %v15222_v50 = vpop.f32.mrb[69].mxu0  ;;  %v7151_v20 = vpop.f32.mrb[68].mxu1 }
0x2dd6   :  { %v7178_v57 = vrot.slane %v7151_v20, 1  ;;  %v15227_v30 = vpop.f32.mrb[69].mxu1 }
0x2dd7   :  { %v7177_v25 = vsel %vm3100_vm5, %v7176_v24, %v7175_v62 }
0x2dd8   :  { %v7179_v49 = vsel %vm3103_vm6, %v7178_v57, %v7177_v25 }
0x2dd9   :  { %7180 = vrot.lane.b32.xlu1 %v7179_v49, %s16401_s11 }
0x2e4b   :  { %v7181_v16 = vpop.permute.xlu1 %7180 }
0x2e4c   :  { %v7183_v19 = vsel %vm107_vm0, %v7156_v29, %v7181_v16 }
0x2e4d   :  { %15245 = vmatmul.mubr.msk.f32.vlgmr.msra.gmra.mrb[70].mxu0 %vm3827_vm8, %v7183_v19 }
0x2e4e   :  { %15271 = vmatpush3.xpose.msk.msra.mxu0 %vm107_vm0, %v17573_v52  ;;  %15272 = vmatprep.mubr.msk.f32.mxu0 %vm16396_vm1, %v16397_v26 }
0x2e4f   :  { %15280 = vmatprep.subr.mxu0 %v16397_v26 }
0x2f20   :  { %v7253_v0 = vpop.f32.mrb[70].mxu0 }
0x2f21   :  { %v7254_v14 = vadd.f32 %v17769_v18, %v7253_v0  ;;  %v15246_v8 = vpop.f32.mrb[71].mxu0 }
0x2f23   :  { %13971 = vst.msk [vmem:[#allocation8 + $0x10] sm:$0xff] %vm334_vm2, %v7254_v14  ;;  %v7257_v39 = vsel %vm334_vm2, %v7254_v14, -inf }
0x2f24   :  { %7258 = vmax.xlane.f32.xlu1 %v7257_v39 }
0x2fb1   :  { %v7259_v12 = vpop.xlane.xlu1 %7258 }
0x2fb2   :  { %vm7260_vm11 = vcmp.eq.f32.partialorder %v7254_v14, %v7259_v12 }
0x2fb3   :  { %v7261_v9 = vsel %vm7260_vm11, %v16577_v28, 16 }
0x2fb4   :  { %v7262_v23 = vsel %vm334_vm2, %v7261_v9, 2147483647 }
0x2fb5   :  { %v7264_v33 = vshra.s32 %v7262_v23, 16  ;;  %v7263_v56 = vand.u32 65535, %v7262_v23 }
0x2fb7   :  { %v7266_v35 = vcvt.s32.f32 %v7264_v33  ;;  %v7265_v42 = vcvt.s32.f32 %v7263_v56 }
0x2fb9   :  { %7267 = vmin.xlane.f32.xlu0 %v7266_v35 }
0x3046   :  { %v7268_v40 = vpop.xlane.xlu0 %7267 }
0x3047   :  { %vm7269_vm12 = vcmp.eq.f32.partialorder %v7266_v35, %v7268_v40  ;;  %v7274_v63 = vcvt.f32.s32 %v7268_v40 }
0x3048   :  { %v7270_v10 = vsel %vm7269_vm12, %v7265_v42, inf }
0x3049   :  { %7271 = vmin.xlane.f32.xlu0 %v7270_v10  ;;  %v7275_v44 = vshll.u32 %v7274_v63, 16 }
0x30d6   :  { %v7272_v37 = vpop.xlane.xlu0 %7271 }
0x30d7   :  { %v7273_v46 = vcvt.f32.s32 %v7272_v37 }
0x30d9   :  { %v7276_v1 = vadd.s32 %v7275_v44, %v7273_v46  ;;  %v17837_v44 = vld [vmem:[#allocation2 + $0x10] sm:$0xff] }
0x30db   :  { %vm7277_vm9 = vcmp.eq.s32.totalorder %v16577_v28, %v7276_v1  ;;  %v17845_v1 = vld [vmem:[#allocation2 + $0x18] sm:$0xff] }
0x30dc   :  { %v14249_v41 = vsel %vm7277_vm9, 1.0, %v16397_v26 }
0x30dd   :  { %15252 = vmatmul.mubr.msk.f32.vlgmr.msra.gmra.mrb[70].mxu1 %vm334_vm2, %v14249_v41 }
0x30de   :  { %15851 = vmatpush3.bf16.msra.mxu1 %v16776_v2  ;;  %15262 = vmatprep.mubr.msk.f32.mxu1 %vm16396_vm1, %v16397_v26 }
0x30df   :  { %15852 = vmatprep.subr.bf16.mxu1 %v16395_v22 }
0x30e2   :  { %15854 = vmatpush3.bf16.msra.mxu1 %v16783_v21 }
0x30e3   :  { %15265 = vmatprep.subr.mxu1 %v16397_v26 }
0x30e5   :  { %15263 = vmatmul.mubr.msk.f32.vlgmr.msra.gmra.mrb[72].mxu1 %vm107_vm0, %v7156_v29 }
0x30e6   :  { %15267 = vmatprep.mubr.msk.f32.mxu1 %vm16396_vm1, %v16397_v26 }
0x30eb   :  { %15266 = vmatpush3.xpose.msk.msra.mxu1 %vm107_vm0, %v17788_v3 }
0x30ec   :  { %15275 = vmatprep.subr.mxu1 %v16397_v26 }
0x31b0   :  { %v7349_v61 = vpop.f32.mrb[70].mxu1 }
0x31b1   :  { %v15253_v54 = vpop.f32.mrb[71].mxu1  ;;  %v7350_v31 = vadd.f32 %v17803_v11, %v7349_v61  ;;  %v17853_v61 = vld [vmem:[#allocation2 + $0x20] sm:$0xff] }
0x31b8   :  { %v7421_v6 = vpop.f32.mrb[72].mxu1 }
0x31b9   :  { %v7422_v60 = vadd.f32 %v17796_v53, %v7421_v6  ;;  %v15264_v36 = vpop.f32.mrb[73].mxu1  ;;  %v17861_v6 = vld [vmem:[#allocation2 + $0x28] sm:$0xff] }
0x31ba   :  { %v17869_v36 = vld [vmem:[#allocation2 + $0x30] sm:$0xff] }
0x31bb   :  { %7433 = vrot.lane.b32.xlu1 %v7422_v60, %s16398_s2  ;;  %v7425_v58 = vadd.f32 %v7422_v60, %v7350_v31 }
0x31bd   :  { %v14252_v45 = vmul.f32 -1.442695, %v7425_v58  ;;  %v17877_v58 = vld [vmem:[#allocation2 + $0x38] sm:$0xff] }
0x31bf   :  { %16108 = vpow2.f32 %v14252_v45 }
0x31c9   :  { %v16109_v59 = vpop.eup %16108 }
0x31ca   :  { %v7429_v15 = vadd.f32 1.0, %v16109_v59 }
0x31cc   :  { %16110 = vrcp.f32 %v7429_v15 }
0x31d6   :  { %v16111_v43 = vpop.eup %16110 }
0x31d7   :  { %v7443_v48 = vsub.f32 1.0, %v16111_v43  ;;  %v7449_v50 = vmul.f32 %v16111_v43, %v17606_v55 }
0x322d   :  { %v7434_v4 = vpop.permute.xlu1 %7433 }
0x322e   :  { %v7436_v5 = vmul.f32 %v16111_v43, %v7434_v4 }
0x3230   :  { %7438 = vrot.lane.b32.xlu0 %v7436_v5, %s16398_s2 }
0x32a2   :  { %v7439_v27 = vpop.permute.xlu0 %7438 }
0x32a3   :  { %v7441_v13 = vadd.f32 %v7439_v27, %v7350_v31 }
0x32a5   :  { %16112 = vtanh.f32 %v7441_v13 }
0x32af   :  { %v16113_v62 = vpop.eup %16112 }
0x32b0   :  { %7445 = vrot.lane.b32.xlu1 %v16113_v62, %s16399_s5 }
0x3322   :  { %v7446_v24 = vpop.permute.xlu1 %7445 }
0x3323   :  { %v7448_v20 = vmul.f32 %v7446_v24, %v7443_v48 }
0x3325   :  { %v17809_v57 = vadd.f32 %v7449_v50, %v7448_v20 }
0x3327   :  { %v7452_v30 = vcombine.high %v17809_v57, %v17809_v57  ;;  %v7459_v25 = vrot.slane %v17809_v57, %v16802_v17 }
0x3329   :  { %v7475_v49 = vrot.slane %v7459_v25, %v16802_v17  ;;  %v7467_v29 = vcombine.high %v7459_v25, %v7459_v25  ;;  %v7466_v16 = vrot.slane %v7452_v30, %v16802_v17 }
0x332b   :  { %v7504_v19 = vrot.slane %v7475_v49, %v16812_v32  ;;  %v7489_v0 = vrot.slane %v7467_v29, %v16802_v17  ;;  %v7497_v14 = vcombine.high %v7475_v49, %v7475_v49  ;;  %v7468_v39 = vcombine.high %v7466_v16, %v7466_v16 }
0x332c   :  { %v7482_v9 = vrot.slane %v7466_v16, %v16802_v17 }
0x332d   :  { %7505 = vrot.lane.b32.xlu1 %v7504_v19, %s16399_s5  ;;  %v7582_v55 = vrot.slane %v7489_v0, %v16812_v32  ;;  %v7499_v8 = vcombine.high %v7489_v0, %v7489_v0  ;;  %v7660_v12 = vrot.slane %v7497_v14, %v16812_v32  ;;  %v7496_v33 = vrot.slane %v7468_v39, %v16802_v17 }
0x332e   :  { %v7816_v35 = vrot.slane %v7482_v9, %v16812_v32  ;;  %v7498_v56 = vcombine.high %v7482_v9, %v7482_v9 }
0x332f   :  { %7583 = vrot.lane.b32.xlu0 %v7582_v55, %s16399_s5  ;;  %v7738_v23 = vrot.slane %v7499_v8, %v16812_v32  ;;  %v7894_v40 = vrot.slane %v7496_v33, %v16812_v32  ;;  %v7500_v42 = vcombine.high %v7496_v33, %v7496_v33 }
0x3330   :  { %v7972_v10 = vrot.slane %v7498_v56, %v16812_v32 }
0x3331   :  { %7661 = vrot.lane.b32.xlu1 %v7660_v12, %s16399_s5  ;;  %v8050_v63 = vrot.slane %v7500_v42, %v16812_v32 }
0x3333   :  { %7739 = vrot.lane.b32.xlu0 %v7738_v23, %s16399_s5 }
0x3335   :  { %7817 = vrot.lane.b32.xlu1 %v7816_v35, %s16399_s5 }
0x3337   :  { %7895 = vrot.lane.b32.xlu0 %v7894_v40, %s16399_s5 }
0x3339   :  { %7973 = vrot.lane.b32.xlu1 %v7972_v10, %s16399_s5 }
0x333b   :  { %8051 = vrot.lane.b32.xlu0 %v8050_v63, %s16399_s5 }
0x339f   :  { %v7506_v37 = vpop.permute.xlu1 %7505 }
0x33a0   :  { %15268 = vmatmul.mubr.msk.f32.vlgmr.msra.gmra.mrb[74].mxu1 %vm107_vm0, %v7506_v37 }
0x33a1   :  { %15276 = vmatpush3.xpose.msk.msra.mxu1 %vm107_vm0, %v17837_v44  ;;  %v7584_v46 = vpop.permute.xlu0 %7583  ;;  %15277 = vmatprep.mubr.msk.f32.mxu1 %vm16396_vm1, %v16397_v26 }
0x33a2   :  { %15273 = vmatmul.mubr.msk.f32.vlgmr.msra.gmra.mrb[72].mxu0 %vm107_vm0, %v7584_v46  ;;  %15285 = vmatprep.subr.mxu1 %v16397_v26 }
0x33a3   :  { %15281 = vmatpush3.xpose.msk.msra.mxu0 %vm107_vm0, %v17845_v1  ;;  %v7662_v41 = vpop.permute.xlu1 %7661  ;;  %15282 = vmatprep.mubr.msk.f32.mxu0 %vm16396_vm1, %v16397_v26 }
0x33a4   :  { %15278 = vmatmul.mubr.msk.f32.vlgmr.msra.gmra.mrb[76].mxu1 %vm107_vm0, %v7662_v41  ;;  %15290 = vmatprep.subr.mxu0 %v16397_v26 }
0x33a5   :  { %15286 = vmatpush3.xpose.msk.msra.mxu1 %vm107_vm0, %v17853_v61  ;;  %v7740_v54 = vpop.permute.xlu0 %7739  ;;  %15287 = vmatprep.mubr.msk.f32.mxu1 %vm16396_vm1, %v16397_v26 }
0x33a6   :  { %15283 = vmatmul.mubr.msk.f32.vlgmr.msra.gmra.mrb[74].mxu0 %vm107_vm0, %v7740_v54  ;;  %15295 = vmatprep.subr.mxu1 %v16397_v26 }
0x33a7   :  { %15291 = vmatpush3.xpose.msk.msra.mxu0 %vm107_vm0, %v17861_v6  ;;  %v7818_v60 = vpop.permute.xlu1 %7817  ;;  %15292 = vmatprep.mubr.msk.f32.mxu0 %vm16396_vm1, %v16397_v26 }
0x33a8   :  { %15288 = vmatmul.mubr.msk.f32.vlgmr.msra.gmra.mrb[78].mxu1 %vm107_vm0, %v7818_v60  ;;  %15300 = vmatprep.subr.mxu0 %v16397_v26 }
0x33a9   :  { %15296 = vmatpush3.xpose.msk.msra.mxu1 %vm107_vm0, %v17869_v36  ;;  %v7896_v31 = vpop.permute.xlu0 %7895  ;;  %15297 = vmatprep.mubr.msk.f32.mxu1 %vm16396_vm1, %v16397_v26 }
0x33aa   :  { %15293 = vmatmul.mubr.msk.f32.vlgmr.msra.gmra.mrb[76].mxu0 %vm107_vm0, %v7896_v31  ;;  %15305 = vmatprep.subr.mxu1 %v16397_v26 }
0x33ab   :  { %15301 = vmatpush3.xpose.msk.msra.mxu0 %vm107_vm0, %v17877_v58  ;;  %v7974_v45 = vpop.permute.xlu1 %7973  ;;  %15302 = vmatprep.mubr.msk.f32.mxu0 %vm16396_vm1, %v16397_v26 }
0x33ac   :  { %15298 = vmatmul.mubr.msk.f32.vlgmr.msra.gmra.mrb[80].mxu1 %vm107_vm0, %v7974_v45  ;;  %15310 = vmatprep.subr.mxu0 %v16397_v26 }
0x33ad   :  { %15306 = vmatpush3.msra.mxu1 %v17788_v3  ;;  %v8052_v59 = vpop.permute.xlu0 %8051  ;;  %15307 = vmatprep.mubr.msk.f32.mxu1 %vm16396_vm1, %v16397_v26 }
0x33ae   :  { %15303 = vmatmul.mubr.msk.f32.vlgmr.msra.gmra.mrb[78].mxu0 %vm107_vm0, %v8052_v59  ;;  %15315 = vmatprep.subr.mxu1 %v16397_v26 }
0x33af   :  { %15311 = vmatpush3.msra.mxu0 %v17573_v52  ;;  %15312 = vmatprep.mubr.msk.f32.mxu0 %vm16396_vm1, %v16397_v26 }
0x33b0   :  { %15320 = vmatprep.subr.mxu0 %v16397_v26 }
0x3473   :  { %v7575_v15 = vpop.f32.mrb[74].mxu1 }
0x3474   :  { %v15269_v43 = vpop.f32.mrb[75].mxu1 }
0x3475   :  { %v7653_v4 = vpop.f32.mrb[72].mxu0 }
0x3476   :  { %v8133_v5 = vrot.slane %v7653_v4, 7  ;;  %v15274_v27 = vpop.f32.mrb[73].mxu0 }
0x3477   :  { %v7731_v13 = vpop.f32.mrb[76].mxu1 }
0x3478   :  { %v8134_v62 = vsel %vm3085_vm13, %v8133_v5, %v7575_v15  ;;  %v8135_v48 = vrot.slane %v7731_v13, 6  ;;  %v15279_v24 = vpop.f32.mrb[77].mxu1 }
0x3479   :  { %v7809_v50 = vpop.f32.mrb[74].mxu0 }
0x347a   :  { %v8136_v20 = vsel %vm3088_vm14, %v8135_v48, %v8134_v62  ;;  %v8137_v30 = vrot.slane %v7809_v50, 5  ;;  %v15284_v52 = vpop.f32.mrb[75].mxu0 }
0x347b   :  { %v7887_v25 = vpop.f32.mrb[78].mxu1 }
0x347c   :  { %v8138_v49 = vsel %vm3091_vm15, %v8137_v30, %v8136_v20  ;;  %v8139_v29 = vrot.slane %v7887_v25, 4  ;;  %v15289_v16 = vpop.f32.mrb[79].mxu1 }
0x347d   :  { %v7965_v19 = vpop.f32.mrb[76].mxu0 }
0x347e   :  { %v8140_v0 = vsel %vm3094_vm3, %v8139_v29, %v8138_v49  ;;  %v8141_v14 = vrot.slane %v7965_v19, 3  ;;  %v15294_v55 = vpop.f32.mrb[77].mxu0 }
0x347f   :  { %v8043_v8 = vpop.f32.mrb[80].mxu1 }
0x3480   :  { %v8142_v39 = vsel %vm3097_vm4, %v8141_v14, %v8140_v0  ;;  %v8143_v12 = vrot.slane %v8043_v8, 2  ;;  %v15299_v9 = vpop.f32.mrb[81].mxu1 }
0x3481   :  { %v8121_v23 = vpop.f32.mrb[78].mxu0 }
0x3482   :  { %v8145_v33 = vrot.slane %v8121_v23, 1  ;;  %v15304_v35 = vpop.f32.mrb[79].mxu0  ;;  %v8144_v56 = vsel %vm3100_vm5, %v8143_v12, %v8142_v39 }
0x3484   :  { %v8146_v40 = vsel %vm3103_vm6, %v8145_v33, %v8144_v56 }
0x3485   :  { %v8148_v42 = vsel %vm3106_vm7, %v8146_v40, -inf }
0x3486   :  { %8149 = vmax.xlane.f32.xlu1 %v8148_v42 }
0x3513   :  { %v8150_v10 = vpop.xlane.xlu1 %8149 }
0x3514   :  { %v8152_v63 = vrot.slane %v8150_v10, 1  ;;  %v8153_v37 = vrot.slane %v8150_v10, 2  ;;  %v8154_v46 = vrot.slane %v8150_v10, 3  ;;  %v8155_v41 = vrot.slane %v8150_v10, 4 }
0x3515   :  { %v8156_v54 = vrot.slane %v8150_v10, 5  ;;  %v8157_v60 = vrot.slane %v8150_v10, 6  ;;  %v8158_v31 = vrot.slane %v8150_v10, 7  ;;  %v8167_v45 = vsub.f32 %v7575_v15, %v8150_v10 }
0x3516   :  { %v8168_v59 = vsub.f32 %v7653_v4, %v8152_v63  ;;  %v8169_v43 = vsub.f32 %v7731_v13, %v8153_v37  ;;  %v8170_v5 = vsub.f32 %v7809_v50, %v8154_v46  ;;  %v8171_v27 = vsub.f32 %v7887_v25, %v8155_v41 }
0x3517   :  { %v8172_v62 = vsub.f32 %v7965_v19, %v8156_v54  ;;  %v8175_v48 = vmul.f32 1.442695, %v8167_v45  ;;  %v8173_v24 = vsub.f32 %v8043_v8, %v8157_v60  ;;  %v8174_v49 = vsub.f32 %v8121_v23, %v8158_v31 }
0x3518   :  { %v8177_v20 = vmul.f32 1.442695, %v8168_v59  ;;  %v8179_v30 = vmul.f32 1.442695, %v8169_v43  ;;  %v8181_v52 = vmul.f32 1.442695, %v8170_v5 }
0x3519   :  { %16114 = vpow2.f32 %v8175_v48  ;;  %v8183_v29 = vmul.f32 1.442695, %v8171_v27  ;;  %v8185_v16 = vmul.f32 1.442695, %v8172_v62  ;;  %v8187_v0 = vmul.f32 1.442695, %v8173_v24 }
0x351a   :  { %16116 = vpow2.f32 %v8177_v20  ;;  %v8189_v14 = vmul.f32 1.442695, %v8174_v49 }
0x351b   :  { %16118 = vpow2.f32 %v8179_v30 }
0x351c   :  { %16120 = vpow2.f32 %v8181_v52 }
0x351d   :  { %16122 = vpow2.f32 %v8183_v29 }
0x351e   :  { %16124 = vpow2.f32 %v8185_v16 }
0x351f   :  { %16126 = vpow2.f32 %v8187_v0 }
0x3520   :  { %16128 = vpow2.f32 %v8189_v14 }
0x3523   :  { %v16115_v15 = vpop.eup %16114 }
0x3524   :  { %v16117_v4 = vpop.eup %16116 }
0x3525   :  { %v16119_v13 = vpop.eup %16118  ;;  %v8199_v50 = vrot.slane %v16117_v4, 7 }
0x3526   :  { %v16121_v25 = vpop.eup %16120  ;;  %v8201_v19 = vrot.slane %v16119_v13, 6 }
0x3527   :  { %v16123_v55 = vpop.eup %16122  ;;  %v8200_v8 = vsel %vm3085_vm13, %v8199_v50, %v16115_v15  ;;  %v8203_v39 = vrot.slane %v16121_v25, 5 }
0x3528   :  { %v16125_v12 = vpop.eup %16124  ;;  %v8202_v9 = vsel %vm3088_vm14, %v8201_v19, %v8200_v8  ;;  %v8205_v23 = vrot.slane %v16123_v55, 4 }
0x3529   :  { %v16127_v33 = vpop.eup %16126  ;;  %v8204_v35 = vsel %vm3091_vm15, %v8203_v39, %v8202_v9  ;;  %v8207_v56 = vrot.slane %v16125_v12, 3 }
0x352a   :  { %v16129_v40 = vpop.eup %16128  ;;  %v8206_v42 = vsel %vm3094_vm3, %v8205_v23, %v8204_v35  ;;  %v8209_v10 = vrot.slane %v16127_v33, 2 }
0x352b   :  { %v8208_v63 = vsel %vm3097_vm4, %v8207_v56, %v8206_v42  ;;  %v8211_v37 = vrot.slane %v16129_v40, 1 }
0x352c   :  { %v8210_v46 = vsel %vm3100_vm5, %v8209_v10, %v8208_v63 }
0x352d   :  { %v8212_v41 = vsel %vm3103_vm6, %v8211_v37, %v8210_v46 }
0x352e   :  { %v8214_v54 = vsel %vm3106_vm7, %v8212_v41, 0.0 }
0x352f   :  { %8215 = vadd.xlane.f32.xlu0 %v8214_v54 }
0x3545   :  { %8833 = vrot.lane.b32.xlu0 %v17809_v57, %s16399_s5 }
0x35bc   :  { %v8216_v60 = vpop.xlane.xlu0 %8215 }
0x35bd   :  { %v8218_v31 = vrot.slane %v8216_v60, 1  ;;  %v8219_v45 = vrot.slane %v8216_v60, 2  ;;  %v8220_v59 = vrot.slane %v8216_v60, 3  ;;  %v8221_v43 = vrot.slane %v8216_v60, 4 }
0x35be   :  { %16130 = vrcp.f32 %v8216_v60  ;;  %v8222_v5 = vrot.slane %v8216_v60, 5  ;;  %v8223_v27 = vrot.slane %v8216_v60, 6  ;;  %v8224_v62 = vrot.slane %v8216_v60, 7 }
0x35bf   :  { %16132 = vrcp.f32 %v8218_v31 }
0x35c0   :  { %16134 = vrcp.f32 %v8219_v45 }
0x35c1   :  { %16136 = vrcp.f32 %v8220_v59 }
0x35c2   :  { %16138 = vrcp.f32 %v8221_v43 }
0x35c3   :  { %16140 = vrcp.f32 %v8222_v5 }
0x35c4   :  { %16142 = vrcp.f32 %v8223_v27 }
0x35c5   :  { %16144 = vrcp.f32 %v8224_v62 }
0x35c8   :  { %v16131_v48 = vpop.eup %16130 }
0x35c9   :  { %v16133_v24 = vpop.eup %16132  ;;  %v8234_v20 = vmul.f32 %v16131_v48, %v16115_v15 }
0x35ca   :  { %v16135_v30 = vpop.eup %16134  ;;  %v8236_v52 = vmul.f32 %v16133_v24, %v16117_v4 }
0x35cb   :  { %v16137_v49 = vpop.eup %16136  ;;  %15308 = vmatmul.mubr.msk.f32.vlgmr.msra.gmra.mrb[82].mxu1 %vm3106_vm7, %v8234_v20  ;;  %v8238_v29 = vmul.f32 %v16135_v30, %v16119_v13 }
0x35cc   :  { %v16139_v16 = vpop.eup %16138  ;;  %15316 = vmatpush3.msra.mxu1 %v17837_v44  ;;  %15313 = vmatmul.mubr.msk.f32.vlgmr.msra.gmra.mrb[80].mxu0 %vm3106_vm7, %v8236_v52  ;;  %v14018_v0 = vrot.slane %v8236_v52, 7  ;;  %v8240_v14 = vmul.f32 %v16137_v49, %v16121_v25 }
0x35cd   :  { %v16141_v50 = vpop.eup %16140  ;;  %15321 = vmatpush3.msra.mxu0 %v17845_v1  ;;  %15317 = vmatprep.mubr.msk.f32.mxu1 %vm16396_vm1, %v16397_v26  ;;  %v14020_v15 = vrot.slane %v8238_v29, 6  ;;  %v8242_v19 = vmul.f32 %v16139_v16, %v16123_v55 }
0x35ce   :  { %v16143_v4 = vpop.eup %16142  ;;  %v14019_v8 = vsel %vm3085_vm13, %v14018_v0, %v8234_v20  ;;  %15325 = vmatprep.subr.mxu1 %v16397_v26  ;;  %15322 = vmatprep.mubr.msk.f32.mxu0 %vm16396_vm1, %v16397_v26  ;;  %v14022_v13 = vrot.slane %v8240_v14, 5  ;;  %v8244_v39 = vmul.f32 %v16141_v50, %v16125_v12 }
0x35cf   :  { %v16145_v9 = vpop.eup %16144  ;;  %15318 = vmatmul.mubr.msk.f32.vlgmr.msra.gmra.mrb[84].mxu1 %vm3106_vm7, %v8238_v29  ;;  %v14021_v25 = vsel %vm3088_vm14, %v14020_v15, %v14019_v8  ;;  %15330 = vmatprep.subr.mxu0 %v16397_v26  ;;  %v14024_v23 = vrot.slane %v8242_v19, 4  ;;  %v8246_v35 = vmul.f32 %v16143_v4, %v16127_v33 }
0x35d0   :  { %15326 = vmatpush3.msra.mxu1 %v17853_v61  ;;  %15323 = vmatmul.mubr.msk.f32.vlgmr.msra.gmra.mrb[82].mxu0 %vm3106_vm7, %v8240_v14  ;;  %v14023_v55 = vsel %vm3091_vm15, %v14022_v13, %v14021_v25  ;;  %v14026_v56 = vrot.slane %v8244_v39, 3  ;;  %v8248_v42 = vmul.f32 %v16145_v9, %v16129_v40 }
0x35d1   :  { %15331 = vmatpush3.msra.mxu0 %v17861_v6  ;;  %15327 = vmatprep.mubr.msk.f32.mxu1 %vm16396_vm1, %v16397_v26  ;;  %v14025_v12 = vsel %vm3094_vm3, %v14024_v23, %v14023_v55  ;;  %v14028_v10 = vrot.slane %v8246_v35, 2  ;;  %v8834_v23 = vpop.permute.xlu0 %8833 }
0x35d2   :  { %15335 = vmatprep.subr.mxu1 %v16397_v26  ;;  %15332 = vmatprep.mubr.msk.f32.mxu0 %vm16396_vm1, %v16397_v26  ;;  %v14027_v33 = vsel %vm3097_vm4, %v14026_v56, %v14025_v12  ;;  %v14030_v63 = vrot.slane %v8248_v42, 1  ;;  %v17976_v56 = vld [vmem:[#allocation2 + $0x8] sm:$0xff] }
0x35d3   :  { %15328 = vmatmul.mubr.msk.f32.vlgmr.msra.gmra.mrb[86].mxu1 %vm3106_vm7, %v8242_v19  ;;  %15340 = vmatprep.subr.mxu0 %v16397_v26  ;;  %v14029_v40 = vsel %vm3100_vm5, %v14028_v10, %v14027_v33 }
0x35d4   :  { %15336 = vmatpush3.msra.mxu1 %v17869_v36  ;;  %15333 = vmatmul.mubr.msk.f32.vlgmr.msra.gmra.mrb[84].mxu0 %vm3106_vm7, %v8244_v39  ;;  %v14031_v37 = vsel %vm3103_vm6, %v14030_v63, %v14029_v40 }
0x35d5   :  { %15341 = vmatpush3.msra.mxu0 %v17877_v58  ;;  %15337 = vmatprep.mubr.msk.f32.mxu1 %vm16396_vm1, %v16397_v26  ;;  %14084 = vst.msk [vmem:[#allocation9 + $0x18] sm:$0xff] %vm3106_vm7, %v14031_v37 }
0x35d6   :  { %15342 = vmatprep.mubr.msk.f32.mxu0 %vm16396_vm1, %v16397_v26  ;;  %15867 = vmatprep.subr.bf16.mxu0 %v16395_v22 }
0x35d7   :  { %15338 = vmatmul.mubr.msk.f32.vlgmr.msra.gmra.mrb[88].mxu1 %vm3106_vm7, %v8246_v35  ;;  %15855 = vmatprep.subr.bf16.mxu1 %v16395_v22 }
0x35d8   :  { %15343 = vmatmul.mubr.msk.f32.vlgmr.msra.gmra.mrb[86].mxu0 %vm3106_vm7, %v8248_v42  ;;  %15857 = vmatpush3.bf16.msra.mxu1 %v17313_v34 }
0x35d9   :  { %15869 = vmatpush3.bf16.msra.mxu0 %v16587_v38  ;;  %15858 = vmatprep.subr.bf16.mxu1 %v16395_v22 }
0x35da   :  { %15361 = vmatprep.mubr.msk.f32.mxu1 %vm16396_vm1, %v16397_v26  ;;  %15368 = vmatprep.mubr.msk.f32.mxu0 %vm16396_vm1, %v16397_v26 }
0x35db   :  { %15870 = vmatprep.subr.bf16.mxu0 %v16395_v22 }
0x35dc   :  { %15860 = vmatpush3.bf16.msra.mxu1 %v17319_v51 }
0x35dd   :  { %15861 = vmatprep.subr.bf16.mxu1 %v16395_v22 }
0x35e0   :  { %15863 = vmatpush3.bf16.msra.mxu1 %v17329_v47 }
0x35e1   :  { %15864 = vmatprep.subr.bf16.mxu1 %v16395_v22 }
0x35e4   :  { %15866 = vmatpush3.bf16.msra.mxu1 %v17339_v7 }
0x35e5   :  { %15387 = vmatprep.subr.mxu1 %v16397_v26 }
0x369e   :  { %v8318_v46 = vpop.f32.mrb[82].mxu1 }
0x369f   :  { %v15309_v41 = vpop.f32.mrb[83].mxu1  ;;  %v8391_v54 = vpop.f32.mrb[80].mxu0 }
0x36a0   :  { %v8844_v60 = vrot.slane %v8391_v54, 7  ;;  %v15314_v31 = vpop.f32.mrb[81].mxu0 }
0x36a2   :  { %v8845_v45 = vsel %vm3085_vm13, %v8844_v60, %v8318_v46  ;;  %v8464_v59 = vpop.f32.mrb[84].mxu1 }
0x36a3   :  { %v8846_v43 = vrot.slane %v8464_v59, 6  ;;  %v15319_v5 = vpop.f32.mrb[85].mxu1  ;;  %v8537_v27 = vpop.f32.mrb[82].mxu0 }
0x36a4   :  { %v8848_v62 = vrot.slane %v8537_v27, 5  ;;  %v15324_v48 = vpop.f32.mrb[83].mxu0 }
0x36a5   :  { %v8847_v24 = vsel %vm3088_vm14, %v8846_v43, %v8845_v45 }
0x36a6   :  { %v8849_v20 = vsel %vm3091_vm15, %v8848_v62, %v8847_v24  ;;  %v8610_v30 = vpop.f32.mrb[86].mxu1 }
0x36a7   :  { %v8850_v52 = vrot.slane %v8610_v30, 4  ;;  %v15329_v49 = vpop.f32.mrb[87].mxu1  ;;  %v8683_v29 = vpop.f32.mrb[84].mxu0 }
0x36a8   :  { %v8852_v16 = vrot.slane %v8683_v29, 3  ;;  %v15334_v0 = vpop.f32.mrb[85].mxu0 }
0x36a9   :  { %v8851_v14 = vsel %vm3094_vm3, %v8850_v52, %v8849_v20 }
0x36aa   :  { %v8853_v50 = vsel %vm3097_vm4, %v8852_v16, %v8851_v14  ;;  %v8756_v15 = vpop.f32.mrb[88].mxu1 }
0x36ab   :  { %v8854_v19 = vrot.slane %v8756_v15, 2  ;;  %v15339_v4 = vpop.f32.mrb[89].mxu1  ;;  %v8829_v8 = vpop.f32.mrb[86].mxu0 }
0x36ac   :  { %v8856_v13 = vrot.slane %v8829_v8, 1  ;;  %v15344_v39 = vpop.f32.mrb[87].mxu0 }
0x36ad   :  { %v8855_v9 = vsel %vm3100_vm5, %v8854_v19, %v8853_v50 }
0x36ae   :  { %v8857_v25 = vsel %vm3103_vm6, %v8856_v13, %v8855_v9 }
0x36af   :  { %8858 = vrot.lane.b32.xlu1 %v8857_v25, %s16401_s11 }
0x3721   :  { %v8859_v35 = vpop.permute.xlu1 %8858 }
0x3722   :  { %v8861_v55 = vsel %vm107_vm0, %v8834_v23, %v8859_v35 }
0x3723   :  { %15362 = vmatmul.mubr.msk.f32.vlgmr.msra.gmra.mrb[90].mxu1 %vm3827_vm8, %v8861_v55 }
0x3724   :  { %15388 = vmatpush3.xpose.msk.msra.mxu1 %vm107_vm0, %v17976_v56  ;;  %15389 = vmatprep.mubr.msk.f32.mxu1 %vm16396_vm1, %v16397_v26 }
0x3725   :  { %15397 = vmatprep.subr.mxu1 %v16397_v26 }
0x37f6   :  { %v8931_v42 = vpop.f32.mrb[90].mxu1 }
0x37f7   :  { %v8932_v12 = vadd.f32 %v17769_v18, %v8931_v42  ;;  %v15363_v10 = vpop.f32.mrb[91].mxu1 }
0x37f9   :  { %13972 = vst.msk [vmem:[#allocation8 + $0x18] sm:$0xff] %vm334_vm2, %v8932_v12  ;;  %v8935_v33 = vsel %vm334_vm2, %v8932_v12, -inf }
0x37fa   :  { %8936 = vmax.xlane.f32.xlu1 %v8935_v33 }
0x3887   :  { %v8937_v63 = vpop.xlane.xlu1 %8936 }
0x3888   :  { %vm8938_vm10 = vcmp.eq.f32.partialorder %v8932_v12, %v8937_v63 }
0x3889   :  { %v8939_v40 = vsel %vm8938_vm10, %v16577_v28, 16 }
0x388a   :  { %v8940_v37 = vsel %vm334_vm2, %v8939_v40, 2147483647 }
0x388b   :  { %v8942_v46 = vshra.s32 %v8940_v37, 16  ;;  %v8941_v54 = vand.u32 65535, %v8940_v37 }
0x388d   :  { %v8944_v41 = vcvt.s32.f32 %v8942_v46  ;;  %v8943_v31 = vcvt.s32.f32 %v8941_v54 }
0x388f   :  { %8945 = vmin.xlane.f32.xlu0 %v8944_v41 }
0x391c   :  { %v8946_v60 = vpop.xlane.xlu0 %8945 }
0x391d   :  { %vm8947_vm11 = vcmp.eq.f32.partialorder %v8944_v41, %v8946_v60  ;;  %v8952_v45 = vcvt.f32.s32 %v8946_v60 }
0x391e   :  { %v8948_v18 = vsel %vm8947_vm11, %v8943_v31, inf }
0x391f   :  { %8949 = vmin.xlane.f32.xlu0 %v8948_v18  ;;  %v8953_v43 = vshll.u32 %v8952_v45, 16 }
0x39ac   :  { %v8950_v59 = vpop.xlane.xlu0 %8949 }
0x39ad   :  { %v8951_v5 = vcvt.f32.s32 %v8950_v59 }
0x39af   :  { %v8954_v27 = vadd.s32 %v8953_v43, %v8951_v5 }
0x39b1   :  { %vm8955_vm12 = vcmp.eq.s32.totalorder %v16577_v28, %v8954_v27 }
0x39b2   :  { %v14278_v62 = vsel %vm8955_vm12, 1.0, %v16397_v26 }
0x39b3   :  { %15369 = vmatmul.mubr.msk.f32.vlgmr.msra.gmra.mrb[88].mxu0 %vm334_vm2, %v14278_v62 }
0x39b4   :  { %15872 = vmatpush3.bf16.msra.mxu0 %v16776_v2  ;;  %15379 = vmatprep.mubr.msk.f32.mxu0 %vm16396_vm1, %v16397_v26 }
0x39b5   :  { %15873 = vmatprep.subr.bf16.mxu0 %v16395_v22 }
0x39b8   :  { %15875 = vmatpush3.bf16.msra.mxu0 %v16783_v21 }
0x39b9   :  { %15382 = vmatprep.subr.mxu0 %v16397_v26 }
0x39bb   :  { %15380 = vmatmul.mubr.msk.f32.vlgmr.msra.gmra.mrb[90].mxu0 %vm107_vm0, %v8834_v23 }
0x39bc   :  { %15384 = vmatprep.mubr.msk.f32.mxu0 %vm16396_vm1, %v16397_v26 }
0x39c1   :  { %15383 = vmatpush3.xpose.msk.msra.mxu0 %vm107_vm0, %v17788_v3 }
0x39c2   :  { %15392 = vmatprep.subr.mxu0 %v16397_v26 }
0x3a86   :  { %v9027_v48 = vpop.f32.mrb[88].mxu0 }
0x3a87   :  { %v15370_v24 = vpop.f32.mrb[89].mxu0  ;;  %v9028_v49 = vadd.f32 %v17803_v11, %v9027_v48 }
0x3a8e   :  { %v9099_v20 = vpop.f32.mrb[90].mxu0 }
0x3a8f   :  { %v9100_v30 = vadd.f32 %v17796_v53, %v9099_v20  ;;  %v15381_v52 = vpop.f32.mrb[91].mxu0 }
0x3a91   :  { %9111 = vrot.lane.b32.xlu1 %v9100_v30, %s16398_s2  ;;  %v9103_v29 = vadd.f32 %v9100_v30, %v9028_v49 }
0x3a93   :  { %v14281_v16 = vmul.f32 -1.442695, %v9103_v29 }
0x3a95   :  { %16146 = vpow2.f32 %v14281_v16 }
0x3a9f   :  { %v16147_v0 = vpop.eup %16146 }
0x3aa0   :  { %v9107_v14 = vadd.f32 1.0, %v16147_v0 }
0x3aa2   :  { %16148 = vrcp.f32 %v9107_v14 }
0x3aac   :  { %v16149_v50 = vpop.eup %16148 }
0x3aad   :  { %v9121_v13 = vsub.f32 1.0, %v16149_v50  ;;  %v9127_v11 = vmul.f32 %v16149_v50, %v17809_v57 }
0x3b03   :  { %v9112_v15 = vpop.permute.xlu1 %9111 }
0x3b04   :  { %v9114_v19 = vmul.f32 %v16149_v50, %v9112_v15 }
0x3b06   :  { %9116 = vrot.lane.b32.xlu0 %v9114_v19, %s16398_s2 }
0x3b78   :  { %v9117_v4 = vpop.permute.xlu0 %9116 }
0x3b79   :  { %v9119_v8 = vadd.f32 %v9117_v4, %v9028_v49 }
0x3b7b   :  { %16150 = vtanh.f32 %v9119_v8 }
0x3b85   :  { %v16151_v53 = vpop.eup %16150 }
0x3b86   :  { %9123 = vrot.lane.b32.xlu1 %v16151_v53, %s16399_s5 }
0x3bf8   :  { %v9124_v39 = vpop.permute.xlu1 %9123 }
0x3bf9   :  { %v9126_v9 = vmul.f32 %v9124_v39, %v9121_v13 }
0x3bfb   :  { %v18009_v25 = vadd.f32 %v9127_v11, %v9126_v9 }
0x3bfd   :  { %v9130_v23 = vcombine.high %v18009_v25, %v18009_v25  ;;  %v9137_v35 = vrot.slane %v18009_v25, %v16802_v17 }
0x3bff   :  { %v9153_v55 = vrot.slane %v9137_v35, %v16802_v17  ;;  %v9145_v42 = vcombine.high %v9137_v35, %v9137_v35  ;;  %v9144_v12 = vrot.slane %v9130_v23, %v16802_v17 }
0x3c01   :  { %v9182_v10 = vrot.slane %v9153_v55, %v16812_v32  ;;  %v9167_v33 = vrot.slane %v9145_v42, %v16802_v17  ;;  %v9175_v63 = vcombine.high %v9153_v55, %v9153_v55  ;;  %v9146_v37 = vcombine.high %v9144_v12, %v9144_v12 }
0x3c02   :  { %v9160_v41 = vrot.slane %v9144_v12, %v16802_v17 }
0x3c03   :  { %9183 = vrot.lane.b32.xlu1 %v9182_v10, %s16399_s5  ;;  %v9260_v57 = vrot.slane %v9167_v33, %v16812_v32  ;;  %v9177_v40 = vcombine.high %v9167_v33, %v9167_v33  ;;  %v9338_v46 = vrot.slane %v9175_v63, %v16812_v32  ;;  %v9174_v60 = vrot.slane %v9146_v37, %v16802_v17 }
0x3c04   :  { %v9494_v31 = vrot.slane %v9160_v41, %v16812_v32  ;;  %v9176_v18 = vcombine.high %v9160_v41, %v9160_v41 }
0x3c05   :  { %9261 = vrot.lane.b32.xlu0 %v9260_v57, %s16399_s5  ;;  %v9416_v54 = vrot.slane %v9177_v40, %v16812_v32  ;;  %v9572_v45 = vrot.slane %v9174_v60, %v16812_v32  ;;  %v9178_v59 = vcombine.high %v9174_v60, %v9174_v60 }
0x3c06   :  { %v9650_v43 = vrot.slane %v9176_v18, %v16812_v32 }
0x3c07   :  { %9339 = vrot.lane.b32.xlu1 %v9338_v46, %s16399_s5  ;;  %v9728_v5 = vrot.slane %v9178_v59, %v16812_v32 }
0x3c09   :  { %9417 = vrot.lane.b32.xlu0 %v9416_v54, %s16399_s5 }
0x3c0b   :  { %9495 = vrot.lane.b32.xlu1 %v9494_v31, %s16399_s5 }
0x3c0d   :  { %9573 = vrot.lane.b32.xlu0 %v9572_v45, %s16399_s5 }
0x3c0f   :  { %9651 = vrot.lane.b32.xlu1 %v9650_v43, %s16399_s5 }
0x3c11   :  { %9729 = vrot.lane.b32.xlu0 %v9728_v5, %s16399_s5 }
0x3c75   :  { %v9184_v27 = vpop.permute.xlu1 %9183 }
0x3c76   :  { %15385 = vmatmul.mubr.msk.f32.vlgmr.msra.gmra.mrb[92].mxu0 %vm107_vm0, %v9184_v27 }
0x3c77   :  { %15393 = vmatpush3.xpose.msk.msra.mxu0 %vm107_vm0, %v17837_v44  ;;  %v9262_v62 = vpop.permute.xlu0 %9261  ;;  %15394 = vmatprep.mubr.msk.f32.mxu0 %vm16396_vm1, %v16397_v26 }
0x3c78   :  { %15390 = vmatmul.mubr.msk.f32.vlgmr.msra.gmra.mrb[92].mxu1 %vm107_vm0, %v9262_v62  ;;  %15402 = vmatprep.subr.mxu0 %v16397_v26 }
0x3c79   :  { %15398 = vmatpush3.xpose.msk.msra.mxu1 %vm107_vm0, %v17845_v1  ;;  %v9340_v48 = vpop.permute.xlu1 %9339  ;;  %15399 = vmatprep.mubr.msk.f32.mxu1 %vm16396_vm1, %v16397_v26 }
0x3c7a   :  { %15395 = vmatmul.mubr.msk.f32.vlgmr.msra.gmra.mrb[94].mxu0 %vm107_vm0, %v9340_v48  ;;  %15407 = vmatprep.subr.mxu1 %v16397_v26 }
0x3c7b   :  { %15403 = vmatpush3.xpose.msk.msra.mxu0 %vm107_vm0, %v17853_v61  ;;  %v9418_v24 = vpop.permute.xlu0 %9417  ;;  %15404 = vmatprep.mubr.msk.f32.mxu0 %vm16396_vm1, %v16397_v26 }
0x3c7c   :  { %15400 = vmatmul.mubr.msk.f32.vlgmr.msra.gmra.mrb[94].mxu1 %vm107_vm0, %v9418_v24  ;;  %15412 = vmatprep.subr.mxu0 %v16397_v26 }
0x3c7d   :  { %15408 = vmatpush3.xpose.msk.msra.mxu1 %vm107_vm0, %v17861_v6  ;;  %v9496_v20 = vpop.permute.xlu1 %9495  ;;  %15409 = vmatprep.mubr.msk.f32.mxu1 %vm16396_vm1, %v16397_v26 }
0x3c7e   :  { %15405 = vmatmul.mubr.msk.f32.vlgmr.msra.gmra.mrb[96].mxu0 %vm107_vm0, %v9496_v20  ;;  %15417 = vmatprep.subr.mxu1 %v16397_v26 }
0x3c7f   :  { %15413 = vmatpush3.xpose.msk.msra.mxu0 %vm107_vm0, %v17869_v36  ;;  %v9574_v30 = vpop.permute.xlu0 %9573  ;;  %15414 = vmatprep.mubr.msk.f32.mxu0 %vm16396_vm1, %v16397_v26 }
0x3c80   :  { %15410 = vmatmul.mubr.msk.f32.vlgmr.msra.gmra.mrb[96].mxu1 %vm107_vm0, %v9574_v30  ;;  %15422 = vmatprep.subr.mxu0 %v16397_v26 }
0x3c81   :  { %15418 = vmatpush3.xpose.msk.msra.mxu1 %vm107_vm0, %v17877_v58  ;;  %v9652_v52 = vpop.permute.xlu1 %9651  ;;  %15419 = vmatprep.mubr.msk.f32.mxu1 %vm16396_vm1, %v16397_v26 }
0x3c82   :  { %15415 = vmatmul.mubr.msk.f32.vlgmr.msra.gmra.mrb[98].mxu0 %vm107_vm0, %v9652_v52  ;;  %15427 = vmatprep.subr.mxu1 %v16397_v26 }
0x3c83   :  { %15423 = vmatpush3.msra.mxu0 %v17788_v3  ;;  %v9730_v36 = vpop.permute.xlu0 %9729  ;;  %15424 = vmatprep.mubr.msk.f32.mxu0 %vm16396_vm1, %v16397_v26 }
0x3c84   :  { %15420 = vmatmul.mubr.msk.f32.vlgmr.msra.gmra.mrb[98].mxu1 %vm107_vm0, %v9730_v36  ;;  %15432 = vmatprep.subr.mxu0 %v16397_v26 }
0x3c85   :  { %15428 = vmatpush3.msra.mxu1 %v17976_v56  ;;  %15429 = vmatprep.mubr.msk.f32.mxu1 %vm16396_vm1, %v16397_v26 }
0x3c86   :  { %15437 = vmatprep.subr.mxu1 %v16397_v26 }
0x3d49   :  { %v9253_v49 = vpop.f32.mrb[92].mxu0 }
0x3d4a   :  { %v15386_v29 = vpop.f32.mrb[93].mxu0 }
0x3d4b   :  { %v9331_v16 = vpop.f32.mrb[92].mxu1 }
0x3d4c   :  { %v9811_v0 = vrot.slane %v9331_v16, 7  ;;  %v15391_v3 = vpop.f32.mrb[93].mxu1 }
0x3d4d   :  { %v9409_v14 = vpop.f32.mrb[94].mxu0 }
0x3d4e   :  { %v9812_v50 = vsel %vm3085_vm13, %v9811_v0, %v9253_v49  ;;  %v9813_v15 = vrot.slane %v9409_v14, 6  ;;  %v15396_v19 = vpop.f32.mrb[95].mxu0 }
0x3d4f   :  { %v9487_v4 = vpop.f32.mrb[94].mxu1 }
0x3d50   :  { %v9814_v8 = vsel %vm3088_vm14, %v9813_v15, %v9812_v50  ;;  %v9815_v53 = vrot.slane %v9487_v4, 5  ;;  %v15401_v13 = vpop.f32.mrb[95].mxu1 }
0x3d51   :  { %v9565_v39 = vpop.f32.mrb[96].mxu0 }
0x3d52   :  { %v9816_v11 = vsel %vm3091_vm15, %v9815_v53, %v9814_v8  ;;  %v9817_v9 = vrot.slane %v9565_v39, 4  ;;  %v15406_v23 = vpop.f32.mrb[97].mxu0 }
0x3d53   :  { %v9643_v35 = vpop.f32.mrb[96].mxu1 }
0x3d54   :  { %v9818_v55 = vsel %vm3094_vm3, %v9817_v9, %v9816_v11  ;;  %v9819_v42 = vrot.slane %v9643_v35, 3  ;;  %v15411_v12 = vpop.f32.mrb[97].mxu1 }
0x3d55   :  { %v9721_v10 = vpop.f32.mrb[98].mxu0 }
0x3d56   :  { %v9820_v33 = vsel %vm3097_vm4, %v9819_v42, %v9818_v55  ;;  %v9821_v63 = vrot.slane %v9721_v10, 2  ;;  %v15416_v57 = vpop.f32.mrb[99].mxu0 }
0x3d57   :  { %v9799_v40 = vpop.f32.mrb[98].mxu1 }
0x3d58   :  { %v9823_v37 = vrot.slane %v9799_v40, 1  ;;  %v15421_v46 = vpop.f32.mrb[99].mxu1  ;;  %v9822_v41 = vsel %vm3100_vm5, %v9821_v63, %v9820_v33 }
0x3d5a   :  { %v9824_v54 = vsel %vm3103_vm6, %v9823_v37, %v9822_v41 }
0x3d5b   :  { %v9826_v60 = vsel %vm3106_vm7, %v9824_v54, -inf }
0x3d5c   :  { %9827 = vmax.xlane.f32.xlu1 %v9826_v60 }
0x3de9   :  { %v9828_v31 = vpop.xlane.xlu1 %9827 }
0x3dea   :  { %v9830_v18 = vrot.slane %v9828_v31, 1  ;;  %v9831_v45 = vrot.slane %v9828_v31, 2  ;;  %v9832_v59 = vrot.slane %v9828_v31, 3  ;;  %v9833_v43 = vrot.slane %v9828_v31, 4 }
0x3deb   :  { %v9834_v5 = vrot.slane %v9828_v31, 5  ;;  %v9835_v27 = vrot.slane %v9828_v31, 6  ;;  %v9836_v62 = vrot.slane %v9828_v31, 7  ;;  %v9845_v48 = vsub.f32 %v9253_v49, %v9828_v31 }
0x3dec   :  { %v9846_v24 = vsub.f32 %v9331_v16, %v9830_v18  ;;  %v9847_v20 = vsub.f32 %v9409_v14, %v9831_v45  ;;  %v9848_v30 = vsub.f32 %v9487_v4, %v9832_v59  ;;  %v9849_v52 = vsub.f32 %v9565_v39, %v9833_v43 }
0x3ded   :  { %v9850_v36 = vsub.f32 %v9643_v35, %v9834_v5  ;;  %v9853_v29 = vmul.f32 1.442695, %v9845_v48  ;;  %v9851_v0 = vsub.f32 %v9721_v10, %v9835_v27  ;;  %v9852_v19 = vsub.f32 %v9799_v40, %v9836_v62 }
0x3dee   :  { %v9855_v3 = vmul.f32 1.442695, %v9846_v24  ;;  %v9857_v50 = vmul.f32 1.442695, %v9847_v20  ;;  %v9859_v15 = vmul.f32 1.442695, %v9848_v30 }
0x3def   :  { %16152 = vpow2.f32 %v9853_v29  ;;  %v9861_v8 = vmul.f32 1.442695, %v9849_v52  ;;  %v9863_v53 = vmul.f32 1.442695, %v9850_v36  ;;  %v9865_v13 = vmul.f32 1.442695, %v9851_v0 }
0x3df0   :  { %16154 = vpow2.f32 %v9855_v3  ;;  %v9867_v11 = vmul.f32 1.442695, %v9852_v19 }
0x3df1   :  { %16156 = vpow2.f32 %v9857_v50 }
0x3df2   :  { %16158 = vpow2.f32 %v9859_v15 }
0x3df3   :  { %16160 = vpow2.f32 %v9861_v8 }
0x3df4   :  { %16162 = vpow2.f32 %v9863_v53 }
0x3df5   :  { %16164 = vpow2.f32 %v9865_v13 }
0x3df6   :  { %16166 = vpow2.f32 %v9867_v11 }
0x3df9   :  { %v16153_v49 = vpop.eup %16152 }
0x3dfa   :  { %v16155_v16 = vpop.eup %16154 }
0x3dfb   :  { %v16157_v14 = vpop.eup %16156  ;;  %v9877_v4 = vrot.slane %v16155_v16, 7 }
0x3dfc   :  { %v16159_v39 = vpop.eup %16158  ;;  %v9879_v9 = vrot.slane %v16157_v14, 6 }
0x3dfd   :  { %v16161_v23 = vpop.eup %16160  ;;  %v9878_v35 = vsel %vm3085_vm13, %v9877_v4, %v16153_v49  ;;  %v9881_v55 = vrot.slane %v16159_v39, 5 }
0x3dfe   :  { %v16163_v42 = vpop.eup %16162  ;;  %v9880_v12 = vsel %vm3088_vm14, %v9879_v9, %v9878_v35  ;;  %v9883_v10 = vrot.slane %v16161_v23, 4 }
0x3dff   :  { %v16165_v33 = vpop.eup %16164  ;;  %v9882_v63 = vsel %vm3091_vm15, %v9881_v55, %v9880_v12  ;;  %v9885_v57 = vrot.slane %v16163_v42, 3 }
0x3e00   :  { %v16167_v40 = vpop.eup %16166  ;;  %v9884_v37 = vsel %vm3094_vm3, %v9883_v10, %v9882_v63  ;;  %v9887_v46 = vrot.slane %v16165_v33, 2  ;;  %v18127_v10 = vld [vmem:[#allocation2 + $0x30] sm:$0xff] }
0x3e01   :  { %v9886_v41 = vsel %vm3097_vm4, %v9885_v57, %v9884_v37  ;;  %v9889_v54 = vrot.slane %v16167_v40, 1 }
0x3e02   :  { %v9888_v60 = vsel %vm3100_vm5, %v9887_v46, %v9886_v41 }
0x3e03   :  { %v9890_v31 = vsel %vm3103_vm6, %v9889_v54, %v9888_v60 }
0x3e04   :  { %v9892_v18 = vsel %vm3106_vm7, %v9890_v31, 0.0 }
0x3e05   :  { %9893 = vadd.xlane.f32.xlu0 %v9892_v18 }
0x3e1b   :  { %10511 = vrot.lane.b32.xlu0 %v18009_v25, %s16399_s5 }
0x3e92   :  { %v9894_v45 = vpop.xlane.xlu0 %9893 }
0x3e93   :  { %v9896_v59 = vrot.slane %v9894_v45, 1  ;;  %v9897_v43 = vrot.slane %v9894_v45, 2  ;;  %v9898_v5 = vrot.slane %v9894_v45, 3  ;;  %v9899_v27 = vrot.slane %v9894_v45, 4 }
0x3e94   :  { %16168 = vrcp.f32 %v9894_v45  ;;  %v9900_v62 = vrot.slane %v9894_v45, 5  ;;  %v9901_v48 = vrot.slane %v9894_v45, 6  ;;  %v9902_v24 = vrot.slane %v9894_v45, 7 }
0x3e95   :  { %16170 = vrcp.f32 %v9896_v59 }
0x3e96   :  { %16172 = vrcp.f32 %v9897_v43 }
0x3e97   :  { %16174 = vrcp.f32 %v9898_v5 }
0x3e98   :  { %16176 = vrcp.f32 %v9899_v27 }
0x3e99   :  { %16178 = vrcp.f32 %v9900_v62 }
0x3e9a   :  { %16180 = vrcp.f32 %v9901_v48 }
0x3e9b   :  { %16182 = vrcp.f32 %v9902_v24 }
0x3e9e   :  { %v16169_v20 = vpop.eup %16168 }
0x3e9f   :  { %v16171_v30 = vpop.eup %16170  ;;  %v9912_v52 = vmul.f32 %v16169_v20, %v16153_v49 }
0x3ea0   :  { %v16173_v36 = vpop.eup %16172  ;;  %v9914_v29 = vmul.f32 %v16171_v30, %v16155_v16 }
0x3ea1   :  { %v16175_v0 = vpop.eup %16174  ;;  %15425 = vmatmul.mubr.msk.f32.vlgmr.msra.gmra.mrb[100].mxu0 %vm3106_vm7, %v9912_v52  ;;  %v9916_v3 = vmul.f32 %v16173_v36, %v16157_v14 }
0x3ea2   :  { %v16177_v50 = vpop.eup %16176  ;;  %15433 = vmatpush3.msra.mxu0 %v17837_v44  ;;  %15430 = vmatmul.mubr.msk.f32.vlgmr.msra.gmra.mrb[100].mxu1 %vm3106_vm7, %v9914_v29  ;;  %v14032_v15 = vrot.slane %v9914_v29, 7  ;;  %v9918_v19 = vmul.f32 %v16175_v0, %v16159_v39 }
0x3ea3   :  { %v16179_v8 = vpop.eup %16178  ;;  %15438 = vmatpush3.msra.mxu1 %v17845_v1  ;;  %15434 = vmatprep.mubr.msk.f32.mxu0 %vm16396_vm1, %v16397_v26  ;;  %v14034_v53 = vrot.slane %v9916_v3, 6  ;;  %v9920_v13 = vmul.f32 %v16177_v50, %v16161_v23 }
0x3ea4   :  { %v16181_v11 = vpop.eup %16180  ;;  %v14033_v49 = vsel %vm3085_vm13, %v14032_v15, %v9912_v52  ;;  %15442 = vmatprep.subr.mxu0 %v16397_v26  ;;  %15439 = vmatprep.mubr.msk.f32.mxu1 %vm16396_vm1, %v16397_v26  ;;  %v14036_v44 = vrot.slane %v9918_v19, 5  ;;  %v9922_v16 = vmul.f32 %v16179_v8, %v16163_v42 }
0x3ea5   :  { %v16183_v14 = vpop.eup %16182  ;;  %15435 = vmatmul.mubr.msk.f32.vlgmr.msra.gmra.mrb[102].mxu0 %vm3106_vm7, %v9916_v3  ;;  %v14035_v1 = vsel %vm3088_vm14, %v14034_v53, %v14033_v49  ;;  %15447 = vmatprep.subr.mxu1 %v16397_v26  ;;  %v14038_v4 = vrot.slane %v9920_v13, 4  ;;  %v9924_v39 = vmul.f32 %v16181_v11, %v16165_v33  ;;  %v10512_v53 = vpop.permute.xlu0 %10511 }
0x3ea6   :  { %15443 = vmatpush3.msra.mxu0 %v17853_v61  ;;  %15440 = vmatmul.mubr.msk.f32.vlgmr.msra.gmra.mrb[102].mxu1 %vm3106_vm7, %v9918_v19  ;;  %v14037_v9 = vsel %vm3091_vm15, %v14036_v44, %v14035_v1  ;;  %v14040_v23 = vrot.slane %v9922_v16, 3  ;;  %v9926_v35 = vmul.f32 %v16183_v14, %v16167_v40  ;;  %v18174_v44 = vld [vmem:[%s18609_s12] ss:$0 sm:$0xff] }
0x3ea7   :  { %15448 = vmatpush3.msra.mxu1 %v17861_v6  ;;  %15444 = vmatprep.mubr.msk.f32.mxu0 %vm16396_vm1, %v16397_v26  ;;  %v14039_v55 = vsel %vm3094_vm3, %v14038_v4, %v14037_v9  ;;  %v14042_v42 = vrot.slane %v9924_v39, 2 }
0x3ea8   :  { %15452 = vmatprep.subr.mxu0 %v16397_v26  ;;  %15449 = vmatprep.mubr.msk.f32.mxu1 %vm16396_vm1, %v16397_v26  ;;  %v14041_v61 = vsel %vm3097_vm4, %v14040_v23, %v14039_v55  ;;  %v14044_v12 = vrot.slane %v9926_v35, 1 }
0x3ea9   :  { %15445 = vmatmul.mubr.msk.f32.vlgmr.msra.gmra.mrb[104].mxu0 %vm3106_vm7, %v9920_v13  ;;  %15457 = vmatprep.subr.mxu1 %v16397_v26  ;;  %v14043_v6 = vsel %vm3100_vm5, %v14042_v42, %v14041_v61 }
0x3eaa   :  { %15453 = vmatpush3.msra.mxu0 %v18127_v10  ;;  %15450 = vmatmul.mubr.msk.f32.vlgmr.msra.gmra.mrb[104].mxu1 %vm3106_vm7, %v9922_v16  ;;  %v14045_v33 = vsel %vm3103_vm6, %v14044_v12, %v14043_v6 }
0x3eab   :  { %15458 = vmatpush3.msra.mxu1 %v17877_v58  ;;  %15454 = vmatprep.mubr.msk.f32.mxu0 %vm16396_vm1, %v16397_v26  ;;  %14085 = vst.msk [vmem:[#allocation9 + $0x20] sm:$0xff] %vm3106_vm7, %v14045_v33 }
0x3eac   :  { %15459 = vmatprep.mubr.msk.f32.mxu1 %vm16396_vm1, %v16397_v26  ;;  %15888 = vmatprep.subr.bf16.mxu1 %v16395_v22 }
0x3ead   :  { %15455 = vmatmul.mubr.msk.f32.vlgmr.msra.gmra.mrb[106].mxu0 %vm3106_vm7, %v9924_v39  ;;  %15876 = vmatprep.subr.bf16.mxu0 %v16395_v22 }
0x3eae   :  { %15460 = vmatmul.mubr.msk.f32.vlgmr.msra.gmra.mrb[106].mxu1 %vm3106_vm7, %v9926_v35  ;;  %15878 = vmatpush3.bf16.msra.mxu0 %v17313_v34 }
0x3eaf   :  { %15890 = vmatpush3.bf16.msra.mxu1 %v16587_v38  ;;  %15879 = vmatprep.subr.bf16.mxu0 %v16395_v22 }
0x3eb0   :  { %15478 = vmatprep.mubr.msk.f32.mxu0 %vm16396_vm1, %v16397_v26  ;;  %15485 = vmatprep.mubr.msk.f32.mxu1 %vm16396_vm1, %v16397_v26 }
0x3eb1   :  { %15891 = vmatprep.subr.bf16.mxu1 %v16395_v22 }
0x3eb2   :  { %15881 = vmatpush3.bf16.msra.mxu0 %v17319_v51 }
0x3eb3   :  { %15882 = vmatprep.subr.bf16.mxu0 %v16395_v22 }
0x3eb6   :  { %15884 = vmatpush3.bf16.msra.mxu0 %v17329_v47 }
0x3eb7   :  { %15885 = vmatprep.subr.bf16.mxu0 %v16395_v22 }
0x3eba   :  { %15887 = vmatpush3.bf16.msra.mxu0 %v17339_v7 }
0x3ebb   :  { %15504 = vmatprep.subr.mxu0 %v16397_v26 }
0x3f74   :  { %v9996_v58 = vpop.f32.mrb[100].mxu0 }
0x3f75   :  { %v15426_v63 = vpop.f32.mrb[101].mxu0  ;;  %v10069_v57 = vpop.f32.mrb[100].mxu1 }
0x3f76   :  { %v10522_v40 = vrot.slane %v10069_v57, 7  ;;  %v15431_v37 = vpop.f32.mrb[101].mxu1 }
0x3f77   :  { %v18193_v37 = vld [vmem:[#allocation2] sm:$0xff] }
0x3f78   :  { %v10523_v46 = vsel %vm3085_vm13, %v10522_v40, %v9996_v58  ;;  %v10142_v41 = vpop.f32.mrb[102].mxu0 }
0x3f79   :  { %v10524_v54 = vrot.slane %v10142_v41, 6  ;;  %v15436_v60 = vpop.f32.mrb[103].mxu0  ;;  %v10215_v31 = vpop.f32.mrb[102].mxu1 }
0x3f7a   :  { %v10526_v18 = vrot.slane %v10215_v31, 5  ;;  %v15441_v45 = vpop.f32.mrb[103].mxu1  ;;  %v18201_v60 = vld [vmem:[%s18607_s10] ss:$0 sm:$0xff] }
0x3f7b   :  { %v10525_v59 = vsel %vm3088_vm14, %v10524_v54, %v10523_v46  ;;  %v18208_v45 = vld [vmem:[%s18606_s9] ss:$0 sm:$0xff]  ;;  %s16402_s9 = smov [#allocation9]  }
0x3f7c   :  { %v10527_v43 = vsel %vm3091_vm15, %v10526_v18, %v10525_v59  ;;  %v10288_v5 = vpop.f32.mrb[104].mxu0  ;;  %s14105_s10 = sshll.u32 %s16402_s9, 4  ;;  %s14106_s10 = int_to_ptr.vmem [resolvable:$true] %s14105_s10 }
0x3f7d   :  { %v10528_v27 = vrot.slane %v10288_v5, 4  ;;  %v15446_v62 = vpop.f32.mrb[105].mxu0  ;;  %v10361_v48 = vpop.f32.mrb[104].mxu1  ;;  %p16343_p3 = scmp.lt.s32.totalorder %s14106_s10, %s14106_s10 }
0x3f7e   :  { %v10530_v24 = vrot.slane %v10361_v48, 3  ;;  %v15451_v20 = vpop.f32.mrb[105].mxu1 }
0x3f7f   :  { %v10529_v30 = vsel %vm3094_vm3, %v10528_v27, %v10527_v43 }
0x3f80   :  { %v10531_v52 = vsel %vm3097_vm4, %v10530_v24, %v10529_v30  ;;  %v10434_v36 = vpop.f32.mrb[106].mxu0 }
0x3f81   :  { %v10532_v29 = vrot.slane %v10434_v36, 2  ;;  %v15456_v0 = vpop.f32.mrb[107].mxu0  ;;  %v10507_v3 = vpop.f32.mrb[106].mxu1 }
0x3f82   :  { %v10534_v50 = vrot.slane %v10507_v3, 1  ;;  %v15461_v15 = vpop.f32.mrb[107].mxu1 }
0x3f83   :  { %v10533_v19 = vsel %vm3100_vm5, %v10532_v29, %v10531_v52 }
0x3f84   :  { %v10535_v8 = vsel %vm3103_vm6, %v10534_v50, %v10533_v19 }
0x3f85   :  { %10536 = vrot.lane.b32.xlu1 %v10535_v8, %s16401_s11 }
0x3ff7   :  { %v10537_v13 = vpop.permute.xlu1 %10536 }
0x3ff8   :  { %v10539_v11 = vsel %vm107_vm0, %v10512_v53, %v10537_v13 }
0x3ff9   :  { %15479 = vmatmul.mubr.msk.f32.vlgmr.msra.gmra.mrb[108].mxu0 %vm3827_vm8, %v10539_v11 }
0x3ffa   :  { %15505 = vmatpush3.xpose.msk.msra.mxu0 %vm107_vm0, %v17976_v56  ;;  %15506 = vmatprep.mubr.msk.f32.mxu0 %vm16396_vm1, %v16397_v26 }
0x3ffb   :  { %15514 = vmatprep.subr.mxu0 %v16397_v26 }
0x40cc   :  { %v10609_v49 = vpop.f32.mrb[108].mxu0 }
0x40cd   :  { %v10610_v16 = vadd.f32 %v18174_v44, %v10609_v49  ;;  %v15480_v14 = vpop.f32.mrb[109].mxu0 }
0x40cf   :  { %13973 = vst.msk [vmem:[#allocation8 + $0x20] sm:$0xff] %vm334_vm2, %v10610_v16  ;;  %v10613_v1 = vsel %vm334_vm2, %v10610_v16, -inf }
0x40d0   :  { %10614 = vmax.xlane.f32.xlu1 %v10613_v1 }
0x415d   :  { %v10615_v4 = vpop.xlane.xlu1 %10614 }
0x415e   :  { %vm10616_vm9 = vcmp.eq.f32.partialorder %v10610_v16, %v10615_v4 }
0x415f   :  { %v10617_v39 = vsel %vm10616_vm9, %v16577_v28, 16 }
0x4160   :  { %v10618_v9 = vsel %vm334_vm2, %v10617_v39, 2147483647 }
0x4161   :  { %v10620_v23 = vshra.s32 %v10618_v9, 16  ;;  %v10619_v55 = vand.u32 65535, %v10618_v9 }
0x4163   :  { %v10622_v35 = vcvt.s32.f32 %v10620_v23  ;;  %v10621_v61 = vcvt.s32.f32 %v10619_v55 }
0x4165   :  { %10623 = vmin.xlane.f32.xlu0 %v10622_v35 }
0x41f2   :  { %v10624_v42 = vpop.xlane.xlu0 %10623 }
0x41f3   :  { %vm10625_vm10 = vcmp.eq.f32.partialorder %v10622_v35, %v10624_v42  ;;  %v10630_v6 = vcvt.f32.s32 %v10624_v42 }
0x41f4   :  { %v10626_v12 = vsel %vm10625_vm10, %v10621_v61, inf }
0x41f5   :  { %10627 = vmin.xlane.f32.xlu0 %v10626_v12  ;;  %v10631_v58 = vshll.u32 %v10630_v6, 16 }
0x4282   :  { %v10628_v33 = vpop.xlane.xlu0 %10627 }
0x4283   :  { %v10629_v63 = vcvt.f32.s32 %v10628_v33 }
0x4285   :  { %v10632_v57 = vadd.s32 %v10631_v58, %v10629_v63  ;;  %v18242_v63 = vld [vmem:[#allocation2 + $0x10] sm:$0xff] }
0x4287   :  { %vm10633_vm11 = vcmp.eq.s32.totalorder %v16577_v28, %v10632_v57 }
0x4288   :  { %v14307_v40 = vsel %vm10633_vm11, 1.0, %v16397_v26 }
0x4289   :  { %15486 = vmatmul.mubr.msk.f32.vlgmr.msra.gmra.mrb[108].mxu1 %vm334_vm2, %v14307_v40  ;;  %v18250_v40 = vld [vmem:[#allocation2 + $0x18] sm:$0xff] }
0x428a   :  { %15893 = vmatpush3.bf16.msra.mxu1 %v16776_v2  ;;  %15496 = vmatprep.mubr.msk.f32.mxu1 %vm16396_vm1, %v16397_v26 }
0x428b   :  { %15894 = vmatprep.subr.bf16.mxu1 %v16395_v22 }
0x428e   :  { %15896 = vmatpush3.bf16.msra.mxu1 %v16783_v21 }
0x428f   :  { %15499 = vmatprep.subr.mxu1 %v16397_v26 }
0x4291   :  { %15497 = vmatmul.mubr.msk.f32.vlgmr.msra.gmra.mrb[110].mxu1 %vm107_vm0, %v10512_v53 }
0x4292   :  { %15501 = vmatprep.mubr.msk.f32.mxu1 %vm16396_vm1, %v16397_v26 }
0x4297   :  { %15500 = vmatpush3.xpose.msk.msra.mxu1 %vm107_vm0, %v18193_v37 }
0x4298   :  { %15509 = vmatprep.subr.mxu1 %v16397_v26 }
0x435c   :  { %v10705_v46 = vpop.f32.mrb[108].mxu1 }
0x435d   :  { %v15487_v41 = vpop.f32.mrb[109].mxu1  ;;  %v10706_v59 = vadd.f32 %v18208_v45, %v10705_v46 }
0x435e   :  { %v18258_v41 = vld [vmem:[#allocation2 + $0x20] sm:$0xff] }
0x4364   :  { %v10777_v54 = vpop.f32.mrb[110].mxu1 }
0x4365   :  { %v10778_v31 = vadd.f32 %v18201_v60, %v10777_v54  ;;  %v15498_v18 = vpop.f32.mrb[111].mxu1 }
0x4367   :  { %10789 = vrot.lane.b32.xlu1 %v10778_v31, %s16398_s2  ;;  %v10781_v43 = vadd.f32 %v10778_v31, %v10706_v59  ;;  %v18266_v31 = vld [vmem:[#allocation2 + $0x28] sm:$0xff] }
0x4369   :  { %v14310_v5 = vmul.f32 -1.442695, %v10781_v43  ;;  %v18280_v43 = vld [vmem:[#allocation2 + $0x38] sm:$0xff] }
0x436b   :  { %16184 = vpow2.f32 %v14310_v5 }
0x4375   :  { %v16185_v27 = vpop.eup %16184 }
0x4376   :  { %v10785_v62 = vadd.f32 1.0, %v16185_v27 }
0x4378   :  { %16186 = vrcp.f32 %v10785_v62 }
0x4382   :  { %v16187_v48 = vpop.eup %16186 }
0x4383   :  { %v10799_v29 = vsub.f32 1.0, %v16187_v48  ;;  %v10805_v3 = vmul.f32 %v16187_v48, %v18009_v25 }
0x43d9   :  { %v10790_v24 = vpop.permute.xlu1 %10789 }
0x43da   :  { %v10792_v20 = vmul.f32 %v16187_v48, %v10790_v24 }
0x43dc   :  { %10794 = vrot.lane.b32.xlu0 %v10792_v20, %s16398_s2 }
0x444e   :  { %v10795_v30 = vpop.permute.xlu0 %10794 }
0x444f   :  { %v10797_v52 = vadd.f32 %v10795_v30, %v10706_v59 }
0x4451   :  { %16188 = vtanh.f32 %v10797_v52 }
0x445b   :  { %v16189_v36 = vpop.eup %16188 }
0x445c   :  { %10801 = vrot.lane.b32.xlu1 %v16189_v36, %s16399_s5 }
0x44ce   :  { %v10802_v0 = vpop.permute.xlu1 %10801 }
0x44cf   :  { %v10804_v50 = vmul.f32 %v10802_v0, %v10799_v29 }
0x44d1   :  { %v18214_v15 = vadd.f32 %v10805_v3, %v10804_v50 }
0x44d3   :  { %v10808_v19 = vcombine.high %v18214_v15, %v18214_v15  ;;  %v10815_v8 = vrot.slane %v18214_v15, %v16802_v17 }
0x44d5   :  { %v10831_v53 = vrot.slane %v10815_v8, %v16802_v17  ;;  %v10823_v13 = vcombine.high %v10815_v8, %v10815_v8  ;;  %v10822_v11 = vrot.slane %v10808_v19, %v16802_v17 }
0x44d7   :  { %v10860_v49 = vrot.slane %v10831_v53, %v16812_v32  ;;  %v10845_v16 = vrot.slane %v10823_v13, %v16802_v17  ;;  %v10853_v14 = vcombine.high %v10831_v53, %v10831_v53  ;;  %v10824_v4 = vcombine.high %v10822_v11, %v10822_v11 }
0x44d8   :  { %v10838_v9 = vrot.slane %v10822_v11, %v16802_v17 }
0x44d9   :  { %10861 = vrot.lane.b32.xlu1 %v10860_v49, %s16399_s5  ;;  %v10938_v25 = vrot.slane %v10845_v16, %v16812_v32  ;;  %v10855_v1 = vcombine.high %v10845_v16, %v10845_v16  ;;  %v11016_v39 = vrot.slane %v10853_v14, %v16812_v32  ;;  %v10852_v35 = vrot.slane %v10824_v4, %v16802_v17 }
0x44da   :  { %v11172_v55 = vrot.slane %v10838_v9, %v16812_v32  ;;  %v10854_v42 = vcombine.high %v10838_v9, %v10838_v9 }
0x44db   :  { %10939 = vrot.lane.b32.xlu0 %v10938_v25, %s16399_s5  ;;  %v11094_v23 = vrot.slane %v10855_v1, %v16812_v32  ;;  %v11250_v61 = vrot.slane %v10852_v35, %v16812_v32  ;;  %v10856_v12 = vcombine.high %v10852_v35, %v10852_v35 }
0x44dc   :  { %v11328_v6 = vrot.slane %v10854_v42, %v16812_v32 }
0x44dd   :  { %11017 = vrot.lane.b32.xlu1 %v11016_v39, %s16399_s5  ;;  %v11406_v33 = vrot.slane %v10856_v12, %v16812_v32 }
0x44df   :  { %11095 = vrot.lane.b32.xlu0 %v11094_v23, %s16399_s5 }
0x44e1   :  { %11173 = vrot.lane.b32.xlu1 %v11172_v55, %s16399_s5 }
0x44e3   :  { %11251 = vrot.lane.b32.xlu0 %v11250_v61, %s16399_s5 }
0x44e5   :  { %11329 = vrot.lane.b32.xlu1 %v11328_v6, %s16399_s5 }
0x44e7   :  { %11407 = vrot.lane.b32.xlu0 %v11406_v33, %s16399_s5 }
0x454b   :  { %v10862_v58 = vpop.permute.xlu1 %10861 }
0x454c   :  { %15502 = vmatmul.mubr.msk.f32.vlgmr.msra.gmra.mrb[112].mxu1 %vm107_vm0, %v10862_v58 }
0x454d   :  { %15510 = vmatpush3.xpose.msk.msra.mxu1 %vm107_vm0, %v18242_v63  ;;  %v10940_v57 = vpop.permute.xlu0 %10939  ;;  %15511 = vmatprep.mubr.msk.f32.mxu1 %vm16396_vm1, %v16397_v26 }
0x454e   :  { %15507 = vmatmul.mubr.msk.f32.vlgmr.msra.gmra.mrb[110].mxu0 %vm107_vm0, %v10940_v57  ;;  %15519 = vmatprep.subr.mxu1 %v16397_v26 }
0x454f   :  { %15515 = vmatpush3.xpose.msk.msra.mxu0 %vm107_vm0, %v18250_v40  ;;  %v11018_v46 = vpop.permute.xlu1 %11017  ;;  %15516 = vmatprep.mubr.msk.f32.mxu0 %vm16396_vm1, %v16397_v26 }
0x4550   :  { %15512 = vmatmul.mubr.msk.f32.vlgmr.msra.gmra.mrb[114].mxu1 %vm107_vm0, %v11018_v46  ;;  %15524 = vmatprep.subr.mxu0 %v16397_v26 }
0x4551   :  { %15520 = vmatpush3.xpose.msk.msra.mxu1 %vm107_vm0, %v18258_v41  ;;  %v11096_v54 = vpop.permute.xlu0 %11095  ;;  %15521 = vmatprep.mubr.msk.f32.mxu1 %vm16396_vm1, %v16397_v26 }
0x4552   :  { %15517 = vmatmul.mubr.msk.f32.vlgmr.msra.gmra.mrb[112].mxu0 %vm107_vm0, %v11096_v54  ;;  %15529 = vmatprep.subr.mxu1 %v16397_v26 }
0x4553   :  { %15525 = vmatpush3.xpose.msk.msra.mxu0 %vm107_vm0, %v18266_v31  ;;  %v11174_v18 = vpop.permute.xlu1 %11173  ;;  %15526 = vmatprep.mubr.msk.f32.mxu0 %vm16396_vm1, %v16397_v26 }
0x4554   :  { %15522 = vmatmul.mubr.msk.f32.vlgmr.msra.gmra.mrb[116].mxu1 %vm107_vm0, %v11174_v18  ;;  %15534 = vmatprep.subr.mxu0 %v16397_v26 }
0x4555   :  { %15530 = vmatpush3.xpose.msk.msra.mxu1 %vm107_vm0, %v18127_v10  ;;  %v11252_v59 = vpop.permute.xlu0 %11251  ;;  %15531 = vmatprep.mubr.msk.f32.mxu1 %vm16396_vm1, %v16397_v26 }
0x4556   :  { %15527 = vmatmul.mubr.msk.f32.vlgmr.msra.gmra.mrb[114].mxu0 %vm107_vm0, %v11252_v59  ;;  %15539 = vmatprep.subr.mxu1 %v16397_v26 }
0x4557   :  { %15535 = vmatpush3.xpose.msk.msra.mxu0 %vm107_vm0, %v18280_v43  ;;  %v11330_v5 = vpop.permute.xlu1 %11329  ;;  %15536 = vmatprep.mubr.msk.f32.mxu0 %vm16396_vm1, %v16397_v26 }
0x4558   :  { %15532 = vmatmul.mubr.msk.f32.vlgmr.msra.gmra.mrb[118].mxu1 %vm107_vm0, %v11330_v5  ;;  %15544 = vmatprep.subr.mxu0 %v16397_v26 }
0x4559   :  { %15540 = vmatpush3.msra.mxu1 %v18193_v37  ;;  %v11408_v27 = vpop.permute.xlu0 %11407  ;;  %15541 = vmatprep.mubr.msk.f32.mxu1 %vm16396_vm1, %v16397_v26 }
0x455a   :  { %15537 = vmatmul.mubr.msk.f32.vlgmr.msra.gmra.mrb[116].mxu0 %vm107_vm0, %v11408_v27  ;;  %15549 = vmatprep.subr.mxu1 %v16397_v26 }
0x455b   :  { %15545 = vmatpush3.msra.mxu0 %v17976_v56  ;;  %15546 = vmatprep.mubr.msk.f32.mxu0 %vm16396_vm1, %v16397_v26 }
0x455c   :  { %15554 = vmatprep.subr.mxu0 %v16397_v26 }
0x461f   :  { %v10931_v62 = vpop.f32.mrb[112].mxu1 }
0x4620   :  { %v15503_v48 = vpop.f32.mrb[113].mxu1 }
0x4621   :  { %v11009_v24 = vpop.f32.mrb[110].mxu0 }
0x4622   :  { %v11489_v20 = vrot.slane %v11009_v24, 7  ;;  %v15508_v30 = vpop.f32.mrb[111].mxu0 }
0x4623   :  { %v11087_v52 = vpop.f32.mrb[114].mxu1 }
0x4624   :  { %v11490_v36 = vsel %vm3085_vm13, %v11489_v20, %v10931_v62  ;;  %v11491_v29 = vrot.slane %v11087_v52, 6  ;;  %v15513_v0 = vpop.f32.mrb[115].mxu1 }
0x4625   :  { %v11165_v3 = vpop.f32.mrb[112].mxu0 }
0x4626   :  { %v11492_v50 = vsel %vm3088_vm14, %v11491_v29, %v11490_v36  ;;  %v11493_v19 = vrot.slane %v11165_v3, 5  ;;  %v15518_v56 = vpop.f32.mrb[113].mxu0 }
0x4627   :  { %v11243_v8 = vpop.f32.mrb[116].mxu1 }
0x4628   :  { %v11494_v53 = vsel %vm3091_vm15, %v11493_v19, %v11492_v50  ;;  %v11495_v13 = vrot.slane %v11243_v8, 4  ;;  %v15523_v11 = vpop.f32.mrb[117].mxu1 }
0x4629   :  { %v11321_v49 = vpop.f32.mrb[114].mxu0 }
0x462a   :  { %v11496_v16 = vsel %vm3094_vm3, %v11495_v13, %v11494_v53  ;;  %v11497_v14 = vrot.slane %v11321_v49, 3  ;;  %v15528_v25 = vpop.f32.mrb[115].mxu0 }
0x462b   :  { %v11399_v1 = vpop.f32.mrb[118].mxu1 }
0x462c   :  { %v11498_v4 = vsel %vm3097_vm4, %v11497_v14, %v11496_v16  ;;  %v11499_v39 = vrot.slane %v11399_v1, 2  ;;  %v15533_v9 = vpop.f32.mrb[119].mxu1 }
0x462d   :  { %v11477_v23 = vpop.f32.mrb[116].mxu0 }
0x462e   :  { %v11501_v35 = vrot.slane %v11477_v23, 1  ;;  %v15538_v55 = vpop.f32.mrb[117].mxu0  ;;  %v11500_v42 = vsel %vm3100_vm5, %v11499_v39, %v11498_v4 }
0x4630   :  { %v11502_v61 = vsel %vm3103_vm6, %v11501_v35, %v11500_v42 }
0x4631   :  { %v11504_v12 = vsel %vm3106_vm7, %v11502_v61, -inf }
0x4632   :  { %11505 = vmax.xlane.f32.xlu1 %v11504_v12 }
0x46bf   :  { %v11506_v6 = vpop.xlane.xlu1 %11505 }
0x46c0   :  { %v11508_v33 = vrot.slane %v11506_v6, 1  ;;  %v11509_v58 = vrot.slane %v11506_v6, 2  ;;  %v11510_v57 = vrot.slane %v11506_v6, 3  ;;  %v11511_v46 = vrot.slane %v11506_v6, 4 }
0x46c1   :  { %v11512_v54 = vrot.slane %v11506_v6, 5  ;;  %v11513_v18 = vrot.slane %v11506_v6, 6  ;;  %v11514_v59 = vrot.slane %v11506_v6, 7  ;;  %v11523_v5 = vsub.f32 %v10931_v62, %v11506_v6 }
0x46c2   :  { %v11524_v27 = vsub.f32 %v11009_v24, %v11508_v33  ;;  %v11525_v48 = vsub.f32 %v11087_v52, %v11509_v58  ;;  %v11526_v20 = vsub.f32 %v11165_v3, %v11510_v57  ;;  %v11527_v30 = vsub.f32 %v11243_v8, %v11511_v46 }
0x46c3   :  { %v11528_v36 = vsub.f32 %v11321_v49, %v11512_v54  ;;  %v11531_v29 = vmul.f32 1.442695, %v11523_v5  ;;  %v11529_v0 = vsub.f32 %v11399_v1, %v11513_v18  ;;  %v11530_v53 = vsub.f32 %v11477_v23, %v11514_v59 }
0x46c4   :  { %v11533_v50 = vmul.f32 1.442695, %v11524_v27  ;;  %v11535_v19 = vmul.f32 1.442695, %v11525_v48  ;;  %v11537_v56 = vmul.f32 1.442695, %v11526_v20 }
0x46c5   :  { %16190 = vpow2.f32 %v11531_v29  ;;  %v11539_v13 = vmul.f32 1.442695, %v11527_v30  ;;  %v11541_v11 = vmul.f32 1.442695, %v11528_v36  ;;  %v11543_v16 = vmul.f32 1.442695, %v11529_v0 }
0x46c6   :  { %16192 = vpow2.f32 %v11533_v50  ;;  %v11545_v14 = vmul.f32 1.442695, %v11530_v53 }
0x46c7   :  { %16194 = vpow2.f32 %v11535_v19 }
0x46c8   :  { %16196 = vpow2.f32 %v11537_v56 }
0x46c9   :  { %16198 = vpow2.f32 %v11539_v13 }
0x46ca   :  { %16200 = vpow2.f32 %v11541_v11 }
0x46cb   :  { %16202 = vpow2.f32 %v11543_v16 }
0x46cc   :  { %16204 = vpow2.f32 %v11545_v14 }
0x46cf   :  { %v16191_v62 = vpop.eup %16190 }
0x46d0   :  { %v16193_v24 = vpop.eup %16192 }
0x46d1   :  { %v16195_v52 = vpop.eup %16194  ;;  %v11555_v3 = vrot.slane %v16193_v24, 7 }
0x46d2   :  { %v16197_v8 = vpop.eup %16196  ;;  %v11557_v49 = vrot.slane %v16195_v52, 6 }
0x46d3   :  { %v16199_v25 = vpop.eup %16198  ;;  %v11556_v1 = vsel %vm3085_vm13, %v11555_v3, %v16191_v62  ;;  %v11559_v4 = vrot.slane %v16197_v8, 5 }
0x46d4   :  { %v16201_v39 = vpop.eup %16200  ;;  %v11558_v9 = vsel %vm3088_vm14, %v11557_v49, %v11556_v1  ;;  %v11561_v23 = vrot.slane %v16199_v25, 4 }
0x46d5   :  { %v16203_v35 = vpop.eup %16202  ;;  %v11560_v55 = vsel %vm3091_vm15, %v11559_v4, %v11558_v9  ;;  %v11563_v42 = vrot.slane %v16201_v39, 3 }
0x46d6   :  { %v16205_v61 = vpop.eup %16204  ;;  %v11562_v12 = vsel %vm3094_vm3, %v11561_v23, %v11560_v55  ;;  %v11565_v6 = vrot.slane %v16203_v35, 2 }
0x46d7   :  { %v11564_v33 = vsel %vm3097_vm4, %v11563_v42, %v11562_v12  ;;  %v11567_v58 = vrot.slane %v16205_v61, 1 }
0x46d8   :  { %v11566_v57 = vsel %vm3100_vm5, %v11565_v6, %v11564_v33 }
0x46d9   :  { %v11568_v46 = vsel %vm3103_vm6, %v11567_v58, %v11566_v57 }
0x46da   :  { %v11570_v54 = vsel %vm3106_vm7, %v11568_v46, 0.0 }
0x46db   :  { %11571 = vadd.xlane.f32.xlu0 %v11570_v54 }
0x46f1   :  { %12189 = vrot.lane.b32.xlu0 %v18214_v15, %s16399_s5 }
0x4768   :  { %v11572_v18 = vpop.xlane.xlu0 %11571 }
0x4769   :  { %v11574_v59 = vrot.slane %v11572_v18, 1  ;;  %v11575_v5 = vrot.slane %v11572_v18, 2  ;;  %v11576_v27 = vrot.slane %v11572_v18, 3  ;;  %v11577_v48 = vrot.slane %v11572_v18, 4 }
0x476a   :  { %16206 = vrcp.f32 %v11572_v18  ;;  %v11578_v20 = vrot.slane %v11572_v18, 5  ;;  %v11579_v30 = vrot.slane %v11572_v18, 6  ;;  %v11580_v36 = vrot.slane %v11572_v18, 7 }
0x476b   :  { %16208 = vrcp.f32 %v11574_v59 }
0x476c   :  { %16210 = vrcp.f32 %v11575_v5 }
0x476d   :  { %16212 = vrcp.f32 %v11576_v27 }
0x476e   :  { %16214 = vrcp.f32 %v11577_v48 }
0x476f   :  { %16216 = vrcp.f32 %v11578_v20 }
0x4770   :  { %16218 = vrcp.f32 %v11579_v30 }
0x4771   :  { %16220 = vrcp.f32 %v11580_v36 }
0x4774   :  { %v16207_v29 = vpop.eup %16206 }
0x4775   :  { %v16209_v0 = vpop.eup %16208  ;;  %v11590_v50 = vmul.f32 %v16207_v29, %v16191_v62 }
0x4776   :  { %v16211_v19 = vpop.eup %16210  ;;  %v11592_v56 = vmul.f32 %v16209_v0, %v16193_v24 }
0x4777   :  { %v16213_v53 = vpop.eup %16212  ;;  %15542 = vmatmul.mubr.msk.f32.vlgmr.msra.gmra.mrb[120].mxu1 %vm3106_vm7, %v11590_v50  ;;  %v11594_v13 = vmul.f32 %v16211_v19, %v16195_v52 }
0x4778   :  { %v16215_v11 = vpop.eup %16214  ;;  %15550 = vmatpush3.msra.mxu1 %v18242_v63  ;;  %15547 = vmatmul.mubr.msk.f32.vlgmr.msra.gmra.mrb[118].mxu0 %vm3106_vm7, %v11592_v56  ;;  %v14046_v16 = vrot.slane %v11592_v56, 7  ;;  %v11596_v14 = vmul.f32 %v16213_v53, %v16197_v8 }
0x4779   :  { %v16217_v3 = vpop.eup %16216  ;;  %15555 = vmatpush3.msra.mxu0 %v18250_v40  ;;  %15551 = vmatprep.mubr.msk.f32.mxu1 %vm16396_vm1, %v16397_v26  ;;  %v14048_v62 = vrot.slane %v11594_v13, 6  ;;  %v11598_v49 = vmul.f32 %v16215_v11, %v16199_v25 }
0x477a   :  { %v16219_v24 = vpop.eup %16218  ;;  %v14047_v1 = vsel %vm3085_vm13, %v14046_v16, %v11590_v50  ;;  %15559 = vmatprep.subr.mxu1 %v16397_v26  ;;  %15556 = vmatprep.mubr.msk.f32.mxu0 %vm16396_vm1, %v16397_v26  ;;  %v14050_v52 = vrot.slane %v11596_v14, 5  ;;  %v11600_v4 = vmul.f32 %v16217_v3, %v16201_v39 }
0x477b   :  { %v16221_v9 = vpop.eup %16220  ;;  %15552 = vmatmul.mubr.msk.f32.vlgmr.msra.gmra.mrb[122].mxu1 %vm3106_vm7, %v11594_v13  ;;  %v14049_v8 = vsel %vm3088_vm14, %v14048_v62, %v14047_v1  ;;  %15564 = vmatprep.subr.mxu0 %v16397_v26  ;;  %v14052_v23 = vrot.slane %v11598_v49, 4  ;;  %v11602_v55 = vmul.f32 %v16219_v24, %v16203_v35 }
0x477c   :  { %15560 = vmatpush3.msra.mxu1 %v18258_v41  ;;  %15557 = vmatmul.mubr.msk.f32.vlgmr.msra.gmra.mrb[120].mxu0 %vm3106_vm7, %v11596_v14  ;;  %v14051_v25 = vsel %vm3091_vm15, %v14050_v52, %v14049_v8  ;;  %v14054_v42 = vrot.slane %v11600_v4, 3  ;;  %v11604_v12 = vmul.f32 %v16221_v9, %v16205_v61  ;;  %v12190_v9 = vpop.permute.xlu0 %12189 }
0x477d   :  { %15565 = vmatpush3.msra.mxu0 %v18266_v31  ;;  %15561 = vmatprep.mubr.msk.f32.mxu1 %vm16396_vm1, %v16397_v26  ;;  %v14053_v39 = vsel %vm3094_vm3, %v14052_v23, %v14051_v25  ;;  %v14056_v6 = vrot.slane %v11602_v55, 2 }
0x477e   :  { %15569 = vmatprep.subr.mxu1 %v16397_v26  ;;  %15566 = vmatprep.mubr.msk.f32.mxu0 %vm16396_vm1, %v16397_v26  ;;  %v14055_v35 = vsel %vm3097_vm4, %v14054_v42, %v14053_v39  ;;  %v14058_v33 = vrot.slane %v11604_v12, 1 }
0x477f   :  { %15562 = vmatmul.mubr.msk.f32.vlgmr.msra.gmra.mrb[124].mxu1 %vm3106_vm7, %v11598_v49  ;;  %15574 = vmatprep.subr.mxu0 %v16397_v26  ;;  %v14057_v61 = vsel %vm3100_vm5, %v14056_v6, %v14055_v35 }
0x4780   :  { %15570 = vmatpush3.msra.mxu1 %v18127_v10  ;;  %15567 = vmatmul.mubr.msk.f32.vlgmr.msra.gmra.mrb[122].mxu0 %vm3106_vm7, %v11600_v4  ;;  %v14059_v58 = vsel %vm3103_vm6, %v14058_v33, %v14057_v61 }
0x4781   :  { %15575 = vmatpush3.msra.mxu0 %v18280_v43  ;;  %15571 = vmatprep.mubr.msk.f32.mxu1 %vm16396_vm1, %v16397_v26  ;;  %14086 = vst.msk [vmem:[#allocation9 + $0x28] sm:$0xff] %vm3106_vm7, %v14059_v58 }
0x4782   :  { %15576 = vmatprep.mubr.msk.f32.mxu0 %vm16396_vm1, %v16397_v26  ;;  %15909 = vmatprep.subr.bf16.mxu0 %v16395_v22 }
0x4783   :  { %15572 = vmatmul.mubr.msk.f32.vlgmr.msra.gmra.mrb[126].mxu1 %vm3106_vm7, %v11602_v55  ;;  %15897 = vmatprep.subr.bf16.mxu1 %v16395_v22  ;;  %v18379_v55 = vld [vmem:[#allocation2 + $0x8] sm:$0xff] }
0x4784   :  { %15577 = vmatmul.mubr.msk.f32.vlgmr.msra.gmra.mrb[124].mxu0 %vm3106_vm7, %v11604_v12  ;;  %15899 = vmatpush3.bf16.msra.mxu1 %v17313_v34 }
0x4785   :  { %15911 = vmatpush3.bf16.msra.mxu0 %v16587_v38  ;;  %15900 = vmatprep.subr.bf16.mxu1 %v16395_v22 }
0x4786   :  { %15595 = vmatprep.mubr.msk.f32.mxu1 %vm16396_vm1, %v16397_v26  ;;  %15602 = vmatprep.mubr.msk.f32.mxu0 %vm16396_vm1, %v16397_v26 }
0x4787   :  { %15912 = vmatprep.subr.bf16.mxu0 %v16395_v22 }
0x4788   :  { %15902 = vmatpush3.bf16.msra.mxu1 %v17319_v51 }
0x4789   :  { %15903 = vmatprep.subr.bf16.mxu1 %v16395_v22 }
0x478c   :  { %15905 = vmatpush3.bf16.msra.mxu1 %v17329_v47 }
0x478d   :  { %15906 = vmatprep.subr.bf16.mxu1 %v16395_v22 }
0x4790   :  { %15908 = vmatpush3.bf16.msra.mxu1 %v17339_v7 }
0x4791   :  { %15621 = vmatprep.subr.mxu1 %v16397_v26 }
0x484a   :  { %v11674_v38 = vpop.f32.mrb[120].mxu1 }
0x484b   :  { %v15543_v10 = vpop.f32.mrb[121].mxu1  ;;  %v11747_v57 = vpop.f32.mrb[118].mxu0 }
0x484c   :  { %v12200_v46 = vrot.slane %v11747_v57, 7  ;;  %v15548_v54 = vpop.f32.mrb[119].mxu0 }
0x484e   :  { %v12201_v18 = vsel %vm3085_vm13, %v12200_v46, %v11674_v38  ;;  %v11820_v59 = vpop.f32.mrb[122].mxu1 }
0x484f   :  { %v12202_v5 = vrot.slane %v11820_v59, 6  ;;  %v15553_v27 = vpop.f32.mrb[123].mxu1  ;;  %v11893_v48 = vpop.f32.mrb[120].mxu0 }
0x4850   :  { %v12204_v20 = vrot.slane %v11893_v48, 5  ;;  %v15558_v30 = vpop.f32.mrb[121].mxu0 }
0x4851   :  { %v12203_v36 = vsel %vm3088_vm14, %v12202_v5, %v12201_v18 }
0x4852   :  { %v12205_v29 = vsel %vm3091_vm15, %v12204_v20, %v12203_v36  ;;  %v11966_v0 = vpop.f32.mrb[124].mxu1 }
0x4853   :  { %v12206_v50 = vrot.slane %v11966_v0, 4  ;;  %v15563_v19 = vpop.f32.mrb[125].mxu1  ;;  %v12039_v56 = vpop.f32.mrb[122].mxu0 }
0x4854   :  { %v12208_v53 = vrot.slane %v12039_v56, 3  ;;  %v15568_v13 = vpop.f32.mrb[123].mxu0 }
0x4855   :  { %v12207_v11 = vsel %vm3094_vm3, %v12206_v50, %v12205_v29 }
0x4856   :  { %v12209_v16 = vsel %vm3097_vm4, %v12208_v53, %v12207_v11  ;;  %v12112_v14 = vpop.f32.mrb[126].mxu1 }
0x4857   :  { %v12210_v3 = vrot.slane %v12112_v14, 2  ;;  %v15573_v62 = vpop.f32.mrb[127].mxu1  ;;  %v12185_v49 = vpop.f32.mrb[124].mxu0 }
0x4858   :  { %v12212_v24 = vrot.slane %v12185_v49, 1  ;;  %v15578_v1 = vpop.f32.mrb[125].mxu0 }
0x4859   :  { %v12211_v52 = vsel %vm3100_vm5, %v12210_v3, %v12209_v16 }
0x485a   :  { %v12213_v4 = vsel %vm3103_vm6, %v12212_v24, %v12211_v52 }
0x485b   :  { %12214 = vrot.lane.b32.xlu1 %v12213_v4, %s16401_s11 }
0x48cd   :  { %v12215_v8 = vpop.permute.xlu1 %12214 }
0x48ce   :  { %v12217_v23 = vsel %vm107_vm0, %v12190_v9, %v12215_v8 }
0x48cf   :  { %15596 = vmatmul.mubr.msk.f32.vlgmr.msra.gmra.mrb[128].mxu1 %vm3827_vm8, %v12217_v23 }
0x48d0   :  { %15622 = vmatpush3.xpose.msk.msra.mxu1 %vm107_vm0, %v18379_v55  ;;  %15623 = vmatprep.mubr.msk.f32.mxu1 %vm16396_vm1, %v16397_v26 }
0x48d1   :  { %15631 = vmatprep.subr.mxu1 %v16397_v26 }
0x49a2   :  { %v12287_v25 = vpop.f32.mrb[128].mxu1 }
0x49a3   :  { %v12288_v42 = vadd.f32 %v18174_v44, %v12287_v25  ;;  %v15597_v12 = vpop.f32.mrb[129].mxu1 }
0x49a5   :  { %13974 = vst.msk [vmem:[#allocation8 + $0x28] sm:$0xff] %vm334_vm2, %v12288_v42  ;;  %v12291_v39 = vsel %vm334_vm2, %v12288_v42, -inf }
0x49a6   :  { %12292 = vmax.xlane.f32.xlu1 %v12291_v39 }
0x4a33   :  { %v12293_v6 = vpop.xlane.xlu1 %12292 }
0x4a34   :  { %vm12294_vm12 = vcmp.eq.f32.partialorder %v12288_v42, %v12293_v6 }
0x4a35   :  { %v12295_v35 = vsel %vm12294_vm12, %v16577_v28, 16 }
0x4a36   :  { %v12296_v33 = vsel %vm334_vm2, %v12295_v35, 2147483647 }
0x4a37   :  { %v12298_v61 = vshra.s32 %v12296_v33, 16  ;;  %v12297_v38 = vand.u32 65535, %v12296_v33 }
0x4a39   :  { %v12300_v58 = vcvt.s32.f32 %v12298_v61  ;;  %v12299_v57 = vcvt.s32.f32 %v12297_v38 }
0x4a3b   :  { %12301 = vmin.xlane.f32.xlu0 %v12300_v58 }
0x4ac8   :  { %v12302_v10 = vpop.xlane.xlu0 %12301 }
0x4ac9   :  { %vm12303_vm9 = vcmp.eq.f32.partialorder %v12300_v58, %v12302_v10  ;;  %v12308_v46 = vcvt.f32.s32 %v12302_v10 }
0x4aca   :  { %v12304_v44 = vsel %vm12303_vm9, %v12299_v57, inf }
0x4acb   :  { %12305 = vmin.xlane.f32.xlu0 %v12304_v44  ;;  %v12309_v18 = vshll.u32 %v12308_v46, 16 }
0x4b58   :  { %v12306_v54 = vpop.xlane.xlu0 %12305 }
0x4b59   :  { %v12307_v59 = vcvt.f32.s32 %v12306_v54 }
0x4b5b   :  { %v12310_v5 = vadd.s32 %v12309_v18, %v12307_v59  ;;  %v18464_v18 = vld [vmem:[#allocation2 + $0x30] sm:$0xff] }
0x4b5d   :  { %vm12311_vm10 = vcmp.eq.s32.totalorder %v16577_v28, %v12310_v5 }
0x4b5e   :  { %v14336_v27 = vsel %vm12311_vm10, 1.0, %v16397_v26 }
0x4b5f   :  { %15603 = vmatmul.mubr.msk.f32.vlgmr.msra.gmra.mrb[126].mxu0 %vm334_vm2, %v14336_v27 }
0x4b60   :  { %15914 = vmatpush3.bf16.msra.mxu0 %v16776_v2  ;;  %15613 = vmatprep.mubr.msk.f32.mxu0 %vm16396_vm1, %v16397_v26 }
0x4b61   :  { %15915 = vmatprep.subr.bf16.mxu0 %v16395_v22 }
0x4b64   :  { %15917 = vmatpush3.bf16.msra.mxu0 %v16783_v21 }
0x4b65   :  { %15616 = vmatprep.subr.mxu0 %v16397_v26 }
0x4b67   :  { %15614 = vmatmul.mubr.msk.f32.vlgmr.msra.gmra.mrb[128].mxu0 %vm107_vm0, %v12190_v9 }
0x4b68   :  { %15618 = vmatprep.mubr.msk.f32.mxu0 %vm16396_vm1, %v16397_v26 }
0x4b6d   :  { %15617 = vmatpush3.xpose.msk.msra.mxu0 %vm107_vm0, %v18193_v37 }
0x4b6e   :  { %15626 = vmatprep.subr.mxu0 %v16397_v26 }
0x4c32   :  { %v12383_v28 = vpop.f32.mrb[126].mxu0 }
0x4c33   :  { %v15604_v2 = vpop.f32.mrb[127].mxu0  ;;  %v12384_v21 = vadd.f32 %v18208_v45, %v12383_v28 }
0x4c3a   :  { %v12455_v48 = vpop.f32.mrb[128].mxu0 }
0x4c3b   :  { %v12456_v20 = vadd.f32 %v18201_v60, %v12455_v48  ;;  %v15615_v30 = vpop.f32.mrb[129].mxu0 }
0x4c3d   :  { %12467 = vrot.lane.b32.xlu1 %v12456_v20, %s16398_s2  ;;  %v12459_v36 = vadd.f32 %v12456_v20, %v12384_v21 }
0x4c3f   :  { %v14339_v29 = vmul.f32 -1.442695, %v12459_v36 }
0x4c41   :  { %16222 = vpow2.f32 %v14339_v29 }
0x4c4b   :  { %v16223_v0 = vpop.eup %16222 }
0x4c4c   :  { %v12463_v50 = vadd.f32 1.0, %v16223_v0 }
0x4c4e   :  { %16224 = vrcp.f32 %v12463_v50 }
0x4c58   :  { %v16225_v19 = vpop.eup %16224 }
0x4c59   :  { %v12477_v16 = vsub.f32 1.0, %v16225_v19  ;;  %v12483_v45 = vmul.f32 %v16225_v19, %v18214_v15 }
0x4caf   :  { %v12468_v56 = vpop.permute.xlu1 %12467 }
0x4cb0   :  { %v12470_v53 = vmul.f32 %v16225_v19, %v12468_v56 }
0x4cb2   :  { %12472 = vrot.lane.b32.xlu0 %v12470_v53, %s16398_s2  ;;  %s16338_s2 = scalar_lea.vmem %s14106_s10, 896 }
0x4cb3   :  { %p16339_p2 = scmp.ne.s32.totalorder %s14106_s10, %s16338_s2  ;;  %p16344_p4 = scmp.lt.s32.totalorder %s16338_s2, %s16338_s2 }
0x4cb5   :  { %p16345_p5 = por %p16344_p4, %p16343_p3 }
0x4cb7   :  { %p16346_p6 = pnand %p16345_p5, %p16339_p2 }
0x4d24   :  { %v12473_v13 = vpop.permute.xlu0 %12472 }
0x4d25   :  { %v12475_v11 = vadd.f32 %v12473_v13, %v12384_v21 }
0x4d27   :  { %16226 = vtanh.f32 %v12475_v11 }
0x4d31   :  { %v16227_v60 = vpop.eup %16226 }
0x4d32   :  { %12479 = vrot.lane.b32.xlu1 %v16227_v60, %s16399_s5 }
0x4da4   :  { %v12480_v14 = vpop.permute.xlu1 %12479 }
0x4da5   :  { %v12482_v3 = vmul.f32 %v12480_v14, %v12477_v16 }
0x4da7   :  { %v18412_v62 = vadd.f32 %v12483_v45, %v12482_v3 }
0x4da9   :  { %v12486_v49 = vcombine.high %v18412_v62, %v18412_v62  ;;  %v12493_v24 = vrot.slane %v18412_v62, %v16802_v17 }
0x4dab   :  { %v12500_v1 = vrot.slane %v12486_v49, %v16802_v17  ;;  %v12501_v52 = vcombine.high %v12493_v24, %v12493_v24  ;;  %v12509_v4 = vrot.slane %v12493_v24, %v16802_v17 }
0x4dad   :  { %v12538_v9 = vrot.slane %v12509_v4, %v16812_v32  ;;  %v12523_v8 = vrot.slane %v12501_v52, %v16802_v17  ;;  %v12531_v23 = vcombine.high %v12509_v4, %v12509_v4  ;;  %v12502_v15 = vcombine.high %v12500_v1, %v12500_v1 }
0x4dae   :  { %v12516_v39 = vrot.slane %v12500_v1, %v16802_v17 }
0x4daf   :  { %12539 = vrot.lane.b32.xlu1 %v12538_v9, %s16399_s5  ;;  %v12616_v25 = vrot.slane %v12523_v8, %v16812_v32  ;;  %v12533_v42 = vcombine.high %v12523_v8, %v12523_v8  ;;  %v12694_v12 = vrot.slane %v12531_v23, %v16812_v32  ;;  %v12530_v35 = vrot.slane %v12502_v15, %v16802_v17 }
0x4db0   :  { %v12850_v33 = vrot.slane %v12516_v39, %v16812_v32  ;;  %v12532_v61 = vcombine.high %v12516_v39, %v12516_v39 }
0x4db1   :  { %12617 = vrot.lane.b32.xlu0 %v12616_v25, %s16399_s5  ;;  %v12772_v6 = vrot.slane %v12533_v42, %v16812_v32  ;;  %v12928_v58 = vrot.slane %v12530_v35, %v16812_v32  ;;  %v12534_v38 = vcombine.high %v12530_v35, %v12530_v35 }
0x4db2   :  { %v13006_v10 = vrot.slane %v12532_v61, %v16812_v32 }
0x4db3   :  { %12695 = vrot.lane.b32.xlu1 %v12694_v12, %s16399_s5  ;;  %v13084_v57 = vrot.slane %v12534_v38, %v16812_v32 }
0x4db5   :  { %12773 = vrot.lane.b32.xlu0 %v12772_v6, %s16399_s5 }
0x4db7   :  { %12851 = vrot.lane.b32.xlu1 %v12850_v33, %s16399_s5 }
0x4db9   :  { %12929 = vrot.lane.b32.xlu0 %v12928_v58, %s16399_s5 }
0x4dbb   :  { %13007 = vrot.lane.b32.xlu1 %v13006_v10, %s16399_s5 }
0x4dbd   :  { %13085 = vrot.lane.b32.xlu0 %v13084_v57, %s16399_s5 }
0x4e21   :  { %v12540_v17 = vpop.permute.xlu1 %12539 }
0x4e22   :  { %15619 = vmatmul.mubr.msk.f32.vlgmr.msra.gmra.mrb[130].mxu0 %vm107_vm0, %v12540_v17 }
0x4e23   :  { %15627 = vmatpush3.xpose.msk.msra.mxu0 %vm107_vm0, %v18242_v63  ;;  %v12618_v44 = vpop.permute.xlu0 %12617  ;;  %15628 = vmatprep.mubr.msk.f32.mxu0 %vm16396_vm1, %v16397_v26 }
0x4e24   :  { %15624 = vmatmul.mubr.msk.f32.vlgmr.msra.gmra.mrb[130].mxu1 %vm107_vm0, %v12618_v44  ;;  %15636 = vmatprep.subr.mxu0 %v16397_v26 }
0x4e25   :  { %15632 = vmatpush3.xpose.msk.msra.mxu1 %vm107_vm0, %v18250_v40  ;;  %v12696_v32 = vpop.permute.xlu1 %12695  ;;  %15633 = vmatprep.mubr.msk.f32.mxu1 %vm16396_vm1, %v16397_v26 }
0x4e26   :  { %15629 = vmatmul.mubr.msk.f32.vlgmr.msra.gmra.mrb[132].mxu0 %vm107_vm0, %v12696_v32  ;;  %15641 = vmatprep.subr.mxu1 %v16397_v26 }
0x4e27   :  { %15637 = vmatpush3.xpose.msk.msra.mxu0 %vm107_vm0, %v18258_v41  ;;  %v12774_v46 = vpop.permute.xlu0 %12773  ;;  %15638 = vmatprep.mubr.msk.f32.mxu0 %vm16396_vm1, %v16397_v26 }
0x4e28   :  { %15634 = vmatmul.mubr.msk.f32.vlgmr.msra.gmra.mrb[132].mxu1 %vm107_vm0, %v12774_v46  ;;  %15646 = vmatprep.subr.mxu0 %v16397_v26 }
0x4e29   :  { %15642 = vmatpush3.xpose.msk.msra.mxu1 %vm107_vm0, %v18266_v31  ;;  %v12852_v54 = vpop.permute.xlu1 %12851  ;;  %15643 = vmatprep.mubr.msk.f32.mxu1 %vm16396_vm1, %v16397_v26 }
0x4e2a   :  { %15639 = vmatmul.mubr.msk.f32.vlgmr.msra.gmra.mrb[134].mxu0 %vm107_vm0, %v12852_v54  ;;  %15651 = vmatprep.subr.mxu1 %v16397_v26 }
0x4e2b   :  { %15647 = vmatpush3.xpose.msk.msra.mxu0 %vm107_vm0, %v18464_v18  ;;  %v12930_v59 = vpop.permute.xlu0 %12929  ;;  %15648 = vmatprep.mubr.msk.f32.mxu0 %vm16396_vm1, %v16397_v26 }
0x4e2c   :  { %15644 = vmatmul.mubr.msk.f32.vlgmr.msra.gmra.mrb[134].mxu1 %vm107_vm0, %v12930_v59  ;;  %15656 = vmatprep.subr.mxu0 %v16397_v26 }
0x4e2d   :  { %15652 = vmatpush3.xpose.msk.msra.mxu1 %vm107_vm0, %v18280_v43  ;;  %v13008_v5 = vpop.permute.xlu1 %13007  ;;  %15653 = vmatprep.mubr.msk.f32.mxu1 %vm16396_vm1, %v16397_v26 }
0x4e2e   :  { %15649 = vmatmul.mubr.msk.f32.vlgmr.msra.gmra.mrb[136].mxu0 %vm107_vm0, %v13008_v5  ;;  %15661 = vmatprep.subr.mxu1 %v16397_v26 }
0x4e2f   :  { %15657 = vmatpush3.msra.mxu0 %v18193_v37  ;;  %v13086_v27 = vpop.permute.xlu0 %13085  ;;  %15658 = vmatprep.mubr.msk.f32.mxu0 %vm16396_vm1, %v16397_v26 }
0x4e30   :  { %15654 = vmatmul.mubr.msk.f32.vlgmr.msra.gmra.mrb[136].mxu1 %vm107_vm0, %v13086_v27  ;;  %15666 = vmatprep.subr.mxu0 %v16397_v26 }
0x4e31   :  { %15662 = vmatpush3.msra.mxu1 %v18379_v55  ;;  %15663 = vmatprep.mubr.msk.f32.mxu1 %vm16396_vm1, %v16397_v26 }
0x4e32   :  { %15671 = vmatprep.subr.mxu1 %v16397_v26 }
0x4ef5   :  { %v12609_v28 = vpop.f32.mrb[130].mxu0 }
0x4ef6   :  { %v15620_v2 = vpop.f32.mrb[131].mxu0 }
0x4ef7   :  { %v12687_v48 = vpop.f32.mrb[130].mxu1 }
0x4ef8   :  { %v13167_v20 = vrot.slane %v12687_v48, 7  ;;  %v15625_v37 = vpop.f32.mrb[131].mxu1 }
0x4ef9   :  { %v12765_v30 = vpop.f32.mrb[132].mxu0 }
0x4efa   :  { %v13168_v21 = vsel %vm3085_vm13, %v13167_v20, %v12609_v28  ;;  %v13169_v36 = vrot.slane %v12765_v30, 6  ;;  %v15630_v29 = vpop.f32.mrb[133].mxu0 }
0x4efb   :  { %v12843_v0 = vpop.f32.mrb[132].mxu1 }
0x4efc   :  { %v13170_v50 = vsel %vm3088_vm14, %v13169_v36, %v13168_v21  ;;  %v13171_v19 = vrot.slane %v12843_v0, 5  ;;  %v15635_v55 = vpop.f32.mrb[133].mxu1 }
0x4efd   :  { %v12921_v56 = vpop.f32.mrb[134].mxu0 }
0x4efe   :  { %v13172_v53 = vsel %vm3091_vm15, %v13171_v19, %v13170_v50  ;;  %v13173_v13 = vrot.slane %v12921_v56, 4  ;;  %v15640_v11 = vpop.f32.mrb[135].mxu0 }
0x4eff   :  { %v12999_v60 = vpop.f32.mrb[134].mxu1 }
0x4f00   :  { %v13174_v16 = vsel %vm3094_vm3, %v13173_v13, %v13172_v53  ;;  %v13175_v14 = vrot.slane %v12999_v60, 3  ;;  %v15645_v45 = vpop.f32.mrb[135].mxu1 }
0x4f01   :  { %v13077_v3 = vpop.f32.mrb[136].mxu0 }
0x4f02   :  { %v13176_v49 = vsel %vm3097_vm4, %v13175_v14, %v13174_v16  ;;  %v13177_v24 = vrot.slane %v13077_v3, 2  ;;  %v15650_v1 = vpop.f32.mrb[137].mxu0 }
0x4f03   :  { %v13155_v52 = vpop.f32.mrb[136].mxu1 }
0x4f04   :  { %v13179_v4 = vrot.slane %v13155_v52, 1  ;;  %v15655_v9 = vpop.f32.mrb[137].mxu1  ;;  %v13178_v8 = vsel %vm3100_vm5, %v13177_v24, %v13176_v49 }
0x4f06   :  { %v13180_v23 = vsel %vm3103_vm6, %v13179_v4, %v13178_v8 }
0x4f07   :  { %v13182_v15 = vsel %vm3106_vm7, %v13180_v23, -inf }
0x4f08   :  { %13183 = vmax.xlane.f32.xlu1 %v13182_v15 }
0x4f95   :  { %v13184_v25 = vpop.xlane.xlu1 %13183 }
0x4f96   :  { %v13186_v42 = vrot.slane %v13184_v25, 1  ;;  %v13187_v12 = vrot.slane %v13184_v25, 2  ;;  %v13188_v39 = vrot.slane %v13184_v25, 3  ;;  %v13189_v6 = vrot.slane %v13184_v25, 4 }
0x4f97   :  { %v13190_v35 = vrot.slane %v13184_v25, 5  ;;  %v13191_v33 = vrot.slane %v13184_v25, 6  ;;  %v13192_v61 = vrot.slane %v13184_v25, 7  ;;  %v13201_v58 = vsub.f32 %v12609_v28, %v13184_v25 }
0x4f98   :  { %v13202_v38 = vsub.f32 %v12687_v48, %v13186_v42  ;;  %v13203_v10 = vsub.f32 %v12765_v30, %v13187_v12  ;;  %v13204_v57 = vsub.f32 %v12843_v0, %v13188_v39  ;;  %v13205_v17 = vsub.f32 %v12921_v56, %v13189_v6 }
0x4f99   :  { %v13206_v44 = vsub.f32 %v12999_v60, %v13190_v35  ;;  %v13209_v32 = vmul.f32 1.442695, %v13201_v58  ;;  %v13207_v46 = vsub.f32 %v13077_v3, %v13191_v33  ;;  %v13208_v27 = vsub.f32 %v13155_v52, %v13192_v61 }
0x4f9a   :  { %v13211_v54 = vmul.f32 1.442695, %v13202_v38  ;;  %v13213_v59 = vmul.f32 1.442695, %v13203_v10  ;;  %v13215_v5 = vmul.f32 1.442695, %v13204_v57 }
0x4f9b   :  { %16228 = vpow2.f32 %v13209_v32  ;;  %v13217_v2 = vmul.f32 1.442695, %v13205_v17  ;;  %v13219_v20 = vmul.f32 1.442695, %v13206_v44  ;;  %v13221_v37 = vmul.f32 1.442695, %v13207_v46 }
0x4f9c   :  { %16230 = vpow2.f32 %v13211_v54  ;;  %v13223_v21 = vmul.f32 1.442695, %v13208_v27 }
0x4f9d   :  { %16232 = vpow2.f32 %v13213_v59 }
0x4f9e   :  { %16234 = vpow2.f32 %v13215_v5 }
0x4f9f   :  { %16236 = vpow2.f32 %v13217_v2 }
0x4fa0   :  { %16238 = vpow2.f32 %v13219_v20 }
0x4fa1   :  { %16240 = vpow2.f32 %v13221_v37 }
0x4fa2   :  { %16242 = vpow2.f32 %v13223_v21 }
0x4fa5   :  { %v16229_v28 = vpop.eup %16228 }
0x4fa6   :  { %v16231_v48 = vpop.eup %16230 }
0x4fa7   :  { %v16233_v30 = vpop.eup %16232  ;;  %v13233_v36 = vrot.slane %v16231_v48, 7 }
0x4fa8   :  { %v16235_v29 = vpop.eup %16234  ;;  %v13235_v0 = vrot.slane %v16233_v30, 6 }
0x4fa9   :  { %v16237_v50 = vpop.eup %16236  ;;  %v13234_v19 = vsel %vm3085_vm13, %v13233_v36, %v16229_v28  ;;  %v13237_v55 = vrot.slane %v16235_v29, 5 }
0x4faa   :  { %v16239_v56 = vpop.eup %16238  ;;  %v13236_v53 = vsel %vm3088_vm14, %v13235_v0, %v13234_v19  ;;  %v13239_v13 = vrot.slane %v16237_v50, 4 }
0x4fab   :  { %v16241_v11 = vpop.eup %16240  ;;  %v13238_v60 = vsel %vm3091_vm15, %v13237_v55, %v13236_v53  ;;  %v13241_v16 = vrot.slane %v16239_v56, 3 }
0x4fac   :  { %v16243_v14 = vpop.eup %16242  ;;  %v13240_v45 = vsel %vm3094_vm3, %v13239_v13, %v13238_v60  ;;  %v13243_v3 = vrot.slane %v16241_v11, 2 }
0x4fad   :  { %v13242_v49 = vsel %vm3097_vm4, %v13241_v16, %v13240_v45  ;;  %v13245_v24 = vrot.slane %v16243_v14, 1 }
0x4fae   :  { %v13244_v1 = vsel %vm3100_vm5, %v13243_v3, %v13242_v49 }
0x4faf   :  { %v13246_v52 = vsel %vm3103_vm6, %v13245_v24, %v13244_v1 }
0x4fb0   :  { %v13248_v4 = vsel %vm3106_vm7, %v13246_v52, 0.0 }
0x4fb1   :  { %13249 = vadd.xlane.f32.xlu0 %v13248_v4 }
0x4fc7   :  { %13867 = vrot.lane.b32.xlu0 %v18412_v62, %s16399_s5 }
0x503e   :  { %v13250_v9 = vpop.xlane.xlu0 %13249 }
0x503f   :  { %v13252_v8 = vrot.slane %v13250_v9, 1  ;;  %v13253_v23 = vrot.slane %v13250_v9, 2  ;;  %v13254_v15 = vrot.slane %v13250_v9, 3  ;;  %v13255_v25 = vrot.slane %v13250_v9, 4 }
0x5040   :  { %16244 = vrcp.f32 %v13250_v9  ;;  %v13256_v42 = vrot.slane %v13250_v9, 5  ;;  %v13257_v12 = vrot.slane %v13250_v9, 6  ;;  %v13258_v39 = vrot.slane %v13250_v9, 7 }
0x5041   :  { %16246 = vrcp.f32 %v13252_v8 }
0x5042   :  { %16248 = vrcp.f32 %v13253_v23 }
0x5043   :  { %16250 = vrcp.f32 %v13254_v15 }
0x5044   :  { %16252 = vrcp.f32 %v13255_v25  ;;  %v13868_v25 = vpop.permute.xlu0 %13867 }
0x5045   :  { %16254 = vrcp.f32 %v13256_v42 }
0x5046   :  { %16256 = vrcp.f32 %v13257_v12 }
0x5047   :  { %16258 = vrcp.f32 %v13258_v39 }
0x504a   :  { %v16245_v6 = vpop.eup %16244 }
0x504b   :  { %v16247_v35 = vpop.eup %16246  ;;  %v13268_v33 = vmul.f32 %v16245_v6, %v16229_v28 }
0x504c   :  { %v16249_v62 = vpop.eup %16248  ;;  %v13270_v61 = vmul.f32 %v16247_v35, %v16231_v48 }
0x504d   :  { %v16251_v58 = vpop.eup %16250  ;;  %15659 = vmatmul.mubr.msk.f32.vlgmr.msra.gmra.mrb[138].mxu0 %vm3106_vm7, %v13268_v33  ;;  %v13272_v38 = vmul.f32 %v16249_v62, %v16233_v30 }
0x504e   :  { %v16253_v10 = vpop.eup %16252  ;;  %15667 = vmatpush3.msra.mxu0 %v18242_v63  ;;  %15664 = vmatmul.mubr.msk.f32.vlgmr.msra.gmra.mrb[138].mxu1 %vm3106_vm7, %v13270_v61  ;;  %v14060_v57 = vrot.slane %v13270_v61, 7  ;;  %v13274_v17 = vmul.f32 %v16251_v58, %v16235_v29 }
0x504f   :  { %v16255_v44 = vpop.eup %16254  ;;  %15672 = vmatpush3.msra.mxu1 %v18250_v40  ;;  %15668 = vmatprep.mubr.msk.f32.mxu0 %vm16396_vm1, %v16397_v26  ;;  %v14062_v32 = vrot.slane %v13272_v38, 6  ;;  %v13276_v46 = vmul.f32 %v16253_v10, %v16237_v50 }
0x5050   :  { %v16257_v54 = vpop.eup %16256  ;;  %v14061_v59 = vsel %vm3085_vm13, %v14060_v57, %v13268_v33  ;;  %15676 = vmatprep.subr.mxu0 %v16397_v26  ;;  %15673 = vmatprep.mubr.msk.f32.mxu1 %vm16396_vm1, %v16397_v26  ;;  %v14064_v63 = vrot.slane %v13274_v17, 5  ;;  %v13278_v5 = vmul.f32 %v16255_v44, %v16239_v56 }
0x5051   :  { %v16259_v27 = vpop.eup %16258  ;;  %15669 = vmatmul.mubr.msk.f32.vlgmr.msra.gmra.mrb[140].mxu0 %vm3106_vm7, %v13272_v38  ;;  %v14063_v40 = vsel %vm3088_vm14, %v14062_v32, %v14061_v59  ;;  %15681 = vmatprep.subr.mxu1 %v16397_v26  ;;  %v14066_v2 = vrot.slane %v13276_v46, 4  ;;  %v13280_v20 = vmul.f32 %v16257_v54, %v16241_v11 }
0x5052   :  { %15677 = vmatpush3.msra.mxu0 %v18258_v41  ;;  %15674 = vmatmul.mubr.msk.f32.vlgmr.msra.gmra.mrb[140].mxu1 %vm3106_vm7, %v13274_v17  ;;  %v14065_v37 = vsel %vm3091_vm15, %v14064_v63, %v14063_v40  ;;  %v14068_v21 = vrot.slane %v13278_v5, 3  ;;  %v13282_v28 = vmul.f32 %v16259_v27, %v16243_v14 }
0x5053   :  { %15682 = vmatpush3.msra.mxu1 %v18266_v31  ;;  %15678 = vmatprep.mubr.msk.f32.mxu0 %vm16396_vm1, %v16397_v26  ;;  %v14067_v48 = vsel %vm3094_vm3, %v14066_v2, %v14065_v37  ;;  %v14070_v30 = vrot.slane %v13280_v20, 2 }
0x5054   :  { %15686 = vmatprep.subr.mxu0 %v16397_v26  ;;  %15683 = vmatprep.mubr.msk.f32.mxu1 %vm16396_vm1, %v16397_v26  ;;  %v14069_v41 = vsel %vm3097_vm4, %v14068_v21, %v14067_v48  ;;  %v14072_v36 = vrot.slane %v13282_v28, 1 }
0x5055   :  { %15679 = vmatmul.mubr.msk.f32.vlgmr.msra.gmra.mrb[142].mxu0 %vm3106_vm7, %v13276_v46  ;;  %15691 = vmatprep.subr.mxu1 %v16397_v26  ;;  %v14071_v31 = vsel %vm3100_vm5, %v14070_v30, %v14069_v41 }
0x5056   :  { %15687 = vmatpush3.msra.mxu0 %v18464_v18  ;;  %15684 = vmatmul.mubr.msk.f32.vlgmr.msra.gmra.mrb[142].mxu1 %vm3106_vm7, %v13278_v5  ;;  %v14073_v29 = vsel %vm3103_vm6, %v14072_v36, %v14071_v31 }
0x5057   :  { %15692 = vmatpush3.msra.mxu1 %v18280_v43  ;;  %15688 = vmatprep.mubr.msk.f32.mxu0 %vm16396_vm1, %v16397_v26  ;;  %14087 = vst.msk [vmem:[#allocation9 + $0x30] sm:$0xff] %vm3106_vm7, %v14073_v29 }
0x5058   :  { %15693 = vmatprep.mubr.msk.f32.mxu1 %vm16396_vm1, %v16397_v26  ;;  %15918 = vmatprep.subr.bf16.mxu0 %v16395_v22 }
0x5059   :  { %15689 = vmatmul.mubr.msk.f32.vlgmr.msra.gmra.mrb[144].mxu0 %vm3106_vm7, %v13280_v20 }
0x505a   :  { %15694 = vmatmul.mubr.msk.f32.vlgmr.msra.gmra.mrb[144].mxu1 %vm3106_vm7, %v13282_v28  ;;  %15920 = vmatpush3.bf16.msra.mxu0 %v17313_v34 }
0x505b   :  { %15921 = vmatprep.subr.bf16.mxu0 %v16395_v22  ;;  %15712 = vmatprep.mubr.msk.f32.mxu0 %vm16396_vm1, %v16397_v26 }
0x505e   :  { %15923 = vmatpush3.bf16.msra.mxu0 %v17319_v51 }
0x505f   :  { %15924 = vmatprep.subr.bf16.mxu0 %v16395_v22 }
0x5062   :  { %15926 = vmatpush3.bf16.msra.mxu0 %v17329_v47 }
0x5063   :  { %15927 = vmatprep.subr.bf16.mxu0 %v16395_v22 }
0x5066   :  { %15929 = vmatpush3.bf16.msra.mxu0 %v17339_v7 }
0x5120   :  { %v13352_v43 = vpop.f32.mrb[138].mxu0 }
0x5121   :  { %v15660_v18 = vpop.f32.mrb[139].mxu0  ;;  %v13425_v0 = vpop.f32.mrb[138].mxu1 }
0x5122   :  { %v13878_v50 = vrot.slane %v13425_v0, 7  ;;  %v15665_v34 = vpop.f32.mrb[139].mxu1 }
0x5124   :  { %v13879_v19 = vsel %vm3085_vm13, %v13878_v50, %v13352_v43  ;;  %v13498_v55 = vpop.f32.mrb[140].mxu0 }
0x5125   :  { %v13880_v56 = vrot.slane %v13498_v55, 6  ;;  %v15670_v26 = vpop.f32.mrb[141].mxu0  ;;  %v13571_v53 = vpop.f32.mrb[140].mxu1 }
0x5126   :  { %v13882_v51 = vrot.slane %v13571_v53, 5  ;;  %v15675_v13 = vpop.f32.mrb[141].mxu1 }
0x5127   :  { %v13881_v11 = vsel %vm3088_vm14, %v13880_v56, %v13879_v19 }
0x5128   :  { %v13883_v47 = vsel %vm3091_vm15, %v13882_v51, %v13881_v11  ;;  %v13644_v22 = vpop.f32.mrb[142].mxu0 }
0x5129   :  { %v13884_v60 = vrot.slane %v13644_v22, 4  ;;  %v15680_v7 = vpop.f32.mrb[143].mxu0  ;;  %v13717_v16 = vpop.f32.mrb[142].mxu1 }
0x512a   :  { %v13886_v14 = vrot.slane %v13717_v16, 3  ;;  %v15685_v45 = vpop.f32.mrb[143].mxu1 }
0x512b   :  { %v13885_v3 = vsel %vm3094_vm3, %v13884_v60, %v13883_v47 }
0x512c   :  { %v13887_v49 = vsel %vm3097_vm4, %v13886_v14, %v13885_v3  ;;  %v13790_v24 = vpop.f32.mrb[144].mxu0 }
0x512d   :  { %v13888_v1 = vrot.slane %v13790_v24, 2  ;;  %v15690_v52 = vpop.f32.mrb[145].mxu0  ;;  %v13863_v4 = vpop.f32.mrb[144].mxu1 }
0x512e   :  { %v13890_v9 = vrot.slane %v13863_v4, 1  ;;  %v15695_v8 = vpop.f32.mrb[145].mxu1 }
0x512f   :  { %v13889_v23 = vsel %vm3100_vm5, %v13888_v1, %v13887_v49 }
0x5130   :  { %v13891_v15 = vsel %vm3103_vm6, %v13890_v9, %v13889_v23 }
0x5131   :  { %13892 = vrot.lane.b32.xlu1 %v13891_v15, %s16401_s11 }
0x51a3   :  { %v13893_v42 = vpop.permute.xlu1 %13892 }
0x51a4   :  { %v13895_v12 = vsel %vm107_vm0, %v13868_v25, %v13893_v42 }
0x51a5   :  { %15713 = vmatmul.mubr.msk.f32.vlgmr.msra.gmra.mrb[146].mxu0 %vm3827_vm8, %v13895_v12 }
0x51a6   :  { %16349 = shalt.err (!%p16346_p6)
}
0x51a7   :  { %s16350_s1 = scalar_lea.hbm %s18611_s14, 896 }
0x51a8   :  { %p16351_p7 = scmp.ne.s32.totalorder %s18611_s14, %s16350_s1  ;;  %p16354_p8 = scmp.lt.u32.totalorder %s16350_s1, %s18611_s14 }
0x51aa   :  { %p16356_p9 = pnand %p16354_p8, %p16351_p7 }
0x51ac   :  { %16359 = shalt.err (!%p16356_p9)
}
0x51ad   :  { %14111 = dma.vmem_to_hbm [thread:$0]  %s14106_s10, 896, %s18611_s14, [#allocation10], %s16391_s23, %s16391_s23, %s16392_s24  }
0x51ae   :  { %s16403_s25 = smov [#allocation8]   ;;  %v16293_v6 = vld [vmem:[%s18609_s12] ss:$0 sm:$0xff] }
0x51af   :  { %s14093_s26 = sshll.u32 %s16403_s25, 4  ;;  %s14094_s26 = int_to_ptr.vmem [resolvable:$true] %s14093_s26 }
0x51b0   :  { %s16360_s15 = scalar_lea.vmem %s14094_s26, 896  ;;  %p16365_p11 = scmp.lt.s32.totalorder %s14094_s26, %s14094_s26 }
0x51b1   :  { %p16361_p10 = scmp.ne.s32.totalorder %s14094_s26, %s16360_s15  ;;  %p16366_p12 = scmp.lt.s32.totalorder %s16360_s15, %s16360_s15 }
0x51b3   :  { %p16367_p13 = por %p16366_p12, %p16365_p11 }
0x51b5   :  { %p16368_p0 = pnand %p16367_p13, %p16361_p10 }
0x5278   :  { %v13965_v39 = vpop.f32.mrb[146].mxu0 }
0x5279   :  { %v13966_v35 = vadd.f32 %v16293_v6, %v13965_v39  ;;  %v15714_v33 = vpop.f32.mrb[147].mxu0 }
0x527b   :  { %13975 = vst.msk [vmem:[#allocation8 + $0x30] sm:$0xff] %vm334_vm2, %v13966_v35 }
0x527c   :  { %16371 = shalt.err (!%p16368_p0)
}
0x527d   :  { %s16372_s4 = scalar_lea.hbm %s18610_s13, 896 }
0x527e   :  { %p16373_p1 = scmp.ne.s32.totalorder %s18610_s13, %s16372_s4  ;;  %p16376_p2 = scmp.lt.u32.totalorder %s16372_s4, %s18610_s13 }
0x5280   :  { %p16378_p3 = pnand %p16376_p2, %p16373_p1 }
0x5282   :  { %16381 = shalt.err (!%p16378_p3)
}
0x5283   :  { %14099 = dma.vmem_to_hbm [thread:$0]  %s14094_s26, 896, %s18610_s13, [#allocation5], %s16391_s23, %s16391_s23, %s16392_s24  }
0x5284   :  { %16386 = dma.done.wait [#allocation5], 896  }
0x5285   :  { %16387 = vsyncadd [#allocation5], 4294966400 }
0x5286   :  { %16388 = dma.done.wait [#allocation10], 896  }
0x5287   :  { %16389 = vsyncadd [#allocation10], 4294966400 }
0x5288   :  { %14118 = vsyncpa [#allocation4], 1 }
0x5289   :  { %14119 = vsyncpa [#allocation7], 1 }
0x528a   :  { %14120 = vsyncpa [#allocation5], 1 }
0x528b   :  { %14121 = vsyncpa [#allocation10], 1 }

</bundles_post_ra>
